<compile_context>
chip_gen: v6e
topology: v6e:2x2x1
jax: 0.10.0
libtpu: 0.0.40
codegen_flags: <defaults>
</compile_context>

<pallas_src>
import functools

import jax
import jax.numpy as jnp
from jax import lax
from jax.experimental import pallas as pl
from jax.experimental.pallas import tpu as pltpu

K = 7            # conv kernel size
PAD = (K - 1) // 2
EPS = 1e-5       # GroupNorm eps (PyTorch default)


def spatial_gate_kernel(w_ref, b_ref, gamma_ref, beta_ref, x_ref, o_ref, *, H, W):
    """One block of NB batch elements per grid step.

    w_ref:     SMEM (2*K*K,)    flattened conv weight (out=1, in=2, K, K)
    b_ref:     SMEM (1,)        conv bias
    gamma_ref: SMEM (1,)        group-norm scale
    beta_ref:  SMEM (1,)        group-norm shift
    x_ref:     VMEM (NB, C, HW) lane-dense input block (HW = H * W)
    o_ref:     VMEM (NB, C, HW) lane-dense output block
    """
    NB, C, HW = x_ref.shape
    inv_c = 1.0 / C
    inv_hw = 1.0 / HW

    # --- border-validity masks for the 7x7 taps (shared by all items) -------
    # Recover (row, col) from the flat lane index without vector integer
    # division: the f32 path with the +0.5 offset is exact for any sane H*W.
    lane = lax.broadcasted_iota(jnp.int32, (1, HW), 1)
    row = jnp.floor((lane.astype(jnp.float32) + 0.5) * (1.0 / W)).astype(jnp.int32)
    col = lane - W * row
    offs = tuple(range(-PAD, PAD + 1))
    row_ok = [(row + dy >= 0) & (row + dy < H) for dy in offs]
    col_ok = [(col + dx >= 0) & (col + dx < W) for dx in offs]
    masks = [[row_ok[iy] & col_ok[ix] for ix in range(K)] for iy in range(K)]

    # Hoisted scalar parameter reads (SMEM).
    wvals = [w_ref[i] for i in range(2 * K * K)]
    bias = b_ref[0]
    gamma = gamma_ref[0]
    beta = beta_ref[0]

    for n in range(NB):                       # static & small: fully unrolled
        xn = x_ref.at[n]                      # (C, HW) view, static index
        on = o_ref.at[n]

        # --- ChannelPool: fused max / mean over C in a single pass ----------
        if C <= 16:
            c_max = xn[0:1, :].astype(jnp.float32)          # (1, HW)
            c_sum = c_max
            for c in range(1, C):
                v = xn[c:c + 1, :].astype(jnp.float32)
                c_max = jnp.maximum(c_max, v)
                c_sum = c_sum + v
        else:
            v0 = xn[pl.ds(0, 1), :].astype(jnp.float32)

            def pool_body(c, carry):
                m, s = carry
                v = xn[pl.ds(c, 1), :].astype(jnp.float32)
                return jnp.maximum(m, v), s + v

            c_max, c_sum = lax.fori_loop(1, C, pool_body, (v0, v0), unroll=4)

        pooled = jnp.concatenate([c_max, c_sum * inv_c], axis=0)   # (2, HW) f32

        # --- 7x7 conv (2 -> 1), zero padding, via lane rolls + masks --------
        # out[i, j] = sum_{dy,dx} w[dy,dx] * pooled[i+dy, j+dx]
        # In flat coords k = i*W + j this is pooled_flat[k + dy*W + dx],
        # fetched with a lane rotation and masked at the borders.
        acc = jnp.full((1, HW), bias, dtype=jnp.float32)
        for iy, dy in enumerate(offs):
            for ix, dx in enumerate(offs):
                s = dy * W + dx
                shifted = pooled if s == 0 else pltpu.roll(pooled, (-s) % HW, axis=1)
                w0 = wvals[iy * K + ix]              # tap on the max channel
                w1 = wvals[K * K + iy * K + ix]      # tap on the mean channel
                term = w0 * shifted[0:1, :] + w1 * shifted[1:2, :]
                acc = acc + jnp.where(masks[iy][ix], term, 0.0)

        # --- GroupNorm(1, 1): single-pass stats over (H, W) -----------------
        s1 = jnp.sum(acc)
        s2 = jnp.sum(acc * acc)
        mu = s1 * inv_hw
        var = jnp.maximum(s2 * inv_hw - mu * mu, 0.0)
        y = gamma * ((acc - mu) * lax.rsqrt(var + EPS)) + beta

        # --- sigmoid gate, native-dtype multiply, lane-dense store ----------
        scale = jax.nn.sigmoid(y).astype(o_ref.dtype)        # (1, HW)
        on[...] = xn[...] * scale                            # broadcast over C


def _pick_batch_block(n, per_item_bytes, max_nb=8, budget_bytes=8 << 20):
    """Largest divisor of n (<= max_nb) whose double-buffered in+out block fits."""
    best = 1
    for cand in range(1, min(n, max_nb) + 1):
        if n % cand == 0 and 4 * cand * per_item_bytes <= budget_bytes:
            best = cand
    return best


@jax.jit
def spatial_gate(x, conv_w, conv_b, gn_gamma, gn_beta):
    """x: (N, C, H, W).  conv_w: (1, 2, K, K).  conv_b/gn_gamma/gn_beta: (1,)."""
    N, C, H, W = x.shape
    HW = H * W
    x_flat = x.reshape(N, C, HW)                       # lane-dense layout
    w_flat = conv_w.reshape(-1).astype(jnp.float32)    # (2*K*K,)

    per_item = C * HW * x.dtype.itemsize
    nb = _pick_batch_block(N, per_item)
    vmem_limit = int(max(4 * nb * per_item + (4 << 20), 32 << 20))

    kernel = functools.partial(spatial_gate_kernel, H=H, W=W)

    out = pl.pallas_call(
        kernel,
        out_shape=jax.ShapeDtypeStruct((N, C, HW), x.dtype),
        grid_spec=pltpu.PrefetchScalarGridSpec(
            num_scalar_prefetch=0,
            grid=(N // nb,),
            in_specs=[
                pl.BlockSpec(memory_space=pltpu.SMEM),   # conv weight (flat)
                pl.BlockSpec(memory_space=pltpu.SMEM),   # conv bias
                pl.BlockSpec(memory_space=pltpu.SMEM),   # gn gamma
                pl.BlockSpec(memory_space=pltpu.SMEM),   # gn beta
                pl.BlockSpec((nb, C, HW), lambda i: (i, 0, 0)),
            ],
            out_specs=pl.BlockSpec((nb, C, HW), lambda i: (i, 0, 0)),
        ),
        compiler_params=pltpu.CompilerParams(
            dimension_semantics=("parallel",),           # batch items independent
            vmem_limit_bytes=vmem_limit,
        ),
    )(w_flat, conv_b.astype(jnp.float32), gn_gamma.astype(jnp.float32),
      gn_beta.astype(jnp.float32), x_flat)

    return out.reshape(N, C, H, W)


def spatial_gate_reference(x, conv_w, conv_b, gn_gamma, gn_beta):
    """Pure-JAX reference matching the PyTorch module semantics."""
    x = x.astype(jnp.float32)
    pooled = jnp.concatenate(
        [jnp.max(x, axis=1, keepdims=True), jnp.mean(x, axis=1, keepdims=True)],
        axis=1)                                                    # (N,2,H,W)
    y = lax.conv_general_dilated(
        pooled, conv_w.astype(jnp.float32),
        window_strides=(1, 1), padding=[(PAD, PAD), (PAD, PAD)],
        dimension_numbers=("NCHW", "OIHW", "NCHW"))
    y = y + conv_b.reshape(1, -1, 1, 1)
    mu = jnp.mean(y, axis=(1, 2, 3), keepdims=True)
    var = jnp.mean((y - mu) ** 2, axis=(1, 2, 3), keepdims=True)
    y = (y - mu) * lax.rsqrt(var + EPS)
    y = gn_gamma.reshape(1, -1, 1, 1) * y + gn_beta.reshape(1, -1, 1, 1)
    return x * jax.nn.sigmoid(y)


if __name__ == "__main__":
    key = jax.random.PRNGKey(0)
    k_x, k_w, k_b = jax.random.split(key, 3)

    N, C, H, W = 2, 4, 16, 16
    x = jax.random.normal(k_x, (N, C, H, W), dtype=jnp.float32)

    # Deterministic parameter init (Conv2d(2,1,7) kaiming-uniform-style bound).
    fan_in = 2 * K * K
    bound = 1.0 / jnp.sqrt(fan_in)
    conv_w = jax.random.uniform(k_w, (1, 2, K, K), jnp.float32, -bound, bound)
    conv_b = jax.random.uniform(k_b, (1,), jnp.float32, -bound, bound)
    gn_gamma = jnp.ones((1,), jnp.float32)   # GroupNorm affine defaults
    gn_beta = jnp.zeros((1,), jnp.float32)

    out = spatial_gate(x, conv_w, conv_b, gn_gamma, gn_beta)
    out = jax.block_until_ready(out)

    ref = spatial_gate_reference(x, conv_w, conv_b, gn_gamma, gn_beta)
    assert out.shape == (N, C, H, W)
    assert jnp.allclose(out, ref, atol=2e-3, rtol=2e-3), "mismatch vs reference"

    print("KERNEL_OK")
</pallas_src>

<mosaic_0001>
module attributes {stable_mosaic.version = 11 : i64} {
  func.func @spatial_gate_kernel(%arg0: i32, %arg1: memref<98xf32, #tpu.memory_space<smem>>, %arg2: memref<1xf32, #tpu.memory_space<smem>>, %arg3: memref<1xf32, #tpu.memory_space<smem>>, %arg4: memref<1xf32, #tpu.memory_space<smem>>, %arg5: memref<2x4x256xf32, #tpu.memory_space<vmem>>, %arg6: memref<2x4x256xf32, #tpu.memory_space<vmem>>) attributes {dimension_semantics = [#tpu.dimension_semantics<parallel>], iteration_bounds = array<i64: 1>, scalar_prefetch = 0 : i64, scratch_operands = 0 : i64, tpu.core_type = #tpu.core_type<tc>, window_params = [{transform_indices = @transform_0, window_bounds = array<i64: 98>}, {transform_indices = @transform_1, window_bounds = array<i64: 1>}, {transform_indices = @transform_2, window_bounds = array<i64: 1>}, {transform_indices = @transform_3, window_bounds = array<i64: 1>}, {transform_indices = @transform_4, window_bounds = array<i64: 2, 4, 256>}, {transform_indices = @transform_5, window_bounds = array<i64: 2, 4, 256>}]} {
    %0 = tpu.iota {dimensions = array<i32: 1>} : vector<1x256xi32>
    %1 = arith.sitofp %0 : vector<1x256xi32> to vector<1x256xf32>
    %cst = arith.constant 5.000000e-01 : f32
    %2 = vector.broadcast %cst : f32 to vector<1x256xf32>
    %3 = arith.addf %1, %2 : vector<1x256xf32>
    %cst_0 = arith.constant 6.250000e-02 : f32
    %4 = vector.broadcast %cst_0 : f32 to vector<1x256xf32>
    %5 = arith.mulf %3, %4 : vector<1x256xf32>
    %6 = math.floor %5 : vector<1x256xf32>
    %7 = arith.fptosi %6 : vector<1x256xf32> to vector<1x256xi32>
    %c16_i32 = arith.constant 16 : i32
    %8 = vector.broadcast %c16_i32 : i32 to vector<1x256xi32>
    %9 = arith.muli %8, %7 : vector<1x256xi32>
    %10 = arith.subi %0, %9 : vector<1x256xi32>
    %c-3_i32 = arith.constant -3 : i32
    %11 = vector.broadcast %c-3_i32 : i32 to vector<1x256xi32>
    %12 = arith.addi %7, %11 : vector<1x256xi32>
    %c0_i32 = arith.constant 0 : i32
    %13 = vector.broadcast %c0_i32 : i32 to vector<1x256xi32>
    %14 = arith.cmpi sge, %12, %13 : vector<1x256xi32>
    %c-3_i32_1 = arith.constant -3 : i32
    %15 = vector.broadcast %c-3_i32_1 : i32 to vector<1x256xi32>
    %16 = arith.addi %7, %15 : vector<1x256xi32>
    %c16_i32_2 = arith.constant 16 : i32
    %17 = vector.broadcast %c16_i32_2 : i32 to vector<1x256xi32>
    %18 = arith.cmpi slt, %16, %17 : vector<1x256xi32>
    %19 = arith.andi %14, %18 : vector<1x256xi1>
    %c-2_i32 = arith.constant -2 : i32
    %20 = vector.broadcast %c-2_i32 : i32 to vector<1x256xi32>
    %21 = arith.addi %7, %20 : vector<1x256xi32>
    %c0_i32_3 = arith.constant 0 : i32
    %22 = vector.broadcast %c0_i32_3 : i32 to vector<1x256xi32>
    %23 = arith.cmpi sge, %21, %22 : vector<1x256xi32>
    %c-2_i32_4 = arith.constant -2 : i32
    %24 = vector.broadcast %c-2_i32_4 : i32 to vector<1x256xi32>
    %25 = arith.addi %7, %24 : vector<1x256xi32>
    %c16_i32_5 = arith.constant 16 : i32
    %26 = vector.broadcast %c16_i32_5 : i32 to vector<1x256xi32>
    %27 = arith.cmpi slt, %25, %26 : vector<1x256xi32>
    %28 = arith.andi %23, %27 : vector<1x256xi1>
    %c-1_i32 = arith.constant -1 : i32
    %29 = vector.broadcast %c-1_i32 : i32 to vector<1x256xi32>
    %30 = arith.addi %7, %29 : vector<1x256xi32>
    %c0_i32_6 = arith.constant 0 : i32
    %31 = vector.broadcast %c0_i32_6 : i32 to vector<1x256xi32>
    %32 = arith.cmpi sge, %30, %31 : vector<1x256xi32>
    %c-1_i32_7 = arith.constant -1 : i32
    %33 = vector.broadcast %c-1_i32_7 : i32 to vector<1x256xi32>
    %34 = arith.addi %7, %33 : vector<1x256xi32>
    %c16_i32_8 = arith.constant 16 : i32
    %35 = vector.broadcast %c16_i32_8 : i32 to vector<1x256xi32>
    %36 = arith.cmpi slt, %34, %35 : vector<1x256xi32>
    %37 = arith.andi %32, %36 : vector<1x256xi1>
    %c0_i32_9 = arith.constant 0 : i32
    %38 = vector.broadcast %c0_i32_9 : i32 to vector<1x256xi32>
    %39 = arith.addi %7, %38 : vector<1x256xi32>
    %c0_i32_10 = arith.constant 0 : i32
    %40 = vector.broadcast %c0_i32_10 : i32 to vector<1x256xi32>
    %41 = arith.cmpi sge, %39, %40 : vector<1x256xi32>
    %c0_i32_11 = arith.constant 0 : i32
    %42 = vector.broadcast %c0_i32_11 : i32 to vector<1x256xi32>
    %43 = arith.addi %7, %42 : vector<1x256xi32>
    %c16_i32_12 = arith.constant 16 : i32
    %44 = vector.broadcast %c16_i32_12 : i32 to vector<1x256xi32>
    %45 = arith.cmpi slt, %43, %44 : vector<1x256xi32>
    %46 = arith.andi %41, %45 : vector<1x256xi1>
    %c1_i32 = arith.constant 1 : i32
    %47 = vector.broadcast %c1_i32 : i32 to vector<1x256xi32>
    %48 = arith.addi %7, %47 : vector<1x256xi32>
    %c0_i32_13 = arith.constant 0 : i32
    %49 = vector.broadcast %c0_i32_13 : i32 to vector<1x256xi32>
    %50 = arith.cmpi sge, %48, %49 : vector<1x256xi32>
    %c1_i32_14 = arith.constant 1 : i32
    %51 = vector.broadcast %c1_i32_14 : i32 to vector<1x256xi32>
    %52 = arith.addi %7, %51 : vector<1x256xi32>
    %c16_i32_15 = arith.constant 16 : i32
    %53 = vector.broadcast %c16_i32_15 : i32 to vector<1x256xi32>
    %54 = arith.cmpi slt, %52, %53 : vector<1x256xi32>
    %55 = arith.andi %50, %54 : vector<1x256xi1>
    %c2_i32 = arith.constant 2 : i32
    %56 = vector.broadcast %c2_i32 : i32 to vector<1x256xi32>
    %57 = arith.addi %7, %56 : vector<1x256xi32>
    %c0_i32_16 = arith.constant 0 : i32
    %58 = vector.broadcast %c0_i32_16 : i32 to vector<1x256xi32>
    %59 = arith.cmpi sge, %57, %58 : vector<1x256xi32>
    %c2_i32_17 = arith.constant 2 : i32
    %60 = vector.broadcast %c2_i32_17 : i32 to vector<1x256xi32>
    %61 = arith.addi %7, %60 : vector<1x256xi32>
    %c16_i32_18 = arith.constant 16 : i32
    %62 = vector.broadcast %c16_i32_18 : i32 to vector<1x256xi32>
    %63 = arith.cmpi slt, %61, %62 : vector<1x256xi32>
    %64 = arith.andi %59, %63 : vector<1x256xi1>
    %c3_i32 = arith.constant 3 : i32
    %65 = vector.broadcast %c3_i32 : i32 to vector<1x256xi32>
    %66 = arith.addi %7, %65 : vector<1x256xi32>
    %c0_i32_19 = arith.constant 0 : i32
    %67 = vector.broadcast %c0_i32_19 : i32 to vector<1x256xi32>
    %68 = arith.cmpi sge, %66, %67 : vector<1x256xi32>
    %c3_i32_20 = arith.constant 3 : i32
    %69 = vector.broadcast %c3_i32_20 : i32 to vector<1x256xi32>
    %70 = arith.addi %7, %69 : vector<1x256xi32>
    %c16_i32_21 = arith.constant 16 : i32
    %71 = vector.broadcast %c16_i32_21 : i32 to vector<1x256xi32>
    %72 = arith.cmpi slt, %70, %71 : vector<1x256xi32>
    %73 = arith.andi %68, %72 : vector<1x256xi1>
    %c-3_i32_22 = arith.constant -3 : i32
    %74 = vector.broadcast %c-3_i32_22 : i32 to vector<1x256xi32>
    %75 = arith.addi %10, %74 : vector<1x256xi32>
    %c0_i32_23 = arith.constant 0 : i32
    %76 = vector.broadcast %c0_i32_23 : i32 to vector<1x256xi32>
    %77 = arith.cmpi sge, %75, %76 : vector<1x256xi32>
    %c-3_i32_24 = arith.constant -3 : i32
    %78 = vector.broadcast %c-3_i32_24 : i32 to vector<1x256xi32>
    %79 = arith.addi %10, %78 : vector<1x256xi32>
    %c16_i32_25 = arith.constant 16 : i32
    %80 = vector.broadcast %c16_i32_25 : i32 to vector<1x256xi32>
    %81 = arith.cmpi slt, %79, %80 : vector<1x256xi32>
    %82 = arith.andi %77, %81 : vector<1x256xi1>
    %c-2_i32_26 = arith.constant -2 : i32
    %83 = vector.broadcast %c-2_i32_26 : i32 to vector<1x256xi32>
    %84 = arith.addi %10, %83 : vector<1x256xi32>
    %c0_i32_27 = arith.constant 0 : i32
    %85 = vector.broadcast %c0_i32_27 : i32 to vector<1x256xi32>
    %86 = arith.cmpi sge, %84, %85 : vector<1x256xi32>
    %c-2_i32_28 = arith.constant -2 : i32
    %87 = vector.broadcast %c-2_i32_28 : i32 to vector<1x256xi32>
    %88 = arith.addi %10, %87 : vector<1x256xi32>
    %c16_i32_29 = arith.constant 16 : i32
    %89 = vector.broadcast %c16_i32_29 : i32 to vector<1x256xi32>
    %90 = arith.cmpi slt, %88, %89 : vector<1x256xi32>
    %91 = arith.andi %86, %90 : vector<1x256xi1>
    %c-1_i32_30 = arith.constant -1 : i32
    %92 = vector.broadcast %c-1_i32_30 : i32 to vector<1x256xi32>
    %93 = arith.addi %10, %92 : vector<1x256xi32>
    %c0_i32_31 = arith.constant 0 : i32
    %94 = vector.broadcast %c0_i32_31 : i32 to vector<1x256xi32>
    %95 = arith.cmpi sge, %93, %94 : vector<1x256xi32>
    %c-1_i32_32 = arith.constant -1 : i32
    %96 = vector.broadcast %c-1_i32_32 : i32 to vector<1x256xi32>
    %97 = arith.addi %10, %96 : vector<1x256xi32>
    %c16_i32_33 = arith.constant 16 : i32
    %98 = vector.broadcast %c16_i32_33 : i32 to vector<1x256xi32>
    %99 = arith.cmpi slt, %97, %98 : vector<1x256xi32>
    %100 = arith.andi %95, %99 : vector<1x256xi1>
    %c0_i32_34 = arith.constant 0 : i32
    %101 = vector.broadcast %c0_i32_34 : i32 to vector<1x256xi32>
    %102 = arith.addi %10, %101 : vector<1x256xi32>
    %c0_i32_35 = arith.constant 0 : i32
    %103 = vector.broadcast %c0_i32_35 : i32 to vector<1x256xi32>
    %104 = arith.cmpi sge, %102, %103 : vector<1x256xi32>
    %c0_i32_36 = arith.constant 0 : i32
    %105 = vector.broadcast %c0_i32_36 : i32 to vector<1x256xi32>
    %106 = arith.addi %10, %105 : vector<1x256xi32>
    %c16_i32_37 = arith.constant 16 : i32
    %107 = vector.broadcast %c16_i32_37 : i32 to vector<1x256xi32>
    %108 = arith.cmpi slt, %106, %107 : vector<1x256xi32>
    %109 = arith.andi %104, %108 : vector<1x256xi1>
    %c1_i32_38 = arith.constant 1 : i32
    %110 = vector.broadcast %c1_i32_38 : i32 to vector<1x256xi32>
    %111 = arith.addi %10, %110 : vector<1x256xi32>
    %c0_i32_39 = arith.constant 0 : i32
    %112 = vector.broadcast %c0_i32_39 : i32 to vector<1x256xi32>
    %113 = arith.cmpi sge, %111, %112 : vector<1x256xi32>
    %c1_i32_40 = arith.constant 1 : i32
    %114 = vector.broadcast %c1_i32_40 : i32 to vector<1x256xi32>
    %115 = arith.addi %10, %114 : vector<1x256xi32>
    %c16_i32_41 = arith.constant 16 : i32
    %116 = vector.broadcast %c16_i32_41 : i32 to vector<1x256xi32>
    %117 = arith.cmpi slt, %115, %116 : vector<1x256xi32>
    %118 = arith.andi %113, %117 : vector<1x256xi1>
    %c2_i32_42 = arith.constant 2 : i32
    %119 = vector.broadcast %c2_i32_42 : i32 to vector<1x256xi32>
    %120 = arith.addi %10, %119 : vector<1x256xi32>
    %c0_i32_43 = arith.constant 0 : i32
    %121 = vector.broadcast %c0_i32_43 : i32 to vector<1x256xi32>
    %122 = arith.cmpi sge, %120, %121 : vector<1x256xi32>
    %c2_i32_44 = arith.constant 2 : i32
    %123 = vector.broadcast %c2_i32_44 : i32 to vector<1x256xi32>
    %124 = arith.addi %10, %123 : vector<1x256xi32>
    %c16_i32_45 = arith.constant 16 : i32
    %125 = vector.broadcast %c16_i32_45 : i32 to vector<1x256xi32>
    %126 = arith.cmpi slt, %124, %125 : vector<1x256xi32>
    %127 = arith.andi %122, %126 : vector<1x256xi1>
    %c3_i32_46 = arith.constant 3 : i32
    %128 = vector.broadcast %c3_i32_46 : i32 to vector<1x256xi32>
    %129 = arith.addi %10, %128 : vector<1x256xi32>
    %c0_i32_47 = arith.constant 0 : i32
    %130 = vector.broadcast %c0_i32_47 : i32 to vector<1x256xi32>
    %131 = arith.cmpi sge, %129, %130 : vector<1x256xi32>
    %c3_i32_48 = arith.constant 3 : i32
    %132 = vector.broadcast %c3_i32_48 : i32 to vector<1x256xi32>
    %133 = arith.addi %10, %132 : vector<1x256xi32>
    %c16_i32_49 = arith.constant 16 : i32
    %134 = vector.broadcast %c16_i32_49 : i32 to vector<1x256xi32>
    %135 = arith.cmpi slt, %133, %134 : vector<1x256xi32>
    %136 = arith.andi %131, %135 : vector<1x256xi1>
    %137 = arith.andi %19, %82 : vector<1x256xi1>
    %138 = arith.andi %19, %91 : vector<1x256xi1>
    %139 = arith.andi %19, %100 : vector<1x256xi1>
    %140 = arith.andi %19, %109 : vector<1x256xi1>
    %141 = arith.andi %19, %118 : vector<1x256xi1>
    %142 = arith.andi %19, %127 : vector<1x256xi1>
    %143 = arith.andi %19, %136 : vector<1x256xi1>
    %144 = arith.andi %28, %82 : vector<1x256xi1>
    %145 = arith.andi %28, %91 : vector<1x256xi1>
    %146 = arith.andi %28, %100 : vector<1x256xi1>
    %147 = arith.andi %28, %109 : vector<1x256xi1>
    %148 = arith.andi %28, %118 : vector<1x256xi1>
    %149 = arith.andi %28, %127 : vector<1x256xi1>
    %150 = arith.andi %28, %136 : vector<1x256xi1>
    %151 = arith.andi %37, %82 : vector<1x256xi1>
    %152 = arith.andi %37, %91 : vector<1x256xi1>
    %153 = arith.andi %37, %100 : vector<1x256xi1>
    %154 = arith.andi %37, %109 : vector<1x256xi1>
    %155 = arith.andi %37, %118 : vector<1x256xi1>
    %156 = arith.andi %37, %127 : vector<1x256xi1>
    %157 = arith.andi %37, %136 : vector<1x256xi1>
    %158 = arith.andi %46, %82 : vector<1x256xi1>
    %159 = arith.andi %46, %91 : vector<1x256xi1>
    %160 = arith.andi %46, %100 : vector<1x256xi1>
    %161 = arith.andi %46, %109 : vector<1x256xi1>
    %162 = arith.andi %46, %118 : vector<1x256xi1>
    %163 = arith.andi %46, %127 : vector<1x256xi1>
    %164 = arith.andi %46, %136 : vector<1x256xi1>
    %165 = arith.andi %55, %82 : vector<1x256xi1>
    %166 = arith.andi %55, %91 : vector<1x256xi1>
    %167 = arith.andi %55, %100 : vector<1x256xi1>
    %168 = arith.andi %55, %109 : vector<1x256xi1>
    %169 = arith.andi %55, %118 : vector<1x256xi1>
    %170 = arith.andi %55, %127 : vector<1x256xi1>
    %171 = arith.andi %55, %136 : vector<1x256xi1>
    %172 = arith.andi %64, %82 : vector<1x256xi1>
    %173 = arith.andi %64, %91 : vector<1x256xi1>
    %174 = arith.andi %64, %100 : vector<1x256xi1>
    %175 = arith.andi %64, %109 : vector<1x256xi1>
    %176 = arith.andi %64, %118 : vector<1x256xi1>
    %177 = arith.andi %64, %127 : vector<1x256xi1>
    %178 = arith.andi %64, %136 : vector<1x256xi1>
    %179 = arith.andi %73, %82 : vector<1x256xi1>
    %180 = arith.andi %73, %91 : vector<1x256xi1>
    %181 = arith.andi %73, %100 : vector<1x256xi1>
    %182 = arith.andi %73, %109 : vector<1x256xi1>
    %183 = arith.andi %73, %118 : vector<1x256xi1>
    %184 = arith.andi %73, %127 : vector<1x256xi1>
    %185 = arith.andi %73, %136 : vector<1x256xi1>
    %c0 = arith.constant 0 : index
    %186 = memref.load %arg1[%c0] : memref<98xf32, #tpu.memory_space<smem>>
    %c1 = arith.constant 1 : index
    %187 = memref.load %arg1[%c1] : memref<98xf32, #tpu.memory_space<smem>>
    %c2 = arith.constant 2 : index
    %188 = memref.load %arg1[%c2] : memref<98xf32, #tpu.memory_space<smem>>
    %c3 = arith.constant 3 : index
    %189 = memref.load %arg1[%c3] : memref<98xf32, #tpu.memory_space<smem>>
    %c4 = arith.constant 4 : index
    %190 = memref.load %arg1[%c4] : memref<98xf32, #tpu.memory_space<smem>>
    %c5 = arith.constant 5 : index
    %191 = memref.load %arg1[%c5] : memref<98xf32, #tpu.memory_space<smem>>
    %c6 = arith.constant 6 : index
    %192 = memref.load %arg1[%c6] : memref<98xf32, #tpu.memory_space<smem>>
    %c7 = arith.constant 7 : index
    %193 = memref.load %arg1[%c7] : memref<98xf32, #tpu.memory_space<smem>>
    %c8 = arith.constant 8 : index
    %194 = memref.load %arg1[%c8] : memref<98xf32, #tpu.memory_space<smem>>
    %c9 = arith.constant 9 : index
    %195 = memref.load %arg1[%c9] : memref<98xf32, #tpu.memory_space<smem>>
    %c10 = arith.constant 10 : index
    %196 = memref.load %arg1[%c10] : memref<98xf32, #tpu.memory_space<smem>>
    %c11 = arith.constant 11 : index
    %197 = memref.load %arg1[%c11] : memref<98xf32, #tpu.memory_space<smem>>
    %c12 = arith.constant 12 : index
    %198 = memref.load %arg1[%c12] : memref<98xf32, #tpu.memory_space<smem>>
    %c13 = arith.constant 13 : index
    %199 = memref.load %arg1[%c13] : memref<98xf32, #tpu.memory_space<smem>>
    %c14 = arith.constant 14 : index
    %200 = memref.load %arg1[%c14] : memref<98xf32, #tpu.memory_space<smem>>
    %c15 = arith.constant 15 : index
    %201 = memref.load %arg1[%c15] : memref<98xf32, #tpu.memory_space<smem>>
    %c16 = arith.constant 16 : index
    %202 = memref.load %arg1[%c16] : memref<98xf32, #tpu.memory_space<smem>>
    %c17 = arith.constant 17 : index
    %203 = memref.load %arg1[%c17] : memref<98xf32, #tpu.memory_space<smem>>
    %c18 = arith.constant 18 : index
    %204 = memref.load %arg1[%c18] : memref<98xf32, #tpu.memory_space<smem>>
    %c19 = arith.constant 19 : index
    %205 = memref.load %arg1[%c19] : memref<98xf32, #tpu.memory_space<smem>>
    %c20 = arith.constant 20 : index
    %206 = memref.load %arg1[%c20] : memref<98xf32, #tpu.memory_space<smem>>
    %c21 = arith.constant 21 : index
    %207 = memref.load %arg1[%c21] : memref<98xf32, #tpu.memory_space<smem>>
    %c22 = arith.constant 22 : index
    %208 = memref.load %arg1[%c22] : memref<98xf32, #tpu.memory_space<smem>>
    %c23 = arith.constant 23 : index
    %209 = memref.load %arg1[%c23] : memref<98xf32, #tpu.memory_space<smem>>
    %c24 = arith.constant 24 : index
    %210 = memref.load %arg1[%c24] : memref<98xf32, #tpu.memory_space<smem>>
    %c25 = arith.constant 25 : index
    %211 = memref.load %arg1[%c25] : memref<98xf32, #tpu.memory_space<smem>>
    %c26 = arith.constant 26 : index
    %212 = memref.load %arg1[%c26] : memref<98xf32, #tpu.memory_space<smem>>
    %c27 = arith.constant 27 : index
    %213 = memref.load %arg1[%c27] : memref<98xf32, #tpu.memory_space<smem>>
    %c28 = arith.constant 28 : index
    %214 = memref.load %arg1[%c28] : memref<98xf32, #tpu.memory_space<smem>>
    %c29 = arith.constant 29 : index
    %215 = memref.load %arg1[%c29] : memref<98xf32, #tpu.memory_space<smem>>
    %c30 = arith.constant 30 : index
    %216 = memref.load %arg1[%c30] : memref<98xf32, #tpu.memory_space<smem>>
    %c31 = arith.constant 31 : index
    %217 = memref.load %arg1[%c31] : memref<98xf32, #tpu.memory_space<smem>>
    %c32 = arith.constant 32 : index
    %218 = memref.load %arg1[%c32] : memref<98xf32, #tpu.memory_space<smem>>
    %c33 = arith.constant 33 : index
    %219 = memref.load %arg1[%c33] : memref<98xf32, #tpu.memory_space<smem>>
    %c34 = arith.constant 34 : index
    %220 = memref.load %arg1[%c34] : memref<98xf32, #tpu.memory_space<smem>>
    %c35 = arith.constant 35 : index
    %221 = memref.load %arg1[%c35] : memref<98xf32, #tpu.memory_space<smem>>
    %c36 = arith.constant 36 : index
    %222 = memref.load %arg1[%c36] : memref<98xf32, #tpu.memory_space<smem>>
    %c37 = arith.constant 37 : index
    %223 = memref.load %arg1[%c37] : memref<98xf32, #tpu.memory_space<smem>>
    %c38 = arith.constant 38 : index
    %224 = memref.load %arg1[%c38] : memref<98xf32, #tpu.memory_space<smem>>
    %c39 = arith.constant 39 : index
    %225 = memref.load %arg1[%c39] : memref<98xf32, #tpu.memory_space<smem>>
    %c40 = arith.constant 40 : index
    %226 = memref.load %arg1[%c40] : memref<98xf32, #tpu.memory_space<smem>>
    %c41 = arith.constant 41 : index
    %227 = memref.load %arg1[%c41] : memref<98xf32, #tpu.memory_space<smem>>
    %c42 = arith.constant 42 : index
    %228 = memref.load %arg1[%c42] : memref<98xf32, #tpu.memory_space<smem>>
    %c43 = arith.constant 43 : index
    %229 = memref.load %arg1[%c43] : memref<98xf32, #tpu.memory_space<smem>>
    %c44 = arith.constant 44 : index
    %230 = memref.load %arg1[%c44] : memref<98xf32, #tpu.memory_space<smem>>
    %c45 = arith.constant 45 : index
    %231 = memref.load %arg1[%c45] : memref<98xf32, #tpu.memory_space<smem>>
    %c46 = arith.constant 46 : index
    %232 = memref.load %arg1[%c46] : memref<98xf32, #tpu.memory_space<smem>>
    %c47 = arith.constant 47 : index
    %233 = memref.load %arg1[%c47] : memref<98xf32, #tpu.memory_space<smem>>
    %c48 = arith.constant 48 : index
    %234 = memref.load %arg1[%c48] : memref<98xf32, #tpu.memory_space<smem>>
    %c49 = arith.constant 49 : index
    %235 = memref.load %arg1[%c49] : memref<98xf32, #tpu.memory_space<smem>>
    %c50 = arith.constant 50 : index
    %236 = memref.load %arg1[%c50] : memref<98xf32, #tpu.memory_space<smem>>
    %c51 = arith.constant 51 : index
    %237 = memref.load %arg1[%c51] : memref<98xf32, #tpu.memory_space<smem>>
    %c52 = arith.constant 52 : index
    %238 = memref.load %arg1[%c52] : memref<98xf32, #tpu.memory_space<smem>>
    %c53 = arith.constant 53 : index
    %239 = memref.load %arg1[%c53] : memref<98xf32, #tpu.memory_space<smem>>
    %c54 = arith.constant 54 : index
    %240 = memref.load %arg1[%c54] : memref<98xf32, #tpu.memory_space<smem>>
    %c55 = arith.constant 55 : index
    %241 = memref.load %arg1[%c55] : memref<98xf32, #tpu.memory_space<smem>>
    %c56 = arith.constant 56 : index
    %242 = memref.load %arg1[%c56] : memref<98xf32, #tpu.memory_space<smem>>
    %c57 = arith.constant 57 : index
    %243 = memref.load %arg1[%c57] : memref<98xf32, #tpu.memory_space<smem>>
    %c58 = arith.constant 58 : index
    %244 = memref.load %arg1[%c58] : memref<98xf32, #tpu.memory_space<smem>>
    %c59 = arith.constant 59 : index
    %245 = memref.load %arg1[%c59] : memref<98xf32, #tpu.memory_space<smem>>
    %c60 = arith.constant 60 : index
    %246 = memref.load %arg1[%c60] : memref<98xf32, #tpu.memory_space<smem>>
    %c61 = arith.constant 61 : index
    %247 = memref.load %arg1[%c61] : memref<98xf32, #tpu.memory_space<smem>>
    %c62 = arith.constant 62 : index
    %248 = memref.load %arg1[%c62] : memref<98xf32, #tpu.memory_space<smem>>
    %c63 = arith.constant 63 : index
    %249 = memref.load %arg1[%c63] : memref<98xf32, #tpu.memory_space<smem>>
    %c64 = arith.constant 64 : index
    %250 = memref.load %arg1[%c64] : memref<98xf32, #tpu.memory_space<smem>>
    %c65 = arith.constant 65 : index
    %251 = memref.load %arg1[%c65] : memref<98xf32, #tpu.memory_space<smem>>
    %c66 = arith.constant 66 : index
    %252 = memref.load %arg1[%c66] : memref<98xf32, #tpu.memory_space<smem>>
    %c67 = arith.constant 67 : index
    %253 = memref.load %arg1[%c67] : memref<98xf32, #tpu.memory_space<smem>>
    %c68 = arith.constant 68 : index
    %254 = memref.load %arg1[%c68] : memref<98xf32, #tpu.memory_space<smem>>
    %c69 = arith.constant 69 : index
    %255 = memref.load %arg1[%c69] : memref<98xf32, #tpu.memory_space<smem>>
    %c70 = arith.constant 70 : index
    %256 = memref.load %arg1[%c70] : memref<98xf32, #tpu.memory_space<smem>>
    %c71 = arith.constant 71 : index
    %257 = memref.load %arg1[%c71] : memref<98xf32, #tpu.memory_space<smem>>
    %c72 = arith.constant 72 : index
    %258 = memref.load %arg1[%c72] : memref<98xf32, #tpu.memory_space<smem>>
    %c73 = arith.constant 73 : index
    %259 = memref.load %arg1[%c73] : memref<98xf32, #tpu.memory_space<smem>>
    %c74 = arith.constant 74 : index
    %260 = memref.load %arg1[%c74] : memref<98xf32, #tpu.memory_space<smem>>
    %c75 = arith.constant 75 : index
    %261 = memref.load %arg1[%c75] : memref<98xf32, #tpu.memory_space<smem>>
    %c76 = arith.constant 76 : index
    %262 = memref.load %arg1[%c76] : memref<98xf32, #tpu.memory_space<smem>>
    %c77 = arith.constant 77 : index
    %263 = memref.load %arg1[%c77] : memref<98xf32, #tpu.memory_space<smem>>
    %c78 = arith.constant 78 : index
    %264 = memref.load %arg1[%c78] : memref<98xf32, #tpu.memory_space<smem>>
    %c79 = arith.constant 79 : index
    %265 = memref.load %arg1[%c79] : memref<98xf32, #tpu.memory_space<smem>>
    %c80 = arith.constant 80 : index
    %266 = memref.load %arg1[%c80] : memref<98xf32, #tpu.memory_space<smem>>
    %c81 = arith.constant 81 : index
    %267 = memref.load %arg1[%c81] : memref<98xf32, #tpu.memory_space<smem>>
    %c82 = arith.constant 82 : index
    %268 = memref.load %arg1[%c82] : memref<98xf32, #tpu.memory_space<smem>>
    %c83 = arith.constant 83 : index
    %269 = memref.load %arg1[%c83] : memref<98xf32, #tpu.memory_space<smem>>
    %c84 = arith.constant 84 : index
    %270 = memref.load %arg1[%c84] : memref<98xf32, #tpu.memory_space<smem>>
    %c85 = arith.constant 85 : index
    %271 = memref.load %arg1[%c85] : memref<98xf32, #tpu.memory_space<smem>>
    %c86 = arith.constant 86 : index
    %272 = memref.load %arg1[%c86] : memref<98xf32, #tpu.memory_space<smem>>
    %c87 = arith.constant 87 : index
    %273 = memref.load %arg1[%c87] : memref<98xf32, #tpu.memory_space<smem>>
    %c88 = arith.constant 88 : index
    %274 = memref.load %arg1[%c88] : memref<98xf32, #tpu.memory_space<smem>>
    %c89 = arith.constant 89 : index
    %275 = memref.load %arg1[%c89] : memref<98xf32, #tpu.memory_space<smem>>
    %c90 = arith.constant 90 : index
    %276 = memref.load %arg1[%c90] : memref<98xf32, #tpu.memory_space<smem>>
    %c91 = arith.constant 91 : index
    %277 = memref.load %arg1[%c91] : memref<98xf32, #tpu.memory_space<smem>>
    %c92 = arith.constant 92 : index
    %278 = memref.load %arg1[%c92] : memref<98xf32, #tpu.memory_space<smem>>
    %c93 = arith.constant 93 : index
    %279 = memref.load %arg1[%c93] : memref<98xf32, #tpu.memory_space<smem>>
    %c94 = arith.constant 94 : index
    %280 = memref.load %arg1[%c94] : memref<98xf32, #tpu.memory_space<smem>>
    %c95 = arith.constant 95 : index
    %281 = memref.load %arg1[%c95] : memref<98xf32, #tpu.memory_space<smem>>
    %c96 = arith.constant 96 : index
    %282 = memref.load %arg1[%c96] : memref<98xf32, #tpu.memory_space<smem>>
    %c97 = arith.constant 97 : index
    %283 = memref.load %arg1[%c97] : memref<98xf32, #tpu.memory_space<smem>>
    %c0_50 = arith.constant 0 : index
    %284 = memref.load %arg2[%c0_50] : memref<1xf32, #tpu.memory_space<smem>>
    %c0_51 = arith.constant 0 : index
    %285 = memref.load %arg3[%c0_51] : memref<1xf32, #tpu.memory_space<smem>>
    %c0_52 = arith.constant 0 : index
    %286 = memref.load %arg4[%c0_52] : memref<1xf32, #tpu.memory_space<smem>>
    %c0_i32_53 = arith.constant 0 : i32
    %c0_i32_54 = arith.constant 0 : i32
    %c0_i32_55 = arith.constant 0 : i32
    %287 = tpu.memref_slice %arg5[%c0_i32_53, %c0_i32_54, %c0_i32_55] : memref<2x4x256xf32, #tpu.memory_space<vmem>> -> memref<1x4x256xf32, #tpu.memory_space<vmem>>
    %288 = tpu.memref_squeeze %287 : memref<1x4x256xf32, #tpu.memory_space<vmem>> -> memref<4x256xf32, #tpu.memory_space<vmem>>
    %c0_56 = arith.constant 0 : index
    %c0_57 = arith.constant 0 : index
    %289 = vector.load %288[%c0_56, %c0_57] : memref<4x256xf32, #tpu.memory_space<vmem>>, vector<1x256xf32>
    %c0_i32_58 = arith.constant 0 : i32
    %c0_i32_59 = arith.constant 0 : i32
    %c0_i32_60 = arith.constant 0 : i32
    %290 = tpu.memref_slice %arg5[%c0_i32_58, %c0_i32_59, %c0_i32_60] : memref<2x4x256xf32, #tpu.memory_space<vmem>> -> memref<1x4x256xf32, #tpu.memory_space<vmem>>
    %291 = tpu.memref_squeeze %290 : memref<1x4x256xf32, #tpu.memory_space<vmem>> -> memref<4x256xf32, #tpu.memory_space<vmem>>
    %c1_61 = arith.constant 1 : index
    %c0_62 = arith.constant 0 : index
    %292 = vector.load %291[%c1_61, %c0_62] : memref<4x256xf32, #tpu.memory_space<vmem>>, vector<1x256xf32>
    %293 = arith.maximumf %289, %292 : vector<1x256xf32>
    %294 = arith.addf %289, %292 : vector<1x256xf32>
    %c0_i32_63 = arith.constant 0 : i32
    %c0_i32_64 = arith.constant 0 : i32
    %c0_i32_65 = arith.constant 0 : i32
    %295 = tpu.memref_slice %arg5[%c0_i32_63, %c0_i32_64, %c0_i32_65] : memref<2x4x256xf32, #tpu.memory_space<vmem>> -> memref<1x4x256xf32, #tpu.memory_space<vmem>>
    %296 = tpu.memref_squeeze %295 : memref<1x4x256xf32, #tpu.memory_space<vmem>> -> memref<4x256xf32, #tpu.memory_space<vmem>>
    %c2_66 = arith.constant 2 : index
    %c0_67 = arith.constant 0 : index
    %297 = vector.load %296[%c2_66, %c0_67] : memref<4x256xf32, #tpu.memory_space<vmem>>, vector<1x256xf32>
    %298 = arith.maximumf %293, %297 : vector<1x256xf32>
    %299 = arith.addf %294, %297 : vector<1x256xf32>
    %c0_i32_68 = arith.constant 0 : i32
    %c0_i32_69 = arith.constant 0 : i32
    %c0_i32_70 = arith.constant 0 : i32
    %300 = tpu.memref_slice %arg5[%c0_i32_68, %c0_i32_69, %c0_i32_70] : memref<2x4x256xf32, #tpu.memory_space<vmem>> -> memref<1x4x256xf32, #tpu.memory_space<vmem>>
    %301 = tpu.memref_squeeze %300 : memref<1x4x256xf32, #tpu.memory_space<vmem>> -> memref<4x256xf32, #tpu.memory_space<vmem>>
    %c3_71 = arith.constant 3 : index
    %c0_72 = arith.constant 0 : index
    %302 = vector.load %301[%c3_71, %c0_72] : memref<4x256xf32, #tpu.memory_space<vmem>>, vector<1x256xf32>
    %303 = arith.maximumf %298, %302 : vector<1x256xf32>
    %304 = arith.addf %299, %302 : vector<1x256xf32>
    %cst_73 = arith.constant 2.500000e-01 : f32
    %305 = vector.broadcast %cst_73 : f32 to vector<1x256xf32>
    %306 = arith.mulf %304, %305 : vector<1x256xf32>
    %307 = tpu.concatenate %303, %306 in 0 : vector<1x256xf32>, vector<1x256xf32> -> vector<2x256xf32>
    %308 = vector.broadcast %284 : f32 to vector<1x256xf32>
    %c51_i32 = arith.constant 51 : i32
    %309 = tpu.dynamic_rotate %307 by %c51_i32 dim 1 : vector<2x256xf32>, i32 -> vector<2x256xf32>
    %310 = vector.extract_strided_slice %309 {offsets = [0, 0], sizes = [1, 256], strides = [1, 1]} : vector<2x256xf32> to vector<1x256xf32>
    %311 = vector.broadcast %186 : f32 to vector<1x256xf32>
    %312 = arith.mulf %311, %310 : vector<1x256xf32>
    %313 = vector.extract_strided_slice %309 {offsets = [1, 0], sizes = [1, 256], strides = [1, 1]} : vector<2x256xf32> to vector<1x256xf32>
    %314 = vector.broadcast %235 : f32 to vector<1x256xf32>
    %315 = arith.mulf %314, %313 : vector<1x256xf32>
    %316 = arith.addf %312, %315 : vector<1x256xf32>
    %cst_74 = arith.constant 0.000000e+00 : f32
    %317 = vector.broadcast %cst_74 : f32 to vector<1x256xf32>
    %318 = arith.select %137, %316, %317 : vector<1x256xi1>, vector<1x256xf32>
    %319 = arith.addf %308, %318 : vector<1x256xf32>
    %c50_i32 = arith.constant 50 : i32
    %320 = tpu.dynamic_rotate %307 by %c50_i32 dim 1 : vector<2x256xf32>, i32 -> vector<2x256xf32>
    %321 = vector.extract_strided_slice %320 {offsets = [0, 0], sizes = [1, 256], strides = [1, 1]} : vector<2x256xf32> to vector<1x256xf32>
    %322 = vector.broadcast %187 : f32 to vector<1x256xf32>
    %323 = arith.mulf %322, %321 : vector<1x256xf32>
    %324 = vector.extract_strided_slice %320 {offsets = [1, 0], sizes = [1, 256], strides = [1, 1]} : vector<2x256xf32> to vector<1x256xf32>
    %325 = vector.broadcast %236 : f32 to vector<1x256xf32>
    %326 = arith.mulf %325, %324 : vector<1x256xf32>
    %327 = arith.addf %323, %326 : vector<1x256xf32>
    %cst_75 = arith.constant 0.000000e+00 : f32
    %328 = vector.broadcast %cst_75 : f32 to vector<1x256xf32>
    %329 = arith.select %138, %327, %328 : vector<1x256xi1>, vector<1x256xf32>
    %330 = arith.addf %319, %329 : vector<1x256xf32>
    %c49_i32 = arith.constant 49 : i32
    %331 = tpu.dynamic_rotate %307 by %c49_i32 dim 1 : vector<2x256xf32>, i32 -> vector<2x256xf32>
    %332 = vector.extract_strided_slice %331 {offsets = [0, 0], sizes = [1, 256], strides = [1, 1]} : vector<2x256xf32> to vector<1x256xf32>
    %333 = vector.broadcast %188 : f32 to vector<1x256xf32>
    %334 = arith.mulf %333, %332 : vector<1x256xf32>
    %335 = vector.extract_strided_slice %331 {offsets = [1, 0], sizes = [1, 256], strides = [1, 1]} : vector<2x256xf32> to vector<1x256xf32>
    %336 = vector.broadcast %237 : f32 to vector<1x256xf32>
    %337 = arith.mulf %336, %335 : vector<1x256xf32>
    %338 = arith.addf %334, %337 : vector<1x256xf32>
    %cst_76 = arith.constant 0.000000e+00 : f32
    %339 = vector.broadcast %cst_76 : f32 to vector<1x256xf32>
    %340 = arith.select %139, %338, %339 : vector<1x256xi1>, vector<1x256xf32>
    %341 = arith.addf %330, %340 : vector<1x256xf32>
    %c48_i32 = arith.constant 48 : i32
    %342 = tpu.dynamic_rotate %307 by %c48_i32 dim 1 : vector<2x256xf32>, i32 -> vector<2x256xf32>
    %343 = vector.extract_strided_slice %342 {offsets = [0, 0], sizes = [1, 256], strides = [1, 1]} : vector<2x256xf32> to vector<1x256xf32>
    %344 = vector.broadcast %189 : f32 to vector<1x256xf32>
    %345 = arith.mulf %344, %343 : vector<1x256xf32>
    %346 = vector.extract_strided_slice %342 {offsets = [1, 0], sizes = [1, 256], strides = [1, 1]} : vector<2x256xf32> to vector<1x256xf32>
    %347 = vector.broadcast %238 : f32 to vector<1x256xf32>
    %348 = arith.mulf %347, %346 : vector<1x256xf32>
    %349 = arith.addf %345, %348 : vector<1x256xf32>
    %cst_77 = arith.constant 0.000000e+00 : f32
    %350 = vector.broadcast %cst_77 : f32 to vector<1x256xf32>
    %351 = arith.select %140, %349, %350 : vector<1x256xi1>, vector<1x256xf32>
    %352 = arith.addf %341, %351 : vector<1x256xf32>
    %c47_i32 = arith.constant 47 : i32
    %353 = tpu.dynamic_rotate %307 by %c47_i32 dim 1 : vector<2x256xf32>, i32 -> vector<2x256xf32>
    %354 = vector.extract_strided_slice %353 {offsets = [0, 0], sizes = [1, 256], strides = [1, 1]} : vector<2x256xf32> to vector<1x256xf32>
    %355 = vector.broadcast %190 : f32 to vector<1x256xf32>
    %356 = arith.mulf %355, %354 : vector<1x256xf32>
    %357 = vector.extract_strided_slice %353 {offsets = [1, 0], sizes = [1, 256], strides = [1, 1]} : vector<2x256xf32> to vector<1x256xf32>
    %358 = vector.broadcast %239 : f32 to vector<1x256xf32>
    %359 = arith.mulf %358, %357 : vector<1x256xf32>
    %360 = arith.addf %356, %359 : vector<1x256xf32>
    %cst_78 = arith.constant 0.000000e+00 : f32
    %361 = vector.broadcast %cst_78 : f32 to vector<1x256xf32>
    %362 = arith.select %141, %360, %361 : vector<1x256xi1>, vector<1x256xf32>
    %363 = arith.addf %352, %362 : vector<1x256xf32>
    %c46_i32 = arith.constant 46 : i32
    %364 = tpu.dynamic_rotate %307 by %c46_i32 dim 1 : vector<2x256xf32>, i32 -> vector<2x256xf32>
    %365 = vector.extract_strided_slice %364 {offsets = [0, 0], sizes = [1, 256], strides = [1, 1]} : vector<2x256xf32> to vector<1x256xf32>
    %366 = vector.broadcast %191 : f32 to vector<1x256xf32>
    %367 = arith.mulf %366, %365 : vector<1x256xf32>
    %368 = vector.extract_strided_slice %364 {offsets = [1, 0], sizes = [1, 256], strides = [1, 1]} : vector<2x256xf32> to vector<1x256xf32>
    %369 = vector.broadcast %240 : f32 to vector<1x256xf32>
    %370 = arith.mulf %369, %368 : vector<1x256xf32>
    %371 = arith.addf %367, %370 : vector<1x256xf32>
    %cst_79 = arith.constant 0.000000e+00 : f32
    %372 = vector.broadcast %cst_79 : f32 to vector<1x256xf32>
    %373 = arith.select %142, %371, %372 : vector<1x256xi1>, vector<1x256xf32>
    %374 = arith.addf %363, %373 : vector<1x256xf32>
    %c45_i32 = arith.constant 45 : i32
    %375 = tpu.dynamic_rotate %307 by %c45_i32 dim 1 : vector<2x256xf32>, i32 -> vector<2x256xf32>
    %376 = vector.extract_strided_slice %375 {offsets = [0, 0], sizes = [1, 256], strides = [1, 1]} : vector<2x256xf32> to vector<1x256xf32>
    %377 = vector.broadcast %192 : f32 to vector<1x256xf32>
    %378 = arith.mulf %377, %376 : vector<1x256xf32>
    %379 = vector.extract_strided_slice %375 {offsets = [1, 0], sizes = [1, 256], strides = [1, 1]} : vector<2x256xf32> to vector<1x256xf32>
    %380 = vector.broadcast %241 : f32 to vector<1x256xf32>
    %381 = arith.mulf %380, %379 : vector<1x256xf32>
    %382 = arith.addf %378, %381 : vector<1x256xf32>
    %cst_80 = arith.constant 0.000000e+00 : f32
    %383 = vector.broadcast %cst_80 : f32 to vector<1x256xf32>
    %384 = arith.select %143, %382, %383 : vector<1x256xi1>, vector<1x256xf32>
    %385 = arith.addf %374, %384 : vector<1x256xf32>
    %c35_i32 = arith.constant 35 : i32
    %386 = tpu.dynamic_rotate %307 by %c35_i32 dim 1 : vector<2x256xf32>, i32 -> vector<2x256xf32>
    %387 = vector.extract_strided_slice %386 {offsets = [0, 0], sizes = [1, 256], strides = [1, 1]} : vector<2x256xf32> to vector<1x256xf32>
    %388 = vector.broadcast %193 : f32 to vector<1x256xf32>
    %389 = arith.mulf %388, %387 : vector<1x256xf32>
    %390 = vector.extract_strided_slice %386 {offsets = [1, 0], sizes = [1, 256], strides = [1, 1]} : vector<2x256xf32> to vector<1x256xf32>
    %391 = vector.broadcast %242 : f32 to vector<1x256xf32>
    %392 = arith.mulf %391, %390 : vector<1x256xf32>
    %393 = arith.addf %389, %392 : vector<1x256xf32>
    %cst_81 = arith.constant 0.000000e+00 : f32
    %394 = vector.broadcast %cst_81 : f32 to vector<1x256xf32>
    %395 = arith.select %144, %393, %394 : vector<1x256xi1>, vector<1x256xf32>
    %396 = arith.addf %385, %395 : vector<1x256xf32>
    %c34_i32 = arith.constant 34 : i32
    %397 = tpu.dynamic_rotate %307 by %c34_i32 dim 1 : vector<2x256xf32>, i32 -> vector<2x256xf32>
    %398 = vector.extract_strided_slice %397 {offsets = [0, 0], sizes = [1, 256], strides = [1, 1]} : vector<2x256xf32> to vector<1x256xf32>
    %399 = vector.broadcast %194 : f32 to vector<1x256xf32>
    %400 = arith.mulf %399, %398 : vector<1x256xf32>
    %401 = vector.extract_strided_slice %397 {offsets = [1, 0], sizes = [1, 256], strides = [1, 1]} : vector<2x256xf32> to vector<1x256xf32>
    %402 = vector.broadcast %243 : f32 to vector<1x256xf32>
    %403 = arith.mulf %402, %401 : vector<1x256xf32>
    %404 = arith.addf %400, %403 : vector<1x256xf32>
    %cst_82 = arith.constant 0.000000e+00 : f32
    %405 = vector.broadcast %cst_82 : f32 to vector<1x256xf32>
    %406 = arith.select %145, %404, %405 : vector<1x256xi1>, vector<1x256xf32>
    %407 = arith.addf %396, %406 : vector<1x256xf32>
    %c33_i32 = arith.constant 33 : i32
    %408 = tpu.dynamic_rotate %307 by %c33_i32 dim 1 : vector<2x256xf32>, i32 -> vector<2x256xf32>
    %409 = vector.extract_strided_slice %408 {offsets = [0, 0], sizes = [1, 256], strides = [1, 1]} : vector<2x256xf32> to vector<1x256xf32>
    %410 = vector.broadcast %195 : f32 to vector<1x256xf32>
    %411 = arith.mulf %410, %409 : vector<1x256xf32>
    %412 = vector.extract_strided_slice %408 {offsets = [1, 0], sizes = [1, 256], strides = [1, 1]} : vector<2x256xf32> to vector<1x256xf32>
    %413 = vector.broadcast %244 : f32 to vector<1x256xf32>
    %414 = arith.mulf %413, %412 : vector<1x256xf32>
    %415 = arith.addf %411, %414 : vector<1x256xf32>
    %cst_83 = arith.constant 0.000000e+00 : f32
    %416 = vector.broadcast %cst_83 : f32 to vector<1x256xf32>
    %417 = arith.select %146, %415, %416 : vector<1x256xi1>, vector<1x256xf32>
    %418 = arith.addf %407, %417 : vector<1x256xf32>
    %c32_i32 = arith.constant 32 : i32
    %419 = tpu.dynamic_rotate %307 by %c32_i32 dim 1 : vector<2x256xf32>, i32 -> vector<2x256xf32>
    %420 = vector.extract_strided_slice %419 {offsets = [0, 0], sizes = [1, 256], strides = [1, 1]} : vector<2x256xf32> to vector<1x256xf32>
    %421 = vector.broadcast %196 : f32 to vector<1x256xf32>
    %422 = arith.mulf %421, %420 : vector<1x256xf32>
    %423 = vector.extract_strided_slice %419 {offsets = [1, 0], sizes = [1, 256], strides = [1, 1]} : vector<2x256xf32> to vector<1x256xf32>
    %424 = vector.broadcast %245 : f32 to vector<1x256xf32>
    %425 = arith.mulf %424, %423 : vector<1x256xf32>
    %426 = arith.addf %422, %425 : vector<1x256xf32>
    %cst_84 = arith.constant 0.000000e+00 : f32
    %427 = vector.broadcast %cst_84 : f32 to vector<1x256xf32>
    %428 = arith.select %147, %426, %427 : vector<1x256xi1>, vector<1x256xf32>
    %429 = arith.addf %418, %428 : vector<1x256xf32>
    %c31_i32 = arith.constant 31 : i32
    %430 = tpu.dynamic_rotate %307 by %c31_i32 dim 1 : vector<2x256xf32>, i32 -> vector<2x256xf32>
    %431 = vector.extract_strided_slice %430 {offsets = [0, 0], sizes = [1, 256], strides = [1, 1]} : vector<2x256xf32> to vector<1x256xf32>
    %432 = vector.broadcast %197 : f32 to vector<1x256xf32>
    %433 = arith.mulf %432, %431 : vector<1x256xf32>
    %434 = vector.extract_strided_slice %430 {offsets = [1, 0], sizes = [1, 256], strides = [1, 1]} : vector<2x256xf32> to vector<1x256xf32>
    %435 = vector.broadcast %246 : f32 to vector<1x256xf32>
    %436 = arith.mulf %435, %434 : vector<1x256xf32>
    %437 = arith.addf %433, %436 : vector<1x256xf32>
    %cst_85 = arith.constant 0.000000e+00 : f32
    %438 = vector.broadcast %cst_85 : f32 to vector<1x256xf32>
    %439 = arith.select %148, %437, %438 : vector<1x256xi1>, vector<1x256xf32>
    %440 = arith.addf %429, %439 : vector<1x256xf32>
    %c30_i32 = arith.constant 30 : i32
    %441 = tpu.dynamic_rotate %307 by %c30_i32 dim 1 : vector<2x256xf32>, i32 -> vector<2x256xf32>
    %442 = vector.extract_strided_slice %441 {offsets = [0, 0], sizes = [1, 256], strides = [1, 1]} : vector<2x256xf32> to vector<1x256xf32>
    %443 = vector.broadcast %198 : f32 to vector<1x256xf32>
    %444 = arith.mulf %443, %442 : vector<1x256xf32>
    %445 = vector.extract_strided_slice %441 {offsets = [1, 0], sizes = [1, 256], strides = [1, 1]} : vector<2x256xf32> to vector<1x256xf32>
    %446 = vector.broadcast %247 : f32 to vector<1x256xf32>
    %447 = arith.mulf %446, %445 : vector<1x256xf32>
    %448 = arith.addf %444, %447 : vector<1x256xf32>
    %cst_86 = arith.constant 0.000000e+00 : f32
    %449 = vector.broadcast %cst_86 : f32 to vector<1x256xf32>
    %450 = arith.select %149, %448, %449 : vector<1x256xi1>, vector<1x256xf32>
    %451 = arith.addf %440, %450 : vector<1x256xf32>
    %c29_i32 = arith.constant 29 : i32
    %452 = tpu.dynamic_rotate %307 by %c29_i32 dim 1 : vector<2x256xf32>, i32 -> vector<2x256xf32>
    %453 = vector.extract_strided_slice %452 {offsets = [0, 0], sizes = [1, 256], strides = [1, 1]} : vector<2x256xf32> to vector<1x256xf32>
    %454 = vector.broadcast %199 : f32 to vector<1x256xf32>
    %455 = arith.mulf %454, %453 : vector<1x256xf32>
    %456 = vector.extract_strided_slice %452 {offsets = [1, 0], sizes = [1, 256], strides = [1, 1]} : vector<2x256xf32> to vector<1x256xf32>
    %457 = vector.broadcast %248 : f32 to vector<1x256xf32>
    %458 = arith.mulf %457, %456 : vector<1x256xf32>
    %459 = arith.addf %455, %458 : vector<1x256xf32>
    %cst_87 = arith.constant 0.000000e+00 : f32
    %460 = vector.broadcast %cst_87 : f32 to vector<1x256xf32>
    %461 = arith.select %150, %459, %460 : vector<1x256xi1>, vector<1x256xf32>
    %462 = arith.addf %451, %461 : vector<1x256xf32>
    %c19_i32 = arith.constant 19 : i32
    %463 = tpu.dynamic_rotate %307 by %c19_i32 dim 1 : vector<2x256xf32>, i32 -> vector<2x256xf32>
    %464 = vector.extract_strided_slice %463 {offsets = [0, 0], sizes = [1, 256], strides = [1, 1]} : vector<2x256xf32> to vector<1x256xf32>
    %465 = vector.broadcast %200 : f32 to vector<1x256xf32>
    %466 = arith.mulf %465, %464 : vector<1x256xf32>
    %467 = vector.extract_strided_slice %463 {offsets = [1, 0], sizes = [1, 256], strides = [1, 1]} : vector<2x256xf32> to vector<1x256xf32>
    %468 = vector.broadcast %249 : f32 to vector<1x256xf32>
    %469 = arith.mulf %468, %467 : vector<1x256xf32>
    %470 = arith.addf %466, %469 : vector<1x256xf32>
    %cst_88 = arith.constant 0.000000e+00 : f32
    %471 = vector.broadcast %cst_88 : f32 to vector<1x256xf32>
    %472 = arith.select %151, %470, %471 : vector<1x256xi1>, vector<1x256xf32>
    %473 = arith.addf %462, %472 : vector<1x256xf32>
    %c18_i32 = arith.constant 18 : i32
    %474 = tpu.dynamic_rotate %307 by %c18_i32 dim 1 : vector<2x256xf32>, i32 -> vector<2x256xf32>
    %475 = vector.extract_strided_slice %474 {offsets = [0, 0], sizes = [1, 256], strides = [1, 1]} : vector<2x256xf32> to vector<1x256xf32>
    %476 = vector.broadcast %201 : f32 to vector<1x256xf32>
    %477 = arith.mulf %476, %475 : vector<1x256xf32>
    %478 = vector.extract_strided_slice %474 {offsets = [1, 0], sizes = [1, 256], strides = [1, 1]} : vector<2x256xf32> to vector<1x256xf32>
    %479 = vector.broadcast %250 : f32 to vector<1x256xf32>
    %480 = arith.mulf %479, %478 : vector<1x256xf32>
    %481 = arith.addf %477, %480 : vector<1x256xf32>
    %cst_89 = arith.constant 0.000000e+00 : f32
    %482 = vector.broadcast %cst_89 : f32 to vector<1x256xf32>
    %483 = arith.select %152, %481, %482 : vector<1x256xi1>, vector<1x256xf32>
    %484 = arith.addf %473, %483 : vector<1x256xf32>
    %c17_i32 = arith.constant 17 : i32
    %485 = tpu.dynamic_rotate %307 by %c17_i32 dim 1 : vector<2x256xf32>, i32 -> vector<2x256xf32>
    %486 = vector.extract_strided_slice %485 {offsets = [0, 0], sizes = [1, 256], strides = [1, 1]} : vector<2x256xf32> to vector<1x256xf32>
    %487 = vector.broadcast %202 : f32 to vector<1x256xf32>
    %488 = arith.mulf %487, %486 : vector<1x256xf32>
    %489 = vector.extract_strided_slice %485 {offsets = [1, 0], sizes = [1, 256], strides = [1, 1]} : vector<2x256xf32> to vector<1x256xf32>
    %490 = vector.broadcast %251 : f32 to vector<1x256xf32>
    %491 = arith.mulf %490, %489 : vector<1x256xf32>
    %492 = arith.addf %488, %491 : vector<1x256xf32>
    %cst_90 = arith.constant 0.000000e+00 : f32
    %493 = vector.broadcast %cst_90 : f32 to vector<1x256xf32>
    %494 = arith.select %153, %492, %493 : vector<1x256xi1>, vector<1x256xf32>
    %495 = arith.addf %484, %494 : vector<1x256xf32>
    %c16_i32_91 = arith.constant 16 : i32
    %496 = tpu.dynamic_rotate %307 by %c16_i32_91 dim 1 : vector<2x256xf32>, i32 -> vector<2x256xf32>
    %497 = vector.extract_strided_slice %496 {offsets = [0, 0], sizes = [1, 256], strides = [1, 1]} : vector<2x256xf32> to vector<1x256xf32>
    %498 = vector.broadcast %203 : f32 to vector<1x256xf32>
    %499 = arith.mulf %498, %497 : vector<1x256xf32>
    %500 = vector.extract_strided_slice %496 {offsets = [1, 0], sizes = [1, 256], strides = [1, 1]} : vector<2x256xf32> to vector<1x256xf32>
    %501 = vector.broadcast %252 : f32 to vector<1x256xf32>
    %502 = arith.mulf %501, %500 : vector<1x256xf32>
    %503 = arith.addf %499, %502 : vector<1x256xf32>
    %cst_92 = arith.constant 0.000000e+00 : f32
    %504 = vector.broadcast %cst_92 : f32 to vector<1x256xf32>
    %505 = arith.select %154, %503, %504 : vector<1x256xi1>, vector<1x256xf32>
    %506 = arith.addf %495, %505 : vector<1x256xf32>
    %c15_i32 = arith.constant 15 : i32
    %507 = tpu.dynamic_rotate %307 by %c15_i32 dim 1 : vector<2x256xf32>, i32 -> vector<2x256xf32>
    %508 = vector.extract_strided_slice %507 {offsets = [0, 0], sizes = [1, 256], strides = [1, 1]} : vector<2x256xf32> to vector<1x256xf32>
    %509 = vector.broadcast %204 : f32 to vector<1x256xf32>
    %510 = arith.mulf %509, %508 : vector<1x256xf32>
    %511 = vector.extract_strided_slice %507 {offsets = [1, 0], sizes = [1, 256], strides = [1, 1]} : vector<2x256xf32> to vector<1x256xf32>
    %512 = vector.broadcast %253 : f32 to vector<1x256xf32>
    %513 = arith.mulf %512, %511 : vector<1x256xf32>
    %514 = arith.addf %510, %513 : vector<1x256xf32>
    %cst_93 = arith.constant 0.000000e+00 : f32
    %515 = vector.broadcast %cst_93 : f32 to vector<1x256xf32>
    %516 = arith.select %155, %514, %515 : vector<1x256xi1>, vector<1x256xf32>
    %517 = arith.addf %506, %516 : vector<1x256xf32>
    %c14_i32 = arith.constant 14 : i32
    %518 = tpu.dynamic_rotate %307 by %c14_i32 dim 1 : vector<2x256xf32>, i32 -> vector<2x256xf32>
    %519 = vector.extract_strided_slice %518 {offsets = [0, 0], sizes = [1, 256], strides = [1, 1]} : vector<2x256xf32> to vector<1x256xf32>
    %520 = vector.broadcast %205 : f32 to vector<1x256xf32>
    %521 = arith.mulf %520, %519 : vector<1x256xf32>
    %522 = vector.extract_strided_slice %518 {offsets = [1, 0], sizes = [1, 256], strides = [1, 1]} : vector<2x256xf32> to vector<1x256xf32>
    %523 = vector.broadcast %254 : f32 to vector<1x256xf32>
    %524 = arith.mulf %523, %522 : vector<1x256xf32>
    %525 = arith.addf %521, %524 : vector<1x256xf32>
    %cst_94 = arith.constant 0.000000e+00 : f32
    %526 = vector.broadcast %cst_94 : f32 to vector<1x256xf32>
    %527 = arith.select %156, %525, %526 : vector<1x256xi1>, vector<1x256xf32>
    %528 = arith.addf %517, %527 : vector<1x256xf32>
    %c13_i32 = arith.constant 13 : i32
    %529 = tpu.dynamic_rotate %307 by %c13_i32 dim 1 : vector<2x256xf32>, i32 -> vector<2x256xf32>
    %530 = vector.extract_strided_slice %529 {offsets = [0, 0], sizes = [1, 256], strides = [1, 1]} : vector<2x256xf32> to vector<1x256xf32>
    %531 = vector.broadcast %206 : f32 to vector<1x256xf32>
    %532 = arith.mulf %531, %530 : vector<1x256xf32>
    %533 = vector.extract_strided_slice %529 {offsets = [1, 0], sizes = [1, 256], strides = [1, 1]} : vector<2x256xf32> to vector<1x256xf32>
    %534 = vector.broadcast %255 : f32 to vector<1x256xf32>
    %535 = arith.mulf %534, %533 : vector<1x256xf32>
    %536 = arith.addf %532, %535 : vector<1x256xf32>
    %cst_95 = arith.constant 0.000000e+00 : f32
    %537 = vector.broadcast %cst_95 : f32 to vector<1x256xf32>
    %538 = arith.select %157, %536, %537 : vector<1x256xi1>, vector<1x256xf32>
    %539 = arith.addf %528, %538 : vector<1x256xf32>
    %c3_i32_96 = arith.constant 3 : i32
    %540 = tpu.dynamic_rotate %307 by %c3_i32_96 dim 1 : vector<2x256xf32>, i32 -> vector<2x256xf32>
    %541 = vector.extract_strided_slice %540 {offsets = [0, 0], sizes = [1, 256], strides = [1, 1]} : vector<2x256xf32> to vector<1x256xf32>
    %542 = vector.broadcast %207 : f32 to vector<1x256xf32>
    %543 = arith.mulf %542, %541 : vector<1x256xf32>
    %544 = vector.extract_strided_slice %540 {offsets = [1, 0], sizes = [1, 256], strides = [1, 1]} : vector<2x256xf32> to vector<1x256xf32>
    %545 = vector.broadcast %256 : f32 to vector<1x256xf32>
    %546 = arith.mulf %545, %544 : vector<1x256xf32>
    %547 = arith.addf %543, %546 : vector<1x256xf32>
    %cst_97 = arith.constant 0.000000e+00 : f32
    %548 = vector.broadcast %cst_97 : f32 to vector<1x256xf32>
    %549 = arith.select %158, %547, %548 : vector<1x256xi1>, vector<1x256xf32>
    %550 = arith.addf %539, %549 : vector<1x256xf32>
    %c2_i32_98 = arith.constant 2 : i32
    %551 = tpu.dynamic_rotate %307 by %c2_i32_98 dim 1 : vector<2x256xf32>, i32 -> vector<2x256xf32>
    %552 = vector.extract_strided_slice %551 {offsets = [0, 0], sizes = [1, 256], strides = [1, 1]} : vector<2x256xf32> to vector<1x256xf32>
    %553 = vector.broadcast %208 : f32 to vector<1x256xf32>
    %554 = arith.mulf %553, %552 : vector<1x256xf32>
    %555 = vector.extract_strided_slice %551 {offsets = [1, 0], sizes = [1, 256], strides = [1, 1]} : vector<2x256xf32> to vector<1x256xf32>
    %556 = vector.broadcast %257 : f32 to vector<1x256xf32>
    %557 = arith.mulf %556, %555 : vector<1x256xf32>
    %558 = arith.addf %554, %557 : vector<1x256xf32>
    %cst_99 = arith.constant 0.000000e+00 : f32
    %559 = vector.broadcast %cst_99 : f32 to vector<1x256xf32>
    %560 = arith.select %159, %558, %559 : vector<1x256xi1>, vector<1x256xf32>
    %561 = arith.addf %550, %560 : vector<1x256xf32>
    %c1_i32_100 = arith.constant 1 : i32
    %562 = tpu.dynamic_rotate %307 by %c1_i32_100 dim 1 : vector<2x256xf32>, i32 -> vector<2x256xf32>
    %563 = vector.extract_strided_slice %562 {offsets = [0, 0], sizes = [1, 256], strides = [1, 1]} : vector<2x256xf32> to vector<1x256xf32>
    %564 = vector.broadcast %209 : f32 to vector<1x256xf32>
    %565 = arith.mulf %564, %563 : vector<1x256xf32>
    %566 = vector.extract_strided_slice %562 {offsets = [1, 0], sizes = [1, 256], strides = [1, 1]} : vector<2x256xf32> to vector<1x256xf32>
    %567 = vector.broadcast %258 : f32 to vector<1x256xf32>
    %568 = arith.mulf %567, %566 : vector<1x256xf32>
    %569 = arith.addf %565, %568 : vector<1x256xf32>
    %cst_101 = arith.constant 0.000000e+00 : f32
    %570 = vector.broadcast %cst_101 : f32 to vector<1x256xf32>
    %571 = arith.select %160, %569, %570 : vector<1x256xi1>, vector<1x256xf32>
    %572 = arith.addf %561, %571 : vector<1x256xf32>
    %573 = vector.extract_strided_slice %307 {offsets = [0, 0], sizes = [1, 256], strides = [1, 1]} : vector<2x256xf32> to vector<1x256xf32>
    %574 = vector.broadcast %210 : f32 to vector<1x256xf32>
    %575 = arith.mulf %574, %573 : vector<1x256xf32>
    %576 = vector.extract_strided_slice %307 {offsets = [1, 0], sizes = [1, 256], strides = [1, 1]} : vector<2x256xf32> to vector<1x256xf32>
    %577 = vector.broadcast %259 : f32 to vector<1x256xf32>
    %578 = arith.mulf %577, %576 : vector<1x256xf32>
    %579 = arith.addf %575, %578 : vector<1x256xf32>
    %cst_102 = arith.constant 0.000000e+00 : f32
    %580 = vector.broadcast %cst_102 : f32 to vector<1x256xf32>
    %581 = arith.select %161, %579, %580 : vector<1x256xi1>, vector<1x256xf32>
    %582 = arith.addf %572, %581 : vector<1x256xf32>
    %c255_i32 = arith.constant 255 : i32
    %583 = tpu.dynamic_rotate %307 by %c255_i32 dim 1 : vector<2x256xf32>, i32 -> vector<2x256xf32>
    %584 = vector.extract_strided_slice %583 {offsets = [0, 0], sizes = [1, 256], strides = [1, 1]} : vector<2x256xf32> to vector<1x256xf32>
    %585 = vector.broadcast %211 : f32 to vector<1x256xf32>
    %586 = arith.mulf %585, %584 : vector<1x256xf32>
    %587 = vector.extract_strided_slice %583 {offsets = [1, 0], sizes = [1, 256], strides = [1, 1]} : vector<2x256xf32> to vector<1x256xf32>
    %588 = vector.broadcast %260 : f32 to vector<1x256xf32>
    %589 = arith.mulf %588, %587 : vector<1x256xf32>
    %590 = arith.addf %586, %589 : vector<1x256xf32>
    %cst_103 = arith.constant 0.000000e+00 : f32
    %591 = vector.broadcast %cst_103 : f32 to vector<1x256xf32>
    %592 = arith.select %162, %590, %591 : vector<1x256xi1>, vector<1x256xf32>
    %593 = arith.addf %582, %592 : vector<1x256xf32>
    %c254_i32 = arith.constant 254 : i32
    %594 = tpu.dynamic_rotate %307 by %c254_i32 dim 1 : vector<2x256xf32>, i32 -> vector<2x256xf32>
    %595 = vector.extract_strided_slice %594 {offsets = [0, 0], sizes = [1, 256], strides = [1, 1]} : vector<2x256xf32> to vector<1x256xf32>
    %596 = vector.broadcast %212 : f32 to vector<1x256xf32>
    %597 = arith.mulf %596, %595 : vector<1x256xf32>
    %598 = vector.extract_strided_slice %594 {offsets = [1, 0], sizes = [1, 256], strides = [1, 1]} : vector<2x256xf32> to vector<1x256xf32>
    %599 = vector.broadcast %261 : f32 to vector<1x256xf32>
    %600 = arith.mulf %599, %598 : vector<1x256xf32>
    %601 = arith.addf %597, %600 : vector<1x256xf32>
    %cst_104 = arith.constant 0.000000e+00 : f32
    %602 = vector.broadcast %cst_104 : f32 to vector<1x256xf32>
    %603 = arith.select %163, %601, %602 : vector<1x256xi1>, vector<1x256xf32>
    %604 = arith.addf %593, %603 : vector<1x256xf32>
    %c253_i32 = arith.constant 253 : i32
    %605 = tpu.dynamic_rotate %307 by %c253_i32 dim 1 : vector<2x256xf32>, i32 -> vector<2x256xf32>
    %606 = vector.extract_strided_slice %605 {offsets = [0, 0], sizes = [1, 256], strides = [1, 1]} : vector<2x256xf32> to vector<1x256xf32>
    %607 = vector.broadcast %213 : f32 to vector<1x256xf32>
    %608 = arith.mulf %607, %606 : vector<1x256xf32>
    %609 = vector.extract_strided_slice %605 {offsets = [1, 0], sizes = [1, 256], strides = [1, 1]} : vector<2x256xf32> to vector<1x256xf32>
    %610 = vector.broadcast %262 : f32 to vector<1x256xf32>
    %611 = arith.mulf %610, %609 : vector<1x256xf32>
    %612 = arith.addf %608, %611 : vector<1x256xf32>
    %cst_105 = arith.constant 0.000000e+00 : f32
    %613 = vector.broadcast %cst_105 : f32 to vector<1x256xf32>
    %614 = arith.select %164, %612, %613 : vector<1x256xi1>, vector<1x256xf32>
    %615 = arith.addf %604, %614 : vector<1x256xf32>
    %c243_i32 = arith.constant 243 : i32
    %616 = tpu.dynamic_rotate %307 by %c243_i32 dim 1 : vector<2x256xf32>, i32 -> vector<2x256xf32>
    %617 = vector.extract_strided_slice %616 {offsets = [0, 0], sizes = [1, 256], strides = [1, 1]} : vector<2x256xf32> to vector<1x256xf32>
    %618 = vector.broadcast %214 : f32 to vector<1x256xf32>
    %619 = arith.mulf %618, %617 : vector<1x256xf32>
    %620 = vector.extract_strided_slice %616 {offsets = [1, 0], sizes = [1, 256], strides = [1, 1]} : vector<2x256xf32> to vector<1x256xf32>
    %621 = vector.broadcast %263 : f32 to vector<1x256xf32>
    %622 = arith.mulf %621, %620 : vector<1x256xf32>
    %623 = arith.addf %619, %622 : vector<1x256xf32>
    %cst_106 = arith.constant 0.000000e+00 : f32
    %624 = vector.broadcast %cst_106 : f32 to vector<1x256xf32>
    %625 = arith.select %165, %623, %624 : vector<1x256xi1>, vector<1x256xf32>
    %626 = arith.addf %615, %625 : vector<1x256xf32>
    %c242_i32 = arith.constant 242 : i32
    %627 = tpu.dynamic_rotate %307 by %c242_i32 dim 1 : vector<2x256xf32>, i32 -> vector<2x256xf32>
    %628 = vector.extract_strided_slice %627 {offsets = [0, 0], sizes = [1, 256], strides = [1, 1]} : vector<2x256xf32> to vector<1x256xf32>
    %629 = vector.broadcast %215 : f32 to vector<1x256xf32>
    %630 = arith.mulf %629, %628 : vector<1x256xf32>
    %631 = vector.extract_strided_slice %627 {offsets = [1, 0], sizes = [1, 256], strides = [1, 1]} : vector<2x256xf32> to vector<1x256xf32>
    %632 = vector.broadcast %264 : f32 to vector<1x256xf32>
    %633 = arith.mulf %632, %631 : vector<1x256xf32>
    %634 = arith.addf %630, %633 : vector<1x256xf32>
    %cst_107 = arith.constant 0.000000e+00 : f32
    %635 = vector.broadcast %cst_107 : f32 to vector<1x256xf32>
    %636 = arith.select %166, %634, %635 : vector<1x256xi1>, vector<1x256xf32>
    %637 = arith.addf %626, %636 : vector<1x256xf32>
    %c241_i32 = arith.constant 241 : i32
    %638 = tpu.dynamic_rotate %307 by %c241_i32 dim 1 : vector<2x256xf32>, i32 -> vector<2x256xf32>
    %639 = vector.extract_strided_slice %638 {offsets = [0, 0], sizes = [1, 256], strides = [1, 1]} : vector<2x256xf32> to vector<1x256xf32>
    %640 = vector.broadcast %216 : f32 to vector<1x256xf32>
    %641 = arith.mulf %640, %639 : vector<1x256xf32>
    %642 = vector.extract_strided_slice %638 {offsets = [1, 0], sizes = [1, 256], strides = [1, 1]} : vector<2x256xf32> to vector<1x256xf32>
    %643 = vector.broadcast %265 : f32 to vector<1x256xf32>
    %644 = arith.mulf %643, %642 : vector<1x256xf32>
    %645 = arith.addf %641, %644 : vector<1x256xf32>
    %cst_108 = arith.constant 0.000000e+00 : f32
    %646 = vector.broadcast %cst_108 : f32 to vector<1x256xf32>
    %647 = arith.select %167, %645, %646 : vector<1x256xi1>, vector<1x256xf32>
    %648 = arith.addf %637, %647 : vector<1x256xf32>
    %c240_i32 = arith.constant 240 : i32
    %649 = tpu.dynamic_rotate %307 by %c240_i32 dim 1 : vector<2x256xf32>, i32 -> vector<2x256xf32>
    %650 = vector.extract_strided_slice %649 {offsets = [0, 0], sizes = [1, 256], strides = [1, 1]} : vector<2x256xf32> to vector<1x256xf32>
    %651 = vector.broadcast %217 : f32 to vector<1x256xf32>
    %652 = arith.mulf %651, %650 : vector<1x256xf32>
    %653 = vector.extract_strided_slice %649 {offsets = [1, 0], sizes = [1, 256], strides = [1, 1]} : vector<2x256xf32> to vector<1x256xf32>
    %654 = vector.broadcast %266 : f32 to vector<1x256xf32>
    %655 = arith.mulf %654, %653 : vector<1x256xf32>
    %656 = arith.addf %652, %655 : vector<1x256xf32>
    %cst_109 = arith.constant 0.000000e+00 : f32
    %657 = vector.broadcast %cst_109 : f32 to vector<1x256xf32>
    %658 = arith.select %168, %656, %657 : vector<1x256xi1>, vector<1x256xf32>
    %659 = arith.addf %648, %658 : vector<1x256xf32>
    %c239_i32 = arith.constant 239 : i32
    %660 = tpu.dynamic_rotate %307 by %c239_i32 dim 1 : vector<2x256xf32>, i32 -> vector<2x256xf32>
    %661 = vector.extract_strided_slice %660 {offsets = [0, 0], sizes = [1, 256], strides = [1, 1]} : vector<2x256xf32> to vector<1x256xf32>
    %662 = vector.broadcast %218 : f32 to vector<1x256xf32>
    %663 = arith.mulf %662, %661 : vector<1x256xf32>
    %664 = vector.extract_strided_slice %660 {offsets = [1, 0], sizes = [1, 256], strides = [1, 1]} : vector<2x256xf32> to vector<1x256xf32>
    %665 = vector.broadcast %267 : f32 to vector<1x256xf32>
    %666 = arith.mulf %665, %664 : vector<1x256xf32>
    %667 = arith.addf %663, %666 : vector<1x256xf32>
    %cst_110 = arith.constant 0.000000e+00 : f32
    %668 = vector.broadcast %cst_110 : f32 to vector<1x256xf32>
    %669 = arith.select %169, %667, %668 : vector<1x256xi1>, vector<1x256xf32>
    %670 = arith.addf %659, %669 : vector<1x256xf32>
    %c238_i32 = arith.constant 238 : i32
    %671 = tpu.dynamic_rotate %307 by %c238_i32 dim 1 : vector<2x256xf32>, i32 -> vector<2x256xf32>
    %672 = vector.extract_strided_slice %671 {offsets = [0, 0], sizes = [1, 256], strides = [1, 1]} : vector<2x256xf32> to vector<1x256xf32>
    %673 = vector.broadcast %219 : f32 to vector<1x256xf32>
    %674 = arith.mulf %673, %672 : vector<1x256xf32>
    %675 = vector.extract_strided_slice %671 {offsets = [1, 0], sizes = [1, 256], strides = [1, 1]} : vector<2x256xf32> to vector<1x256xf32>
    %676 = vector.broadcast %268 : f32 to vector<1x256xf32>
    %677 = arith.mulf %676, %675 : vector<1x256xf32>
    %678 = arith.addf %674, %677 : vector<1x256xf32>
    %cst_111 = arith.constant 0.000000e+00 : f32
    %679 = vector.broadcast %cst_111 : f32 to vector<1x256xf32>
    %680 = arith.select %170, %678, %679 : vector<1x256xi1>, vector<1x256xf32>
    %681 = arith.addf %670, %680 : vector<1x256xf32>
    %c237_i32 = arith.constant 237 : i32
    %682 = tpu.dynamic_rotate %307 by %c237_i32 dim 1 : vector<2x256xf32>, i32 -> vector<2x256xf32>
    %683 = vector.extract_strided_slice %682 {offsets = [0, 0], sizes = [1, 256], strides = [1, 1]} : vector<2x256xf32> to vector<1x256xf32>
    %684 = vector.broadcast %220 : f32 to vector<1x256xf32>
    %685 = arith.mulf %684, %683 : vector<1x256xf32>
    %686 = vector.extract_strided_slice %682 {offsets = [1, 0], sizes = [1, 256], strides = [1, 1]} : vector<2x256xf32> to vector<1x256xf32>
    %687 = vector.broadcast %269 : f32 to vector<1x256xf32>
    %688 = arith.mulf %687, %686 : vector<1x256xf32>
    %689 = arith.addf %685, %688 : vector<1x256xf32>
    %cst_112 = arith.constant 0.000000e+00 : f32
    %690 = vector.broadcast %cst_112 : f32 to vector<1x256xf32>
    %691 = arith.select %171, %689, %690 : vector<1x256xi1>, vector<1x256xf32>
    %692 = arith.addf %681, %691 : vector<1x256xf32>
    %c227_i32 = arith.constant 227 : i32
    %693 = tpu.dynamic_rotate %307 by %c227_i32 dim 1 : vector<2x256xf32>, i32 -> vector<2x256xf32>
    %694 = vector.extract_strided_slice %693 {offsets = [0, 0], sizes = [1, 256], strides = [1, 1]} : vector<2x256xf32> to vector<1x256xf32>
    %695 = vector.broadcast %221 : f32 to vector<1x256xf32>
    %696 = arith.mulf %695, %694 : vector<1x256xf32>
    %697 = vector.extract_strided_slice %693 {offsets = [1, 0], sizes = [1, 256], strides = [1, 1]} : vector<2x256xf32> to vector<1x256xf32>
    %698 = vector.broadcast %270 : f32 to vector<1x256xf32>
    %699 = arith.mulf %698, %697 : vector<1x256xf32>
    %700 = arith.addf %696, %699 : vector<1x256xf32>
    %cst_113 = arith.constant 0.000000e+00 : f32
    %701 = vector.broadcast %cst_113 : f32 to vector<1x256xf32>
    %702 = arith.select %172, %700, %701 : vector<1x256xi1>, vector<1x256xf32>
    %703 = arith.addf %692, %702 : vector<1x256xf32>
    %c226_i32 = arith.constant 226 : i32
    %704 = tpu.dynamic_rotate %307 by %c226_i32 dim 1 : vector<2x256xf32>, i32 -> vector<2x256xf32>
    %705 = vector.extract_strided_slice %704 {offsets = [0, 0], sizes = [1, 256], strides = [1, 1]} : vector<2x256xf32> to vector<1x256xf32>
    %706 = vector.broadcast %222 : f32 to vector<1x256xf32>
    %707 = arith.mulf %706, %705 : vector<1x256xf32>
    %708 = vector.extract_strided_slice %704 {offsets = [1, 0], sizes = [1, 256], strides = [1, 1]} : vector<2x256xf32> to vector<1x256xf32>
    %709 = vector.broadcast %271 : f32 to vector<1x256xf32>
    %710 = arith.mulf %709, %708 : vector<1x256xf32>
    %711 = arith.addf %707, %710 : vector<1x256xf32>
    %cst_114 = arith.constant 0.000000e+00 : f32
    %712 = vector.broadcast %cst_114 : f32 to vector<1x256xf32>
    %713 = arith.select %173, %711, %712 : vector<1x256xi1>, vector<1x256xf32>
    %714 = arith.addf %703, %713 : vector<1x256xf32>
    %c225_i32 = arith.constant 225 : i32
    %715 = tpu.dynamic_rotate %307 by %c225_i32 dim 1 : vector<2x256xf32>, i32 -> vector<2x256xf32>
    %716 = vector.extract_strided_slice %715 {offsets = [0, 0], sizes = [1, 256], strides = [1, 1]} : vector<2x256xf32> to vector<1x256xf32>
    %717 = vector.broadcast %223 : f32 to vector<1x256xf32>
    %718 = arith.mulf %717, %716 : vector<1x256xf32>
    %719 = vector.extract_strided_slice %715 {offsets = [1, 0], sizes = [1, 256], strides = [1, 1]} : vector<2x256xf32> to vector<1x256xf32>
    %720 = vector.broadcast %272 : f32 to vector<1x256xf32>
    %721 = arith.mulf %720, %719 : vector<1x256xf32>
    %722 = arith.addf %718, %721 : vector<1x256xf32>
    %cst_115 = arith.constant 0.000000e+00 : f32
    %723 = vector.broadcast %cst_115 : f32 to vector<1x256xf32>
    %724 = arith.select %174, %722, %723 : vector<1x256xi1>, vector<1x256xf32>
    %725 = arith.addf %714, %724 : vector<1x256xf32>
    %c224_i32 = arith.constant 224 : i32
    %726 = tpu.dynamic_rotate %307 by %c224_i32 dim 1 : vector<2x256xf32>, i32 -> vector<2x256xf32>
    %727 = vector.extract_strided_slice %726 {offsets = [0, 0], sizes = [1, 256], strides = [1, 1]} : vector<2x256xf32> to vector<1x256xf32>
    %728 = vector.broadcast %224 : f32 to vector<1x256xf32>
    %729 = arith.mulf %728, %727 : vector<1x256xf32>
    %730 = vector.extract_strided_slice %726 {offsets = [1, 0], sizes = [1, 256], strides = [1, 1]} : vector<2x256xf32> to vector<1x256xf32>
    %731 = vector.broadcast %273 : f32 to vector<1x256xf32>
    %732 = arith.mulf %731, %730 : vector<1x256xf32>
    %733 = arith.addf %729, %732 : vector<1x256xf32>
    %cst_116 = arith.constant 0.000000e+00 : f32
    %734 = vector.broadcast %cst_116 : f32 to vector<1x256xf32>
    %735 = arith.select %175, %733, %734 : vector<1x256xi1>, vector<1x256xf32>
    %736 = arith.addf %725, %735 : vector<1x256xf32>
    %c223_i32 = arith.constant 223 : i32
    %737 = tpu.dynamic_rotate %307 by %c223_i32 dim 1 : vector<2x256xf32>, i32 -> vector<2x256xf32>
    %738 = vector.extract_strided_slice %737 {offsets = [0, 0], sizes = [1, 256], strides = [1, 1]} : vector<2x256xf32> to vector<1x256xf32>
    %739 = vector.broadcast %225 : f32 to vector<1x256xf32>
    %740 = arith.mulf %739, %738 : vector<1x256xf32>
    %741 = vector.extract_strided_slice %737 {offsets = [1, 0], sizes = [1, 256], strides = [1, 1]} : vector<2x256xf32> to vector<1x256xf32>
    %742 = vector.broadcast %274 : f32 to vector<1x256xf32>
    %743 = arith.mulf %742, %741 : vector<1x256xf32>
    %744 = arith.addf %740, %743 : vector<1x256xf32>
    %cst_117 = arith.constant 0.000000e+00 : f32
    %745 = vector.broadcast %cst_117 : f32 to vector<1x256xf32>
    %746 = arith.select %176, %744, %745 : vector<1x256xi1>, vector<1x256xf32>
    %747 = arith.addf %736, %746 : vector<1x256xf32>
    %c222_i32 = arith.constant 222 : i32
    %748 = tpu.dynamic_rotate %307 by %c222_i32 dim 1 : vector<2x256xf32>, i32 -> vector<2x256xf32>
    %749 = vector.extract_strided_slice %748 {offsets = [0, 0], sizes = [1, 256], strides = [1, 1]} : vector<2x256xf32> to vector<1x256xf32>
    %750 = vector.broadcast %226 : f32 to vector<1x256xf32>
    %751 = arith.mulf %750, %749 : vector<1x256xf32>
    %752 = vector.extract_strided_slice %748 {offsets = [1, 0], sizes = [1, 256], strides = [1, 1]} : vector<2x256xf32> to vector<1x256xf32>
    %753 = vector.broadcast %275 : f32 to vector<1x256xf32>
    %754 = arith.mulf %753, %752 : vector<1x256xf32>
    %755 = arith.addf %751, %754 : vector<1x256xf32>
    %cst_118 = arith.constant 0.000000e+00 : f32
    %756 = vector.broadcast %cst_118 : f32 to vector<1x256xf32>
    %757 = arith.select %177, %755, %756 : vector<1x256xi1>, vector<1x256xf32>
    %758 = arith.addf %747, %757 : vector<1x256xf32>
    %c221_i32 = arith.constant 221 : i32
    %759 = tpu.dynamic_rotate %307 by %c221_i32 dim 1 : vector<2x256xf32>, i32 -> vector<2x256xf32>
    %760 = vector.extract_strided_slice %759 {offsets = [0, 0], sizes = [1, 256], strides = [1, 1]} : vector<2x256xf32> to vector<1x256xf32>
    %761 = vector.broadcast %227 : f32 to vector<1x256xf32>
    %762 = arith.mulf %761, %760 : vector<1x256xf32>
    %763 = vector.extract_strided_slice %759 {offsets = [1, 0], sizes = [1, 256], strides = [1, 1]} : vector<2x256xf32> to vector<1x256xf32>
    %764 = vector.broadcast %276 : f32 to vector<1x256xf32>
    %765 = arith.mulf %764, %763 : vector<1x256xf32>
    %766 = arith.addf %762, %765 : vector<1x256xf32>
    %cst_119 = arith.constant 0.000000e+00 : f32
    %767 = vector.broadcast %cst_119 : f32 to vector<1x256xf32>
    %768 = arith.select %178, %766, %767 : vector<1x256xi1>, vector<1x256xf32>
    %769 = arith.addf %758, %768 : vector<1x256xf32>
    %c211_i32 = arith.constant 211 : i32
    %770 = tpu.dynamic_rotate %307 by %c211_i32 dim 1 : vector<2x256xf32>, i32 -> vector<2x256xf32>
    %771 = vector.extract_strided_slice %770 {offsets = [0, 0], sizes = [1, 256], strides = [1, 1]} : vector<2x256xf32> to vector<1x256xf32>
    %772 = vector.broadcast %228 : f32 to vector<1x256xf32>
    %773 = arith.mulf %772, %771 : vector<1x256xf32>
    %774 = vector.extract_strided_slice %770 {offsets = [1, 0], sizes = [1, 256], strides = [1, 1]} : vector<2x256xf32> to vector<1x256xf32>
    %775 = vector.broadcast %277 : f32 to vector<1x256xf32>
    %776 = arith.mulf %775, %774 : vector<1x256xf32>
    %777 = arith.addf %773, %776 : vector<1x256xf32>
    %cst_120 = arith.constant 0.000000e+00 : f32
    %778 = vector.broadcast %cst_120 : f32 to vector<1x256xf32>
    %779 = arith.select %179, %777, %778 : vector<1x256xi1>, vector<1x256xf32>
    %780 = arith.addf %769, %779 : vector<1x256xf32>
    %c210_i32 = arith.constant 210 : i32
    %781 = tpu.dynamic_rotate %307 by %c210_i32 dim 1 : vector<2x256xf32>, i32 -> vector<2x256xf32>
    %782 = vector.extract_strided_slice %781 {offsets = [0, 0], sizes = [1, 256], strides = [1, 1]} : vector<2x256xf32> to vector<1x256xf32>
    %783 = vector.broadcast %229 : f32 to vector<1x256xf32>
    %784 = arith.mulf %783, %782 : vector<1x256xf32>
    %785 = vector.extract_strided_slice %781 {offsets = [1, 0], sizes = [1, 256], strides = [1, 1]} : vector<2x256xf32> to vector<1x256xf32>
    %786 = vector.broadcast %278 : f32 to vector<1x256xf32>
    %787 = arith.mulf %786, %785 : vector<1x256xf32>
    %788 = arith.addf %784, %787 : vector<1x256xf32>
    %cst_121 = arith.constant 0.000000e+00 : f32
    %789 = vector.broadcast %cst_121 : f32 to vector<1x256xf32>
    %790 = arith.select %180, %788, %789 : vector<1x256xi1>, vector<1x256xf32>
    %791 = arith.addf %780, %790 : vector<1x256xf32>
    %c209_i32 = arith.constant 209 : i32
    %792 = tpu.dynamic_rotate %307 by %c209_i32 dim 1 : vector<2x256xf32>, i32 -> vector<2x256xf32>
    %793 = vector.extract_strided_slice %792 {offsets = [0, 0], sizes = [1, 256], strides = [1, 1]} : vector<2x256xf32> to vector<1x256xf32>
    %794 = vector.broadcast %230 : f32 to vector<1x256xf32>
    %795 = arith.mulf %794, %793 : vector<1x256xf32>
    %796 = vector.extract_strided_slice %792 {offsets = [1, 0], sizes = [1, 256], strides = [1, 1]} : vector<2x256xf32> to vector<1x256xf32>
    %797 = vector.broadcast %279 : f32 to vector<1x256xf32>
    %798 = arith.mulf %797, %796 : vector<1x256xf32>
    %799 = arith.addf %795, %798 : vector<1x256xf32>
    %cst_122 = arith.constant 0.000000e+00 : f32
    %800 = vector.broadcast %cst_122 : f32 to vector<1x256xf32>
    %801 = arith.select %181, %799, %800 : vector<1x256xi1>, vector<1x256xf32>
    %802 = arith.addf %791, %801 : vector<1x256xf32>
    %c208_i32 = arith.constant 208 : i32
    %803 = tpu.dynamic_rotate %307 by %c208_i32 dim 1 : vector<2x256xf32>, i32 -> vector<2x256xf32>
    %804 = vector.extract_strided_slice %803 {offsets = [0, 0], sizes = [1, 256], strides = [1, 1]} : vector<2x256xf32> to vector<1x256xf32>
    %805 = vector.broadcast %231 : f32 to vector<1x256xf32>
    %806 = arith.mulf %805, %804 : vector<1x256xf32>
    %807 = vector.extract_strided_slice %803 {offsets = [1, 0], sizes = [1, 256], strides = [1, 1]} : vector<2x256xf32> to vector<1x256xf32>
    %808 = vector.broadcast %280 : f32 to vector<1x256xf32>
    %809 = arith.mulf %808, %807 : vector<1x256xf32>
    %810 = arith.addf %806, %809 : vector<1x256xf32>
    %cst_123 = arith.constant 0.000000e+00 : f32
    %811 = vector.broadcast %cst_123 : f32 to vector<1x256xf32>
    %812 = arith.select %182, %810, %811 : vector<1x256xi1>, vector<1x256xf32>
    %813 = arith.addf %802, %812 : vector<1x256xf32>
    %c207_i32 = arith.constant 207 : i32
    %814 = tpu.dynamic_rotate %307 by %c207_i32 dim 1 : vector<2x256xf32>, i32 -> vector<2x256xf32>
    %815 = vector.extract_strided_slice %814 {offsets = [0, 0], sizes = [1, 256], strides = [1, 1]} : vector<2x256xf32> to vector<1x256xf32>
    %816 = vector.broadcast %232 : f32 to vector<1x256xf32>
    %817 = arith.mulf %816, %815 : vector<1x256xf32>
    %818 = vector.extract_strided_slice %814 {offsets = [1, 0], sizes = [1, 256], strides = [1, 1]} : vector<2x256xf32> to vector<1x256xf32>
    %819 = vector.broadcast %281 : f32 to vector<1x256xf32>
    %820 = arith.mulf %819, %818 : vector<1x256xf32>
    %821 = arith.addf %817, %820 : vector<1x256xf32>
    %cst_124 = arith.constant 0.000000e+00 : f32
    %822 = vector.broadcast %cst_124 : f32 to vector<1x256xf32>
    %823 = arith.select %183, %821, %822 : vector<1x256xi1>, vector<1x256xf32>
    %824 = arith.addf %813, %823 : vector<1x256xf32>
    %c206_i32 = arith.constant 206 : i32
    %825 = tpu.dynamic_rotate %307 by %c206_i32 dim 1 : vector<2x256xf32>, i32 -> vector<2x256xf32>
    %826 = vector.extract_strided_slice %825 {offsets = [0, 0], sizes = [1, 256], strides = [1, 1]} : vector<2x256xf32> to vector<1x256xf32>
    %827 = vector.broadcast %233 : f32 to vector<1x256xf32>
    %828 = arith.mulf %827, %826 : vector<1x256xf32>
    %829 = vector.extract_strided_slice %825 {offsets = [1, 0], sizes = [1, 256], strides = [1, 1]} : vector<2x256xf32> to vector<1x256xf32>
    %830 = vector.broadcast %282 : f32 to vector<1x256xf32>
    %831 = arith.mulf %830, %829 : vector<1x256xf32>
    %832 = arith.addf %828, %831 : vector<1x256xf32>
    %cst_125 = arith.constant 0.000000e+00 : f32
    %833 = vector.broadcast %cst_125 : f32 to vector<1x256xf32>
    %834 = arith.select %184, %832, %833 : vector<1x256xi1>, vector<1x256xf32>
    %835 = arith.addf %824, %834 : vector<1x256xf32>
    %c205_i32 = arith.constant 205 : i32
    %836 = tpu.dynamic_rotate %307 by %c205_i32 dim 1 : vector<2x256xf32>, i32 -> vector<2x256xf32>
    %837 = vector.extract_strided_slice %836 {offsets = [0, 0], sizes = [1, 256], strides = [1, 1]} : vector<2x256xf32> to vector<1x256xf32>
    %838 = vector.broadcast %234 : f32 to vector<1x256xf32>
    %839 = arith.mulf %838, %837 : vector<1x256xf32>
    %840 = vector.extract_strided_slice %836 {offsets = [1, 0], sizes = [1, 256], strides = [1, 1]} : vector<2x256xf32> to vector<1x256xf32>
    %841 = vector.broadcast %283 : f32 to vector<1x256xf32>
    %842 = arith.mulf %841, %840 : vector<1x256xf32>
    %843 = arith.addf %839, %842 : vector<1x256xf32>
    %cst_126 = arith.constant 0.000000e+00 : f32
    %844 = vector.broadcast %cst_126 : f32 to vector<1x256xf32>
    %845 = arith.select %185, %843, %844 : vector<1x256xi1>, vector<1x256xf32>
    %846 = arith.addf %835, %845 : vector<1x256xf32>
    %847 = vector.shape_cast %846 : vector<1x256xf32> to vector<1x1x256xf32>
    %cst_127 = arith.constant dense<0.000000e+00> : vector<1xf32>
    %848 = vector.multi_reduction <add>, %847, %cst_127 [1, 2] : vector<1x1x256xf32> to vector<1xf32>
    %849 = vector.shape_cast %848 : vector<1xf32> to vector<1x1x1xf32>
    %850 = vector.extract %849[0, 0, 0] : f32 from vector<1x1x1xf32>
    %851 = arith.mulf %846, %846 : vector<1x256xf32>
    %852 = vector.shape_cast %851 : vector<1x256xf32> to vector<1x1x256xf32>
    %cst_128 = arith.constant dense<0.000000e+00> : vector<1xf32>
    %853 = vector.multi_reduction <add>, %852, %cst_128 [1, 2] : vector<1x1x256xf32> to vector<1xf32>
    %854 = vector.shape_cast %853 : vector<1xf32> to vector<1x1x1xf32>
    %855 = vector.extract %854[0, 0, 0] : f32 from vector<1x1x1xf32>
    %cst_129 = arith.constant 3.906250e-03 : f32
    %856 = arith.mulf %850, %cst_129 : f32
    %cst_130 = arith.constant 3.906250e-03 : f32
    %857 = arith.mulf %855, %cst_130 : f32
    %858 = arith.mulf %856, %856 : f32
    %859 = arith.subf %857, %858 : f32
    %cst_131 = arith.constant 0.000000e+00 : f32
    %860 = arith.maximumf %859, %cst_131 : f32
    %861 = vector.broadcast %856 : f32 to vector<1x256xf32>
    %862 = arith.subf %846, %861 : vector<1x256xf32>
    %cst_132 = arith.constant 9.99999974E-6 : f32
    %863 = arith.addf %860, %cst_132 : f32
    %864 = math.rsqrt %863 : f32
    %865 = vector.broadcast %864 : f32 to vector<1x256xf32>
    %866 = arith.mulf %862, %865 : vector<1x256xf32>
    %867 = vector.broadcast %285 : f32 to vector<1x256xf32>
    %868 = arith.mulf %867, %866 : vector<1x256xf32>
    %869 = vector.broadcast %286 : f32 to vector<1x256xf32>
    %870 = arith.addf %868, %869 : vector<1x256xf32>
    %871 = arith.negf %870 : vector<1x256xf32>
    %872 = math.exp %871 : vector<1x256xf32>
    %cst_133 = arith.constant 1.000000e+00 : f32
    %873 = vector.broadcast %cst_133 : f32 to vector<1x256xf32>
    %874 = arith.addf %873, %872 : vector<1x256xf32>
    %875 = arith.divf %873, %874 : vector<1x256xf32>
    %c0_134 = arith.constant 0 : index
    %c0_135 = arith.constant 0 : index
    %c0_136 = arith.constant 0 : index
    %876 = vector.load %arg5[%c0_134, %c0_135, %c0_136] : memref<2x4x256xf32, #tpu.memory_space<vmem>>, vector<1x4x256xf32>
    %877 = vector.shape_cast %876 : vector<1x4x256xf32> to vector<4x256xf32>
    %878 = vector.broadcast %875 : vector<1x256xf32> to vector<4x256xf32>
    %879 = arith.mulf %877, %878 : vector<4x256xf32>
    %c0_137 = arith.constant 0 : index
    %c0_138 = arith.constant 0 : index
    %c0_139 = arith.constant 0 : index
    %880 = vector.load %arg6[%c0_137, %c0_138, %c0_139] : memref<2x4x256xf32, #tpu.memory_space<vmem>>, vector<1x4x256xf32>
    %881 = vector.shape_cast %880 : vector<1x4x256xf32> to vector<4x256xf32>
    %882 = vector.shape_cast %879 : vector<4x256xf32> to vector<1x4x256xf32>
    tpu.vector_store %arg6[%c0_137, %c0_138, %c0_139], %882 {strides = array<i32>} : memref<2x4x256xf32, #tpu.memory_space<vmem>>, vector<1x4x256xf32>,
    %c1_i32_140 = arith.constant 1 : i32
    %c0_i32_141 = arith.constant 0 : i32
    %c0_i32_142 = arith.constant 0 : i32
    %883 = tpu.memref_slice %arg5[%c1_i32_140, %c0_i32_141, %c0_i32_142] : memref<2x4x256xf32, #tpu.memory_space<vmem>> -> memref<1x4x256xf32, #tpu.memory_space<vmem>>
    %884 = tpu.memref_squeeze %883 : memref<1x4x256xf32, #tpu.memory_space<vmem>> -> memref<4x256xf32, #tpu.memory_space<vmem>>
    %c0_143 = arith.constant 0 : index
    %c0_144 = arith.constant 0 : index
    %885 = vector.load %884[%c0_143, %c0_144] : memref<4x256xf32, #tpu.memory_space<vmem>>, vector<1x256xf32>
    %c1_i32_145 = arith.constant 1 : i32
    %c0_i32_146 = arith.constant 0 : i32
    %c0_i32_147 = arith.constant 0 : i32
    %886 = tpu.memref_slice %arg5[%c1_i32_145, %c0_i32_146, %c0_i32_147] : memref<2x4x256xf32, #tpu.memory_space<vmem>> -> memref<1x4x256xf32, #tpu.memory_space<vmem>>
    %887 = tpu.memref_squeeze %886 : memref<1x4x256xf32, #tpu.memory_space<vmem>> -> memref<4x256xf32, #tpu.memory_space<vmem>>
    %c1_148 = arith.constant 1 : index
    %c0_149 = arith.constant 0 : index
    %888 = vector.load %887[%c1_148, %c0_149] : memref<4x256xf32, #tpu.memory_space<vmem>>, vector<1x256xf32>
    %889 = arith.maximumf %885, %888 : vector<1x256xf32>
    %890 = arith.addf %885, %888 : vector<1x256xf32>
    %c1_i32_150 = arith.constant 1 : i32
    %c0_i32_151 = arith.constant 0 : i32
    %c0_i32_152 = arith.constant 0 : i32
    %891 = tpu.memref_slice %arg5[%c1_i32_150, %c0_i32_151, %c0_i32_152] : memref<2x4x256xf32, #tpu.memory_space<vmem>> -> memref<1x4x256xf32, #tpu.memory_space<vmem>>
    %892 = tpu.memref_squeeze %891 : memref<1x4x256xf32, #tpu.memory_space<vmem>> -> memref<4x256xf32, #tpu.memory_space<vmem>>
    %c2_153 = arith.constant 2 : index
    %c0_154 = arith.constant 0 : index
    %893 = vector.load %892[%c2_153, %c0_154] : memref<4x256xf32, #tpu.memory_space<vmem>>, vector<1x256xf32>
    %894 = arith.maximumf %889, %893 : vector<1x256xf32>
    %895 = arith.addf %890, %893 : vector<1x256xf32>
    %c1_i32_155 = arith.constant 1 : i32
    %c0_i32_156 = arith.constant 0 : i32
    %c0_i32_157 = arith.constant 0 : i32
    %896 = tpu.memref_slice %arg5[%c1_i32_155, %c0_i32_156, %c0_i32_157] : memref<2x4x256xf32, #tpu.memory_space<vmem>> -> memref<1x4x256xf32, #tpu.memory_space<vmem>>
    %897 = tpu.memref_squeeze %896 : memref<1x4x256xf32, #tpu.memory_space<vmem>> -> memref<4x256xf32, #tpu.memory_space<vmem>>
    %c3_158 = arith.constant 3 : index
    %c0_159 = arith.constant 0 : index
    %898 = vector.load %897[%c3_158, %c0_159] : memref<4x256xf32, #tpu.memory_space<vmem>>, vector<1x256xf32>
    %899 = arith.maximumf %894, %898 : vector<1x256xf32>
    %900 = arith.addf %895, %898 : vector<1x256xf32>
    %cst_160 = arith.constant 2.500000e-01 : f32
    %901 = vector.broadcast %cst_160 : f32 to vector<1x256xf32>
    %902 = arith.mulf %900, %901 : vector<1x256xf32>
    %903 = tpu.concatenate %899, %902 in 0 : vector<1x256xf32>, vector<1x256xf32> -> vector<2x256xf32>
    %904 = vector.broadcast %284 : f32 to vector<1x256xf32>
    %c51_i32_161 = arith.constant 51 : i32
    %905 = tpu.dynamic_rotate %903 by %c51_i32_161 dim 1 : vector<2x256xf32>, i32 -> vector<2x256xf32>
    %906 = vector.extract_strided_slice %905 {offsets = [0, 0], sizes = [1, 256], strides = [1, 1]} : vector<2x256xf32> to vector<1x256xf32>
    %907 = vector.broadcast %186 : f32 to vector<1x256xf32>
    %908 = arith.mulf %907, %906 : vector<1x256xf32>
    %909 = vector.extract_strided_slice %905 {offsets = [1, 0], sizes = [1, 256], strides = [1, 1]} : vector<2x256xf32> to vector<1x256xf32>
    %910 = vector.broadcast %235 : f32 to vector<1x256xf32>
    %911 = arith.mulf %910, %909 : vector<1x256xf32>
    %912 = arith.addf %908, %911 : vector<1x256xf32>
    %cst_162 = arith.constant 0.000000e+00 : f32
    %913 = vector.broadcast %cst_162 : f32 to vector<1x256xf32>
    %914 = arith.select %137, %912, %913 : vector<1x256xi1>, vector<1x256xf32>
    %915 = arith.addf %904, %914 : vector<1x256xf32>
    %c50_i32_163 = arith.constant 50 : i32
    %916 = tpu.dynamic_rotate %903 by %c50_i32_163 dim 1 : vector<2x256xf32>, i32 -> vector<2x256xf32>
    %917 = vector.extract_strided_slice %916 {offsets = [0, 0], sizes = [1, 256], strides = [1, 1]} : vector<2x256xf32> to vector<1x256xf32>
    %918 = vector.broadcast %187 : f32 to vector<1x256xf32>
    %919 = arith.mulf %918, %917 : vector<1x256xf32>
    %920 = vector.extract_strided_slice %916 {offsets = [1, 0], sizes = [1, 256], strides = [1, 1]} : vector<2x256xf32> to vector<1x256xf32>
    %921 = vector.broadcast %236 : f32 to vector<1x256xf32>
    %922 = arith.mulf %921, %920 : vector<1x256xf32>
    %923 = arith.addf %919, %922 : vector<1x256xf32>
    %cst_164 = arith.constant 0.000000e+00 : f32
    %924 = vector.broadcast %cst_164 : f32 to vector<1x256xf32>
    %925 = arith.select %138, %923, %924 : vector<1x256xi1>, vector<1x256xf32>
    %926 = arith.addf %915, %925 : vector<1x256xf32>
    %c49_i32_165 = arith.constant 49 : i32
    %927 = tpu.dynamic_rotate %903 by %c49_i32_165 dim 1 : vector<2x256xf32>, i32 -> vector<2x256xf32>
    %928 = vector.extract_strided_slice %927 {offsets = [0, 0], sizes = [1, 256], strides = [1, 1]} : vector<2x256xf32> to vector<1x256xf32>
    %929 = vector.broadcast %188 : f32 to vector<1x256xf32>
    %930 = arith.mulf %929, %928 : vector<1x256xf32>
    %931 = vector.extract_strided_slice %927 {offsets = [1, 0], sizes = [1, 256], strides = [1, 1]} : vector<2x256xf32> to vector<1x256xf32>
    %932 = vector.broadcast %237 : f32 to vector<1x256xf32>
    %933 = arith.mulf %932, %931 : vector<1x256xf32>
    %934 = arith.addf %930, %933 : vector<1x256xf32>
    %cst_166 = arith.constant 0.000000e+00 : f32
    %935 = vector.broadcast %cst_166 : f32 to vector<1x256xf32>
    %936 = arith.select %139, %934, %935 : vector<1x256xi1>, vector<1x256xf32>
    %937 = arith.addf %926, %936 : vector<1x256xf32>
    %c48_i32_167 = arith.constant 48 : i32
    %938 = tpu.dynamic_rotate %903 by %c48_i32_167 dim 1 : vector<2x256xf32>, i32 -> vector<2x256xf32>
    %939 = vector.extract_strided_slice %938 {offsets = [0, 0], sizes = [1, 256], strides = [1, 1]} : vector<2x256xf32> to vector<1x256xf32>
    %940 = vector.broadcast %189 : f32 to vector<1x256xf32>
    %941 = arith.mulf %940, %939 : vector<1x256xf32>
    %942 = vector.extract_strided_slice %938 {offsets = [1, 0], sizes = [1, 256], strides = [1, 1]} : vector<2x256xf32> to vector<1x256xf32>
    %943 = vector.broadcast %238 : f32 to vector<1x256xf32>
    %944 = arith.mulf %943, %942 : vector<1x256xf32>
    %945 = arith.addf %941, %944 : vector<1x256xf32>
    %cst_168 = arith.constant 0.000000e+00 : f32
    %946 = vector.broadcast %cst_168 : f32 to vector<1x256xf32>
    %947 = arith.select %140, %945, %946 : vector<1x256xi1>, vector<1x256xf32>
    %948 = arith.addf %937, %947 : vector<1x256xf32>
    %c47_i32_169 = arith.constant 47 : i32
    %949 = tpu.dynamic_rotate %903 by %c47_i32_169 dim 1 : vector<2x256xf32>, i32 -> vector<2x256xf32>
    %950 = vector.extract_strided_slice %949 {offsets = [0, 0], sizes = [1, 256], strides = [1, 1]} : vector<2x256xf32> to vector<1x256xf32>
    %951 = vector.broadcast %190 : f32 to vector<1x256xf32>
    %952 = arith.mulf %951, %950 : vector<1x256xf32>
    %953 = vector.extract_strided_slice %949 {offsets = [1, 0], sizes = [1, 256], strides = [1, 1]} : vector<2x256xf32> to vector<1x256xf32>
    %954 = vector.broadcast %239 : f32 to vector<1x256xf32>
    %955 = arith.mulf %954, %953 : vector<1x256xf32>
    %956 = arith.addf %952, %955 : vector<1x256xf32>
    %cst_170 = arith.constant 0.000000e+00 : f32
    %957 = vector.broadcast %cst_170 : f32 to vector<1x256xf32>
    %958 = arith.select %141, %956, %957 : vector<1x256xi1>, vector<1x256xf32>
    %959 = arith.addf %948, %958 : vector<1x256xf32>
    %c46_i32_171 = arith.constant 46 : i32
    %960 = tpu.dynamic_rotate %903 by %c46_i32_171 dim 1 : vector<2x256xf32>, i32 -> vector<2x256xf32>
    %961 = vector.extract_strided_slice %960 {offsets = [0, 0], sizes = [1, 256], strides = [1, 1]} : vector<2x256xf32> to vector<1x256xf32>
    %962 = vector.broadcast %191 : f32 to vector<1x256xf32>
    %963 = arith.mulf %962, %961 : vector<1x256xf32>
    %964 = vector.extract_strided_slice %960 {offsets = [1, 0], sizes = [1, 256], strides = [1, 1]} : vector<2x256xf32> to vector<1x256xf32>
    %965 = vector.broadcast %240 : f32 to vector<1x256xf32>
    %966 = arith.mulf %965, %964 : vector<1x256xf32>
    %967 = arith.addf %963, %966 : vector<1x256xf32>
    %cst_172 = arith.constant 0.000000e+00 : f32
    %968 = vector.broadcast %cst_172 : f32 to vector<1x256xf32>
    %969 = arith.select %142, %967, %968 : vector<1x256xi1>, vector<1x256xf32>
    %970 = arith.addf %959, %969 : vector<1x256xf32>
    %c45_i32_173 = arith.constant 45 : i32
    %971 = tpu.dynamic_rotate %903 by %c45_i32_173 dim 1 : vector<2x256xf32>, i32 -> vector<2x256xf32>
    %972 = vector.extract_strided_slice %971 {offsets = [0, 0], sizes = [1, 256], strides = [1, 1]} : vector<2x256xf32> to vector<1x256xf32>
    %973 = vector.broadcast %192 : f32 to vector<1x256xf32>
    %974 = arith.mulf %973, %972 : vector<1x256xf32>
    %975 = vector.extract_strided_slice %971 {offsets = [1, 0], sizes = [1, 256], strides = [1, 1]} : vector<2x256xf32> to vector<1x256xf32>
    %976 = vector.broadcast %241 : f32 to vector<1x256xf32>
    %977 = arith.mulf %976, %975 : vector<1x256xf32>
    %978 = arith.addf %974, %977 : vector<1x256xf32>
    %cst_174 = arith.constant 0.000000e+00 : f32
    %979 = vector.broadcast %cst_174 : f32 to vector<1x256xf32>
    %980 = arith.select %143, %978, %979 : vector<1x256xi1>, vector<1x256xf32>
    %981 = arith.addf %970, %980 : vector<1x256xf32>
    %c35_i32_175 = arith.constant 35 : i32
    %982 = tpu.dynamic_rotate %903 by %c35_i32_175 dim 1 : vector<2x256xf32>, i32 -> vector<2x256xf32>
    %983 = vector.extract_strided_slice %982 {offsets = [0, 0], sizes = [1, 256], strides = [1, 1]} : vector<2x256xf32> to vector<1x256xf32>
    %984 = vector.broadcast %193 : f32 to vector<1x256xf32>
    %985 = arith.mulf %984, %983 : vector<1x256xf32>
    %986 = vector.extract_strided_slice %982 {offsets = [1, 0], sizes = [1, 256], strides = [1, 1]} : vector<2x256xf32> to vector<1x256xf32>
    %987 = vector.broadcast %242 : f32 to vector<1x256xf32>
    %988 = arith.mulf %987, %986 : vector<1x256xf32>
    %989 = arith.addf %985, %988 : vector<1x256xf32>
    %cst_176 = arith.constant 0.000000e+00 : f32
    %990 = vector.broadcast %cst_176 : f32 to vector<1x256xf32>
    %991 = arith.select %144, %989, %990 : vector<1x256xi1>, vector<1x256xf32>
    %992 = arith.addf %981, %991 : vector<1x256xf32>
    %c34_i32_177 = arith.constant 34 : i32
    %993 = tpu.dynamic_rotate %903 by %c34_i32_177 dim 1 : vector<2x256xf32>, i32 -> vector<2x256xf32>
    %994 = vector.extract_strided_slice %993 {offsets = [0, 0], sizes = [1, 256], strides = [1, 1]} : vector<2x256xf32> to vector<1x256xf32>
    %995 = vector.broadcast %194 : f32 to vector<1x256xf32>
    %996 = arith.mulf %995, %994 : vector<1x256xf32>
    %997 = vector.extract_strided_slice %993 {offsets = [1, 0], sizes = [1, 256], strides = [1, 1]} : vector<2x256xf32> to vector<1x256xf32>
    %998 = vector.broadcast %243 : f32 to vector<1x256xf32>
    %999 = arith.mulf %998, %997 : vector<1x256xf32>
    %1000 = arith.addf %996, %999 : vector<1x256xf32>
    %cst_178 = arith.constant 0.000000e+00 : f32
    %1001 = vector.broadcast %cst_178 : f32 to vector<1x256xf32>
    %1002 = arith.select %145, %1000, %1001 : vector<1x256xi1>, vector<1x256xf32>
    %1003 = arith.addf %992, %1002 : vector<1x256xf32>
    %c33_i32_179 = arith.constant 33 : i32
    %1004 = tpu.dynamic_rotate %903 by %c33_i32_179 dim 1 : vector<2x256xf32>, i32 -> vector<2x256xf32>
    %1005 = vector.extract_strided_slice %1004 {offsets = [0, 0], sizes = [1, 256], strides = [1, 1]} : vector<2x256xf32> to vector<1x256xf32>
    %1006 = vector.broadcast %195 : f32 to vector<1x256xf32>
    %1007 = arith.mulf %1006, %1005 : vector<1x256xf32>
    %1008 = vector.extract_strided_slice %1004 {offsets = [1, 0], sizes = [1, 256], strides = [1, 1]} : vector<2x256xf32> to vector<1x256xf32>
    %1009 = vector.broadcast %244 : f32 to vector<1x256xf32>
    %1010 = arith.mulf %1009, %1008 : vector<1x256xf32>
    %1011 = arith.addf %1007, %1010 : vector<1x256xf32>
    %cst_180 = arith.constant 0.000000e+00 : f32
    %1012 = vector.broadcast %cst_180 : f32 to vector<1x256xf32>
    %1013 = arith.select %146, %1011, %1012 : vector<1x256xi1>, vector<1x256xf32>
    %1014 = arith.addf %1003, %1013 : vector<1x256xf32>
    %c32_i32_181 = arith.constant 32 : i32
    %1015 = tpu.dynamic_rotate %903 by %c32_i32_181 dim 1 : vector<2x256xf32>, i32 -> vector<2x256xf32>
    %1016 = vector.extract_strided_slice %1015 {offsets = [0, 0], sizes = [1, 256], strides = [1, 1]} : vector<2x256xf32> to vector<1x256xf32>
    %1017 = vector.broadcast %196 : f32 to vector<1x256xf32>
    %1018 = arith.mulf %1017, %1016 : vector<1x256xf32>
    %1019 = vector.extract_strided_slice %1015 {offsets = [1, 0], sizes = [1, 256], strides = [1, 1]} : vector<2x256xf32> to vector<1x256xf32>
    %1020 = vector.broadcast %245 : f32 to vector<1x256xf32>
    %1021 = arith.mulf %1020, %1019 : vector<1x256xf32>
    %1022 = arith.addf %1018, %1021 : vector<1x256xf32>
    %cst_182 = arith.constant 0.000000e+00 : f32
    %1023 = vector.broadcast %cst_182 : f32 to vector<1x256xf32>
    %1024 = arith.select %147, %1022, %1023 : vector<1x256xi1>, vector<1x256xf32>
    %1025 = arith.addf %1014, %1024 : vector<1x256xf32>
    %c31_i32_183 = arith.constant 31 : i32
    %1026 = tpu.dynamic_rotate %903 by %c31_i32_183 dim 1 : vector<2x256xf32>, i32 -> vector<2x256xf32>
    %1027 = vector.extract_strided_slice %1026 {offsets = [0, 0], sizes = [1, 256], strides = [1, 1]} : vector<2x256xf32> to vector<1x256xf32>
    %1028 = vector.broadcast %197 : f32 to vector<1x256xf32>
    %1029 = arith.mulf %1028, %1027 : vector<1x256xf32>
    %1030 = vector.extract_strided_slice %1026 {offsets = [1, 0], sizes = [1, 256], strides = [1, 1]} : vector<2x256xf32> to vector<1x256xf32>
    %1031 = vector.broadcast %246 : f32 to vector<1x256xf32>
    %1032 = arith.mulf %1031, %1030 : vector<1x256xf32>
    %1033 = arith.addf %1029, %1032 : vector<1x256xf32>
    %cst_184 = arith.constant 0.000000e+00 : f32
    %1034 = vector.broadcast %cst_184 : f32 to vector<1x256xf32>
    %1035 = arith.select %148, %1033, %1034 : vector<1x256xi1>, vector<1x256xf32>
    %1036 = arith.addf %1025, %1035 : vector<1x256xf32>
    %c30_i32_185 = arith.constant 30 : i32
    %1037 = tpu.dynamic_rotate %903 by %c30_i32_185 dim 1 : vector<2x256xf32>, i32 -> vector<2x256xf32>
    %1038 = vector.extract_strided_slice %1037 {offsets = [0, 0], sizes = [1, 256], strides = [1, 1]} : vector<2x256xf32> to vector<1x256xf32>
    %1039 = vector.broadcast %198 : f32 to vector<1x256xf32>
    %1040 = arith.mulf %1039, %1038 : vector<1x256xf32>
    %1041 = vector.extract_strided_slice %1037 {offsets = [1, 0], sizes = [1, 256], strides = [1, 1]} : vector<2x256xf32> to vector<1x256xf32>
    %1042 = vector.broadcast %247 : f32 to vector<1x256xf32>
    %1043 = arith.mulf %1042, %1041 : vector<1x256xf32>
    %1044 = arith.addf %1040, %1043 : vector<1x256xf32>
    %cst_186 = arith.constant 0.000000e+00 : f32
    %1045 = vector.broadcast %cst_186 : f32 to vector<1x256xf32>
    %1046 = arith.select %149, %1044, %1045 : vector<1x256xi1>, vector<1x256xf32>
    %1047 = arith.addf %1036, %1046 : vector<1x256xf32>
    %c29_i32_187 = arith.constant 29 : i32
    %1048 = tpu.dynamic_rotate %903 by %c29_i32_187 dim 1 : vector<2x256xf32>, i32 -> vector<2x256xf32>
    %1049 = vector.extract_strided_slice %1048 {offsets = [0, 0], sizes = [1, 256], strides = [1, 1]} : vector<2x256xf32> to vector<1x256xf32>
    %1050 = vector.broadcast %199 : f32 to vector<1x256xf32>
    %1051 = arith.mulf %1050, %1049 : vector<1x256xf32>
    %1052 = vector.extract_strided_slice %1048 {offsets = [1, 0], sizes = [1, 256], strides = [1, 1]} : vector<2x256xf32> to vector<1x256xf32>
    %1053 = vector.broadcast %248 : f32 to vector<1x256xf32>
    %1054 = arith.mulf %1053, %1052 : vector<1x256xf32>
    %1055 = arith.addf %1051, %1054 : vector<1x256xf32>
    %cst_188 = arith.constant 0.000000e+00 : f32
    %1056 = vector.broadcast %cst_188 : f32 to vector<1x256xf32>
    %1057 = arith.select %150, %1055, %1056 : vector<1x256xi1>, vector<1x256xf32>
    %1058 = arith.addf %1047, %1057 : vector<1x256xf32>
    %c19_i32_189 = arith.constant 19 : i32
    %1059 = tpu.dynamic_rotate %903 by %c19_i32_189 dim 1 : vector<2x256xf32>, i32 -> vector<2x256xf32>
    %1060 = vector.extract_strided_slice %1059 {offsets = [0, 0], sizes = [1, 256], strides = [1, 1]} : vector<2x256xf32> to vector<1x256xf32>
    %1061 = vector.broadcast %200 : f32 to vector<1x256xf32>
    %1062 = arith.mulf %1061, %1060 : vector<1x256xf32>
    %1063 = vector.extract_strided_slice %1059 {offsets = [1, 0], sizes = [1, 256], strides = [1, 1]} : vector<2x256xf32> to vector<1x256xf32>
    %1064 = vector.broadcast %249 : f32 to vector<1x256xf32>
    %1065 = arith.mulf %1064, %1063 : vector<1x256xf32>
    %1066 = arith.addf %1062, %1065 : vector<1x256xf32>
    %cst_190 = arith.constant 0.000000e+00 : f32
    %1067 = vector.broadcast %cst_190 : f32 to vector<1x256xf32>
    %1068 = arith.select %151, %1066, %1067 : vector<1x256xi1>, vector<1x256xf32>
    %1069 = arith.addf %1058, %1068 : vector<1x256xf32>
    %c18_i32_191 = arith.constant 18 : i32
    %1070 = tpu.dynamic_rotate %903 by %c18_i32_191 dim 1 : vector<2x256xf32>, i32 -> vector<2x256xf32>
    %1071 = vector.extract_strided_slice %1070 {offsets = [0, 0], sizes = [1, 256], strides = [1, 1]} : vector<2x256xf32> to vector<1x256xf32>
    %1072 = vector.broadcast %201 : f32 to vector<1x256xf32>
    %1073 = arith.mulf %1072, %1071 : vector<1x256xf32>
    %1074 = vector.extract_strided_slice %1070 {offsets = [1, 0], sizes = [1, 256], strides = [1, 1]} : vector<2x256xf32> to vector<1x256xf32>
    %1075 = vector.broadcast %250 : f32 to vector<1x256xf32>
    %1076 = arith.mulf %1075, %1074 : vector<1x256xf32>
    %1077 = arith.addf %1073, %1076 : vector<1x256xf32>
    %cst_192 = arith.constant 0.000000e+00 : f32
    %1078 = vector.broadcast %cst_192 : f32 to vector<1x256xf32>
    %1079 = arith.select %152, %1077, %1078 : vector<1x256xi1>, vector<1x256xf32>
    %1080 = arith.addf %1069, %1079 : vector<1x256xf32>
    %c17_i32_193 = arith.constant 17 : i32
    %1081 = tpu.dynamic_rotate %903 by %c17_i32_193 dim 1 : vector<2x256xf32>, i32 -> vector<2x256xf32>
    %1082 = vector.extract_strided_slice %1081 {offsets = [0, 0], sizes = [1, 256], strides = [1, 1]} : vector<2x256xf32> to vector<1x256xf32>
    %1083 = vector.broadcast %202 : f32 to vector<1x256xf32>
    %1084 = arith.mulf %1083, %1082 : vector<1x256xf32>
    %1085 = vector.extract_strided_slice %1081 {offsets = [1, 0], sizes = [1, 256], strides = [1, 1]} : vector<2x256xf32> to vector<1x256xf32>
    %1086 = vector.broadcast %251 : f32 to vector<1x256xf32>
    %1087 = arith.mulf %1086, %1085 : vector<1x256xf32>
    %1088 = arith.addf %1084, %1087 : vector<1x256xf32>
    %cst_194 = arith.constant 0.000000e+00 : f32
    %1089 = vector.broadcast %cst_194 : f32 to vector<1x256xf32>
    %1090 = arith.select %153, %1088, %1089 : vector<1x256xi1>, vector<1x256xf32>
    %1091 = arith.addf %1080, %1090 : vector<1x256xf32>
    %c16_i32_195 = arith.constant 16 : i32
    %1092 = tpu.dynamic_rotate %903 by %c16_i32_195 dim 1 : vector<2x256xf32>, i32 -> vector<2x256xf32>
    %1093 = vector.extract_strided_slice %1092 {offsets = [0, 0], sizes = [1, 256], strides = [1, 1]} : vector<2x256xf32> to vector<1x256xf32>
    %1094 = vector.broadcast %203 : f32 to vector<1x256xf32>
    %1095 = arith.mulf %1094, %1093 : vector<1x256xf32>
    %1096 = vector.extract_strided_slice %1092 {offsets = [1, 0], sizes = [1, 256], strides = [1, 1]} : vector<2x256xf32> to vector<1x256xf32>
    %1097 = vector.broadcast %252 : f32 to vector<1x256xf32>
    %1098 = arith.mulf %1097, %1096 : vector<1x256xf32>
    %1099 = arith.addf %1095, %1098 : vector<1x256xf32>
    %cst_196 = arith.constant 0.000000e+00 : f32
    %1100 = vector.broadcast %cst_196 : f32 to vector<1x256xf32>
    %1101 = arith.select %154, %1099, %1100 : vector<1x256xi1>, vector<1x256xf32>
    %1102 = arith.addf %1091, %1101 : vector<1x256xf32>
    %c15_i32_197 = arith.constant 15 : i32
    %1103 = tpu.dynamic_rotate %903 by %c15_i32_197 dim 1 : vector<2x256xf32>, i32 -> vector<2x256xf32>
    %1104 = vector.extract_strided_slice %1103 {offsets = [0, 0], sizes = [1, 256], strides = [1, 1]} : vector<2x256xf32> to vector<1x256xf32>
    %1105 = vector.broadcast %204 : f32 to vector<1x256xf32>
    %1106 = arith.mulf %1105, %1104 : vector<1x256xf32>
    %1107 = vector.extract_strided_slice %1103 {offsets = [1, 0], sizes = [1, 256], strides = [1, 1]} : vector<2x256xf32> to vector<1x256xf32>
    %1108 = vector.broadcast %253 : f32 to vector<1x256xf32>
    %1109 = arith.mulf %1108, %1107 : vector<1x256xf32>
    %1110 = arith.addf %1106, %1109 : vector<1x256xf32>
    %cst_198 = arith.constant 0.000000e+00 : f32
    %1111 = vector.broadcast %cst_198 : f32 to vector<1x256xf32>
    %1112 = arith.select %155, %1110, %1111 : vector<1x256xi1>, vector<1x256xf32>
    %1113 = arith.addf %1102, %1112 : vector<1x256xf32>
    %c14_i32_199 = arith.constant 14 : i32
    %1114 = tpu.dynamic_rotate %903 by %c14_i32_199 dim 1 : vector<2x256xf32>, i32 -> vector<2x256xf32>
    %1115 = vector.extract_strided_slice %1114 {offsets = [0, 0], sizes = [1, 256], strides = [1, 1]} : vector<2x256xf32> to vector<1x256xf32>
    %1116 = vector.broadcast %205 : f32 to vector<1x256xf32>
    %1117 = arith.mulf %1116, %1115 : vector<1x256xf32>
    %1118 = vector.extract_strided_slice %1114 {offsets = [1, 0], sizes = [1, 256], strides = [1, 1]} : vector<2x256xf32> to vector<1x256xf32>
    %1119 = vector.broadcast %254 : f32 to vector<1x256xf32>
    %1120 = arith.mulf %1119, %1118 : vector<1x256xf32>
    %1121 = arith.addf %1117, %1120 : vector<1x256xf32>
    %cst_200 = arith.constant 0.000000e+00 : f32
    %1122 = vector.broadcast %cst_200 : f32 to vector<1x256xf32>
    %1123 = arith.select %156, %1121, %1122 : vector<1x256xi1>, vector<1x256xf32>
    %1124 = arith.addf %1113, %1123 : vector<1x256xf32>
    %c13_i32_201 = arith.constant 13 : i32
    %1125 = tpu.dynamic_rotate %903 by %c13_i32_201 dim 1 : vector<2x256xf32>, i32 -> vector<2x256xf32>
    %1126 = vector.extract_strided_slice %1125 {offsets = [0, 0], sizes = [1, 256], strides = [1, 1]} : vector<2x256xf32> to vector<1x256xf32>
    %1127 = vector.broadcast %206 : f32 to vector<1x256xf32>
    %1128 = arith.mulf %1127, %1126 : vector<1x256xf32>
    %1129 = vector.extract_strided_slice %1125 {offsets = [1, 0], sizes = [1, 256], strides = [1, 1]} : vector<2x256xf32> to vector<1x256xf32>
    %1130 = vector.broadcast %255 : f32 to vector<1x256xf32>
    %1131 = arith.mulf %1130, %1129 : vector<1x256xf32>
    %1132 = arith.addf %1128, %1131 : vector<1x256xf32>
    %cst_202 = arith.constant 0.000000e+00 : f32
    %1133 = vector.broadcast %cst_202 : f32 to vector<1x256xf32>
    %1134 = arith.select %157, %1132, %1133 : vector<1x256xi1>, vector<1x256xf32>
    %1135 = arith.addf %1124, %1134 : vector<1x256xf32>
    %c3_i32_203 = arith.constant 3 : i32
    %1136 = tpu.dynamic_rotate %903 by %c3_i32_203 dim 1 : vector<2x256xf32>, i32 -> vector<2x256xf32>
    %1137 = vector.extract_strided_slice %1136 {offsets = [0, 0], sizes = [1, 256], strides = [1, 1]} : vector<2x256xf32> to vector<1x256xf32>
    %1138 = vector.broadcast %207 : f32 to vector<1x256xf32>
    %1139 = arith.mulf %1138, %1137 : vector<1x256xf32>
    %1140 = vector.extract_strided_slice %1136 {offsets = [1, 0], sizes = [1, 256], strides = [1, 1]} : vector<2x256xf32> to vector<1x256xf32>
    %1141 = vector.broadcast %256 : f32 to vector<1x256xf32>
    %1142 = arith.mulf %1141, %1140 : vector<1x256xf32>
    %1143 = arith.addf %1139, %1142 : vector<1x256xf32>
    %cst_204 = arith.constant 0.000000e+00 : f32
    %1144 = vector.broadcast %cst_204 : f32 to vector<1x256xf32>
    %1145 = arith.select %158, %1143, %1144 : vector<1x256xi1>, vector<1x256xf32>
    %1146 = arith.addf %1135, %1145 : vector<1x256xf32>
    %c2_i32_205 = arith.constant 2 : i32
    %1147 = tpu.dynamic_rotate %903 by %c2_i32_205 dim 1 : vector<2x256xf32>, i32 -> vector<2x256xf32>
    %1148 = vector.extract_strided_slice %1147 {offsets = [0, 0], sizes = [1, 256], strides = [1, 1]} : vector<2x256xf32> to vector<1x256xf32>
    %1149 = vector.broadcast %208 : f32 to vector<1x256xf32>
    %1150 = arith.mulf %1149, %1148 : vector<1x256xf32>
    %1151 = vector.extract_strided_slice %1147 {offsets = [1, 0], sizes = [1, 256], strides = [1, 1]} : vector<2x256xf32> to vector<1x256xf32>
    %1152 = vector.broadcast %257 : f32 to vector<1x256xf32>
    %1153 = arith.mulf %1152, %1151 : vector<1x256xf32>
    %1154 = arith.addf %1150, %1153 : vector<1x256xf32>
    %cst_206 = arith.constant 0.000000e+00 : f32
    %1155 = vector.broadcast %cst_206 : f32 to vector<1x256xf32>
    %1156 = arith.select %159, %1154, %1155 : vector<1x256xi1>, vector<1x256xf32>
    %1157 = arith.addf %1146, %1156 : vector<1x256xf32>
    %c1_i32_207 = arith.constant 1 : i32
    %1158 = tpu.dynamic_rotate %903 by %c1_i32_207 dim 1 : vector<2x256xf32>, i32 -> vector<2x256xf32>
    %1159 = vector.extract_strided_slice %1158 {offsets = [0, 0], sizes = [1, 256], strides = [1, 1]} : vector<2x256xf32> to vector<1x256xf32>
    %1160 = vector.broadcast %209 : f32 to vector<1x256xf32>
    %1161 = arith.mulf %1160, %1159 : vector<1x256xf32>
    %1162 = vector.extract_strided_slice %1158 {offsets = [1, 0], sizes = [1, 256], strides = [1, 1]} : vector<2x256xf32> to vector<1x256xf32>
    %1163 = vector.broadcast %258 : f32 to vector<1x256xf32>
    %1164 = arith.mulf %1163, %1162 : vector<1x256xf32>
    %1165 = arith.addf %1161, %1164 : vector<1x256xf32>
    %cst_208 = arith.constant 0.000000e+00 : f32
    %1166 = vector.broadcast %cst_208 : f32 to vector<1x256xf32>
    %1167 = arith.select %160, %1165, %1166 : vector<1x256xi1>, vector<1x256xf32>
    %1168 = arith.addf %1157, %1167 : vector<1x256xf32>
    %1169 = vector.extract_strided_slice %903 {offsets = [0, 0], sizes = [1, 256], strides = [1, 1]} : vector<2x256xf32> to vector<1x256xf32>
    %1170 = vector.broadcast %210 : f32 to vector<1x256xf32>
    %1171 = arith.mulf %1170, %1169 : vector<1x256xf32>
    %1172 = vector.extract_strided_slice %903 {offsets = [1, 0], sizes = [1, 256], strides = [1, 1]} : vector<2x256xf32> to vector<1x256xf32>
    %1173 = vector.broadcast %259 : f32 to vector<1x256xf32>
    %1174 = arith.mulf %1173, %1172 : vector<1x256xf32>
    %1175 = arith.addf %1171, %1174 : vector<1x256xf32>
    %cst_209 = arith.constant 0.000000e+00 : f32
    %1176 = vector.broadcast %cst_209 : f32 to vector<1x256xf32>
    %1177 = arith.select %161, %1175, %1176 : vector<1x256xi1>, vector<1x256xf32>
    %1178 = arith.addf %1168, %1177 : vector<1x256xf32>
    %c255_i32_210 = arith.constant 255 : i32
    %1179 = tpu.dynamic_rotate %903 by %c255_i32_210 dim 1 : vector<2x256xf32>, i32 -> vector<2x256xf32>
    %1180 = vector.extract_strided_slice %1179 {offsets = [0, 0], sizes = [1, 256], strides = [1, 1]} : vector<2x256xf32> to vector<1x256xf32>
    %1181 = vector.broadcast %211 : f32 to vector<1x256xf32>
    %1182 = arith.mulf %1181, %1180 : vector<1x256xf32>
    %1183 = vector.extract_strided_slice %1179 {offsets = [1, 0], sizes = [1, 256], strides = [1, 1]} : vector<2x256xf32> to vector<1x256xf32>
    %1184 = vector.broadcast %260 : f32 to vector<1x256xf32>
    %1185 = arith.mulf %1184, %1183 : vector<1x256xf32>
    %1186 = arith.addf %1182, %1185 : vector<1x256xf32>
    %cst_211 = arith.constant 0.000000e+00 : f32
    %1187 = vector.broadcast %cst_211 : f32 to vector<1x256xf32>
    %1188 = arith.select %162, %1186, %1187 : vector<1x256xi1>, vector<1x256xf32>
    %1189 = arith.addf %1178, %1188 : vector<1x256xf32>
    %c254_i32_212 = arith.constant 254 : i32
    %1190 = tpu.dynamic_rotate %903 by %c254_i32_212 dim 1 : vector<2x256xf32>, i32 -> vector<2x256xf32>
    %1191 = vector.extract_strided_slice %1190 {offsets = [0, 0], sizes = [1, 256], strides = [1, 1]} : vector<2x256xf32> to vector<1x256xf32>
    %1192 = vector.broadcast %212 : f32 to vector<1x256xf32>
    %1193 = arith.mulf %1192, %1191 : vector<1x256xf32>
    %1194 = vector.extract_strided_slice %1190 {offsets = [1, 0], sizes = [1, 256], strides = [1, 1]} : vector<2x256xf32> to vector<1x256xf32>
    %1195 = vector.broadcast %261 : f32 to vector<1x256xf32>
    %1196 = arith.mulf %1195, %1194 : vector<1x256xf32>
    %1197 = arith.addf %1193, %1196 : vector<1x256xf32>
    %cst_213 = arith.constant 0.000000e+00 : f32
    %1198 = vector.broadcast %cst_213 : f32 to vector<1x256xf32>
    %1199 = arith.select %163, %1197, %1198 : vector<1x256xi1>, vector<1x256xf32>
    %1200 = arith.addf %1189, %1199 : vector<1x256xf32>
    %c253_i32_214 = arith.constant 253 : i32
    %1201 = tpu.dynamic_rotate %903 by %c253_i32_214 dim 1 : vector<2x256xf32>, i32 -> vector<2x256xf32>
    %1202 = vector.extract_strided_slice %1201 {offsets = [0, 0], sizes = [1, 256], strides = [1, 1]} : vector<2x256xf32> to vector<1x256xf32>
    %1203 = vector.broadcast %213 : f32 to vector<1x256xf32>
    %1204 = arith.mulf %1203, %1202 : vector<1x256xf32>
    %1205 = vector.extract_strided_slice %1201 {offsets = [1, 0], sizes = [1, 256], strides = [1, 1]} : vector<2x256xf32> to vector<1x256xf32>
    %1206 = vector.broadcast %262 : f32 to vector<1x256xf32>
    %1207 = arith.mulf %1206, %1205 : vector<1x256xf32>
    %1208 = arith.addf %1204, %1207 : vector<1x256xf32>
    %cst_215 = arith.constant 0.000000e+00 : f32
    %1209 = vector.broadcast %cst_215 : f32 to vector<1x256xf32>
    %1210 = arith.select %164, %1208, %1209 : vector<1x256xi1>, vector<1x256xf32>
    %1211 = arith.addf %1200, %1210 : vector<1x256xf32>
    %c243_i32_216 = arith.constant 243 : i32
    %1212 = tpu.dynamic_rotate %903 by %c243_i32_216 dim 1 : vector<2x256xf32>, i32 -> vector<2x256xf32>
    %1213 = vector.extract_strided_slice %1212 {offsets = [0, 0], sizes = [1, 256], strides = [1, 1]} : vector<2x256xf32> to vector<1x256xf32>
    %1214 = vector.broadcast %214 : f32 to vector<1x256xf32>
    %1215 = arith.mulf %1214, %1213 : vector<1x256xf32>
    %1216 = vector.extract_strided_slice %1212 {offsets = [1, 0], sizes = [1, 256], strides = [1, 1]} : vector<2x256xf32> to vector<1x256xf32>
    %1217 = vector.broadcast %263 : f32 to vector<1x256xf32>
    %1218 = arith.mulf %1217, %1216 : vector<1x256xf32>
    %1219 = arith.addf %1215, %1218 : vector<1x256xf32>
    %cst_217 = arith.constant 0.000000e+00 : f32
    %1220 = vector.broadcast %cst_217 : f32 to vector<1x256xf32>
    %1221 = arith.select %165, %1219, %1220 : vector<1x256xi1>, vector<1x256xf32>
    %1222 = arith.addf %1211, %1221 : vector<1x256xf32>
    %c242_i32_218 = arith.constant 242 : i32
    %1223 = tpu.dynamic_rotate %903 by %c242_i32_218 dim 1 : vector<2x256xf32>, i32 -> vector<2x256xf32>
    %1224 = vector.extract_strided_slice %1223 {offsets = [0, 0], sizes = [1, 256], strides = [1, 1]} : vector<2x256xf32> to vector<1x256xf32>
    %1225 = vector.broadcast %215 : f32 to vector<1x256xf32>
    %1226 = arith.mulf %1225, %1224 : vector<1x256xf32>
    %1227 = vector.extract_strided_slice %1223 {offsets = [1, 0], sizes = [1, 256], strides = [1, 1]} : vector<2x256xf32> to vector<1x256xf32>
    %1228 = vector.broadcast %264 : f32 to vector<1x256xf32>
    %1229 = arith.mulf %1228, %1227 : vector<1x256xf32>
    %1230 = arith.addf %1226, %1229 : vector<1x256xf32>
    %cst_219 = arith.constant 0.000000e+00 : f32
    %1231 = vector.broadcast %cst_219 : f32 to vector<1x256xf32>
    %1232 = arith.select %166, %1230, %1231 : vector<1x256xi1>, vector<1x256xf32>
    %1233 = arith.addf %1222, %1232 : vector<1x256xf32>
    %c241_i32_220 = arith.constant 241 : i32
    %1234 = tpu.dynamic_rotate %903 by %c241_i32_220 dim 1 : vector<2x256xf32>, i32 -> vector<2x256xf32>
    %1235 = vector.extract_strided_slice %1234 {offsets = [0, 0], sizes = [1, 256], strides = [1, 1]} : vector<2x256xf32> to vector<1x256xf32>
    %1236 = vector.broadcast %216 : f32 to vector<1x256xf32>
    %1237 = arith.mulf %1236, %1235 : vector<1x256xf32>
    %1238 = vector.extract_strided_slice %1234 {offsets = [1, 0], sizes = [1, 256], strides = [1, 1]} : vector<2x256xf32> to vector<1x256xf32>
    %1239 = vector.broadcast %265 : f32 to vector<1x256xf32>
    %1240 = arith.mulf %1239, %1238 : vector<1x256xf32>
    %1241 = arith.addf %1237, %1240 : vector<1x256xf32>
    %cst_221 = arith.constant 0.000000e+00 : f32
    %1242 = vector.broadcast %cst_221 : f32 to vector<1x256xf32>
    %1243 = arith.select %167, %1241, %1242 : vector<1x256xi1>, vector<1x256xf32>
    %1244 = arith.addf %1233, %1243 : vector<1x256xf32>
    %c240_i32_222 = arith.constant 240 : i32
    %1245 = tpu.dynamic_rotate %903 by %c240_i32_222 dim 1 : vector<2x256xf32>, i32 -> vector<2x256xf32>
    %1246 = vector.extract_strided_slice %1245 {offsets = [0, 0], sizes = [1, 256], strides = [1, 1]} : vector<2x256xf32> to vector<1x256xf32>
    %1247 = vector.broadcast %217 : f32 to vector<1x256xf32>
    %1248 = arith.mulf %1247, %1246 : vector<1x256xf32>
    %1249 = vector.extract_strided_slice %1245 {offsets = [1, 0], sizes = [1, 256], strides = [1, 1]} : vector<2x256xf32> to vector<1x256xf32>
    %1250 = vector.broadcast %266 : f32 to vector<1x256xf32>
    %1251 = arith.mulf %1250, %1249 : vector<1x256xf32>
    %1252 = arith.addf %1248, %1251 : vector<1x256xf32>
    %cst_223 = arith.constant 0.000000e+00 : f32
    %1253 = vector.broadcast %cst_223 : f32 to vector<1x256xf32>
    %1254 = arith.select %168, %1252, %1253 : vector<1x256xi1>, vector<1x256xf32>
    %1255 = arith.addf %1244, %1254 : vector<1x256xf32>
    %c239_i32_224 = arith.constant 239 : i32
    %1256 = tpu.dynamic_rotate %903 by %c239_i32_224 dim 1 : vector<2x256xf32>, i32 -> vector<2x256xf32>
    %1257 = vector.extract_strided_slice %1256 {offsets = [0, 0], sizes = [1, 256], strides = [1, 1]} : vector<2x256xf32> to vector<1x256xf32>
    %1258 = vector.broadcast %218 : f32 to vector<1x256xf32>
    %1259 = arith.mulf %1258, %1257 : vector<1x256xf32>
    %1260 = vector.extract_strided_slice %1256 {offsets = [1, 0], sizes = [1, 256], strides = [1, 1]} : vector<2x256xf32> to vector<1x256xf32>
    %1261 = vector.broadcast %267 : f32 to vector<1x256xf32>
    %1262 = arith.mulf %1261, %1260 : vector<1x256xf32>
    %1263 = arith.addf %1259, %1262 : vector<1x256xf32>
    %cst_225 = arith.constant 0.000000e+00 : f32
    %1264 = vector.broadcast %cst_225 : f32 to vector<1x256xf32>
    %1265 = arith.select %169, %1263, %1264 : vector<1x256xi1>, vector<1x256xf32>
    %1266 = arith.addf %1255, %1265 : vector<1x256xf32>
    %c238_i32_226 = arith.constant 238 : i32
    %1267 = tpu.dynamic_rotate %903 by %c238_i32_226 dim 1 : vector<2x256xf32>, i32 -> vector<2x256xf32>
    %1268 = vector.extract_strided_slice %1267 {offsets = [0, 0], sizes = [1, 256], strides = [1, 1]} : vector<2x256xf32> to vector<1x256xf32>
    %1269 = vector.broadcast %219 : f32 to vector<1x256xf32>
    %1270 = arith.mulf %1269, %1268 : vector<1x256xf32>
    %1271 = vector.extract_strided_slice %1267 {offsets = [1, 0], sizes = [1, 256], strides = [1, 1]} : vector<2x256xf32> to vector<1x256xf32>
    %1272 = vector.broadcast %268 : f32 to vector<1x256xf32>
    %1273 = arith.mulf %1272, %1271 : vector<1x256xf32>
    %1274 = arith.addf %1270, %1273 : vector<1x256xf32>
    %cst_227 = arith.constant 0.000000e+00 : f32
    %1275 = vector.broadcast %cst_227 : f32 to vector<1x256xf32>
    %1276 = arith.select %170, %1274, %1275 : vector<1x256xi1>, vector<1x256xf32>
    %1277 = arith.addf %1266, %1276 : vector<1x256xf32>
    %c237_i32_228 = arith.constant 237 : i32
    %1278 = tpu.dynamic_rotate %903 by %c237_i32_228 dim 1 : vector<2x256xf32>, i32 -> vector<2x256xf32>
    %1279 = vector.extract_strided_slice %1278 {offsets = [0, 0], sizes = [1, 256], strides = [1, 1]} : vector<2x256xf32> to vector<1x256xf32>
    %1280 = vector.broadcast %220 : f32 to vector<1x256xf32>
    %1281 = arith.mulf %1280, %1279 : vector<1x256xf32>
    %1282 = vector.extract_strided_slice %1278 {offsets = [1, 0], sizes = [1, 256], strides = [1, 1]} : vector<2x256xf32> to vector<1x256xf32>
    %1283 = vector.broadcast %269 : f32 to vector<1x256xf32>
    %1284 = arith.mulf %1283, %1282 : vector<1x256xf32>
    %1285 = arith.addf %1281, %1284 : vector<1x256xf32>
    %cst_229 = arith.constant 0.000000e+00 : f32
    %1286 = vector.broadcast %cst_229 : f32 to vector<1x256xf32>
    %1287 = arith.select %171, %1285, %1286 : vector<1x256xi1>, vector<1x256xf32>
    %1288 = arith.addf %1277, %1287 : vector<1x256xf32>
    %c227_i32_230 = arith.constant 227 : i32
    %1289 = tpu.dynamic_rotate %903 by %c227_i32_230 dim 1 : vector<2x256xf32>, i32 -> vector<2x256xf32>
    %1290 = vector.extract_strided_slice %1289 {offsets = [0, 0], sizes = [1, 256], strides = [1, 1]} : vector<2x256xf32> to vector<1x256xf32>
    %1291 = vector.broadcast %221 : f32 to vector<1x256xf32>
    %1292 = arith.mulf %1291, %1290 : vector<1x256xf32>
    %1293 = vector.extract_strided_slice %1289 {offsets = [1, 0], sizes = [1, 256], strides = [1, 1]} : vector<2x256xf32> to vector<1x256xf32>
    %1294 = vector.broadcast %270 : f32 to vector<1x256xf32>
    %1295 = arith.mulf %1294, %1293 : vector<1x256xf32>
    %1296 = arith.addf %1292, %1295 : vector<1x256xf32>
    %cst_231 = arith.constant 0.000000e+00 : f32
    %1297 = vector.broadcast %cst_231 : f32 to vector<1x256xf32>
    %1298 = arith.select %172, %1296, %1297 : vector<1x256xi1>, vector<1x256xf32>
    %1299 = arith.addf %1288, %1298 : vector<1x256xf32>
    %c226_i32_232 = arith.constant 226 : i32
    %1300 = tpu.dynamic_rotate %903 by %c226_i32_232 dim 1 : vector<2x256xf32>, i32 -> vector<2x256xf32>
    %1301 = vector.extract_strided_slice %1300 {offsets = [0, 0], sizes = [1, 256], strides = [1, 1]} : vector<2x256xf32> to vector<1x256xf32>
    %1302 = vector.broadcast %222 : f32 to vector<1x256xf32>
    %1303 = arith.mulf %1302, %1301 : vector<1x256xf32>
    %1304 = vector.extract_strided_slice %1300 {offsets = [1, 0], sizes = [1, 256], strides = [1, 1]} : vector<2x256xf32> to vector<1x256xf32>
    %1305 = vector.broadcast %271 : f32 to vector<1x256xf32>
    %1306 = arith.mulf %1305, %1304 : vector<1x256xf32>
    %1307 = arith.addf %1303, %1306 : vector<1x256xf32>
    %cst_233 = arith.constant 0.000000e+00 : f32
    %1308 = vector.broadcast %cst_233 : f32 to vector<1x256xf32>
    %1309 = arith.select %173, %1307, %1308 : vector<1x256xi1>, vector<1x256xf32>
    %1310 = arith.addf %1299, %1309 : vector<1x256xf32>
    %c225_i32_234 = arith.constant 225 : i32
    %1311 = tpu.dynamic_rotate %903 by %c225_i32_234 dim 1 : vector<2x256xf32>, i32 -> vector<2x256xf32>
    %1312 = vector.extract_strided_slice %1311 {offsets = [0, 0], sizes = [1, 256], strides = [1, 1]} : vector<2x256xf32> to vector<1x256xf32>
    %1313 = vector.broadcast %223 : f32 to vector<1x256xf32>
    %1314 = arith.mulf %1313, %1312 : vector<1x256xf32>
    %1315 = vector.extract_strided_slice %1311 {offsets = [1, 0], sizes = [1, 256], strides = [1, 1]} : vector<2x256xf32> to vector<1x256xf32>
    %1316 = vector.broadcast %272 : f32 to vector<1x256xf32>
    %1317 = arith.mulf %1316, %1315 : vector<1x256xf32>
    %1318 = arith.addf %1314, %1317 : vector<1x256xf32>
    %cst_235 = arith.constant 0.000000e+00 : f32
    %1319 = vector.broadcast %cst_235 : f32 to vector<1x256xf32>
    %1320 = arith.select %174, %1318, %1319 : vector<1x256xi1>, vector<1x256xf32>
    %1321 = arith.addf %1310, %1320 : vector<1x256xf32>
    %c224_i32_236 = arith.constant 224 : i32
    %1322 = tpu.dynamic_rotate %903 by %c224_i32_236 dim 1 : vector<2x256xf32>, i32 -> vector<2x256xf32>
    %1323 = vector.extract_strided_slice %1322 {offsets = [0, 0], sizes = [1, 256], strides = [1, 1]} : vector<2x256xf32> to vector<1x256xf32>
    %1324 = vector.broadcast %224 : f32 to vector<1x256xf32>
    %1325 = arith.mulf %1324, %1323 : vector<1x256xf32>
    %1326 = vector.extract_strided_slice %1322 {offsets = [1, 0], sizes = [1, 256], strides = [1, 1]} : vector<2x256xf32> to vector<1x256xf32>
    %1327 = vector.broadcast %273 : f32 to vector<1x256xf32>
    %1328 = arith.mulf %1327, %1326 : vector<1x256xf32>
    %1329 = arith.addf %1325, %1328 : vector<1x256xf32>
    %cst_237 = arith.constant 0.000000e+00 : f32
    %1330 = vector.broadcast %cst_237 : f32 to vector<1x256xf32>
    %1331 = arith.select %175, %1329, %1330 : vector<1x256xi1>, vector<1x256xf32>
    %1332 = arith.addf %1321, %1331 : vector<1x256xf32>
    %c223_i32_238 = arith.constant 223 : i32
    %1333 = tpu.dynamic_rotate %903 by %c223_i32_238 dim 1 : vector<2x256xf32>, i32 -> vector<2x256xf32>
    %1334 = vector.extract_strided_slice %1333 {offsets = [0, 0], sizes = [1, 256], strides = [1, 1]} : vector<2x256xf32> to vector<1x256xf32>
    %1335 = vector.broadcast %225 : f32 to vector<1x256xf32>
    %1336 = arith.mulf %1335, %1334 : vector<1x256xf32>
    %1337 = vector.extract_strided_slice %1333 {offsets = [1, 0], sizes = [1, 256], strides = [1, 1]} : vector<2x256xf32> to vector<1x256xf32>
    %1338 = vector.broadcast %274 : f32 to vector<1x256xf32>
    %1339 = arith.mulf %1338, %1337 : vector<1x256xf32>
    %1340 = arith.addf %1336, %1339 : vector<1x256xf32>
    %cst_239 = arith.constant 0.000000e+00 : f32
    %1341 = vector.broadcast %cst_239 : f32 to vector<1x256xf32>
    %1342 = arith.select %176, %1340, %1341 : vector<1x256xi1>, vector<1x256xf32>
    %1343 = arith.addf %1332, %1342 : vector<1x256xf32>
    %c222_i32_240 = arith.constant 222 : i32
    %1344 = tpu.dynamic_rotate %903 by %c222_i32_240 dim 1 : vector<2x256xf32>, i32 -> vector<2x256xf32>
    %1345 = vector.extract_strided_slice %1344 {offsets = [0, 0], sizes = [1, 256], strides = [1, 1]} : vector<2x256xf32> to vector<1x256xf32>
    %1346 = vector.broadcast %226 : f32 to vector<1x256xf32>
    %1347 = arith.mulf %1346, %1345 : vector<1x256xf32>
    %1348 = vector.extract_strided_slice %1344 {offsets = [1, 0], sizes = [1, 256], strides = [1, 1]} : vector<2x256xf32> to vector<1x256xf32>
    %1349 = vector.broadcast %275 : f32 to vector<1x256xf32>
    %1350 = arith.mulf %1349, %1348 : vector<1x256xf32>
    %1351 = arith.addf %1347, %1350 : vector<1x256xf32>
    %cst_241 = arith.constant 0.000000e+00 : f32
    %1352 = vector.broadcast %cst_241 : f32 to vector<1x256xf32>
    %1353 = arith.select %177, %1351, %1352 : vector<1x256xi1>, vector<1x256xf32>
    %1354 = arith.addf %1343, %1353 : vector<1x256xf32>
    %c221_i32_242 = arith.constant 221 : i32
    %1355 = tpu.dynamic_rotate %903 by %c221_i32_242 dim 1 : vector<2x256xf32>, i32 -> vector<2x256xf32>
    %1356 = vector.extract_strided_slice %1355 {offsets = [0, 0], sizes = [1, 256], strides = [1, 1]} : vector<2x256xf32> to vector<1x256xf32>
    %1357 = vector.broadcast %227 : f32 to vector<1x256xf32>
    %1358 = arith.mulf %1357, %1356 : vector<1x256xf32>
    %1359 = vector.extract_strided_slice %1355 {offsets = [1, 0], sizes = [1, 256], strides = [1, 1]} : vector<2x256xf32> to vector<1x256xf32>
    %1360 = vector.broadcast %276 : f32 to vector<1x256xf32>
    %1361 = arith.mulf %1360, %1359 : vector<1x256xf32>
    %1362 = arith.addf %1358, %1361 : vector<1x256xf32>
    %cst_243 = arith.constant 0.000000e+00 : f32
    %1363 = vector.broadcast %cst_243 : f32 to vector<1x256xf32>
    %1364 = arith.select %178, %1362, %1363 : vector<1x256xi1>, vector<1x256xf32>
    %1365 = arith.addf %1354, %1364 : vector<1x256xf32>
    %c211_i32_244 = arith.constant 211 : i32
    %1366 = tpu.dynamic_rotate %903 by %c211_i32_244 dim 1 : vector<2x256xf32>, i32 -> vector<2x256xf32>
    %1367 = vector.extract_strided_slice %1366 {offsets = [0, 0], sizes = [1, 256], strides = [1, 1]} : vector<2x256xf32> to vector<1x256xf32>
    %1368 = vector.broadcast %228 : f32 to vector<1x256xf32>
    %1369 = arith.mulf %1368, %1367 : vector<1x256xf32>
    %1370 = vector.extract_strided_slice %1366 {offsets = [1, 0], sizes = [1, 256], strides = [1, 1]} : vector<2x256xf32> to vector<1x256xf32>
    %1371 = vector.broadcast %277 : f32 to vector<1x256xf32>
    %1372 = arith.mulf %1371, %1370 : vector<1x256xf32>
    %1373 = arith.addf %1369, %1372 : vector<1x256xf32>
    %cst_245 = arith.constant 0.000000e+00 : f32
    %1374 = vector.broadcast %cst_245 : f32 to vector<1x256xf32>
    %1375 = arith.select %179, %1373, %1374 : vector<1x256xi1>, vector<1x256xf32>
    %1376 = arith.addf %1365, %1375 : vector<1x256xf32>
    %c210_i32_246 = arith.constant 210 : i32
    %1377 = tpu.dynamic_rotate %903 by %c210_i32_246 dim 1 : vector<2x256xf32>, i32 -> vector<2x256xf32>
    %1378 = vector.extract_strided_slice %1377 {offsets = [0, 0], sizes = [1, 256], strides = [1, 1]} : vector<2x256xf32> to vector<1x256xf32>
    %1379 = vector.broadcast %229 : f32 to vector<1x256xf32>
    %1380 = arith.mulf %1379, %1378 : vector<1x256xf32>
    %1381 = vector.extract_strided_slice %1377 {offsets = [1, 0], sizes = [1, 256], strides = [1, 1]} : vector<2x256xf32> to vector<1x256xf32>
    %1382 = vector.broadcast %278 : f32 to vector<1x256xf32>
    %1383 = arith.mulf %1382, %1381 : vector<1x256xf32>
    %1384 = arith.addf %1380, %1383 : vector<1x256xf32>
    %cst_247 = arith.constant 0.000000e+00 : f32
    %1385 = vector.broadcast %cst_247 : f32 to vector<1x256xf32>
    %1386 = arith.select %180, %1384, %1385 : vector<1x256xi1>, vector<1x256xf32>
    %1387 = arith.addf %1376, %1386 : vector<1x256xf32>
    %c209_i32_248 = arith.constant 209 : i32
    %1388 = tpu.dynamic_rotate %903 by %c209_i32_248 dim 1 : vector<2x256xf32>, i32 -> vector<2x256xf32>
    %1389 = vector.extract_strided_slice %1388 {offsets = [0, 0], sizes = [1, 256], strides = [1, 1]} : vector<2x256xf32> to vector<1x256xf32>
    %1390 = vector.broadcast %230 : f32 to vector<1x256xf32>
    %1391 = arith.mulf %1390, %1389 : vector<1x256xf32>
    %1392 = vector.extract_strided_slice %1388 {offsets = [1, 0], sizes = [1, 256], strides = [1, 1]} : vector<2x256xf32> to vector<1x256xf32>
    %1393 = vector.broadcast %279 : f32 to vector<1x256xf32>
    %1394 = arith.mulf %1393, %1392 : vector<1x256xf32>
    %1395 = arith.addf %1391, %1394 : vector<1x256xf32>
    %cst_249 = arith.constant 0.000000e+00 : f32
    %1396 = vector.broadcast %cst_249 : f32 to vector<1x256xf32>
    %1397 = arith.select %181, %1395, %1396 : vector<1x256xi1>, vector<1x256xf32>
    %1398 = arith.addf %1387, %1397 : vector<1x256xf32>
    %c208_i32_250 = arith.constant 208 : i32
    %1399 = tpu.dynamic_rotate %903 by %c208_i32_250 dim 1 : vector<2x256xf32>, i32 -> vector<2x256xf32>
    %1400 = vector.extract_strided_slice %1399 {offsets = [0, 0], sizes = [1, 256], strides = [1, 1]} : vector<2x256xf32> to vector<1x256xf32>
    %1401 = vector.broadcast %231 : f32 to vector<1x256xf32>
    %1402 = arith.mulf %1401, %1400 : vector<1x256xf32>
    %1403 = vector.extract_strided_slice %1399 {offsets = [1, 0], sizes = [1, 256], strides = [1, 1]} : vector<2x256xf32> to vector<1x256xf32>
    %1404 = vector.broadcast %280 : f32 to vector<1x256xf32>
    %1405 = arith.mulf %1404, %1403 : vector<1x256xf32>
    %1406 = arith.addf %1402, %1405 : vector<1x256xf32>
    %cst_251 = arith.constant 0.000000e+00 : f32
    %1407 = vector.broadcast %cst_251 : f32 to vector<1x256xf32>
    %1408 = arith.select %182, %1406, %1407 : vector<1x256xi1>, vector<1x256xf32>
    %1409 = arith.addf %1398, %1408 : vector<1x256xf32>
    %c207_i32_252 = arith.constant 207 : i32
    %1410 = tpu.dynamic_rotate %903 by %c207_i32_252 dim 1 : vector<2x256xf32>, i32 -> vector<2x256xf32>
    %1411 = vector.extract_strided_slice %1410 {offsets = [0, 0], sizes = [1, 256], strides = [1, 1]} : vector<2x256xf32> to vector<1x256xf32>
    %1412 = vector.broadcast %232 : f32 to vector<1x256xf32>
    %1413 = arith.mulf %1412, %1411 : vector<1x256xf32>
    %1414 = vector.extract_strided_slice %1410 {offsets = [1, 0], sizes = [1, 256], strides = [1, 1]} : vector<2x256xf32> to vector<1x256xf32>
    %1415 = vector.broadcast %281 : f32 to vector<1x256xf32>
    %1416 = arith.mulf %1415, %1414 : vector<1x256xf32>
    %1417 = arith.addf %1413, %1416 : vector<1x256xf32>
    %cst_253 = arith.constant 0.000000e+00 : f32
    %1418 = vector.broadcast %cst_253 : f32 to vector<1x256xf32>
    %1419 = arith.select %183, %1417, %1418 : vector<1x256xi1>, vector<1x256xf32>
    %1420 = arith.addf %1409, %1419 : vector<1x256xf32>
    %c206_i32_254 = arith.constant 206 : i32
    %1421 = tpu.dynamic_rotate %903 by %c206_i32_254 dim 1 : vector<2x256xf32>, i32 -> vector<2x256xf32>
    %1422 = vector.extract_strided_slice %1421 {offsets = [0, 0], sizes = [1, 256], strides = [1, 1]} : vector<2x256xf32> to vector<1x256xf32>
    %1423 = vector.broadcast %233 : f32 to vector<1x256xf32>
    %1424 = arith.mulf %1423, %1422 : vector<1x256xf32>
    %1425 = vector.extract_strided_slice %1421 {offsets = [1, 0], sizes = [1, 256], strides = [1, 1]} : vector<2x256xf32> to vector<1x256xf32>
    %1426 = vector.broadcast %282 : f32 to vector<1x256xf32>
    %1427 = arith.mulf %1426, %1425 : vector<1x256xf32>
    %1428 = arith.addf %1424, %1427 : vector<1x256xf32>
    %cst_255 = arith.constant 0.000000e+00 : f32
    %1429 = vector.broadcast %cst_255 : f32 to vector<1x256xf32>
    %1430 = arith.select %184, %1428, %1429 : vector<1x256xi1>, vector<1x256xf32>
    %1431 = arith.addf %1420, %1430 : vector<1x256xf32>
    %c205_i32_256 = arith.constant 205 : i32
    %1432 = tpu.dynamic_rotate %903 by %c205_i32_256 dim 1 : vector<2x256xf32>, i32 -> vector<2x256xf32>
    %1433 = vector.extract_strided_slice %1432 {offsets = [0, 0], sizes = [1, 256], strides = [1, 1]} : vector<2x256xf32> to vector<1x256xf32>
    %1434 = vector.broadcast %234 : f32 to vector<1x256xf32>
    %1435 = arith.mulf %1434, %1433 : vector<1x256xf32>
    %1436 = vector.extract_strided_slice %1432 {offsets = [1, 0], sizes = [1, 256], strides = [1, 1]} : vector<2x256xf32> to vector<1x256xf32>
    %1437 = vector.broadcast %283 : f32 to vector<1x256xf32>
    %1438 = arith.mulf %1437, %1436 : vector<1x256xf32>
    %1439 = arith.addf %1435, %1438 : vector<1x256xf32>
    %cst_257 = arith.constant 0.000000e+00 : f32
    %1440 = vector.broadcast %cst_257 : f32 to vector<1x256xf32>
    %1441 = arith.select %185, %1439, %1440 : vector<1x256xi1>, vector<1x256xf32>
    %1442 = arith.addf %1431, %1441 : vector<1x256xf32>
    %1443 = vector.shape_cast %1442 : vector<1x256xf32> to vector<1x1x256xf32>
    %cst_258 = arith.constant dense<0.000000e+00> : vector<1xf32>
    %1444 = vector.multi_reduction <add>, %1443, %cst_258 [1, 2] : vector<1x1x256xf32> to vector<1xf32>
    %1445 = vector.shape_cast %1444 : vector<1xf32> to vector<1x1x1xf32>
    %1446 = vector.extract %1445[0, 0, 0] : f32 from vector<1x1x1xf32>
    %1447 = arith.mulf %1442, %1442 : vector<1x256xf32>
    %1448 = vector.shape_cast %1447 : vector<1x256xf32> to vector<1x1x256xf32>
    %cst_259 = arith.constant dense<0.000000e+00> : vector<1xf32>
    %1449 = vector.multi_reduction <add>, %1448, %cst_259 [1, 2] : vector<1x1x256xf32> to vector<1xf32>
    %1450 = vector.shape_cast %1449 : vector<1xf32> to vector<1x1x1xf32>
    %1451 = vector.extract %1450[0, 0, 0] : f32 from vector<1x1x1xf32>
    %cst_260 = arith.constant 3.906250e-03 : f32
    %1452 = arith.mulf %1446, %cst_260 : f32
    %cst_261 = arith.constant 3.906250e-03 : f32
    %1453 = arith.mulf %1451, %cst_261 : f32
    %1454 = arith.mulf %1452, %1452 : f32
    %1455 = arith.subf %1453, %1454 : f32
    %cst_262 = arith.constant 0.000000e+00 : f32
    %1456 = arith.maximumf %1455, %cst_262 : f32
    %1457 = vector.broadcast %1452 : f32 to vector<1x256xf32>
    %1458 = arith.subf %1442, %1457 : vector<1x256xf32>
    %cst_263 = arith.constant 9.99999974E-6 : f32
    %1459 = arith.addf %1456, %cst_263 : f32
    %1460 = math.rsqrt %1459 : f32
    %1461 = vector.broadcast %1460 : f32 to vector<1x256xf32>
    %1462 = arith.mulf %1458, %1461 : vector<1x256xf32>
    %1463 = vector.broadcast %285 : f32 to vector<1x256xf32>
    %1464 = arith.mulf %1463, %1462 : vector<1x256xf32>
    %1465 = vector.broadcast %286 : f32 to vector<1x256xf32>
    %1466 = arith.addf %1464, %1465 : vector<1x256xf32>
    %1467 = arith.negf %1466 : vector<1x256xf32>
    %1468 = math.exp %1467 : vector<1x256xf32>
    %cst_264 = arith.constant 1.000000e+00 : f32
    %1469 = vector.broadcast %cst_264 : f32 to vector<1x256xf32>
    %1470 = arith.addf %1469, %1468 : vector<1x256xf32>
    %1471 = arith.divf %1469, %1470 : vector<1x256xf32>
    %c1_265 = arith.constant 1 : index
    %c0_266 = arith.constant 0 : index
    %c0_267 = arith.constant 0 : index
    %1472 = vector.load %arg5[%c1_265, %c0_266, %c0_267] : memref<2x4x256xf32, #tpu.memory_space<vmem>>, vector<1x4x256xf32>
    %1473 = vector.shape_cast %1472 : vector<1x4x256xf32> to vector<4x256xf32>
    %1474 = vector.broadcast %1471 : vector<1x256xf32> to vector<4x256xf32>
    %1475 = arith.mulf %1473, %1474 : vector<4x256xf32>
    %c1_268 = arith.constant 1 : index
    %c0_269 = arith.constant 0 : index
    %c0_270 = arith.constant 0 : index
    %1476 = vector.load %arg6[%c1_268, %c0_269, %c0_270] : memref<2x4x256xf32, #tpu.memory_space<vmem>>, vector<1x4x256xf32>
    %1477 = vector.shape_cast %1476 : vector<1x4x256xf32> to vector<4x256xf32>
    %1478 = vector.shape_cast %1475 : vector<4x256xf32> to vector<1x4x256xf32>
    tpu.vector_store %arg6[%c1_268, %c0_269, %c0_270], %1478 {strides = array<i32>} : memref<2x4x256xf32, #tpu.memory_space<vmem>>, vector<1x4x256xf32>,
    return
  }
  func.func @transform_0(%arg0: i32) -> i32 {
    %c0_i32 = arith.constant 0 : i32
    %c0_i32_0 = arith.constant 0 : i32
    return %c0_i32 : i32
  }
  func.func @transform_1(%arg0: i32) -> i32 {
    %c0_i32 = arith.constant 0 : i32
    %c0_i32_0 = arith.constant 0 : i32
    return %c0_i32 : i32
  }
  func.func @transform_2(%arg0: i32) -> i32 {
    %c0_i32 = arith.constant 0 : i32
    %c0_i32_0 = arith.constant 0 : i32
    return %c0_i32 : i32
  }
  func.func @transform_3(%arg0: i32) -> i32 {
    %c0_i32 = arith.constant 0 : i32
    %c0_i32_0 = arith.constant 0 : i32
    return %c0_i32 : i32
  }
  func.func @transform_4(%arg0: i32) -> (i32, i32, i32) {
    %c0_i32 = arith.constant 0 : i32
    %c0_i32_0 = arith.constant 0 : i32
    %c0_i32_1 = arith.constant 0 : i32
    return %arg0, %c0_i32, %c0_i32_0 : i32, i32, i32
  }
  func.func @transform_5(%arg0: i32) -> (i32, i32, i32) {
    %c0_i32 = arith.constant 0 : i32
    %c0_i32_0 = arith.constant 0 : i32
    %c0_i32_1 = arith.constant 0 : i32
    return %arg0, %c0_i32, %c0_i32_0 : i32, i32, i32
  }
}

</mosaic_0001>

<bundles_post_ra>
// kernel: spatial_gate.1
= control target key start
LH: loop header
LB: loop body
LE: loop exit
PB: predicated region body
PF: predicated region fallthrough
CT: control target
= control target key end

     0   :  { %s7416_s0 = inlined_call_operand.vmem [shape: f32[98], index: 0, kind: input, shape index: {}]   ;;  %s7417_s1 = inlined_call_operand.<no memory space> [shape: f32[1], index: 1, kind: input, shape index: {}]   ;;  %s7418_s2 = inlined_call_operand.<no memory space> [shape: f32[1], index: 2, kind: input, shape index: {}]   ;;  %s7419_s3 = inlined_call_operand.<no memory space> [shape: f32[1], index: 3, kind: input, shape index: {}]   ;;  %s7420_s4 = inlined_call_operand.vmem [shape: f32[2,4,256], index: 4, kind: input, shape index: {}]   ;;  %s7421_s5 = inlined_call_operand.vmem [shape: f32[2,4,256], index: 5, kind: output, shape index: {}]  }
   0x1   :  { %7864 = sst [smem:[#allocation125_spill]] %s7418_s2 }
   0x2   :  { %7865 = sst [smem:[#allocation126_spill]] %s7419_s3 }
   0x3   :  { %7866 = sst [smem:[#allocation127_spill]] %s7420_s4 }
   0x4   :  { %7867 = sst [smem:[#allocation128_spill]] %s7421_s5 }
   0x5   :  { %13 = vsyncpa [#allocation6], 0  ;;  %s20_s20 = sshll.u32 %s7416_s0, 4  ;;  %s21_s20 = int_to_ptr.vmem [resolvable:$true] %s20_s20 }
   0x6   :  { %s3080_s21 = scalar_lea.vmem %s21_s20, 16  ;;  %p3085_p1 = scmp.lt.s32.totalorder %s21_s20, %s21_s20 }
   0x7   :  { %p3081_p0 = scmp.ne.s32.totalorder %s21_s20, %s3080_s21  ;;  %p3086_p2 = scmp.lt.s32.totalorder %s3080_s21, %s3080_s21 }
   0x9   :  { %p3087_p3 = por %p3086_p2, %p3085_p1 }
   0xb   :  { %p3088_p4 = pnand %p3087_p3, %p3081_p0 }
   0xd   :  { %3091 = shalt.err (!%p3088_p4)
}
   0xe   :  { %s3094_s22 = smov [#allocation5]  }
   0xf   :  { %23 = dma.vmem_to_smem %s21_s20, 16, %s3094_s22, [#allocation6]  }
  0x10   :  { %3092 = dma.done.wait [#allocation6], 16  }
  0x11   :  { %3093 = vsyncadd [#allocation6], 4294967280 }
  0x12   :  { %35 = sfence }
  0x13   :  { %v36_v0 = vlaneseq  ;;  %v360_v1 = vld [vmem:[%s7420_s4] ss:$4 sm:$0x3]  ;;  %v2981_v2 = vld [vmem:[%s7420_s4 + $0x1] ss:$4 sm:$0x3]  ;;  %v3443_v50 = vstv %s7417_s1 }
  0x14   :  { %v363_v3 = vmax.f32 %v360_v1, %v2981_v2  ;;  %v364_v4 = vadd.f32 %v2981_v2, %v360_v1  ;;  %v2982_v5 = vld [vmem:[%s7420_s4 + $0x2] ss:$4 sm:$0x3]  ;;  %v2983_v6 = vld [vmem:[%s7420_s4 + $0x3] ss:$4 sm:$0x3] }
  0x15   :  { %v376_v7 = vshrl.u32 %v36_v0, 7  ;;  %vm7513_vm0 = vcmask 1040384   ;;  %s7466_s30 = smov 50   ;;  %s7468_s6 = smov 51   ;;  %v3289_v21 = vand.u32 127, %v36_v0  ;;  %7885 = vst [vmem:[#allocation25_spill] sm:$0xff] %v3443_v50 }
  0x16   :  { %v367_v8 = vmax.f32 %v363_v3, %v2982_v5  ;;  %v368_v9 = vadd.f32 %v2982_v5, %v364_v4  ;;  %s7464_s7 = smov 49   ;;  %s7462_s8 = smov 48   ;;  %v2986_v33 = vld [vmem:[%s7420_s4 + $0x8] ss:$4 sm:$0x3] }
  0x17   :  { %v3190_v10 = vsub.s32 0, %v376_v7  ;;  %v3192_v13 = vsub.s32 1, %v376_v7  ;;  %s7458_s9 = smov 47   ;;  %s7456_s10 = smov 46   ;;  %v3304_v22 = vadd.s32 128, %v3289_v21  ;;  %v39_v23 = vcvt.s32.f32 %v3289_v21 }
  0x18   :  { %v371_v11 = vmax.f32 %v367_v8, %v2983_v6  ;;  %v372_v12 = vadd.f32 %v2983_v6, %v368_v9  ;;  %s7454_s11 = smov 45   ;;  %s7452_s12 = smov 35   ;;  %v2987_v34 = vld [vmem:[%s7420_s4 + $0x9] ss:$4 sm:$0x3]  ;;  %vm7528_vm1 = vcmp.lt.s32.totalorder %v3289_v21, 51 }
  0x19   :  { %7868 = vst [vmem:[#allocation8_spill] sm:$0xff] %v3190_v10  ;;  %s7448_s13 = smov 34   ;;  %s7446_s14 = smov 33   ;;  %v40_v24 = vcvt.s32.f32 %v3304_v22  ;;  %v41_v25 = vadd.f32 0.5, %v39_v23  ;;  %v1697_v37 = vadd.f32 %v2987_v34, %v2986_v33  ;;  %v1696_v41 = vmax.f32 %v2986_v33, %v2987_v34 }
  0x1a   :  { %v373_v14 = vmul.f32 0.25, %v372_v12  ;;  %v378_v15 = vrot.slane %v371_v11, %v3190_v10  ;;  %v382_v17 = vrot.slane %v371_v11, %v3192_v13  ;;  %s7444_s15 = smov 32   ;;  %s7442_s16 = smov 31   ;;  %v2988_v38 = vld [vmem:[%s7420_s4 + $0xa] ss:$4 sm:$0x3] }
  0x1b   :  { %s7440_s17 = smov 30   ;;  %s7436_s18 = smov 29   ;;  %v42_v26 = vadd.f32 0.5, %v40_v24  ;;  %v43_v27 = vmul.f32 0.0625, %v41_v25  ;;  %v1701_v42 = vadd.f32 %v2988_v38, %v1697_v37  ;;  %v1700_v48 = vmax.f32 %v1696_v41, %v2988_v38 }
  0x1c   :  { %v389_v16 = vrot.slane %v373_v14, %v3190_v10  ;;  %v393_v18 = vrot.slane %v373_v14, %v3192_v13  ;;  %s7434_s19 = smov 19   ;;  %s7432_s20 = smov 18   ;;  %v2989_v43 = vld [vmem:[%s7420_s4 + $0xb] ss:$4 sm:$0x3]  ;;  %vm7546_vm8 = vcmp.lt.s32.totalorder %v3289_v21, 50 }
  0x1d   :  { %s7428_s21 = smov 17   ;;  %s7426_s22 = smov 16   ;;  %v44_v28 = vmul.f32 0.0625, %v42_v26  ;;  %v45_v29 = vfloor.f32 %v43_v27  ;;  %v1705_v49 = vadd.f32 %v2989_v43, %v1701_v42  ;;  %v3487_v63 = vmax.f32 %v1700_v48, %v2989_v43 }
  0x1e   :  { %v3199_v19 = vsel %vm7513_vm0, %v378_v15, %v389_v16  ;;  %v3206_v20 = vsel %vm7513_vm0, %v382_v17, %v393_v18  ;;  %s7424_s23 = smov 15   ;;  %s7422_s24 = smov 14  }
  0x1f   :  { %425 = vrot.lane.b32.xlu1 %v3199_v19, %s7466_s30  ;;  %400 = vrot.lane.b32.xlu0 %v3199_v19, %s7468_s6  ;;  %s3284_s25 = sld [smem:[#allocation5 + $0x1]]  ;;  %s7430_s27 = smov 13   ;;  %v46_v30 = vfloor.f32 %v44_v28  ;;  %v2994_v31 = vtrunc.f32 %v45_v29  ;;  %v3489_v0 = vmul.f32 0.25, %v1705_v49  ;;  %v1715_v18 = vrot.slane %v3487_v63, %v3192_v13 }
  0x20   :  { %s3286_s0 = sld [smem:[#allocation5 + $0x32]]  ;;  %s7475_s2 = smov 125   ;;  %v1711_v25 = vrot.slane %v3487_v63, %v3190_v10 }
  0x21   :  { %s3291_s26 = sld [smem:[#allocation5]]  ;;  %v2996_v32 = vtrunc.f32 %v46_v30  ;;  %v3384_v35 = vcvt.f32.s32 %v2994_v31 }
  0x22   :  { %s3297_s28 = sld [smem:[#allocation5 + $0x31]] }
  0x23   :  { %427 = vrot.lane.b32.xlu1 %v3206_v20, %s7466_s30  ;;  %402 = vrot.lane.b32.xlu0 %v3206_v20, %s7468_s6  ;;  %s3299_s29 = sld [smem:[#allocation5 + $0x2]]  ;;  %s7473_s30 = smov 126   ;;  %7877 = vst [vmem:[#allocation17_spill] sm:$0xff] %v3384_v35  ;;  %v3388_v36 = vcvt.f32.s32 %v2996_v32  ;;  %v49_v39 = vmul.u32 16, %v3384_v35  ;;  %v3450_v52 = vadd.s32 4294967293, %v3384_v35  ;;  %v3601_v37 = vadd.s32 4294967294, %v3384_v35 }
  0x24   :  { %s3362_s6 = sld [smem:[#allocation5 + $0x3c]]  ;;  %vm77_vm14 = vcmp.ge.s32.totalorder %v3384_v35, 0  ;;  %vm79_vm11 = vcmp.lt.s32.totalorder %v3384_v35, 16 }
  0x25   :  { %s3366_s5 = sld [smem:[#allocation5 + $0x3d]]  ;;  %7879 = vst [vmem:[#allocation19_spill] sm:$0xff] %v3388_v36  ;;  %v50_v40 = vmul.u32 16, %v3388_v36  ;;  %v3425_v46 = vsub.s32 %v3289_v21, %v49_v39  ;;  %v3453_v53 = vadd.s32 4294967293, %v3388_v36  ;;  %v3466_v57 = vstv %s3284_s25 }
  0x26   :  { %s3368_s3 = sld [smem:[#allocation5 + $0xd]]  ;;  %7886 = vst [vmem:[#allocation26_spill] sm:$0xff] %v3466_v57  ;;  %v3480_v61 = vstv %s3286_s0  ;;  %vm55_vm2 = vcmp.ge.s32.totalorder %v3450_v52, 0  ;;  %vm57_vm3 = vcmp.lt.s32.totalorder %v3450_v52, 16  ;;  %v3604_v38 = vadd.s32 4294967294, %v3388_v36 }
  0x27   :  { %452 = vrot.lane.b32.xlu1 %v3206_v20, %s7464_s7  ;;  %450 = vrot.lane.b32.xlu0 %v3199_v19, %s7464_s7  ;;  %s3356_s7 = sld [smem:[#allocation5 + $0xb]]  ;;  %v3430_v47 = vsub.s32 %v3304_v22, %v50_v40  ;;  %v3456_v54 = vadd.s32 4294967294, %v3425_v46  ;;  %v3461_v56 = vadd.s32 4294967293, %v3425_v46  ;;  %v3475_v60 = vadd.s32 4294967295, %v3425_v46  ;;  %7887 = vst [vmem:[#allocation27_spill] sm:$0xff] %v3480_v61 }
  0x28   :  { %s3463_s1 = sld [smem:[#allocation5 + $0x45]]  ;;  %v3494_v1 = vstv %s3291_s26  ;;  %v3497_v2 = vstv %s3297_s28  ;;  %v3505_v4 = vadd.s32 1, %v3425_v46  ;;  %v3520_v9 = vadd.s32 2, %v3425_v46  ;;  %s7483_s28 = smov 111   ;;  %7908 = vst [vmem:[#allocation44_spill] sm:$0xff] %v3604_v38 }
  0x29   :  { %v3469_v58 = vadd.s32 4294967294, %v3430_v47  ;;  %v3472_v59 = vadd.s32 4294967293, %v3430_v47  ;;  %s3477_s4 = sld [smem:[#allocation5 + $0x15]]  ;;  %v3485_v62 = vadd.s32 4294967295, %v3430_v47  ;;  %7888 = vst [vmem:[#allocation28_spill] sm:$0xff] %v3494_v1  ;;  %7889 = vst [vmem:[#allocation29_spill] sm:$0xff] %v3497_v2  ;;  %v3502_v3 = vstv %s3299_s29 }
  0x2a   :  { %7872 = sst [smem:[#allocation12_spill]] %s3362_s6  ;;  %7890 = vst [vmem:[#allocation30_spill] sm:$0xff] %v3502_v3  ;;  %v3517_v8 = vadd.s32 1, %v3430_v47  ;;  %v3523_v11 = vadd.s32 2, %v3430_v47  ;;  %v1726_v22 = vrot.slane %v3489_v0, %v3192_v13  ;;  %v3553_v23 = vadd.s32 3, %v3425_v46 }
  0x2b   :  { %477 = vrot.lane.b32.xlu1 %v3206_v20, %s7462_s8  ;;  %475 = vrot.lane.b32.xlu0 %v3199_v19, %s7462_s8  ;;  %s3354_s8 = sld [smem:[#allocation5 + $0x3b]]  ;;  %v1722_v13 = vrot.slane %v3489_v0, %v3190_v10  ;;  %v3568_v26 = vadd.s32 3, %v3430_v47  ;;  %vm131_vm4 = vcmp.ge.s32.totalorder %v3425_v46, 0  ;;  %vm133_vm5 = vcmp.lt.s32.totalorder %v3425_v46, 16 }
  0x2c   :  { %7874 = sst [smem:[#allocation14_spill]] %s3366_s5  ;;  %vm132_vm6 = vcmp.ge.s32.totalorder %v3430_v47, 0  ;;  %vm134_vm7 = vcmp.lt.s32.totalorder %v3430_v47, 16  ;;  %v3611_v39 = vsel %vm7513_vm0, %v1715_v18, %v1726_v22  ;;  %vm56_vm9 = vcmp.ge.s32.totalorder %v3453_v53, 0 }
  0x2d   :  { %7871 = sst [smem:[#allocation11_spill]] %s3356_s7  ;;  %v3628_v43 = vsel %vm7513_vm0, %v1711_v25, %v1722_v13  ;;  %vm58_vm10 = vcmp.lt.s32.totalorder %v3453_v53, 16  ;;  %vm111_vm12 = vcmp.lt.s32.totalorder %v3461_v56, 16  ;;  %vm3767_vm0 = vmand %vm55_vm2, %vm57_vm3  ;;  %vm78_vm15 = vcmp.ge.s32.totalorder %v3388_v36, 0 }
  0x2e   :  { %7875 = sst [smem:[#allocation15_spill]] %s3368_s3  ;;  %vm3789_vm2 = vmand %vm131_vm4, %vm133_vm5  ;;  %vm80_vm3 = vcmp.lt.s32.totalorder %v3388_v36, 16  ;;  %vm7564_vm5 = vcmp.lt.s32.totalorder %v3289_v21, 47  ;;  %vm120_vm13 = vcmp.lt.s32.totalorder %v3469_v58, 16 }
  0x2f   :  { %502 = vrot.lane.b32.xlu1 %v3206_v20, %s7458_s9  ;;  %500 = vrot.lane.b32.xlu0 %v3199_v19, %s7458_s9  ;;  %s3350_s9 = sld [smem:[#allocation5 + $0x3a]]  ;;  %vm3810_vm4 = vmand %vm132_vm6, %vm134_vm7 }
  0x30   :  { %s3382_s5 = sld [smem:[#allocation5 + $0xe]]  ;;  %vm3849_vm6 = vmand %vm77_vm14, %vm79_vm11  ;;  %vm7983_vm14 = vcmp.lt.s32.totalorder %v3289_v21, 49 }
  0x31   :  { %7870 = sst [smem:[#allocation10_spill]] %s3354_s8  ;;  %s7485_s8 = smov 112   ;;  %vm3872_vm11 = vmand %vm78_vm15, %vm80_vm3 }
  0x32   :  { %s3386_s3 = sld [smem:[#allocation5 + $0x3f]]  ;;  %vm7556_vm15 = vmand %vm3849_vm6, %vm3789_vm2 }
  0x33   :  { %527 = vrot.lane.b32.xlu1 %v3206_v20, %s7456_s10  ;;  %525 = vrot.lane.b32.xlu0 %v3199_v19, %s7456_s10  ;;  %s7470_s10 = smov 127   ;;  %s3396_s6 = sld [smem:[#allocation5 + $0x40]]  ;;  %vm7557_vm3 = vmand %vm3872_vm11, %vm3810_vm4 }
  0x34   :  { %s3413_s7 = sld [smem:[#allocation5 + $0x42]]  ;;  %vm7984_vm7 = vmmov %vm7983_vm14 }
  0x35   :  { %s3491_s25 = sld [smem:[#allocation5 + $0x46]]  ;;  %v3617_v41 = vstv %s3350_s9 }
  0x36   :  { %7876 = sst [smem:[#allocation16_spill]] %s3382_s5  ;;  %s7479_s5 = smov 114   ;;  %7913 = vst [vmem:[#allocation46_spill] sm:$0xff] %v3617_v41 }
  0x37   :  { %552 = vrot.lane.b32.xlu1 %v3206_v20, %s7454_s11  ;;  %550 = vrot.lane.b32.xlu0 %v3199_v19, %s7454_s11  ;;  %s3344_s11 = sld [smem:[#allocation5 + $0x9]] }
  0x38   :  { %7878 = sst [smem:[#allocation18_spill]] %s3386_s3 }
  0x39   :  { %s3404_s3 = sld [smem:[#allocation5 + $0x41]] }
  0x3a   :  { %7883 = sst [smem:[#allocation23_spill]] %s3413_s7  ;;  %s3124_s7 = smov 113  }
  0x3b   :  { %577 = vrot.lane.b32.xlu1 %v3206_v20, %s7452_s12  ;;  %575 = vrot.lane.b32.xlu0 %v3199_v19, %s7452_s12  ;;  %s3342_s12 = sld [smem:[#allocation5 + $0x39]] }
  0x3c   :  { %s3507_s0 = sld [smem:[#allocation5 + $0x16]] }
  0x3d   :  { %s3525_s26 = sld [smem:[#allocation5 + $0x49]]  ;;  %v3614_v40 = vstv %s3344_s11 }
  0x3e   :  { %7912 = vst [vmem:[#allocation45_spill] sm:$0xff] %v3614_v40  ;;  %s3622_s29 = sld [smem:[#allocation5 + $0x4a]] }
  0x3f   :  { %602 = vrot.lane.b32.xlu1 %v3206_v20, %s7448_s13  ;;  %600 = vrot.lane.b32.xlu0 %v3199_v19, %s7448_s13  ;;  %s3338_s13 = sld [smem:[#allocation5 + $0x38]] }
  0x40   :  { %7881 = sst [smem:[#allocation21_spill]] %s3404_s3 }
  0x41   :  { %s3418_s3 = sld [smem:[#allocation5 + $0x12]]  ;;  %v3596_v34 = vstv %s3342_s12 }
  0x42   :  { %7904 = vst [vmem:[#allocation43_spill] sm:$0xff] %v3596_v34  ;;  %s3639_s11 = sld [smem:[#allocation5 + $0x1a]]  ;;  %v3816_v34 = vstv %s3507_s0 }
  0x43   :  { %627 = vrot.lane.b32.xlu1 %v3206_v20, %s7446_s14  ;;  %625 = vrot.lane.b32.xlu0 %v3199_v19, %s7446_s14  ;;  %s7460_s14 = smov 1   ;;  %v3657_v13 = vstv %s3525_s26  ;;  %s3129_s26 = smov 99   ;;  %7956 = vst [vmem:[#allocation76_spill] sm:$0xff] %v3816_v34 }
  0x44   :  { %7924 = vst [vmem:[#allocation54_spill] sm:$0xff] %v3657_v13  ;;  %v3728_v40 = vmul.f32 %v3657_v13, %v3199_v19  ;;  %v3843_v34 = vstv %s3622_s29  ;;  %s3876_s0 = sld [smem:[#allocation5 + $0x20]]  ;;  %s8021_s29 = smov 50  }
  0x45   :  { %v3586_v32 = vstv %s3338_s13  ;;  %s7907_s13 = sld [smem:[#allocation12_spill]]  ;;  %7961 = vst [vmem:[#allocation81_spill] sm:$0xff] %v3843_v34 }
  0x46   :  { %7901 = vst [vmem:[#allocation41_spill] sm:$0xff] %v3586_v32  ;;  %v1008_v46 = vrot.slane %v3728_v40, 1 }
  0x47   :  { %652 = vrot.lane.b32.xlu1 %v3206_v20, %s7444_s15  ;;  %650 = vrot.lane.b32.xlu0 %v3199_v19, %s7444_s15  ;;  %s3332_s15 = sld [smem:[#allocation5 + $0x7]] }
  0x4b   :  { %677 = vrot.lane.b32.xlu1 %v3206_v20, %s7442_s16  ;;  %675 = vrot.lane.b32.xlu0 %v3199_v19, %s7442_s16  ;;  %s3330_s16 = sld [smem:[#allocation5 + $0x37]]  ;;  %v3637_v63 = vstv %s7907_s13 }
  0x4c   :  { %7919 = vst [vmem:[#allocation50_spill] sm:$0xff] %v3637_v63  ;;  %s7929_s13 = sld [smem:[#allocation23_spill]] }
  0x4d   :  { %v3583_v31 = vstv %s3332_s15  ;;  %s7906_s15 = sld [smem:[#allocation11_spill]] }
  0x4e   :  { %7900 = vst [vmem:[#allocation40_spill] sm:$0xff] %v3583_v31 }
  0x4f   :  { %702 = vrot.lane.b32.xlu1 %v3206_v20, %s7440_s17  ;;  %700 = vrot.lane.b32.xlu0 %v3199_v19, %s7440_s17  ;;  %s3328_s17 = sld [smem:[#allocation5 + $0x6]] }
  0x51   :  { %v3580_v30 = vstv %s3330_s16  ;;  %s3598_s16 = sld [smem:[#allocation5 + $0x19]] }
  0x52   :  { %7899 = vst [vmem:[#allocation39_spill] sm:$0xff] %v3580_v30 }
  0x53   :  { %727 = vrot.lane.b32.xlu1 %v3206_v20, %s7436_s18  ;;  %725 = vrot.lane.b32.xlu0 %v3199_v19, %s7436_s18  ;;  %s7450_s18 = smov 2   ;;  %v3634_v49 = vstv %s7906_s15 }
  0x54   :  { %7918 = vst [vmem:[#allocation49_spill] sm:$0xff] %v3634_v49 }
  0x55   :  { %v3577_v29 = vstv %s3328_s17  ;;  %s7905_s17 = sld [smem:[#allocation10_spill]] }
  0x56   :  { %7898 = vst [vmem:[#allocation38_spill] sm:$0xff] %v3577_v29 }
  0x57   :  { %752 = vrot.lane.b32.xlu1 %v3206_v20, %s7434_s19  ;;  %750 = vrot.lane.b32.xlu0 %v3199_v19, %s7434_s19  ;;  %s3320_s19 = sld [smem:[#allocation5 + $0x5]] }
  0x5b   :  { %777 = vrot.lane.b32.xlu1 %v3206_v20, %s7432_s20  ;;  %775 = vrot.lane.b32.xlu0 %v3199_v19, %s7432_s20  ;;  %s3317_s20 = sld [smem:[#allocation5 + $0x35]]  ;;  %v3631_v48 = vstv %s7905_s17 }
  0x5c   :  { %7917 = vst [vmem:[#allocation48_spill] sm:$0xff] %v3631_v48  ;;  %s7925_s17 = sld [smem:[#allocation21_spill]] }
  0x5d   :  { %v3544_v17 = vstv %s3320_s19  ;;  %s3565_s19 = sld [smem:[#allocation5 + $0x48]] }
  0x5e   :  { %7896 = vst [vmem:[#allocation36_spill] sm:$0xff] %v3544_v17 }
  0x5f   :  { %802 = vrot.lane.b32.xlu1 %v3206_v20, %s7428_s21  ;;  %800 = vrot.lane.b32.xlu0 %v3199_v19, %s7428_s21  ;;  %s3312_s21 = sld [smem:[#allocation5 + $0x34]] }
  0x61   :  { %v3537_v16 = vstv %s3317_s20 }
  0x62   :  { %7895 = vst [vmem:[#allocation35_spill] sm:$0xff] %v3537_v16 }
  0x63   :  { %827 = vrot.lane.b32.xlu1 %v3206_v20, %s7426_s22  ;;  %825 = vrot.lane.b32.xlu0 %v3199_v19, %s7426_s22  ;;  %s7438_s22 = smov 3   ;;  %v3837_v40 = vstv %s3565_s19  ;;  %s8000_s19 = smov 51  }
  0x64   :  { %7959 = vst [vmem:[#allocation79_spill] sm:$0xff] %v3837_v40  ;;  %v7967_v40 = vmov 0 }
  0x65   :  { %v3531_v14 = vstv %s3312_s21  ;;  %s3550_s21 = sld [smem:[#allocation5 + $0x17]]  ;;  %v7968_v40 = vsel %vm3872_vm11, 4294967295, %v7967_v40 }
  0x66   :  { %7893 = vst [vmem:[#allocation33_spill] sm:$0xff] %v3531_v14  ;;  %7969 = vst [vmem:[#allocation85_spill] sm:$0xff] %v7968_v40 }
  0x67   :  { %852 = vrot.lane.b32.xlu1 %v3206_v20, %s7424_s23  ;;  %850 = vrot.lane.b32.xlu0 %v3199_v19, %s7424_s23  ;;  %s3306_s23 = sld [smem:[#allocation5 + $0x3]] }
  0x6b   :  { %877 = vrot.lane.b32.xlu1 %v3206_v20, %s7422_s24  ;;  %875 = vrot.lane.b32.xlu0 %v3199_v19, %s7422_s24  ;;  %s3301_s24 = sld [smem:[#allocation5 + $0x33]] }
  0x6d   :  { %v3528_v12 = vstv %s3306_s23  ;;  %s7492_s23 = smov 110  }
  0x6e   :  { %7892 = vst [vmem:[#allocation32_spill] sm:$0xff] %v3528_v12 }
  0x6f   :  { %902 = vrot.lane.b32.xlu1 %v3206_v20, %s7430_s27  ;;  %900 = vrot.lane.b32.xlu0 %v3199_v19, %s7430_s27  ;;  %s3314_s27 = sld [smem:[#allocation5 + $0x4]] }
  0x71   :  { %v3512_v6 = vstv %s3301_s24  ;;  %s3539_s24 = sld [smem:[#allocation5 + $0x47]] }
  0x72   :  { %7891 = vst [vmem:[#allocation31_spill] sm:$0xff] %v3512_v6 }
  0x73   :  { %927 = vrot.lane.b32.xlu1 %v3206_v20, %s7438_s22  ;;  %925 = vrot.lane.b32.xlu0 %v3199_v19, %s7438_s22  ;;  %s3326_s22 = sld [smem:[#allocation5 + $0x36]] }
  0x75   :  { %v3534_v15 = vstv %s3314_s27  ;;  %s7911_s27 = sld [smem:[#allocation15_spill]] }
  0x76   :  { %7894 = vst [vmem:[#allocation34_spill] sm:$0xff] %v3534_v15 }
  0x77   :  { %952 = vrot.lane.b32.xlu1 %v3206_v20, %s7450_s18  ;;  %950 = vrot.lane.b32.xlu0 %v3199_v19, %s7450_s18  ;;  %s3340_s18 = sld [smem:[#allocation5 + $0x8]]  ;;  %v3819_v29 = vstv %s3539_s24 }
  0x78   :  { %7957 = vst [vmem:[#allocation77_spill] sm:$0xff] %v3819_v29  ;;  %v7962_v29 = vmov 0  ;;  %s3909_s24 = sld [smem:[#allocation5 + $0x51]] }
  0x79   :  { %v3559_v24 = vstv %s3326_s22  ;;  %s3588_s22 = sld [smem:[#allocation5 + $0x18]]  ;;  %v7963_v29 = vsel %vm3849_vm6, 4294967295, %v7962_v29 }
  0x7a   :  { %7897 = vst [vmem:[#allocation37_spill] sm:$0xff] %v3559_v24  ;;  %7964 = vst [vmem:[#allocation82_spill] sm:$0xff] %v7963_v29 }
  0x7b   :  { %977 = vrot.lane.b32.xlu1 %v3206_v20, %s7460_s14  ;;  %975 = vrot.lane.b32.xlu0 %v3199_v19, %s7460_s14  ;;  %s3352_s14 = sld [smem:[#allocation5 + $0xa]]  ;;  %v3652_v25 = vstv %s7911_s27 }
  0x7c   :  { %7923 = vst [vmem:[#allocation53_spill] sm:$0xff] %v3652_v25  ;;  %s4173_s27 = sld [smem:[#allocation5 + $0x23]] }
  0x7d   :  { %v3593_v33 = vstv %s3340_s18  ;;  %s7910_s18 = sld [smem:[#allocation14_spill]] }
  0x7e   :  { %7903 = vst [vmem:[#allocation42_spill] sm:$0xff] %v3593_v33 }
  0x7f   :  { %1020 = vrot.lane.b32.xlu1 %v3206_v20, %s7470_s10  ;;  %1018 = vrot.lane.b32.xlu0 %v3199_v19, %s7470_s10  ;;  %s3364_s10 = sld [smem:[#allocation5 + $0xc]] }
  0x81   :  { %7869 = sst [smem:[#allocation9_spill]] %s3352_s14 }
  0x82   :  { %s3390_s14 = sld [smem:[#allocation5 + $0xf]] }
  0x83   :  { %1045 = vrot.lane.b32.xlu1 %v3206_v20, %s7473_s30  ;;  %1043 = vrot.lane.b32.xlu0 %v3199_v19, %s7473_s30  ;;  %s3377_s30 = sld [smem:[#allocation5 + $0x3e]]  ;;  %v3649_v10 = vstv %s7910_s18 }
  0x84   :  { %s7902_s20 = sld [smem:[#allocation9_spill]]  ;;  %7922 = vst [vmem:[#allocation52_spill] sm:$0xff] %v3649_v10  ;;  %v3679_v10 = vstv %s3396_s6 }
  0x85   :  { %7873 = sst [smem:[#allocation13_spill]] %s3364_s10  ;;  %7933 = vst [vmem:[#allocation60_spill] sm:$0xff] %v3679_v10 }
  0x86   :  { %s3401_s10 = sld [smem:[#allocation5 + $0x10]] }
  0x87   :  { %1070 = vrot.lane.b32.xlu1 %v3206_v20, %s7475_s2  ;;  %1068 = vrot.lane.b32.xlu0 %v3199_v19, %s7475_s2  ;;  %s7477_s2 = smov 115   ;;  %s7909_s12 = sld [smem:[#allocation13_spill]] }
  0x88   :  { %7880 = sst [smem:[#allocation20_spill]] %s3390_s14 }
  0x89   :  { %s3407_s14 = sld [smem:[#allocation5 + $0x11]]  ;;  %v3660_v49 = vstv %s3377_s30 }
  0x8a   :  { %v3620_v42 = vstv %s7902_s20  ;;  %s7920_s9 = sld [smem:[#allocation20_spill]]  ;;  %7926 = vst [vmem:[#allocation55_spill] sm:$0xff] %v3660_v49 }
  0x8b   :  { %1095 = vrot.lane.b32.xlu1 %v3206_v20, %s7477_s2  ;;  %1093 = vrot.lane.b32.xlu0 %v3199_v19, %s7477_s2  ;;  %s3438_s2 = sld [smem:[#allocation5 + $0x44]]  ;;  %7914 = vst [vmem:[#allocation47_spill] sm:$0xff] %v3620_v42 }
  0x8c   :  { %s3654_s20 = sld [smem:[#allocation5 + $0x4b]]  ;;  %v3682_v49 = vstv %s3401_s10 }
  0x8d   :  { %v3646_v22 = vstv %s7909_s12  ;;  %s3128_s12 = smov 109   ;;  %7934 = vst [vmem:[#allocation61_spill] sm:$0xff] %v3682_v49  ;;  %s3684_s30 = sld [smem:[#allocation5 + $0x4c]]  ;;  %v3700_v49 = vstv %s7929_s13 }
  0x8e   :  { %7921 = vst [vmem:[#allocation51_spill] sm:$0xff] %v3646_v22  ;;  %v3671_v22 = vadd.s32 4294967295, %v3384_v35  ;;  %7939 = vst [vmem:[#allocation65_spill] sm:$0xff] %v3700_v49  ;;  %s3702_s6 = sld [smem:[#allocation5 + $0x1c]]  ;;  %v3716_v49 = vstv %s3418_s3  ;;  %s3134_s13 = smov 94  }
  0x8f   :  { %7882 = sst [smem:[#allocation22_spill]] %s3407_s14  ;;  %1120 = vrot.lane.b32.xlu1 %v3206_v20, %s7479_s5  ;;  %1118 = vrot.lane.b32.xlu0 %v3199_v19, %s7479_s5  ;;  %7940 = vst [vmem:[#allocation66_spill] sm:$0xff] %v3716_v49 }
  0x90   :  { %s3427_s14 = sld [smem:[#allocation5 + $0x43]]  ;;  %7931 = vst [vmem:[#allocation58_spill] sm:$0xff] %v3671_v22  ;;  %v3676_v25 = vstv %s7920_s9  ;;  %v3724_v22 = vstv %s3588_s22 }
  0x91   :  { %v3420_v44 = vpop.permute.xlu1 %425  ;;  %v3422_v45 = vpop.permute.xlu0 %400  ;;  %s3432_s5 = sld [smem:[#allocation5 + $0x13]]  ;;  %7932 = vst [vmem:[#allocation59_spill] sm:$0xff] %v3676_v25  ;;  %v3694_v25 = vstv %s7925_s17  ;;  %7942 = vst [vmem:[#allocation68_spill] sm:$0xff] %v3724_v22  ;;  %v3736_v33 = vstv %s3438_s2  ;;  %v1002_v52 = vmul.f32 %v3724_v22, %v3206_v20 }
  0x92   :  { %s7927_s15 = sld [smem:[#allocation22_spill]]  ;;  %7937 = vst [vmem:[#allocation63_spill] sm:$0xff] %v3694_v25  ;;  %7944 = vst [vmem:[#allocation70_spill] sm:$0xff] %v3736_v33  ;;  %v7952_v33 = vmov 0  ;;  %v3866_v34 = vstv %s3654_s20  ;;  %s8049_s20 = smov 49  }
  0x93   :  { %1145 = vrot.lane.b32.xlu1 %v3206_v20, %s3124_s7  ;;  %1143 = vrot.lane.b32.xlu0 %v3199_v19, %s3124_s7  ;;  %s3721_s10 = sld [smem:[#allocation5 + $0x4d]]  ;;  %v7953_v33 = vsel %vm3789_vm2, 4294967295, %v7952_v33  ;;  %7966 = vst [vmem:[#allocation84_spill] sm:$0xff] %v3866_v34  ;;  %v3888_v38 = vstv %s3684_s30  ;;  %s8068_s30 = smov 48  }
  0x94   :  { %s3744_s3 = sld [smem:[#allocation5 + $0x1d]]  ;;  %7971 = vst [vmem:[#allocation87_spill] sm:$0xff] %v3888_v38  ;;  %v3891_v17 = vstv %s3702_s6  ;;  %s8095_s6 = smov 47  }
  0x95   :  { %v3447_v51 = vpop.permute.xlu1 %427  ;;  %v3458_v55 = vpop.permute.xlu0 %402  ;;  %s3798_s2 = sld [smem:[#allocation5 + $0x4f]]  ;;  %7972 = vst [vmem:[#allocation88_spill] sm:$0xff] %v3891_v17 }
  0x96   :  { %7884 = sst [smem:[#allocation24_spill]] %s3427_s14  ;;  %v3832_v47 = vsel %vm7546_vm8, %v3447_v51, %v3420_v44 }
  0x97   :  { %s3445_s14 = sld [smem:[#allocation5 + $0x14]]  ;;  %1170 = vrot.lane.b32.xlu1 %v3206_v20, %s7485_s8  ;;  %1168 = vrot.lane.b32.xlu0 %v3199_v19, %s7485_s8  ;;  %v3733_v48 = vstv %s3432_s5 }
  0x98   :  { %s7916_s8 = sld [smem:[#allocation18_spill]]  ;;  %v3697_v10 = vstv %s7927_s15  ;;  %7943 = vst [vmem:[#allocation69_spill] sm:$0xff] %v3733_v48  ;;  %v3755_v48 = vstv %s3477_s4  ;;  %s3130_s4 = smov 98  }
  0x99   :  { %v3509_v5 = vpop.permute.xlu1 %452  ;;  %v3514_v7 = vpop.permute.xlu0 %450  ;;  %7938 = vst [vmem:[#allocation64_spill] sm:$0xff] %v3697_v10  ;;  %7947 = vst [vmem:[#allocation73_spill] sm:$0xff] %v3755_v48  ;;  %s3761_s5 = sld [smem:[#allocation5 + $0x4e]] }
  0x9a   :  { %v3936_v53 = vstv %s3744_s3  ;;  %s4098_s22 = sld [smem:[#allocation5 + $0x52]]  ;;  %s8112_s3 = smov 46  }
  0x9b   :  { %1195 = vrot.lane.b32.xlu1 %v3206_v20, %s7483_s28  ;;  %1193 = vrot.lane.b32.xlu0 %v3199_v19, %s7483_s28  ;;  %s7915_s28 = sld [smem:[#allocation16_spill]]  ;;  %7979 = vst [vmem:[#allocation93_spill] sm:$0xff] %v3936_v53 }
  0x9c   :  { %s4142_s18 = sld [smem:[#allocation5 + $0x53]] }
  0x9d   :  { %v3572_v27 = vpop.permute.xlu1 %477  ;;  %v3574_v28 = vpop.permute.xlu0 %475  ;;  %v3739_v49 = vstv %s3445_s14  ;;  %s3776_s14 = sld [smem:[#allocation5 + $0x1e]] }
  0x9e   :  { %v3666_v63 = vstv %s7916_s8  ;;  %s7935_s8 = sld [smem:[#allocation24_spill]]  ;;  %7945 = vst [vmem:[#allocation71_spill] sm:$0xff] %v3739_v49  ;;  %v3758_v49 = vstv %s3491_s25 }
  0x9f   :  { %1220 = vrot.lane.b32.xlu1 %v3206_v20, %s7492_s23  ;;  %1218 = vrot.lane.b32.xlu0 %v3199_v19, %s7492_s23  ;;  %7930 = vst [vmem:[#allocation57_spill] sm:$0xff] %v3666_v63  ;;  %s3668_s23 = sld [smem:[#allocation5 + $0x1b]]  ;;  %v3706_v63 = vmul.f32 %v3657_v13, %v3206_v20  ;;  %v406_v13 = vsel %vm7528_vm1, %v3458_v55, %v3422_v45  ;;  %7948 = vst [vmem:[#allocation74_spill] sm:$0xff] %v3758_v49 }
  0xa0   :  { %v405_v49 = vsel %vm7528_vm1, %v3422_v45, %v3458_v55  ;;  %v1001_v45 = vmul.f32 %v3724_v22, %v3199_v19  ;;  %v3804_v55 = vmul.f32 %v3497_v2, %v406_v13  ;;  %v3822_v22 = vstv %s3550_s21  ;;  %s3853_s25 = sld [smem:[#allocation5 + $0x50]] }
  0xa1   :  { %v3641_v0 = vpop.permute.xlu1 %502  ;;  %v3643_v18 = vpop.permute.xlu0 %500  ;;  %v3663_v42 = vstv %s7915_s28  ;;  %v1009_v48 = vrot.slane %v3706_v63, 1  ;;  %v7954_v63 = vmov 0  ;;  %7958 = vst [vmem:[#allocation78_spill] sm:$0xff] %v3822_v22  ;;  %v3840_v22 = vstv %s3598_s16  ;;  %s3131_s28 = smov 97   ;;  %s3962_s21 = sld [smem:[#allocation5 + $0x21]] }
  0xa2   :  { %7928 = vst [vmem:[#allocation56_spill] sm:$0xff] %v3663_v42  ;;  %v3687_v42 = vadd.s32 4294967295, %v3388_v36  ;;  %v7955_v63 = vsel %vm3810_vm4, 4294967295, %v7954_v63  ;;  %7960 = vst [vmem:[#allocation80_spill] sm:$0xff] %v3840_v22  ;;  %v3856_v32 = vmul.f32 %v3497_v2, %v405_v49  ;;  %v3863_v22 = vstv %s3639_s11  ;;  %s3132_s16 = smov 96   ;;  %s4188_s9 = sld [smem:[#allocation5 + $0x54]] }
  0xa3   :  { %1245 = vrot.lane.b32.xlu1 %v3206_v20, %s3128_s12  ;;  %1243 = vrot.lane.b32.xlu0 %v3199_v19, %s3128_s12  ;;  %7965 = vst [vmem:[#allocation83_spill] sm:$0xff] %v3863_v22  ;;  %v1013_v2 = vadd.f32 %v1009_v48, %v1002_v52  ;;  %v1012_v48 = vadd.f32 %v1008_v46, %v1001_v45  ;;  %v415_v17 = vrot.slane %v3804_v55, 1  ;;  %v3933_v45 = vadd.s32 1, %v3388_v36  ;;  %s3133_s11 = smov 95   ;;  %s4352_s17 = sld [smem:[#allocation5 + $0x24]] }
  0xa4   :  { %7936 = vst [vmem:[#allocation62_spill] sm:$0xff] %v3687_v42  ;;  %v3719_v42 = vstv %s7935_s8  ;;  %v3901_v52 = vsel %vm7546_vm8, %v3420_v44, %v3447_v51  ;;  %v408_v38 = vmul.f32 %v3494_v1, %v406_v13  ;;  %vm3919_vm8 = vmand %vm56_vm9, %vm58_vm10  ;;  %v7973_v44 = vmov 0  ;;  %s4372_s15 = sld [smem:[#allocation5 + $0x55]]  ;;  %s3135_s8 = smov 93  }
  0xa5   :  { %v3711_v25 = vpop.permute.xlu1 %527  ;;  %v3713_v10 = vpop.permute.xlu0 %525  ;;  %7941 = vst [vmem:[#allocation67_spill] sm:$0xff] %v3719_v42  ;;  %v3742_v42 = vstv %s3463_s1  ;;  %s3824_s1 = sld [smem:[#allocation5 + $0x1f]]  ;;  %v3885_v34 = vstv %s3668_s23  ;;  %v7974_v44 = vsel %vm3919_vm8, 4294967295, %v7973_v44  ;;  %v3927_v51 = vstv %s3721_s10  ;;  %7978 = vst [vmem:[#allocation92_spill] sm:$0xff] %v3933_v45  ;;  %s3136_s10 = smov 83  }
  0xa6   :  { %7946 = vst [vmem:[#allocation72_spill] sm:$0xff] %v3742_v42  ;;  %v7949_v42 = vmov 0  ;;  %7970 = vst [vmem:[#allocation86_spill] sm:$0xff] %v3885_v34  ;;  %v3905_v34 = vmul.f32 %v3480_v61, %v3832_v47  ;;  %v3930_v13 = vadd.s32 1, %v3384_v35  ;;  %vm7980_vm9 = vcmp.ge.s32.totalorder %v3461_v56, 0  ;;  %s4116_s23 = sld [smem:[#allocation5 + $0x22]] }
  0xa7   :  { %1270 = vrot.lane.b32.xlu1 %v3206_v20, %s3129_s26  ;;  %v7950_v42 = vsel %vm3767_vm0, 4294967295, %v7949_v42  ;;  %1268 = vrot.lane.b32.xlu0 %v3199_v19, %s3129_s26  ;;  %7975 = vst [vmem:[#allocation89_spill] sm:$0xff] %v7974_v44  ;;  %7976 = vst [vmem:[#allocation90_spill] sm:$0xff] %v3927_v51  ;;  %v7981_v46 = vmov 0  ;;  %v409_v55 = vmul.f32 %v3494_v1, %v405_v49  ;;  %v416_v51 = vrot.slane %v3856_v32, 1 }
  0xa8   :  { %7951 = vst [vmem:[#allocation75_spill] sm:$0xff] %v7950_v42  ;;  %7977 = vst [vmem:[#allocation91_spill] sm:$0xff] %v3930_v13  ;;  %v3952_v13 = vsel %vm7983_vm14, %v3514_v7, %v3509_v5  ;;  %v3958_v56 = vsel %vm7984_vm7, %v3509_v5, %v3514_v7  ;;  %v7987_v32 = vmov 0  ;;  %v437_v49 = vmul.f32 %v3480_v61, %v3901_v52 }
  0xa9   :  { %v3793_v41 = vpop.permute.xlu1 %552  ;;  %v3795_v31 = vpop.permute.xlu0 %550  ;;  %vm3942_vm10 = vmand %vm7980_vm9, %vm111_vm12  ;;  %vm7985_vm12 = vcmp.lt.s32.totalorder %v3456_v54, 16  ;;  %vm7986_vm9 = vcmp.ge.s32.totalorder %v3456_v54, 0  ;;  %v3979_v7 = vstv %s3761_s5  ;;  %v3986_v53 = vsel %vm7556_vm15, %v1012_v48, 0.0  ;;  %s3137_s5 = smov 82  }
  0xaa   :  { %v7982_v46 = vsel %vm3942_vm10, 4294967295, %v7981_v46  ;;  %vm3968_vm1 = vmand %vm7986_vm9, %vm7985_vm12  ;;  %7989 = vst [vmem:[#allocation94_spill] sm:$0xff] %v3979_v7  ;;  %v3993_v54 = vsel %vm7557_vm3, %v1013_v2, 0.0  ;;  %v440_v61 = vrot.slane %v3905_v34, 1  ;;  %vm7992_vm7 = vcmp.lt.s32.totalorder %v3472_v59, 16 }
  0xab   :  { %1295 = vrot.lane.b32.xlu1 %v3206_v20, %s3130_s4  ;;  %1293 = vrot.lane.b32.xlu0 %v3199_v19, %s3130_s4  ;;  %v7988_v32 = vsel %vm3968_vm1, 4294967295, %v7987_v32  ;;  %7990 = vst [vmem:[#allocation95_spill] sm:$0xff] %v3986_v53  ;;  %7991 = vst [vmem:[#allocation96_spill] sm:$0xff] %v3993_v54  ;;  %vm7993_vm14 = vcmp.ge.s32.totalorder %v3472_v59, 0  ;;  %v7994_v7 = vmov 0  ;;  %v419_v45 = vadd.f32 %v415_v17, %v408_v38  ;;  %v8110_v44 = vld [vmem:[#allocation62_spill] sm:$0xff] }
  0xac   :  { %vm4000_vm12 = vmand %vm7993_vm14, %vm7992_vm7  ;;  %v4007_v2 = vstv %s3776_s14  ;;  %v4010_v48 = vstv %s3798_s2  ;;  %v4018_v59 = vmul.f32 %v3512_v6, %v3958_v56  ;;  %v4022_v17 = vmul.f32 %v3512_v6, %v3952_v13  ;;  %s8132_s14 = smov 45   ;;  %s3138_s2 = smov 81  }
  0xad   :  { %v3880_v30 = vpop.permute.xlu1 %577  ;;  %v3882_v22 = vpop.permute.xlu0 %575  ;;  %v7995_v7 = vsel %vm4000_vm12, 4294967295, %v7994_v7  ;;  %7996 = vst [vmem:[#allocation97_spill] sm:$0xff] %v4007_v2  ;;  %7997 = vst [vmem:[#allocation98_spill] sm:$0xff] %v4010_v48  ;;  %vm7998_vm14 = vcmp.lt.s32.totalorder %v3289_v21, 48  ;;  %v420_v6 = vadd.f32 %v416_v51, %v409_v55  ;;  %v4047_v2 = vstv %s3824_s1  ;;  %s8152_s1 = smov 35  }
  0xae   :  { %v4028_v34 = vsel %vm7998_vm14, %v3574_v28, %v3572_v27  ;;  %vm7999_vm3 = vmmov %vm7998_vm14  ;;  %8001 = vst [vmem:[#allocation99_spill] sm:$0xff] %v4047_v2  ;;  %v433_v48 = vmul.f32 %v3466_v57, %v3832_v47  ;;  %v441_v54 = vrot.slane %v437_v49, 1  ;;  %v4065_v51 = vsel %vm7564_vm5, %v3643_v18, %v3641_v0 }
  0xaf   :  { %1320 = vrot.lane.b32.xlu1 %v3206_v20, %s3131_s28  ;;  %1318 = vrot.lane.b32.xlu0 %v3199_v19, %s3131_s28  ;;  %v4034_v38 = vsel %vm7999_vm3, %v3572_v27, %v3574_v28  ;;  %v4050_v27 = vstv %s3853_s25  ;;  %v4053_v28 = vstv %s3876_s0  ;;  %vm7580_vm3 = vmand %vm3919_vm8, %vm4000_vm12  ;;  %v4071_v55 = vsel %vm7564_vm5, %v3641_v0, %v3643_v18  ;;  %s3139_s25 = smov 80   ;;  %s8173_s0 = smov 34  }
  0xb0   :  { %8002 = vst [vmem:[#allocation100_spill] sm:$0xff] %v4050_v27  ;;  %8003 = vst [vmem:[#allocation101_spill] sm:$0xff] %v4053_v28  ;;  %vm8004_vm14 = vcmp.ge.s32.totalorder %v3469_v58, 0  ;;  %v8005_v49 = vmov 0  ;;  %v486_v0 = vmul.f32 %v3531_v14, %v4034_v38  ;;  %v487_v18 = vmul.f32 %v3531_v14, %v4028_v34 }
  0xb1   :  { %v3974_v1 = vpop.permute.xlu1 %602  ;;  %v3976_v5 = vpop.permute.xlu0 %600  ;;  %vm4081_vm9 = vmand %vm8004_vm14, %vm120_vm13  ;;  %v4096_v27 = vstv %s3909_s24  ;;  %v434_v58 = vmul.f32 %v3466_v57, %v3901_v52  ;;  %v444_v53 = vadd.f32 %v440_v61, %v433_v48  ;;  %vm8009_vm13 = vcmp.lt.s32.totalorder %v3475_v60, 16  ;;  %s3140_s24 = smov 79  }
  0xb2   :  { %v8006_v49 = vsel %vm4081_vm9, 4294967295, %v8005_v49  ;;  %vm8007_vm15 = vmand %vm3767_vm0, %vm3942_vm10  ;;  %8008 = vst [vmem:[#allocation102_spill] sm:$0xff] %v4096_v27  ;;  %v465_v14 = vrot.slane %v4018_v59, 1  ;;  %v466_v40 = vrot.slane %v4022_v17, 1  ;;  %v8015_v61 = vmov 0 }
  0xb3   :  { %1733 = vrot.lane.b32.xlu1 %v3611_v39, %s8000_s19  ;;  %1731 = vrot.lane.b32.xlu0 %v3628_v43, %s8000_s19  ;;  %v421_v2 = vsel %vm8007_vm15, %v419_v45, 0.0  ;;  %vm8010_vm15 = vcmp.ge.s32.totalorder %v3475_v60, 0  ;;  %v8011_v45 = vmov 0  ;;  %v422_v60 = vsel %vm7580_vm3, %v420_v6, 0.0  ;;  %vm8020_vm7 = vmand %vm3767_vm0, %vm3968_vm1  ;;  %s5039_s19 = sld [smem:[#allocation5 + $0x25]] }
  0xb4   :  { %vm4106_vm14 = vmand %vm8010_vm15, %vm8009_vm13  ;;  %vm8013_vm13 = vcmp.lt.s32.totalorder %v3485_v62, 16  ;;  %vm8014_vm15 = vcmp.ge.s32.totalorder %v3485_v62, 0  ;;  %v511_v52 = vmul.f32 %v3537_v16, %v4071_v55  ;;  %v512_v48 = vmul.f32 %v3537_v16, %v4065_v51 }
  0xb5   :  { %v4073_v28 = vpop.permute.xlu1 %627  ;;  %v4075_v47 = vpop.permute.xlu0 %625  ;;  %v8012_v45 = vsel %vm4106_vm14, 4294967295, %v8011_v45  ;;  %vm4127_vm11 = vmand %vm8014_vm15, %vm8013_vm13  ;;  %v4140_v6 = vstv %s3962_s21  ;;  %v445_v62 = vadd.f32 %v441_v54, %v434_v58  ;;  %v423_v59 = vadd.f32 %v421_v2, %v3443_v50  ;;  %s8189_s21 = smov 33  }
  0xb6   :  { %v8016_v61 = vsel %vm4127_vm11, 4294967295, %v8015_v61  ;;  %8017 = vst [vmem:[#allocation103_spill] sm:$0xff] %v4140_v6  ;;  %vm7581_vm13 = vmand %vm3919_vm8, %vm4081_vm9  ;;  %v458_v17 = vmul.f32 %v3502_v3, %v3958_v56  ;;  %v459_v16 = vmul.f32 %v3502_v3, %v3952_v13  ;;  %v490_v6 = vrot.slane %v486_v0, 1 }
  0xb7   :  { %1345 = vrot.lane.b32.xlu1 %v3206_v20, %s3132_s16  ;;  %1343 = vrot.lane.b32.xlu0 %v3199_v19, %s3132_s16  ;;  %v491_v29 = vrot.slane %v487_v18, 1  ;;  %vm8018_vm3 = vcmp.lt.s32.totalorder %v3289_v21, 46  ;;  %v446_v56 = vsel %vm8020_vm7, %v444_v53, 0.0  ;;  %v424_v2 = vadd.f32 %v422_v60, %v3443_v50  ;;  %v8065_v50 = vld [vmem:[#allocation43_spill] sm:$0xff] }
  0xb8   :  { %v4165_v54 = vsel %vm8018_vm3, %v3713_v10, %v3711_v25  ;;  %vm8019_vm5 = vmmov %vm8018_vm3  ;;  %v469_v0 = vadd.f32 %v465_v14, %v458_v17  ;;  %v470_v18 = vadd.f32 %v466_v40, %v459_v16  ;;  %v515_v14 = vrot.slane %v511_v52, 1 }
  0xb9   :  { %v4153_v57 = vpop.permute.xlu1 %652  ;;  %v4155_v27 = vpop.permute.xlu0 %650  ;;  %v4171_v13 = vsel %vm8019_vm5, %v3711_v25, %v3713_v10  ;;  %v483_v10 = vmul.f32 %v3528_v12, %v4034_v38  ;;  %v484_v25 = vmul.f32 %v3528_v12, %v4028_v34  ;;  %v516_v16 = vrot.slane %v512_v48, 1  ;;  %vm8030_vm5 = vmand %vm3767_vm0, %vm4106_vm14 }
  0xba   :  { %v447_v40 = vsel %vm7581_vm13, %v445_v62, 0.0  ;;  %v448_v53 = vadd.f32 %v446_v56, %v423_v59  ;;  %vm8022_vm7 = vcmp.lt.s32.totalorder %v3505_v4, 16  ;;  %vm8023_vm3 = vcmp.ge.s32.totalorder %v3505_v4, 0 }
  0xbb   :  { %1755 = vrot.lane.b32.xlu1 %v3611_v39, %s8021_s29  ;;  %1753 = vrot.lane.b32.xlu0 %v3628_v43, %s8021_s29  ;;  %vm4210_vm15 = vmand %vm8023_vm3, %vm8022_vm7  ;;  %v8024_v34 = vmov 0  ;;  %v536_v38 = vmul.f32 %v3559_v24, %v4171_v13  ;;  %v537_v58 = vmul.f32 %v3559_v24, %v4165_v54  ;;  %v494_v48 = vadd.f32 %v490_v6, %v483_v10  ;;  %s8206_s29 = smov 32  }
  0xbc   :  { %v8025_v34 = vsel %vm4210_vm15, 4294967295, %v8024_v34  ;;  %v495_v4 = vadd.f32 %v491_v29, %v484_v25  ;;  %vm8026_vm3 = vcmp.lt.s32.totalorder %v3517_v8, 16  ;;  %vm8027_vm7 = vcmp.ge.s32.totalorder %v3517_v8, 0 }
  0xbd   :  { %v4219_v60 = vpop.permute.xlu1 %677  ;;  %v4221_v52 = vpop.permute.xlu0 %675  ;;  %vm4227_vm13 = vmand %vm8027_vm7, %vm8026_vm3  ;;  %v8028_v62 = vmov 0  ;;  %v508_v59 = vmul.f32 %v3534_v15, %v4071_v55  ;;  %v509_v17 = vmul.f32 %v3534_v15, %v4065_v51  ;;  %v449_v56 = vadd.f32 %v447_v40, %v424_v2 }
  0xbe   :  { %v8029_v62 = vsel %vm4227_vm13, 4294967295, %v8028_v62  ;;  %v471_v29 = vsel %vm8030_vm5, %v469_v0, 0.0  ;;  %v4247_v8 = vstv %s4098_s22  ;;  %v4250_v55 = vstv %s4116_s23  ;;  %vm8033_vm7 = vmand %vm3919_vm8, %vm4127_vm11  ;;  %s5050_s22 = sld [smem:[#allocation5 + $0x56]]  ;;  %s3141_s23 = smov 78  }
  0xbf   :  { %1370 = vrot.lane.b32.xlu1 %v3206_v20, %s3133_s11  ;;  %8031 = vst [vmem:[#allocation104_spill] sm:$0xff] %v4247_v8  ;;  %8032 = vst [vmem:[#allocation105_spill] sm:$0xff] %v4250_v55  ;;  %v472_v51 = vsel %vm8033_vm7, %v470_v18, 0.0  ;;  %v519_v6 = vadd.f32 %v515_v14, %v508_v59  ;;  %v520_v2 = vadd.f32 %v516_v16, %v509_v17  ;;  %1368 = vrot.lane.b32.xlu0 %v3199_v19, %s3133_s11 }
  0xc0   :  { %v4266_v0 = vstv %s4142_s18  ;;  %v540_v18 = vrot.slane %v536_v38, 1  ;;  %v541_v10 = vrot.slane %v537_v58, 1  ;;  %vm8035_vm5 = vcmp.lt.s32.totalorder %v3289_v21, 45  ;;  %s5067_s18 = sld [smem:[#allocation5 + $0x26]] }
  0xc1   :  { %8034 = vst [vmem:[#allocation106_spill] sm:$0xff] %v4266_v0  ;;  %v555_v25 = vsel %vm8035_vm5, %v3795_v31, %v3793_v41  ;;  %vm8036_vm3 = vmmov %vm8035_vm5  ;;  %v4280_v16 = vpop.permute.xlu1 %702  ;;  %v4282_v40 = vpop.permute.xlu0 %700  ;;  %v473_v38 = vadd.f32 %v471_v29, %v448_v53  ;;  %vm8039_vm11 = vcmp.lt.s32.totalorder %v3520_v9, 16  ;;  %vm8040_vm14 = vcmp.ge.s32.totalorder %v3520_v9, 0  ;;  %v8048_v9 = vld [vmem:[#allocation36_spill] sm:$0xff]  ;;  %v8094_v0 = vld [vmem:[#allocation50_spill] sm:$0xff] }
  0xc2   :  { %v556_v14 = vsel %vm8036_vm3, %v3793_v41, %v3795_v31  ;;  %vm8037_vm5 = vmand %vm3767_vm0, %vm3789_vm2  ;;  %v8041_v41 = vmov 0  ;;  %vm7618_vm7 = vcmp.lt.s32.totalorder %v3289_v21, 32  ;;  %v4306_v53 = vstv %s4173_s27  ;;  %s5076_s27 = sld [smem:[#allocation5 + $0x57]] }
  0xc3   :  { %v496_v58 = vsel %vm8037_vm5, %v494_v48, 0.0  ;;  %vm8038_vm3 = vmand %vm3919_vm8, %vm3810_vm4  ;;  %8043 = vst [vmem:[#allocation107_spill] sm:$0xff] %v4306_v53  ;;  %v474_v48 = vadd.f32 %v472_v51, %v449_v56  ;;  %vm8044_vm4 = vcmp.lt.s32.totalorder %v3523_v11, 16  ;;  %v533_v59 = vmul.f32 %v8048_v9, %v4171_v13  ;;  %1777 = vrot.lane.b32.xlu1 %v3611_v39, %s8049_s20  ;;  %v8051_v56 = vld [vmem:[#allocation44_spill] sm:$0xff]  ;;  %v8054_v13 = vld [vmem:[#allocation39_spill] sm:$0xff]  ;;  %1775 = vrot.lane.b32.xlu0 %v3628_v43, %s8049_s20  ;;  %s5142_s20 = sld [smem:[#allocation5 + $0x58]] }
  0xc4   :  { %v497_v31 = vsel %vm8038_vm3, %v495_v4, 0.0  ;;  %vm4300_vm6 = vmand %vm8040_vm14, %vm8039_vm11  ;;  %vm8045_vm3 = vcmp.ge.s32.totalorder %v3523_v11, 0  ;;  %v8046_v4 = vmov 0  ;;  %v534_v17 = vmul.f32 %v8048_v9, %v4165_v54 }
  0xc5   :  { %v8042_v41 = vsel %vm4300_vm6, 4294967295, %v8041_v41  ;;  %vm4314_vm9 = vmand %vm8045_vm3, %vm8044_vm4  ;;  %v4325_v29 = vstv %s4188_s9  ;;  %v561_v51 = vmul.f32 %v8054_v13, %v556_v14  ;;  %v562_v9 = vmul.f32 %v8054_v13, %v555_v25  ;;  %v4348_v3 = vpop.permute.xlu1 %727  ;;  %s5116_s9 = sld [smem:[#allocation5 + $0x27]] }
  0xc6   :  { %v8047_v4 = vsel %vm4314_vm9, 4294967295, %v8046_v4  ;;  %8050 = vst [vmem:[#allocation108_spill] sm:$0xff] %v4325_v29  ;;  %vm8052_vm4 = vmand %vm3767_vm0, %vm4210_vm15  ;;  %v498_v15 = vadd.f32 %v496_v58, %v473_v38  ;;  %v499_v24 = vadd.f32 %v497_v31, %v474_v48  ;;  %v545_v12 = vadd.f32 %v541_v10, %v534_v17  ;;  %v8067_v29 = vld [vmem:[#allocation46_spill] sm:$0xff] }
  0xc7   :  { %v521_v11 = vsel %vm8052_vm4, %v519_v6, 0.0  ;;  %vm8053_vm3 = vmand %vm3919_vm8, %vm4227_vm13  ;;  %v544_v6 = vadd.f32 %v540_v18, %v533_v59  ;;  %vm8055_vm11 = vcmp.lt.s32.totalorder %v3289_v21, 35  ;;  %v4367_v10 = vadd.s32 2, %v3384_v35  ;;  %1395 = vrot.lane.b32.xlu1 %v3206_v20, %s3134_s13  ;;  %1393 = vrot.lane.b32.xlu0 %v3199_v19, %s3134_s13 }
  0xc8   :  { %v522_v54 = vsel %vm8053_vm3, %v520_v2, 0.0  ;;  %vm7614_vm4 = vmand %vm3767_vm0, %vm4300_vm6  ;;  %v4350_v2 = vpop.permute.xlu0 %725  ;;  %v580_v38 = vsel %vm8055_vm11, %v3882_v22, %v3880_v30  ;;  %v4370_v58 = vadd.s32 2, %v3388_v36  ;;  %v523_v31 = vadd.f32 %v521_v11, %v498_v15  ;;  %v8066_v36 = vld [vmem:[#allocation40_spill] sm:$0xff] }
  0xc9   :  { %vm7613_vm3 = vmand %vm3919_vm8, %vm4314_vm9  ;;  %8057 = vst [vmem:[#allocation44_spill] sm:$0xff] %v4367_v10  ;;  %v524_v48 = vadd.f32 %v522_v54, %v499_v24  ;;  %vm8059_vm5 = vcmp.lt.s32.totalorder %v3289_v21, 34  ;;  %v566_v17 = vrot.slane %v562_v9, 1  ;;  %v8063_v9 = vld [vmem:[#allocation41_spill] sm:$0xff]  ;;  %v584_v35 = vmul.f32 %v8066_v36, %v580_v38 }
  0xca   :  { %vm8056_vm14 = vmmov %vm8055_vm11  ;;  %8058 = vst [vmem:[#allocation109_spill] sm:$0xff] %v4370_v58  ;;  %v605_v59 = vsel %vm8059_vm5, %v3976_v5, %v3974_v1  ;;  %v587_v54 = vmul.f32 %v8063_v9, %v580_v38 }
  0xcb   :  { %v581_v18 = vsel %vm8056_vm14, %v3880_v30, %v3882_v22  ;;  %vm8060_vm11 = vmmov %vm8059_vm5  ;;  %v565_v22 = vrot.slane %v561_v51, 1  ;;  %vm8061_vm14 = vcmp.lt.s32.totalorder %v3289_v21, 33  ;;  %v8064_v51 = vld [vmem:[#allocation38_spill] sm:$0xff]  ;;  %v612_v55 = vmul.f32 %v8065_v50, %v605_v59  ;;  %1799 = vrot.lane.b32.xlu1 %v3611_v39, %s8068_s30  ;;  %1797 = vrot.lane.b32.xlu0 %v3628_v43, %s8068_s30  ;;  %s3142_s30 = smov 77  }
  0xcc   :  { %v606_v30 = vsel %vm8060_vm11, %v3974_v1, %v3976_v5  ;;  %v630_v15 = vsel %vm8061_vm14, %v4075_v47, %v4073_v28  ;;  %vm8062_vm5 = vmmov %vm8061_vm14  ;;  %v546_v1 = vsel %vm7614_vm4, %v544_v6, 0.0  ;;  %v547_v5 = vsel %vm7613_vm3, %v545_v12, 0.0 }
  0xcd   :  { %v631_v24 = vsel %vm8062_vm5, %v4073_v28, %v4075_v47  ;;  %v586_v11 = vmul.f32 %v8063_v9, %v581_v18  ;;  %v4407_v28 = vpop.permute.xlu1 %752  ;;  %v4409_v47 = vpop.permute.xlu0 %750  ;;  %v558_v13 = vmul.f32 %v8064_v51, %v556_v14  ;;  %v559_v6 = vmul.f32 %v8064_v51, %v555_v25 }
  0xce   :  { %v611_v53 = vmul.f32 %v8065_v50, %v606_v30  ;;  %v583_v12 = vmul.f32 %v8066_v36, %v581_v18  ;;  %v636_v9 = vmul.f32 %v8067_v29, %v631_v24  ;;  %v637_v58 = vmul.f32 %v8067_v29, %v630_v15 }
  0xcf   :  { %vm8069_vm5 = vcmp.lt.s32.totalorder %v3553_v23, 16  ;;  %vm8070_vm3 = vcmp.ge.s32.totalorder %v3553_v23, 0  ;;  %v8071_v25 = vmov 0  ;;  %v548_v14 = vadd.f32 %v546_v1, %v523_v31  ;;  %1420 = vrot.lane.b32.xlu1 %v3206_v20, %s3135_s8  ;;  %1418 = vrot.lane.b32.xlu0 %v3199_v19, %s3135_s8 }
  0xd0   :  { %vm4426_vm4 = vmand %vm8070_vm3, %vm8069_vm5  ;;  %v4430_v38 = vadd.f32 %v547_v5, %v524_v48  ;;  %v569_v18 = vadd.f32 %v565_v22, %v558_v13  ;;  %v570_v29 = vadd.f32 %v566_v17, %v559_v6  ;;  %vm8073_vm14 = vcmp.lt.s32.totalorder %v3568_v26, 16 }
  0xd1   :  { %v8072_v25 = vsel %vm4426_vm4, 4294967295, %v8071_v25  ;;  %vm8074_vm11 = vcmp.ge.s32.totalorder %v3568_v26, 0  ;;  %v8075_v23 = vmov 0  ;;  %v590_v50 = vrot.slane %v586_v11, 1  ;;  %v4450_v48 = vpop.permute.xlu1 %777  ;;  %v4452_v22 = vpop.permute.xlu0 %775 }
  0xd2   :  { %vm4438_vm2 = vmand %vm8074_vm11, %vm8073_vm14  ;;  %v591_v36 = vrot.slane %v587_v54, 1  ;;  %v655_v31 = vsel %vm7618_vm7, %v4155_v27, %v4153_v57  ;;  %v656_v13 = vsel %vm7618_vm7, %v4153_v57, %v4155_v27  ;;  %vm8077_vm3 = vcmp.lt.s32.totalorder %v3601_v37, 16  ;;  %v8092_v54 = vld [vmem:[#allocation48_spill] sm:$0xff] }
  0xd3   :  { %v8076_v23 = vsel %vm4438_vm2, 4294967295, %v8075_v23  ;;  %vm8078_vm11 = vcmp.ge.s32.totalorder %v3601_v37, 0  ;;  %v8079_v26 = vmov 0  ;;  %v615_v17 = vrot.slane %v611_v53, 1  ;;  %1821 = vrot.lane.b32.xlu1 %v3611_v39, %s8095_s6  ;;  %1819 = vrot.lane.b32.xlu0 %v3628_v43, %s8095_s6  ;;  %s8229_s6 = smov 31  }
  0xd4   :  { %vm4458_vm14 = vmand %vm8078_vm11, %vm8077_vm3  ;;  %v616_v1 = vrot.slane %v612_v55, 1  ;;  %v4463_v5 = vstv %s4352_s17  ;;  %v4466_v11 = vstv %s4372_s15  ;;  %vm8084_vm5 = vcmp.lt.s32.totalorder %v8051_v56, 16  ;;  %s5155_s17 = sld [smem:[#allocation5 + $0x28]] }
  0xd5   :  { %v8080_v26 = vsel %vm4458_vm14, 4294967295, %v8079_v26  ;;  %8082 = vst [vmem:[#allocation111_spill] sm:$0xff] %v4463_v5  ;;  %8083 = vst [vmem:[#allocation112_spill] sm:$0xff] %v4466_v11  ;;  %vm8085_vm7 = vcmp.ge.s32.totalorder %v8051_v56, 0  ;;  %v8086_v57 = vmov 0  ;;  %v640_v27 = vrot.slane %v636_v9, 1  ;;  %v4505_v11 = vpop.permute.xlu0 %800 }
  0xd6   :  { %8081 = vst [vmem:[#allocation110_spill] sm:$0xff] %v8080_v26  ;;  %vm4472_vm9 = vmand %vm8085_vm7, %vm8084_vm5  ;;  %v641_v37 = vrot.slane %v637_v58, 1  ;;  %vm8089_vm3 = vcmp.lt.s32.totalorder %v3289_v21, 31  ;;  %v8091_v56 = vld [vmem:[#allocation42_spill] sm:$0xff]  ;;  %v661_v6 = vmul.f32 %v8092_v54, %v656_v13  ;;  %v662_v51 = vmul.f32 %v8092_v54, %v655_v31  ;;  %v8093_v5 = vld [vmem:[#allocation45_spill] sm:$0xff]  ;;  %s5173_s15 = sld [smem:[#allocation5 + $0x59]] }
  0xd7   :  { %v8087_v57 = vsel %vm4472_vm9, 4294967295, %v8086_v57  ;;  %v680_v53 = vsel %vm8089_vm3, %v4221_v52, %v4219_v60  ;;  %vm8090_vm11 = vmmov %vm8089_vm3  ;;  %v608_v58 = vmul.f32 %v8091_v56, %v606_v30  ;;  %v609_v9 = vmul.f32 %v8091_v56, %v605_v59  ;;  %v4503_v56 = vpop.permute.xlu1 %802  ;;  %1445 = vrot.lane.b32.xlu1 %v3206_v20, %s3136_s10  ;;  %1443 = vrot.lane.b32.xlu0 %v3199_v19, %s3136_s10 }
  0xd8   :  { %8088 = vst [vmem:[#allocation113_spill] sm:$0xff] %v8087_v57  ;;  %v681_v55 = vsel %vm8090_vm11, %v4219_v60, %v4221_v52  ;;  %vm7629_vm7 = vmand %vm3767_vm0, %vm4426_vm4  ;;  %v594_v60 = vadd.f32 %v590_v50, %v583_v12  ;;  %v595_v52 = vadd.f32 %v591_v36, %v584_v35  ;;  %v633_v30 = vmul.f32 %v8093_v5, %v631_v24 }
  0xd9   :  { %vm7630_vm3 = vmand %vm3919_vm8, %vm4438_vm2  ;;  %v634_v59 = vmul.f32 %v8093_v5, %v630_v15  ;;  %v619_v54 = vadd.f32 %v615_v17, %v608_v58  ;;  %v686_v10 = vmul.f32 %v8094_v0, %v681_v55  ;;  %v687_v8 = vmul.f32 %v8094_v0, %v680_v53 }
  0xda   :  { %v571_v35 = vsel %vm7629_vm7, %v569_v18, 0.0  ;;  %v620_v36 = vadd.f32 %v616_v1, %v609_v9  ;;  %v644_v50 = vadd.f32 %v640_v27, %v633_v30  ;;  %vm7633_vm11 = vmand %vm4472_vm9, %vm4000_vm12  ;;  %v572_v24 = vsel %vm7630_vm3, %v570_v29, 0.0  ;;  %v8098_v27 = vld [vmem:[#allocation47_spill] sm:$0xff] }
  0xdb   :  { %v4519_v15 = vadd.f32 %v641_v37, %v634_v59  ;;  %v665_v12 = vrot.slane %v661_v6, 1  ;;  %v666_v18 = vrot.slane %v662_v51, 1  ;;  %vm8096_vm7 = vcmp.lt.s32.totalorder %v3289_v21, 30  ;;  %v4545_v29 = vpop.permute.xlu1 %827  ;;  %v4547_v51 = vpop.permute.xlu0 %825  ;;  %1843 = vrot.lane.b32.xlu1 %v3611_v39, %s8112_s3  ;;  %1841 = vrot.lane.b32.xlu0 %v3628_v43, %s8112_s3  ;;  %s8239_s3 = smov 30  }
  0xdc   :  { %v705_v17 = vsel %vm8096_vm7, %v4282_v40, %v4280_v16  ;;  %vm8097_vm5 = vmmov %vm8096_vm7  ;;  %v658_v37 = vmul.f32 %v8098_v27, %v656_v13  ;;  %v659_v58 = vmul.f32 %v8098_v27, %v655_v31  ;;  %v573_v9 = vadd.f32 %v571_v35, %v548_v14  ;;  %v8101_v13 = vld [vmem:[#allocation52_spill] sm:$0xff] }
  0xdd   :  { %v706_v1 = vsel %vm8097_vm5, %v4280_v16, %v4282_v40  ;;  %vm8099_vm7 = vmand %vm4458_vm14, %vm3942_vm10  ;;  %v690_v40 = vrot.slane %v686_v10, 1  ;;  %v691_v6 = vrot.slane %v687_v8, 1  ;;  %vm8100_vm5 = vcmp.lt.s32.totalorder %v3289_v21, 29 }
  0xde   :  { %v596_v16 = vsel %vm8099_vm7, %v594_v60, 0.0  ;;  %v731_v31 = vsel %vm8100_vm5, %v4348_v3, %v4350_v2  ;;  %v597_v14 = vsel %vm7633_vm11, %v595_v52, 0.0  ;;  %v711_v60 = vmul.f32 %v8101_v13, %v706_v1  ;;  %vm8102_vm7 = vmmov %vm8100_vm5  ;;  %v8103_v52 = vld [vmem:[#allocation49_spill] sm:$0xff] }
  0xdf   :  { %v712_v8 = vmul.f32 %v8101_v13, %v705_v17  ;;  %v730_v10 = vsel %vm8102_vm7, %v4350_v2, %v4348_v3  ;;  %v574_v30 = vadd.f32 %v572_v24, %v4430_v38  ;;  %v4576_v59 = vadd.f32 %v665_v12, %v658_v37  ;;  %v8105_v3 = vld [vmem:[#allocation55_spill] sm:$0xff]  ;;  %v4590_v38 = vpop.permute.xlu1 %852  ;;  %v4592_v24 = vpop.permute.xlu0 %850  ;;  %v8106_v12 = vld [vmem:[#allocation58_spill] sm:$0xff]  ;;  %vm8108_vm11 = vmand %vm4458_vm14, %vm3968_vm1  ;;  %1470 = vrot.lane.b32.xlu1 %v3206_v20, %s3137_s5 }
  0xe0   :  { %v4578_v35 = vadd.f32 %v666_v18, %v659_v58  ;;  %v683_v0 = vmul.f32 %v8103_v52, %v681_v55  ;;  %v684_v27 = vmul.f32 %v8103_v52, %v680_v53  ;;  %vm8104_vm7 = vnez %v8006_v49  ;;  %v8109_v13 = vld [vmem:[#allocation51_spill] sm:$0xff]  ;;  %1468 = vrot.lane.b32.xlu0 %v3199_v19, %s3137_s5 }
  0xe1   :  { %v736_v2 = vmul.f32 %v8105_v3, %v731_v31  ;;  %vm8107_vm5 = vnez %v8012_v45  ;;  %v598_v53 = vadd.f32 %v596_v16, %v573_v9  ;;  %v599_v55 = vadd.f32 %v597_v14, %v574_v30  ;;  %v8121_v30 = vld [vmem:[#allocation57_spill] sm:$0xff] }
  0xe2   :  { %v621_v18 = vsel %vm8108_vm11, %v619_v54, 0.0  ;;  %v4605_v37 = vadd.f32 %v690_v40, %v683_v0  ;;  %v4607_v58 = vadd.f32 %v691_v6, %v684_v27  ;;  %v708_v52 = vmul.f32 %v8109_v13, %v706_v1  ;;  %vm8116_vm8 = vmand %vm4458_vm14, %vm8107_vm5  ;;  %v8117_v40 = vld [vmem:[#allocation53_spill] sm:$0xff] }
  0xe3   :  { %v737_v5 = vmul.f32 %v8105_v3, %v730_v10  ;;  %v709_v9 = vmul.f32 %v8109_v13, %v705_v17  ;;  %v715_v16 = vrot.slane %v711_v60, 1  ;;  %v716_v14 = vrot.slane %v712_v8, 1  ;;  %v4651_v8 = vpop.permute.xlu0 %875  ;;  %1865 = vrot.lane.b32.xlu1 %v3611_v39, %s8132_s14 }
  0xe4   :  { %vm8111_vm11 = vcmp.lt.s32.totalorder %v3289_v21, 19  ;;  %vm8113_vm0 = vnez %v8016_v61  ;;  %v623_v1 = vadd.f32 %v621_v18, %v598_v53  ;;  %v646_v27 = vsel %vm8116_vm8, %v644_v50, 0.0  ;;  %v8124_v18 = vld [vmem:[#allocation60_spill] sm:$0xff]  ;;  %1863 = vrot.lane.b32.xlu0 %v3628_v43, %s8132_s14  ;;  %s8258_s14 = smov 29  }
  0xe5   :  { %v756_v0 = vsel %vm8111_vm11, %v4407_v28, %v4409_v47  ;;  %vm8114_vm3 = vmmov %vm8111_vm11  ;;  %v733_v6 = vmul.f32 %v8117_v40, %v731_v31  ;;  %v740_v60 = vrot.slane %v736_v2, 1  ;;  %v734_v50 = vmul.f32 %v8117_v40, %v730_v10 }
  0xe6   :  { %v755_v54 = vsel %vm8114_vm3, %v4409_v47, %v4407_v28  ;;  %vm8115_vm11 = vmand %vm4472_vm9, %vm8104_vm7  ;;  %vm8118_vm3 = vcmp.lt.s32.totalorder %v3289_v21, 18  ;;  %v741_v31 = vrot.slane %v737_v5, 1  ;;  %v761_v2 = vmul.f32 %v8121_v30, %v756_v0 }
  0xe7   :  { %v622_v17 = vsel %vm8115_vm11, %v620_v36, 0.0  ;;  %v780_v28 = vsel %vm8118_vm3, %v4452_v22, %v4450_v48  ;;  %vm8119_vm1 = vmmov %vm8118_vm3  ;;  %v4649_v36 = vpop.permute.xlu1 %877  ;;  %vm8120_vm11 = vnez %v7953_v33  ;;  %vm8122_vm5 = vnez %v7955_v63  ;;  %1495 = vrot.lane.b32.xlu1 %v3206_v20, %s3138_s2 }
  0xe8   :  { %v781_v47 = vsel %vm8119_vm1, %v4450_v48, %v4452_v22  ;;  %vm7651_vm8 = vmand %vm4458_vm14, %vm8120_vm11  ;;  %v4670_v22 = vadd.f32 %v715_v16, %v708_v52  ;;  %v4672_v10 = vadd.f32 %v716_v14, %v709_v9  ;;  %v762_v5 = vmul.f32 %v8121_v30, %v755_v54  ;;  %v8129_v30 = vld [vmem:[#allocation63_spill] sm:$0xff]  ;;  %1493 = vrot.lane.b32.xlu0 %v3199_v19, %s3138_s2 }
  0xe9   :  { %vm8123_vm7 = vmand %vm4472_vm9, %vm8113_vm0  ;;  %v624_v53 = vadd.f32 %v622_v17, %v599_v55  ;;  %v786_v40 = vmul.f32 %v8124_v18, %v781_v47  ;;  %v787_v3 = vmul.f32 %v8124_v18, %v780_v28  ;;  %vm8125_vm3 = vcmp.lt.s32.totalorder %v3289_v21, 17  ;;  %v4690_v55 = vpop.permute.xlu0 %900 }
  0xea   :  { %v647_v48 = vsel %vm8123_vm7, %v4519_v15, 0.0  ;;  %v806_v15 = vsel %vm8125_vm3, %v4503_v56, %v4505_v11  ;;  %v648_v52 = vadd.f32 %v646_v27, %v623_v1  ;;  %v4685_v9 = vadd.f32 %v740_v60, %v733_v6  ;;  %vm8126_vm3 = vmand %vm4472_vm9, %vm8122_vm5  ;;  %v8127_v6 = vld [vmem:[#allocation56_spill] sm:$0xff] }
  0xeb   :  { %v4688_v16 = vpop.permute.xlu1 %902  ;;  %v649_v14 = vadd.f32 %v647_v48, %v624_v53  ;;  %v671_v17 = vsel %vm7651_vm8, %v4576_v59, 0.0  ;;  %v672_v1 = vsel %vm8126_vm3, %v4578_v35, 0.0  ;;  %v4708_v27 = vadd.f32 %v741_v31, %v734_v50  ;;  %1887 = vrot.lane.b32.xlu1 %v3611_v39, %s8152_s1 }
  0xec   :  { %v758_v60 = vmul.f32 %v8127_v6, %v756_v0  ;;  %v765_v18 = vrot.slane %v761_v2, 1  ;;  %vm8128_vm7 = vcmp.lt.s32.totalorder %v3289_v21, 17  ;;  %v766_v53 = vrot.slane %v762_v5, 1  ;;  %1885 = vrot.lane.b32.xlu0 %v3628_v43, %s8152_s1  ;;  %s8268_s1 = smov 19  }
  0xed   :  { %v805_v48 = vsel %vm8128_vm7, %v4505_v11, %v4503_v56  ;;  %v811_v59 = vmul.f32 %v8129_v30, %v806_v15  ;;  %vm8130_vm8 = vcmp.lt.s32.totalorder %v3289_v21, 16  ;;  %v759_v11 = vmul.f32 %v8127_v6, %v755_v54  ;;  %vm8138_vm7 = vmand %vm4458_vm14, %vm4210_vm15  ;;  %v8139_v54 = vld [vmem:[#allocation59_spill] sm:$0xff]  ;;  %v4751_v31 = vpop.permute.xlu0 %925  ;;  %v8145_v6 = vld [vmem:[#allocation65_spill] sm:$0xff] }
  0xee   :  { %v830_v13 = vsel %vm8130_vm8, %v4547_v51, %v4545_v29  ;;  %vm8131_vm3 = vmmov %vm8130_vm8  ;;  %v790_v56 = vrot.slane %v786_v40, 1  ;;  %v791_v0 = vrot.slane %v787_v3, 1  ;;  %vm8133_vm8 = vcmp.lt.s32.totalorder %v8106_v12, 16 }
  0xef   :  { %v831_v35 = vsel %vm8131_vm3, %v4545_v29, %v4547_v51  ;;  %vm8134_vm1 = vcmp.ge.s32.totalorder %v8106_v12, 0  ;;  %v8135_v29 = vmov 0  ;;  %v696_v51 = vsel %vm8138_vm7, %v4605_v37, 0.0  ;;  %v4749_v50 = vpop.permute.xlu1 %927  ;;  %vm8150_vm15 = vmand %vm4458_vm14, %vm4300_vm6  ;;  %1520 = vrot.lane.b32.xlu1 %v3206_v20, %s3139_s25 }
  0xf0   :  { %vm4737_vm3 = vmand %vm8134_vm1, %vm8133_vm8  ;;  %v783_v3 = vmul.f32 %v8139_v54, %v781_v47  ;;  %v812_v40 = vmul.f32 %v8129_v30, %v805_v48  ;;  %vm8140_vm1 = vcmp.lt.s32.totalorder %v8110_v44, 16  ;;  %vm8141_vm8 = vcmp.ge.s32.totalorder %v8110_v44, 0  ;;  %1518 = vrot.lane.b32.xlu0 %v3199_v19, %s3139_s25 }
  0xf1   :  { %v8136_v29 = vsel %vm4737_vm3, 4294967295, %v8135_v29  ;;  %vm4757_vm5 = vmand %vm8141_vm8, %vm8140_vm1  ;;  %v8142_v12 = vmov 0  ;;  %v673_v2 = vadd.f32 %v671_v17, %v648_v52  ;;  %v674_v5 = vadd.f32 %v672_v1, %v649_v14 }
  0xf2   :  { %8137 = vst [vmem:[#allocation58_spill] sm:$0xff] %v8136_v29  ;;  %v8143_v12 = vsel %vm4757_vm5, 4294967295, %v8142_v12  ;;  %v784_v37 = vmul.f32 %v8139_v54, %v780_v28  ;;  %v836_v47 = vmul.f32 %v8145_v6, %v831_v35  ;;  %v837_v30 = vmul.f32 %v8145_v6, %v830_v13  ;;  %vm8146_vm1 = vmand %vm4472_vm9, %vm4227_vm13  ;;  %v8148_v54 = vld [vmem:[#allocation61_spill] sm:$0xff] }
  0xf3   :  { %8144 = vst [vmem:[#allocation62_spill] sm:$0xff] %v8143_v12  ;;  %v697_v44 = vsel %vm8146_vm1, %v4607_v58, 0.0  ;;  %v769_v52 = vadd.f32 %v765_v18, %v758_v60  ;;  %v770_v28 = vadd.f32 %v766_v53, %v759_v11  ;;  %v815_v14 = vrot.slane %v811_v59, 1  ;;  %v4796_v53 = vpop.permute.xlu1 %952  ;;  %v8151_v11 = vld [vmem:[#allocation64_spill] sm:$0xff]  ;;  %1909 = vrot.lane.b32.xlu1 %v3611_v39, %s8173_s0 }
  0xf4   :  { %vm8147_vm8 = vnez %v8047_v4  ;;  %v698_v17 = vadd.f32 %v696_v51, %v673_v2  ;;  %v794_v1 = vadd.f32 %v790_v56, %v783_v3  ;;  %v4781_v6 = vadd.f32 %v791_v0, %v784_v37  ;;  %1907 = vrot.lane.b32.xlu0 %v3628_v43, %s8173_s0  ;;  %s8277_s0 = smov 18  }
  0xf5   :  { %v808_v42 = vmul.f32 %v8148_v54, %v806_v15  ;;  %v809_v58 = vmul.f32 %v8148_v54, %v805_v48  ;;  %v816_v18 = vrot.slane %v812_v40, 1  ;;  %vm8149_vm7 = vcmp.lt.s32.totalorder %v3289_v21, 15  ;;  %v4798_v15 = vpop.permute.xlu0 %950  ;;  %v8243_v54 = vld [vmem:[#allocation86_spill] sm:$0xff] }
  0xf6   :  { %v856_v60 = vsel %vm8149_vm7, %v4590_v38, %v4592_v24  ;;  %v699_v48 = vadd.f32 %v697_v44, %v674_v5  ;;  %v721_v59 = vsel %vm8150_vm15, %v4670_v22, 0.0  ;;  %v833_v56 = vmul.f32 %v8151_v11, %v831_v35  ;;  %vm8153_vm15 = vmand %vm4472_vm9, %vm8147_vm8 }
  0xf7   :  { %v840_v0 = vrot.slane %v836_v47, 1  ;;  %v841_v51 = vrot.slane %v837_v30, 1  ;;  %v855_v3 = vsel %vm8149_vm7, %v4592_v24, %v4590_v38  ;;  %v819_v40 = vadd.f32 %v815_v14, %v808_v42  ;;  %vm8154_vm7 = vmand %vm4458_vm14, %vm4426_vm4  ;;  %v4851_v5 = vpop.permute.xlu1 %977  ;;  %1545 = vrot.lane.b32.xlu1 %v3206_v20, %s3140_s24 }
  0xf8   :  { %v834_v2 = vmul.f32 %v8151_v11, %v830_v13  ;;  %v722_v38 = vsel %vm8153_vm15, %v4672_v10, 0.0  ;;  %v746_v42 = vsel %vm8154_vm7, %v4685_v9, 0.0  ;;  %v8155_v13 = vld [vmem:[#allocation67_spill] sm:$0xff]  ;;  %vm8156_vm6 = vcmp.lt.s32.totalorder %v3289_v21, 14  ;;  %vm8159_vm7 = vmand %vm4737_vm3, %vm3942_vm10  ;;  %1543 = vrot.lane.b32.xlu0 %v3199_v19, %s3140_s24 }
  0xf9   :  { %v861_v24 = vmul.f32 %v8155_v13, %v856_v60  ;;  %v880_v30 = vsel %vm8156_vm6, %v4651_v8, %v4649_v36  ;;  %vm8157_vm1 = vmmov %vm8156_vm6  ;;  %v723_v10 = vadd.f32 %v721_v59, %v698_v17  ;;  %v820_v9 = vadd.f32 %v816_v18, %v809_v58  ;;  %v4853_v37 = vpop.permute.xlu0 %975  ;;  %v8161_v58 = vld [vmem:[#allocation66_spill] sm:$0xff] }
  0xfa   :  { %v881_v22 = vsel %vm8157_vm1, %v4649_v36, %v4651_v8  ;;  %v862_v35 = vmul.f32 %v8155_v13, %v855_v3  ;;  %vm8158_vm1 = vmand %vm4472_vm9, %vm4438_vm2  ;;  %v771_v8 = vsel %vm8159_vm7, %v769_v52, 0.0  ;;  %v844_v47 = vadd.f32 %v840_v0, %v833_v56  ;;  %v8162_v59 = vld [vmem:[#allocation70_spill] sm:$0xff] }
  0xfb   :  { %v747_v36 = vsel %vm8158_vm1, %v4708_v27, 0.0  ;;  %v4867_v44 = vadd.f32 %v841_v51, %v834_v2  ;;  %vm8160_vm15 = vnez %v7988_v32  ;;  %v724_v14 = vadd.f32 %v722_v38, %v699_v48  ;;  %vm8164_vm6 = vmand %vm4757_vm5, %vm4000_vm12  ;;  %1931 = vrot.lane.b32.xlu1 %v3611_v39, %s8189_s21 }
  0xfc   :  { %v748_v17 = vadd.f32 %v746_v42, %v723_v10  ;;  %v858_v18 = vmul.f32 %v8161_v58, %v856_v60  ;;  %v886_v27 = vmul.f32 %v8162_v59, %v881_v22  ;;  %v887_v13 = vmul.f32 %v8162_v59, %v880_v30  ;;  %vm8168_vm12 = vmand %vm4737_vm3, %vm8160_vm15  ;;  %1929 = vrot.lane.b32.xlu0 %v3628_v43, %s8189_s21  ;;  %s5436_s21 = sld [smem:[#allocation5 + $0x29]] }
  0xfd   :  { %vm8163_vm1 = vnez %v8006_v49  ;;  %v772_v52 = vsel %vm8164_vm6, %v770_v28, 0.0  ;;  %v859_v60 = vmul.f32 %v8161_v58, %v855_v3  ;;  %v865_v48 = vrot.slane %v861_v24, 1  ;;  %v4898_v28 = vpop.permute.xlu1 %1020  ;;  %v4900_v3 = vpop.permute.xlu0 %1018  ;;  %v8169_v24 = vld [vmem:[#allocation69_spill] sm:$0xff] }
  0xfe   :  { %v749_v56 = vadd.f32 %v747_v36, %v724_v14  ;;  %v773_v0 = vadd.f32 %v771_v8, %v748_v17  ;;  %v866_v51 = vrot.slane %v862_v35, 1  ;;  %vm8165_vm9 = vcmp.lt.s32.totalorder %v3289_v21, 13  ;;  %v8174_v14 = vld [vmem:[#allocation72_spill] sm:$0xff] }
  0xff   :  { %v905_v2 = vsel %vm8165_vm9, %v4690_v55, %v4688_v16  ;;  %vm8166_vm7 = vmmov %vm8165_vm9  ;;  %vm8167_vm6 = vnez %v8012_v45  ;;  %v796_v42 = vsel %vm8168_vm12, %v794_v1, 0.0  ;;  %v883_v10 = vmul.f32 %v8169_v24, %v881_v22  ;;  %1570 = vrot.lane.b32.xlu1 %v3206_v20, %s3141_s23 }
 0x100   :  { %v906_v38 = vsel %vm8166_vm7, %v4688_v16, %v4690_v55  ;;  %v884_v35 = vmul.f32 %v8169_v24, %v880_v30  ;;  %vm7673_vm9 = vmand %vm4757_vm5, %vm8113_vm0  ;;  %v774_v16 = vadd.f32 %v772_v52, %v749_v56  ;;  %v890_v36 = vrot.slane %v886_v27, 1  ;;  %v8176_v56 = vld [vmem:[#allocation74_spill] sm:$0xff]  ;;  %1568 = vrot.lane.b32.xlu0 %v3199_v19, %s3141_s23 }
 0x101   :  { %vm8170_vm7 = vmand %vm4757_vm5, %vm8163_vm1  ;;  %v891_v8 = vrot.slane %v887_v13, 1  ;;  %vm8171_vm12 = vcmp.lt.s32.totalorder %v3289_v21, 3  ;;  %v869_v22 = vadd.f32 %v865_v48, %v858_v18  ;;  %v911_v17 = vmul.f32 %v8174_v14, %v906_v38  ;;  %v4946_v13 = vpop.permute.xlu1 %1045  ;;  %v4948_v18 = vpop.permute.xlu0 %1043 }
 0x102   :  { %v797_v55 = vsel %vm8170_vm7, %v4781_v6, 0.0  ;;  %v930_v1 = vsel %vm8171_vm12, %v4751_v31, %v4749_v50  ;;  %vm8172_vm14 = vmmov %vm8171_vm12  ;;  %v912_v6 = vmul.f32 %v8174_v14, %v905_v2  ;;  %v798_v27 = vadd.f32 %v796_v42, %v773_v0 }
 0x103   :  { %v931_v30 = vsel %vm8172_vm14, %v4749_v50, %v4751_v31  ;;  %vm8175_vm14 = vmand %vm4737_vm3, %vm8167_vm6  ;;  %v870_v31 = vadd.f32 %v866_v51, %v859_v60  ;;  %v799_v52 = vadd.f32 %v797_v55, %v774_v16  ;;  %v822_v48 = vsel %vm7673_vm9, %v820_v9, 0.0  ;;  %1953 = vrot.lane.b32.xlu1 %v3611_v39, %s8206_s29 }
 0x104   :  { %v821_v50 = vsel %vm8175_vm14, %v819_v40, 0.0  ;;  %v936_v14 = vmul.f32 %v8176_v56, %v931_v30  ;;  %v937_v24 = vmul.f32 %v8176_v56, %v930_v1  ;;  %vm8177_vm12 = vcmp.lt.s32.totalorder %v3289_v21, 2  ;;  %1951 = vrot.lane.b32.xlu0 %v3628_v43, %s8206_s29  ;;  %s5513_s29 = sld [smem:[#allocation5 + $0x5b]] }
 0x105   :  { %v955_v40 = vsel %vm8177_vm12, %v4798_v15, %v4796_v53  ;;  %vm8178_vm14 = vmmov %vm8177_vm12  ;;  %v894_v0 = vadd.f32 %v890_v36, %v883_v10  ;;  %v895_v51 = vadd.f32 %v891_v8, %v884_v35  ;;  %vm8179_vm9 = vnez %v7955_v63  ;;  %v8185_v36 = vld [vmem:[#allocation77_spill] sm:$0xff] }
 0x106   :  { %v956_v60 = vsel %vm8178_vm14, %v4796_v53, %v4798_v15  ;;  %v823_v9 = vadd.f32 %v821_v50, %v798_v27  ;;  %vm8180_vm12 = vmand %vm4737_vm3, %vm8120_vm11  ;;  %v915_v15 = vrot.slane %v911_v17, 1  ;;  %v916_v42 = vrot.slane %v912_v6, 1  ;;  %v4996_v6 = vpop.permute.xlu1 %1070  ;;  %v8188_v27 = vld [vmem:[#allocation79_spill] sm:$0xff] }
 0x107   :  { %v846_v53 = vsel %vm8180_vm12, %v844_v47, 0.0  ;;  %vm8181_vm14 = vcmp.lt.s32.totalorder %v3289_v21, 1  ;;  %vm8183_vm0 = vnez %v8025_v34  ;;  %v8184_v47 = vld [vmem:[#allocation71_spill] sm:$0xff]  ;;  %v961_v8 = vmul.f32 %v8185_v36, %v956_v60  ;;  %vm8192_vm11 = vmand %vm4757_vm5, %vm4227_vm13  ;;  %1595 = vrot.lane.b32.xlu1 %v3206_v20, %s3142_s30 }
 0x108   :  { %v980_v10 = vsel %vm8181_vm14, %v4853_v37, %v4851_v5  ;;  %vm8182_vm7 = vmmov %vm8181_vm14  ;;  %v908_v16 = vmul.f32 %v8184_v47, %v906_v38  ;;  %v909_v55 = vmul.f32 %v8184_v47, %v905_v2  ;;  %v962_v17 = vmul.f32 %v8185_v36, %v955_v40  ;;  %1593 = vrot.lane.b32.xlu0 %v3199_v19, %s3142_s30 }
 0x109   :  { %v981_v35 = vsel %vm8182_vm7, %v4851_v5, %v4853_v37  ;;  %v4998_v5 = vpop.permute.xlu0 %1068  ;;  %v940_v37 = vrot.slane %v936_v14, 1  ;;  %v941_v50 = vrot.slane %v937_v24, 1  ;;  %vm8186_vm12 = vnez %v8042_v41  ;;  %vm8187_vm14 = vmand %vm4757_vm5, %vm8179_vm9 }
 0x10a   :  { %v824_v2 = vadd.f32 %v822_v48, %v799_v52  ;;  %v847_v38 = vsel %vm8187_vm14, %v4867_v44, 0.0  ;;  %v986_v36 = vmul.f32 %v8188_v27, %v981_v35  ;;  %v987_v56 = vmul.f32 %v8188_v27, %v980_v10  ;;  %vm8190_vm7 = vmand %vm4737_vm3, %vm8183_vm0  ;;  %v8191_v48 = vld [vmem:[#allocation73_spill] sm:$0xff]  ;;  %v5035_v59 = vpop.permute.xlu1 %1095 }
 0x10b   :  { %v848_v24 = vadd.f32 %v846_v53, %v823_v9  ;;  %v871_v14 = vsel %vm8190_vm7, %v869_v22, 0.0  ;;  %v919_v44 = vadd.f32 %v915_v15, %v908_v16  ;;  %v920_v52 = vadd.f32 %v916_v42, %v909_v55  ;;  %vm8193_vm14 = vmand %vm4737_vm3, %vm8186_vm12  ;;  %v8195_v55 = vld [vmem:[#allocation76_spill] sm:$0xff]  ;;  %1975 = vrot.lane.b32.xlu1 %v3611_v39, %s8229_s6 }
 0x10c   :  { %v933_v47 = vmul.f32 %v8191_v48, %v931_v30  ;;  %v934_v27 = vmul.f32 %v8191_v48, %v930_v1  ;;  %v965_v9 = vrot.slane %v961_v8, 1  ;;  %v966_v53 = vrot.slane %v962_v17, 1  ;;  %vm8194_vm7 = vmand %vm4757_vm5, %vm8147_vm8  ;;  %1973 = vrot.lane.b32.xlu0 %v3628_v43, %s8229_s6  ;;  %v8241_v48 = vld [vmem:[#allocation96_spill] sm:$0xff]  ;;  %s8329_s6 = smov 13  }
 0x10d   :  { %v5037_v58 = vpop.permute.xlu0 %1093  ;;  %v849_v1 = vadd.f32 %v847_v38, %v824_v2  ;;  %v872_v30 = vsel %vm8192_vm11, %v870_v31, 0.0  ;;  %v896_v42 = vsel %vm8193_vm14, %v894_v0, 0.0  ;;  %v897_v16 = vsel %vm8194_vm7, %v895_v51, 0.0  ;;  %v8196_v0 = vld [vmem:[#allocation82_spill] sm:$0xff]  ;;  %vm8201_vm13 = vmand %vm4737_vm3, %vm4426_vm4 }
 0x10e   :  { %v944_v22 = vadd.f32 %v940_v37, %v933_v47  ;;  %v945_v15 = vadd.f32 %v941_v50, %v934_v27  ;;  %v958_v8 = vmul.f32 %v8195_v55, %v956_v60  ;;  %v959_v31 = vmul.f32 %v8195_v55, %v955_v40  ;;  %vm8202_vm7 = vmand %vm4757_vm5, %vm4438_vm2  ;;  %v8203_v2 = vld [vmem:[#allocation78_spill] sm:$0xff] }
 0x10f   :  { %v990_v47 = vrot.slane %v986_v36, 1  ;;  %v991_v17 = vrot.slane %v987_v56, 1  ;;  %vm8197_vm14 = vnez %v8196_v0  ;;  %vm8198_vm11 = vnez %v7995_v7  ;;  %v8199_v56 = vld [vmem:[#allocation85_spill] sm:$0xff]  ;;  %1997 = vrot.lane.b32.xlu1 %v3611_v39, %s8239_s3 }
 0x110   :  { %vm8200_vm8 = vnez %v8199_v56  ;;  %v873_v40 = vadd.f32 %v871_v14, %v848_v24  ;;  %v874_v60 = vadd.f32 %v872_v30, %v849_v1  ;;  %v921_v51 = vsel %vm8201_vm13, %v919_v44, 0.0  ;;  %v5094_v24 = vpop.permute.xlu1 %1120  ;;  %1995 = vrot.lane.b32.xlu0 %v3628_v43, %s8239_s3  ;;  %s5662_s3 = sld [smem:[#allocation5 + $0x2c]] }
 0x111   :  { %v922_v36 = vsel %vm8202_vm7, %v920_v52, 0.0  ;;  %v969_v37 = vadd.f32 %v965_v9, %v958_v8  ;;  %v970_v50 = vadd.f32 %v966_v53, %v959_v31  ;;  %v983_v38 = vmul.f32 %v8203_v2, %v981_v35  ;;  %v5096_v14 = vpop.permute.xlu0 %1118  ;;  %vm8208_vm9 = vmand %vm8200_vm8, %vm8198_vm11 }
 0x112   :  { %v984_v27 = vmul.f32 %v8203_v2, %v980_v10  ;;  %vm8204_vm12 = vcmp.lt.s32.totalorder %v3289_v21, 127  ;;  %v898_v10 = vadd.f32 %v896_v42, %v873_v40  ;;  %v899_v52 = vadd.f32 %v897_v16, %v874_v60  ;;  %v8212_v42 = vld [vmem:[#allocation81_spill] sm:$0xff] }
 0x113   :  { %v1023_v44 = vsel %vm8204_vm12, %v4900_v3, %v4898_v28  ;;  %vm8205_vm7 = vmmov %vm8204_vm12  ;;  %v994_v9 = vadd.f32 %v990_v47, %v983_v38  ;;  %vm8209_vm13 = vcmp.lt.s32.totalorder %v3289_v21, 126  ;;  %v5171_v40 = vstv %s5050_s22  ;;  %2019 = vrot.lane.b32.xlu1 %v3611_v39, %s8258_s14  ;;  %s8286_s22 = smov 17  }
 0x114   :  { %v1024_v35 = vsel %vm8205_vm7, %v4898_v28, %v4900_v3  ;;  %v995_v53 = vadd.f32 %v991_v17, %v984_v27  ;;  %vm8207_vm7 = vmand %vm8197_vm14, %vm3942_vm10  ;;  %v947_v3 = vsel %vm8208_vm9, %v945_v15, 0.0  ;;  %v1048_v1 = vsel %vm8209_vm13, %v4948_v18, %v4946_v13  ;;  %v5151_v31 = vpop.permute.xlu1 %1145  ;;  %8216 = vst [vmem:[#allocation115_spill] sm:$0xff] %v5171_v40  ;;  %2017 = vrot.lane.b32.xlu0 %v3628_v43, %s8258_s14  ;;  %s5676_s14 = sld [smem:[#allocation5 + $0x5d]] }
 0x115   :  { %v946_v28 = vsel %vm8207_vm7, %v944_v22, 0.0  ;;  %vm8210_vm12 = vmmov %vm8209_vm13  ;;  %vm8211_vm7 = vnez %v8016_v61  ;;  %v923_v22 = vadd.f32 %v921_v51, %v898_v10  ;;  %v924_v15 = vadd.f32 %v922_v36, %v899_v52  ;;  %v8217_v36 = vld [vmem:[#allocation84_spill] sm:$0xff]  ;;  %v8220_v10 = vld [vmem:[#allocation91_spill] sm:$0xff] }
 0x116   :  { %v1049_v30 = vsel %vm8210_vm12, %v4946_v13, %v4948_v18  ;;  %v1029_v16 = vmul.f32 %v8212_v42, %v1023_v44  ;;  %v1030_v8 = vmul.f32 %v8212_v42, %v1024_v35  ;;  %v5153_v13 = vpop.permute.xlu0 %1143  ;;  %vm8213_vm12 = vmand %vm8197_vm14, %vm8160_vm15  ;;  %v5168_v17 = vstv %s5039_s19  ;;  %s5454_s19 = sld [smem:[#allocation5 + $0x5a]] }
 0x117   :  { %v971_v18 = vsel %vm8213_vm12, %v969_v37, 0.0  ;;  %vm8214_vm9 = vmand %vm8200_vm8, %vm8163_vm1  ;;  %8215 = vst [vmem:[#allocation114_spill] sm:$0xff] %v5168_v17  ;;  %v948_v60 = vadd.f32 %v946_v28, %v923_v22  ;;  %v949_v51 = vadd.f32 %v947_v3, %v924_v15  ;;  %v1054_v38 = vmul.f32 %v8217_v36, %v1048_v1  ;;  %2041 = vrot.lane.b32.xlu1 %v3611_v39, %s8268_s1 }
 0x118   :  { %v972_v47 = vsel %vm8214_vm9, %v970_v50, 0.0  ;;  %v1055_v37 = vmul.f32 %v8217_v36, %v1049_v30  ;;  %vm8218_vm9 = vmand %vm8197_vm14, %vm8167_vm6  ;;  %v5195_v20 = vstv %s5067_s18  ;;  %v5198_v52 = vstv %s5076_s27  ;;  %v5204_v2 = vpop.permute.xlu1 %1170  ;;  %2039 = vrot.lane.b32.xlu0 %v3628_v43, %s8268_s1  ;;  %s5501_s18 = sld [smem:[#allocation5 + $0x2a]]  ;;  %s8297_s27 = smov 16  }
 0x119   :  { %v996_v50 = vsel %vm8218_vm9, %v994_v9, 0.0  ;;  %vm8219_vm13 = vmand %vm8200_vm8, %vm8211_vm7  ;;  %8221 = vst [vmem:[#allocation91_spill] sm:$0xff] %v5195_v20  ;;  %v973_v28 = vadd.f32 %v971_v18, %v948_v60  ;;  %v974_v3 = vadd.f32 %v972_v47, %v949_v51  ;;  %v8223_v9 = vld [vmem:[#allocation80_spill] sm:$0xff]  ;;  %v1033_v36 = vrot.slane %v1029_v16, 1  ;;  %s8343_s1 = smov 3  }
 0x11a   :  { %v997_v27 = vsel %vm8219_vm13, %v995_v53, 0.0  ;;  %8222 = vst [vmem:[#allocation116_spill] sm:$0xff] %v5198_v52  ;;  %v1026_v22 = vmul.f32 %v8223_v9, %v1023_v44  ;;  %v1027_v15 = vmul.f32 %v8223_v9, %v1024_v35  ;;  %v1034_v42 = vrot.slane %v1030_v8, 1  ;;  %v8224_v53 = vld [vmem:[#allocation92_spill] sm:$0xff]  ;;  %v5214_v35 = vpop.permute.xlu0 %1168  ;;  %vm8246_vm7 = vmand %vm8197_vm14, %vm8183_vm0 }
 0x11b   :  { %vm8225_vm5 = vcmp.lt.s32.totalorder %v3289_v21, 125  ;;  %v998_v16 = vadd.f32 %v996_v50, %v973_v28  ;;  %v999_v8 = vadd.f32 %v997_v27, %v974_v3  ;;  %v1058_v18 = vrot.slane %v1054_v38, 1  ;;  %v8233_v3 = vld [vmem:[#allocation87_spill] sm:$0xff]  ;;  %2063 = vrot.lane.b32.xlu1 %v3611_v39, %s8277_s0 }
 0x11c   :  { %v1073_v19 = vsel %vm8225_vm5, %v4998_v5, %v4996_v6  ;;  %vm8226_vm12 = vmmov %vm8225_vm5  ;;  %v1059_v47 = vrot.slane %v1055_v37, 1  ;;  %vm8227_vm9 = vcmp.lt.s32.totalorder %v3289_v21, 115  ;;  %v5232_v37 = vstv %s5116_s9  ;;  %v5239_v9 = vpop.permute.xlu1 %1195  ;;  %2061 = vrot.lane.b32.xlu0 %v3628_v43, %s8277_s0  ;;  %s5551_s9 = sld [smem:[#allocation5 + $0x2b]] }
 0x11d   :  { %v1074_v44 = vsel %vm8226_vm12, %v4996_v6, %v4998_v5  ;;  %v1098_v60 = vsel %vm8227_vm9, %v5037_v58, %v5035_v59  ;;  %vm8228_vm5 = vmmov %vm8227_vm9  ;;  %v8230_v6 = vld [vmem:[#allocation83_spill] sm:$0xff]  ;;  %8231 = vst [vmem:[#allocation92_spill] sm:$0xff] %v5232_v37  ;;  %v5235_v50 = vstv %s5142_s20  ;;  %v1037_v27 = vadd.f32 %v1033_v36, %v1026_v22  ;;  %s8310_s20 = smov 15   ;;  %s5731_s0 = sld [smem:[#allocation5 + $0x2d]] }
 0x11e   :  { %v1099_v51 = vsel %vm8228_vm5, %v5035_v59, %v5037_v58  ;;  %v1051_v5 = vmul.f32 %v8230_v6, %v1048_v1  ;;  %v1052_v38 = vmul.f32 %v8230_v6, %v1049_v30  ;;  %8232 = vst [vmem:[#allocation117_spill] sm:$0xff] %v5235_v50  ;;  %v1038_v28 = vadd.f32 %v1034_v42, %v1027_v15  ;;  %v8234_v1 = vld [vmem:[#allocation90_spill] sm:$0xff]  ;;  %v5247_v55 = vpop.permute.xlu0 %1193 }
 0x11f   :  { %v1079_v58 = vmul.f32 %v8233_v3, %v1073_v19  ;;  %v1080_v59 = vmul.f32 %v8233_v3, %v1074_v44  ;;  %v1104_v30 = vmul.f32 %v8234_v1, %v1098_v60  ;;  %v1105_v6 = vmul.f32 %v8234_v1, %v1099_v51  ;;  %v8240_v1 = vld [vmem:[#allocation95_spill] sm:$0xff]  ;;  %2085 = vrot.lane.b32.xlu1 %v3611_v39, %s8286_s22 }
 0x120   :  { %v5251_v42 = vstv %s5155_s17  ;;  %v5254_v36 = vstv %s5173_s15  ;;  %vm8237_vm5 = vnez %v8029_v62  ;;  %vm8238_vm3 = vnez %v8042_v41  ;;  %2083 = vrot.lane.b32.xlu0 %v3628_v43, %s8286_s22  ;;  %s5565_s17 = sld [smem:[#allocation5 + $0x5c]]  ;;  %s8316_s15 = smov 14  }
 0x121   :  { %8235 = vst [vmem:[#allocation118_spill] sm:$0xff] %v5251_v42  ;;  %8236 = vst [vmem:[#allocation119_spill] sm:$0xff] %v5254_v36  ;;  %v1062_v22 = vadd.f32 %v1058_v18, %v1051_v5  ;;  %v1063_v15 = vadd.f32 %v1059_v47, %v1052_v38  ;;  %v1016_v3 = vadd.f32 %v8240_v1, %v998_v16  ;;  %vm8242_vm9 = vnez %v8047_v4  ;;  %v5284_v47 = vpop.permute.xlu1 %1220  ;;  %s8360_s22 = smov 1  }
 0x122   :  { %v1017_v11 = vadd.f32 %v8241_v48, %v999_v8  ;;  %v1076_v12 = vmul.f32 %v8243_v54, %v1073_v19  ;;  %v1077_v29 = vmul.f32 %v8243_v54, %v1074_v44  ;;  %vm8244_vm12 = vcmp.lt.s32.totalorder %v3289_v21, 114 }
 0x123   :  { %v1123_v18 = vsel %vm8244_vm12, %v5096_v14, %v5094_v24  ;;  %vm8245_vm13 = vmmov %vm8244_vm12  ;;  %v1083_v48 = vrot.slane %v1079_v58, 1  ;;  %v1084_v8 = vrot.slane %v1080_v59, 1  ;;  %v1039_v19 = vsel %vm8246_vm7, %v1037_v27, 0.0  ;;  %v5308_v27 = vpop.permute.xlu0 %1218  ;;  %2107 = vrot.lane.b32.xlu1 %v3611_v39, %s8297_s27 }
 0x124   :  { %v1124_v16 = vsel %vm8245_vm13, %v5094_v24, %v5096_v14  ;;  %vm8247_vm12 = vmand %vm8200_vm8, %vm8237_vm5  ;;  %v1108_v24 = vrot.slane %v1104_v30, 1  ;;  %v1109_v14 = vrot.slane %v1105_v6, 1  ;;  %vm8248_vm6 = vcmp.lt.s32.totalorder %v3289_v21, 113  ;;  %2105 = vrot.lane.b32.xlu0 %v3628_v43, %s8297_s27  ;;  %s5824_s27 = sld [smem:[#allocation5 + $0x5f]] }
 0x125   :  { %v1040_v44 = vsel %vm8247_vm12, %v1038_v28, 0.0  ;;  %v1148_v5 = vsel %vm8248_vm6, %v5153_v13, %v5151_v31  ;;  %vm8249_vm7 = vmmov %vm8248_vm6  ;;  %vm8252_vm6 = vcmp.lt.s32.totalorder %v8220_v10, 16  ;;  %vm8253_vm5 = vcmp.ge.s32.totalorder %v8220_v10, 0  ;;  %v8264_v10 = vld [vmem:[#allocation88_spill] sm:$0xff] }
 0x126   :  { %v1149_v38 = vsel %vm8249_vm7, %v5151_v31, %v5153_v13  ;;  %vm8250_vm12 = vmand %vm8197_vm14, %vm8238_vm3  ;;  %v8254_v31 = vmov 0  ;;  %v8257_v13 = vld [vmem:[#allocation94_spill] sm:$0xff]  ;;  %v8261_v1 = vmov 0  ;;  %v1101_v30 = vmul.f32 %v8264_v10, %v1098_v60 }
 0x127   :  { %v1064_v28 = vsel %vm8250_vm12, %v1062_v22, 0.0  ;;  %vm8251_vm13 = vmand %vm8200_vm8, %vm8242_vm9  ;;  %v1129_v58 = vmul.f32 %v8257_v13, %v1123_v18  ;;  %v1130_v59 = vmul.f32 %v8257_v13, %v1124_v16  ;;  %vm8259_vm12 = vcmp.lt.s32.totalorder %v8224_v53, 16  ;;  %v8265_v13 = vld [vmem:[#allocation98_spill] sm:$0xff]  ;;  %2129 = vrot.lane.b32.xlu1 %v3611_v39, %s8310_s20 }
 0x128   :  { %v1065_v6 = vsel %vm8251_vm13, %v1063_v15, 0.0  ;;  %vm5324_vm0 = vmand %vm8253_vm5, %vm8252_vm6  ;;  %vm8260_vm13 = vcmp.ge.s32.totalorder %v8224_v53, 0  ;;  %v1102_v22 = vmul.f32 %v8264_v10, %v1099_v51  ;;  %v1041_v15 = vadd.f32 %v1039_v19, %v1016_v3  ;;  %v5365_v10 = vpop.permute.xlu0 %1243  ;;  %2127 = vrot.lane.b32.xlu0 %v3628_v43, %s8310_s20  ;;  %s8386_s20 = smov 125  }
 0x129   :  { %v8255_v31 = vsel %vm5324_vm0, 4294967295, %v8254_v31  ;;  %vm5337_vm9 = vmand %vm8260_vm13, %vm8259_vm12  ;;  %v1042_v54 = vadd.f32 %v1040_v44, %v1017_v11  ;;  %v1154_v53 = vmul.f32 %v8265_v13, %v1148_v5  ;;  %v1155_v57 = vmul.f32 %v8265_v13, %v1149_v38  ;;  %v5359_v11 = vpop.permute.xlu1 %1245 }
 0x12a   :  { %8256 = vst [vmem:[#allocation95_spill] sm:$0xff] %v8255_v31  ;;  %v8262_v1 = vsel %vm5337_vm9, 4294967295, %v8261_v1  ;;  %vm7722_vm5 = vmand %vm8200_vm8, %vm4438_vm2  ;;  %vm8266_vm6 = vcmp.lt.s32.totalorder %v3289_v21, 112  ;;  %v1087_v3 = vadd.f32 %v1083_v48, %v1076_v12  ;;  %v1088_v19 = vadd.f32 %v1084_v8, %v1077_v29 }
 0x12b   :  { %8263 = vst [vmem:[#allocation96_spill] sm:$0xff] %v8262_v1  ;;  %v1173_v60 = vsel %vm8266_vm6, %v5214_v35, %v5204_v2  ;;  %vm8267_vm12 = vmmov %vm8266_vm6  ;;  %v1112_v44 = vadd.f32 %v1108_v24, %v1101_v30  ;;  %v1113_v13 = vadd.f32 %v1109_v14, %v1102_v22  ;;  %v1133_v26 = vrot.slane %v1129_v58, 1  ;;  %v8270_v24 = vld [vmem:[#allocation100_spill] sm:$0xff]  ;;  %2151 = vrot.lane.b32.xlu1 %v3611_v39, %s8316_s15 }
 0x12c   :  { %v1174_v51 = vsel %vm8267_vm12, %v5204_v2, %v5214_v35  ;;  %v1134_v2 = vrot.slane %v1130_v59, 1  ;;  %v1066_v29 = vadd.f32 %v1064_v28, %v1041_v15  ;;  %v1067_v12 = vadd.f32 %v1065_v6, %v1042_v54  ;;  %v8269_v35 = vld [vmem:[#allocation93_spill] sm:$0xff]  ;;  %vm8273_vm13 = vmand %vm8197_vm14, %vm4426_vm4  ;;  %v5411_v6 = vpop.permute.xlu0 %1268  ;;  %2149 = vrot.lane.b32.xlu0 %v3628_v43, %s8316_s15  ;;  %s8403_s15 = smov 114  }
 0x12d   :  { %v1126_v48 = vmul.f32 %v8269_v35, %v1123_v18  ;;  %v1127_v8 = vmul.f32 %v8269_v35, %v1124_v16  ;;  %v1179_v14 = vmul.f32 %v8270_v24, %v1173_v60  ;;  %v1180_v30 = vmul.f32 %v8270_v24, %v1174_v51  ;;  %v5389_v16 = vpop.permute.xlu1 %1270  ;;  %v8278_v24 = vld [vmem:[#allocation102_spill] sm:$0xff] }
 0x12e   :  { %v1158_v58 = vrot.slane %v1154_v53, 1  ;;  %v1159_v59 = vrot.slane %v1155_v57, 1  ;;  %vm8271_vm12 = vcmp.lt.s32.totalorder %v3289_v21, 111  ;;  %v1089_v28 = vsel %vm8273_vm13, %v1087_v3, 0.0  ;;  %v8276_v53 = vld [vmem:[#allocation97_spill] sm:$0xff] }
 0x12f   :  { %v1198_v54 = vsel %vm8271_vm12, %v5247_v55, %v5239_v9  ;;  %vm8272_vm6 = vmmov %vm8271_vm12  ;;  %v1090_v57 = vsel %vm7722_vm5, %v1088_v19, 0.0  ;;  %v1137_v22 = vadd.f32 %v1133_v26, %v1126_v48  ;;  %v1138_v15 = vadd.f32 %v1134_v2, %v1127_v8  ;;  %v8281_v8 = vld [vmem:[#allocation99_spill] sm:$0xff]  ;;  %2173 = vrot.lane.b32.xlu1 %v3611_v39, %s8329_s6 }
 0x130   :  { %v1199_v18 = vsel %vm8272_vm6, %v5239_v9, %v5247_v55  ;;  %vm8274_vm12 = vmand %vm5324_vm0, %vm3942_vm10  ;;  %v1151_v3 = vmul.f32 %v8276_v53, %v1148_v5  ;;  %v1152_v19 = vmul.f32 %v8276_v53, %v1149_v38  ;;  %v1204_v35 = vmul.f32 %v8278_v24, %v1198_v54  ;;  %2171 = vrot.lane.b32.xlu0 %v3628_v43, %s8329_s6  ;;  %s8426_s6 = smov 111  }
 0x131   :  { %v1114_v55 = vsel %vm8274_vm12, %v1112_v44, 0.0  ;;  %vm8275_vm6 = vmand %vm5337_vm9, %vm8198_vm11  ;;  %v1184_v44 = vrot.slane %v1180_v30, 1  ;;  %v1205_v56 = vmul.f32 %v8278_v24, %v1199_v18  ;;  %vm8279_vm5 = vnez %v8012_v45  ;;  %v5434_v38 = vpop.permute.xlu1 %1295 }
 0x132   :  { %v1115_v9 = vsel %vm8275_vm6, %v1113_v13, 0.0  ;;  %v1183_v13 = vrot.slane %v1179_v14, 1  ;;  %v1162_v26 = vadd.f32 %v1158_v58, %v1151_v3  ;;  %v1163_v5 = vadd.f32 %v1159_v59, %v1152_v19  ;;  %vm8284_vm6 = vmand %vm5324_vm0, %vm8160_vm15  ;;  %v8292_v19 = vld [vmem:[#allocation101_spill] sm:$0xff] }
 0x133   :  { %v1091_v2 = vadd.f32 %v1089_v28, %v1066_v29  ;;  %v1092_v48 = vadd.f32 %v1090_v57, %v1067_v12  ;;  %vm8280_vm12 = vnez %v8016_v61  ;;  %v1176_v14 = vmul.f32 %v8281_v8, %v1173_v60  ;;  %v5452_v12 = vpop.permute.xlu0 %1293  ;;  %2195 = vrot.lane.b32.xlu1 %v3611_v39, %s8343_s1 }
 0x134   :  { %v1177_v30 = vmul.f32 %v8281_v8, %v1174_v51  ;;  %vm8282_vm7 = vcmp.lt.s32.totalorder %v3289_v21, 110  ;;  %v1139_v60 = vsel %vm8284_vm6, %v1137_v22, 0.0  ;;  %v1208_v57 = vrot.slane %v1204_v35, 1  ;;  %vm8288_vm6 = vmand %vm5324_vm0, %vm8279_vm5  ;;  %2193 = vrot.lane.b32.xlu0 %v3628_v43, %s8343_s1  ;;  %s6161_s1 = sld [smem:[#allocation5 + $0x60]] }
 0x135   :  { %v1223_v58 = vsel %vm8282_vm7, %v5308_v27, %v5284_v47  ;;  %vm8283_vm13 = vmmov %vm8282_vm7  ;;  %v1187_v59 = vadd.f32 %v1183_v13, %v1176_v14  ;;  %v1209_v22 = vrot.slane %v1205_v56, 1  ;;  %vm8290_vm8 = vnez %v7955_v63  ;;  %v8291_v56 = vld [vmem:[#allocation104_spill] sm:$0xff]  ;;  %v1321_v3 = vpop.permute.xlu1 %1320 }
 0x136   :  { %v1224_v29 = vsel %vm8283_vm13, %v5284_v47, %v5308_v27  ;;  %vm8285_vm7 = vmand %vm5337_vm9, %vm8163_vm1  ;;  %v1116_v47 = vadd.f32 %v1114_v55, %v1091_v2  ;;  %v1117_v27 = vadd.f32 %v1115_v9, %v1092_v48  ;;  %vm8287_vm13 = vnez %v7953_v33 }
 0x137   :  { %v1140_v51 = vsel %vm8285_vm7, %v1138_v15, 0.0  ;;  %v1188_v28 = vadd.f32 %v1184_v44, %v1177_v30  ;;  %v1164_v15 = vsel %vm8288_vm6, %v1162_v26, 0.0  ;;  %vm8289_vm7 = vmand %vm5337_vm9, %vm8280_vm12  ;;  %v1229_v35 = vmul.f32 %v8291_v56, %v1223_v58  ;;  %v1319_v2 = vpop.permute.xlu0 %1318 }
 0x138   :  { %v1165_v55 = vsel %vm8289_vm7, %v1163_v5, 0.0  ;;  %v1230_v9 = vmul.f32 %v8291_v56, %v1224_v29  ;;  %v1201_v13 = vmul.f32 %v8292_v19, %v1198_v54  ;;  %v1202_v44 = vmul.f32 %v8292_v19, %v1199_v18  ;;  %v8307_v19 = vld [vmem:[#allocation103_spill] sm:$0xff] }
 0x139   :  { %vm8293_vm6 = vcmp.lt.s32.totalorder %v3289_v21, 109  ;;  %vm8295_vm14 = vcmp.lt.s32.totalorder %v3289_v21, 97  ;;  %v1141_v18 = vadd.f32 %v1139_v60, %v1116_v47  ;;  %v1142_v14 = vadd.f32 %v1140_v51, %v1117_v27  ;;  %v8301_v51 = vld [vmem:[#allocation44_spill] sm:$0xff] }
 0x13a   :  { %v1248_v26 = vsel %vm8293_vm6, %v5365_v10, %v5359_v11  ;;  %vm8294_vm7 = vmmov %vm8293_vm6  ;;  %v5505_v48 = vsel %vm8295_vm14, %v1319_v2, %v1321_v3  ;;  %v1212_v30 = vadd.f32 %v1208_v57, %v1201_v13  ;;  %v1213_v60 = vadd.f32 %v1209_v22, %v1202_v44  ;;  %v8304_v57 = vld [vmem:[#allocation109_spill] sm:$0xff]  ;;  %v5541_v22 = vpop.permute.xlu1 %1733 }
 0x13b   :  { %v1249_v5 = vsel %vm8294_vm7, %v5359_v11, %v5365_v10  ;;  %vm8296_vm12 = vmmov %vm8295_vm14  ;;  %v1233_v47 = vrot.slane %v1229_v35, 1  ;;  %v1234_v27 = vrot.slane %v1230_v9, 1  ;;  %v5543_v13 = vpop.permute.xlu0 %1731  ;;  %v5546_v44 = vstv %s5436_s21  ;;  %s5749_s21 = sld [smem:[#allocation5 + $0x5e]] }
 0x13c   :  { %v5509_v54 = vsel %vm8296_vm12, %v1321_v3, %v1319_v2  ;;  %vm8298_vm6 = vmand %vm5324_vm0, %vm8287_vm13  ;;  %vm8300_vm12 = vnez %v8025_v34  ;;  %8305 = vst [vmem:[#allocation44_spill] sm:$0xff] %v5546_v44  ;;  %v5549_v2 = vstv %s5454_s19  ;;  %v1166_v35 = vadd.f32 %v1164_v15, %v1141_v18  ;;  %s8349_s19 = smov 2  }
 0x13d   :  { %v1189_v10 = vsel %vm8298_vm6, %v1187_v59, 0.0  ;;  %vm8299_vm14 = vmand %vm5337_vm9, %vm8290_vm8  ;;  %vm8302_vm6 = vnez %v8029_v62  ;;  %v8303_v59 = vld [vmem:[#allocation106_spill] sm:$0xff]  ;;  %8306 = vst [vmem:[#allocation109_spill] sm:$0xff] %v5549_v2  ;;  %v1167_v9 = vadd.f32 %v1165_v55, %v1142_v14  ;;  %v1226_v56 = vmul.f32 %v8307_v19, %v1223_v58  ;;  %2217 = vrot.lane.b32.xlu1 %v3611_v39, %s8349_s19  ;;  %2215 = vrot.lane.b32.xlu0 %v3628_v43, %s8349_s19  ;;  %s8804_s19 = sld [smem:[#allocation126_spill]] }
 0x13e   :  { %v1190_v11 = vsel %vm8299_vm14, %v1188_v28, 0.0  ;;  %vm7733_vm14 = vmand %vm5337_vm9, %vm8302_vm6  ;;  %v1254_v28 = vmul.f32 %v8303_v59, %v1248_v26  ;;  %v1255_v3 = vmul.f32 %v8303_v59, %v1249_v5  ;;  %v1227_v59 = vmul.f32 %v8307_v19, %v1224_v29  ;;  %v8321_v19 = vld [vmem:[#allocation105_spill] sm:$0xff] }
 0x13f   :  { %vm8308_vm7 = vcmp.lt.s32.totalorder %v3289_v21, 99  ;;  %vm8311_vm13 = vmand %vm5324_vm0, %vm8300_vm12  ;;  %v1215_v29 = vsel %vm7733_vm14, %v1213_v60, 0.0  ;;  %v1237_v15 = vadd.f32 %v1233_v47, %v1226_v56  ;;  %v1251_v53 = vmul.f32 %v8321_v19, %v1248_v26 }
 0x140   :  { %v1273_v8 = vsel %vm8308_vm7, %v5411_v6, %v5389_v16  ;;  %vm8309_vm5 = vmmov %vm8308_vm7  ;;  %v1214_v58 = vsel %vm8311_vm13, %v1212_v30, 0.0  ;;  %v1238_v55 = vadd.f32 %v1234_v27, %v1227_v59  ;;  %v1258_v18 = vrot.slane %v1254_v28, 1  ;;  %v5583_v30 = vpop.permute.xlu1 %1345  ;;  %v1344_v27 = vpop.permute.xlu0 %1343 }
 0x141   :  { %v1274_v24 = vsel %vm8309_vm5, %v5389_v16, %v5411_v6  ;;  %v1191_v16 = vadd.f32 %v1189_v10, %v1166_v35  ;;  %v1192_v6 = vadd.f32 %v1190_v11, %v1167_v9  ;;  %v1259_v14 = vrot.slane %v1255_v3, 1  ;;  %v8313_v10 = vld [vmem:[#allocation108_spill] sm:$0xff]  ;;  %v8319_v3 = vld [vmem:[#allocation17_spill] sm:$0xff]  ;;  %2239 = vrot.lane.b32.xlu1 %v3611_v39, %s8360_s22  ;;  %2237 = vrot.lane.b32.xlu0 %v3628_v43, %s8360_s22 }
 0x142   :  { %vm8312_vm7 = vnez %v8047_v4  ;;  %v1279_v11 = vmul.f32 %v8313_v10, %v1273_v8  ;;  %v1280_v60 = vmul.f32 %v8313_v10, %v1274_v24  ;;  %vm8314_vm5 = vcmp.lt.s32.totalorder %v3289_v21, 98  ;;  %v8320_v9 = vld [vmem:[#allocation19_spill] sm:$0xff] }
 0x143   :  { %vm7740_vm14 = vmand %vm5337_vm9, %vm8312_vm7  ;;  %v1298_v56 = vsel %vm8314_vm5, %v5452_v12, %v5434_v38  ;;  %v5603_v59 = vstv %s5501_s18  ;;  %v5606_v28 = vstv %s5513_s29  ;;  %v5609_v35 = vadd.s32 3, %v8319_v3  ;;  %s5816_s18 = sld [smem:[#allocation5 + $0x2e]]  ;;  %s8367_s29 = smov 127  }
 0x144   :  { %vm8315_vm6 = vmmov %vm8314_vm5  ;;  %8317 = vst [vmem:[#allocation120_spill] sm:$0xff] %v5603_v59  ;;  %v5612_v10 = vadd.s32 3, %v8320_v9  ;;  %v1252_v0 = vmul.f32 %v8321_v19, %v1249_v5  ;;  %v1240_v26 = vsel %vm7740_vm14, %v1238_v55, 0.0  ;;  %v8323_v5 = vld [vmem:[#allocation112_spill] sm:$0xff]  ;;  %v1283_v55 = vrot.slane %v1279_v11, 1  ;;  %v5640_v9 = vpop.permute.xlu0 %1753 }
 0x145   :  { %v1299_v47 = vsel %vm8315_vm6, %v5434_v38, %v5452_v12  ;;  %8318 = vst [vmem:[#allocation121_spill] sm:$0xff] %v5606_v28  ;;  %v1216_v38 = vadd.f32 %v1214_v58, %v1191_v16  ;;  %v1217_v12 = vadd.f32 %v1215_v29, %v1192_v6  ;;  %vm8322_vm6 = vmand %vm5324_vm0, %vm8238_vm3  ;;  %v1304_v58 = vmul.f32 %v8323_v5, %v1298_v56  ;;  %v5634_v16 = vpop.permute.xlu1 %1755 }
 0x146   :  { %v1239_v59 = vsel %vm8322_vm6, %v1237_v15, 0.0  ;;  %v1305_v29 = vmul.f32 %v8323_v5, %v1299_v47  ;;  %v1262_v6 = vadd.f32 %v1258_v18, %v1251_v53  ;;  %v1263_v15 = vadd.f32 %v1259_v14, %v1252_v0  ;;  %v8337_v18 = vld [vmem:[#allocation107_spill] sm:$0xff]  ;;  %vm8340_vm3 = vmand %vm5324_vm0, %vm4426_vm4  ;;  %2277 = vrot.lane.b32.xlu1 %v3611_v39, %s8367_s29  ;;  %2275 = vrot.lane.b32.xlu0 %v3628_v43, %s8367_s29 }
 0x147   :  { %v1284_v3 = vrot.slane %v1280_v60, 1  ;;  %vm8324_vm14 = vcmp.lt.s32.totalorder %v8301_v51, 16  ;;  %vm8325_vm13 = vcmp.ge.s32.totalorder %v8301_v51, 0  ;;  %v8326_v19 = vmov 0 }
 0x148   :  { %vm5646_vm5 = vmand %vm8325_vm13, %vm8324_vm14  ;;  %v1329_v5 = vmul.f32 %v5171_v40, %v5505_v48  ;;  %v1330_v28 = vmul.f32 %v5171_v40, %v5509_v54  ;;  %v5657_v0 = vstv %s5551_s9  ;;  %v5660_v53 = vstv %s5565_s17  ;;  %s8381_s9 = smov 126   ;;  %s8396_s17 = smov 115  }
 0x149   :  { %v8327_v19 = vsel %vm5646_vm5, 4294967295, %v8326_v19  ;;  %8330 = vst [vmem:[#allocation19_spill] sm:$0xff] %v5657_v0  ;;  %8331 = vst [vmem:[#allocation122_spill] sm:$0xff] %v5660_v53  ;;  %vm8332_vm14 = vcmp.lt.s32.totalorder %v8304_v57, 16  ;;  %vm8333_vm13 = vcmp.ge.s32.totalorder %v8304_v57, 0  ;;  %v8334_v51 = vmov 0 }
 0x14a   :  { %8328 = vst [vmem:[#allocation17_spill] sm:$0xff] %v8327_v19  ;;  %vm5668_vm6 = vmand %vm8333_vm13, %vm8332_vm14  ;;  %v1276_v14 = vmul.f32 %v8337_v18, %v1273_v8  ;;  %v1277_v11 = vmul.f32 %v8337_v18, %v1274_v24  ;;  %v1241_v60 = vadd.f32 %v1239_v59, %v1216_v38  ;;  %v1242_v40 = vadd.f32 %v1240_v26, %v1217_v12  ;;  %v5686_v24 = vpop.permute.xlu1 %1370  ;;  %v1369_v12 = vpop.permute.xlu0 %1368  ;;  %v8342_v26 = vld [vmem:[#allocation111_spill] sm:$0xff]  ;;  %v8606_v19 = vld [vmem:[#allocation76_spill] sm:$0xff] }
 0x14b   :  { %v8335_v51 = vsel %vm5668_vm6, 4294967295, %v8334_v51  ;;  %v1308_v0 = vrot.slane %v1304_v58, 1  ;;  %v1309_v53 = vrot.slane %v1305_v29, 1  ;;  %vm8338_vm14 = vcmp.lt.s32.totalorder %v3289_v21, 51  ;;  %vm8353_vm7 = vmand %vm5646_vm5, %vm8160_vm15  ;;  %2299 = vrot.lane.b32.xlu1 %v3611_v39, %s8381_s9  ;;  %2297 = vrot.lane.b32.xlu0 %v3628_v43, %s8381_s9 }
 0x14c   :  { %8336 = vst [vmem:[#allocation123_spill] sm:$0xff] %v8335_v51  ;;  %v1735_v57 = vsel %vm8338_vm14, %v5543_v13, %v5541_v22  ;;  %vm8339_vm13 = vmmov %vm8338_vm14  ;;  %v1264_v59 = vsel %vm8340_vm3, %v1262_v6, 0.0  ;;  %v1301_v58 = vmul.f32 %v8342_v26, %v1298_v56  ;;  %v1302_v29 = vmul.f32 %v8342_v26, %v1299_v47 }
 0x14d   :  { %v1736_v8 = vsel %vm8339_vm13, %v5541_v22, %v5543_v13  ;;  %vm8341_vm14 = vmand %vm5337_vm9, %vm4438_vm2  ;;  %v1287_v22 = vadd.f32 %v1283_v55, %v1276_v14  ;;  %v1288_v13 = vadd.f32 %v1284_v3, %v1277_v11  ;;  %v1333_v6 = vrot.slane %v1329_v5, 1 }
 0x14e   :  { %v1265_v38 = vsel %vm8341_vm14, %v1263_v15, 0.0  ;;  %vm7753_vm13 = vmand %vm5646_vm5, %vm3942_vm10  ;;  %v1334_v18 = vrot.slane %v1330_v28, 1  ;;  %v8344_v15 = vld [vmem:[#allocation29_spill] sm:$0xff]  ;;  %vm8345_vm3 = vcmp.lt.s32.totalorder %v3289_v21, 96  ;;  %v1312_v56 = vadd.f32 %v1308_v0, %v1301_v58  ;;  %v5729_v11 = vpop.permute.xlu1 %1777 }
 0x14f   :  { %v1739_v1 = vmul.f32 %v1736_v8, %v8344_v15  ;;  %v1740_v55 = vmul.f32 %v1735_v57, %v8344_v15  ;;  %v1348_v3 = vsel %vm8345_vm3, %v1344_v27, %v5583_v30  ;;  %vm8346_vm14 = vmmov %vm8345_vm3  ;;  %v1313_v47 = vadd.f32 %v1309_v53, %v1302_v29  ;;  %2321 = vrot.lane.b32.xlu1 %v3611_v39, %s8386_s20 }
 0x150   :  { %v1349_v14 = vsel %vm8346_vm14, %v5583_v30, %v1344_v27  ;;  %v1326_v28 = vmul.f32 %v5168_v17, %v5505_v48  ;;  %v1327_v5 = vmul.f32 %v5168_v17, %v5509_v54  ;;  %v1289_v30 = vsel %vm7753_vm13, %v1287_v22, 0.0  ;;  %vm8347_vm3 = vmand %vm5668_vm6, %vm8198_vm11  ;;  %v5747_v48 = vpop.permute.xlu0 %1775  ;;  %2319 = vrot.lane.b32.xlu0 %v3628_v43, %s8386_s20  ;;  %s8807_s20 = sld [smem:[#allocation128_spill]] }
 0x151   :  { %v1290_v27 = vsel %vm8347_vm3, %v1288_v13, 0.0  ;;  %v1266_v54 = vadd.f32 %v1264_v59, %v1241_v60  ;;  %v1267_v0 = vadd.f32 %v1265_v38, %v1242_v40  ;;  %vm8348_vm13 = vnez %v8012_v45  ;;  %vm8354_vm3 = vmand %vm5668_vm6, %vm8163_vm1 }
 0x152   :  { %v1337_v53 = vadd.f32 %v1333_v6, %v1326_v28  ;;  %v1338_v22 = vadd.f32 %v1334_v18, %v1327_v5  ;;  %v1354_v13 = vmul.f32 %v5198_v52, %v1348_v3  ;;  %v1355_v58 = vmul.f32 %v5198_v52, %v1349_v14  ;;  %v1396_v29 = vpop.permute.xlu1 %1395 }
 0x153   :  { %vm8350_vm14 = vnez %v8016_v61  ;;  %v1743_v40 = vrot.slane %v1739_v1, 1  ;;  %v1744_v60 = vrot.slane %v1740_v55, 1  ;;  %v5767_v18 = vstv %s5662_s3  ;;  %v8355_v55 = vld [vmem:[#allocation28_spill] sm:$0xff]  ;;  %2343 = vrot.lane.b32.xlu1 %v3611_v39, %s8396_s17  ;;  %s8436_s3 = smov 110  }
 0x154   :  { %8351 = vst [vmem:[#allocation29_spill] sm:$0xff] %v5767_v18  ;;  %v5770_v59 = vstv %s5676_s14  ;;  %v1314_v38 = vsel %vm8353_vm7, %v1312_v56, 0.0  ;;  %v1315_v1 = vsel %vm8354_vm3, %v1313_v47, 0.0  ;;  %v1291_v6 = vadd.f32 %v1289_v30, %v1266_v54  ;;  %v1394_v52 = vpop.permute.xlu0 %1393  ;;  %vm8358_vm3 = vmand %vm5646_vm5, %vm8348_vm13  ;;  %2341 = vrot.lane.b32.xlu0 %v3628_v43, %s8396_s17  ;;  %s6147_s14 = sld [smem:[#allocation5 + $0x2f]] }
 0x155   :  { %8352 = vst [vmem:[#allocation124_spill] sm:$0xff] %v5770_v59  ;;  %v1292_v15 = vadd.f32 %v1290_v27, %v1267_v0  ;;  %v1737_v28 = vmul.f32 %v1736_v8, %v8355_v55  ;;  %v1738_v5 = vmul.f32 %v1735_v57, %v8355_v55  ;;  %vm8356_vm9 = vcmp.lt.s32.totalorder %v3289_v21, 50  ;;  %vm8359_vm0 = vmand %vm5668_vm6, %vm8350_vm14 }
 0x156   :  { %v1757_v17 = vsel %vm8356_vm9, %v5640_v9, %v5634_v16  ;;  %vm8357_vm7 = vmmov %vm8356_vm9  ;;  %v1339_v47 = vsel %vm8358_vm3, %v1337_v53, 0.0  ;;  %v1340_v57 = vsel %vm8359_vm0, %v1338_v22, 0.0  ;;  %v1358_v8 = vrot.slane %v1354_v13, 1  ;;  %v8363_v22 = vld [vmem:[#allocation27_spill] sm:$0xff] }
 0x157   :  { %v1758_v56 = vsel %vm8357_vm7, %v5634_v16, %v5640_v9  ;;  %v1359_v30 = vrot.slane %v1355_v58, 1  ;;  %v1747_v16 = vadd.f32 %v1743_v40, %v1737_v28  ;;  %v1748_v9 = vadd.f32 %v1744_v60, %v1738_v5  ;;  %v1800_v40 = vpop.permute.xlu1 %1799  ;;  %2365 = vrot.lane.b32.xlu1 %v3611_v39, %s8403_s15 }
 0x158   :  { %vm8361_vm9 = vcmp.lt.s32.totalorder %v3289_v21, 95  ;;  %v1351_v0 = vmul.f32 %v5195_v20, %v1348_v3  ;;  %v1352_v53 = vmul.f32 %v5195_v20, %v1349_v14  ;;  %v1761_v13 = vmul.f32 %v1758_v56, %v8363_v22  ;;  %v1798_v60 = vpop.permute.xlu0 %1797  ;;  %2363 = vrot.lane.b32.xlu0 %v3628_v43, %s8403_s15 }
 0x159   :  { %v1373_v27 = vsel %vm8361_vm9, %v1369_v12, %v5686_v24  ;;  %vm8362_vm7 = vmmov %vm8361_vm9  ;;  %v1762_v58 = vmul.f32 %v1757_v17, %v8363_v22  ;;  %v1316_v55 = vadd.f32 %v1314_v38, %v1291_v6  ;;  %v1317_v28 = vadd.f32 %v1315_v1, %v1292_v15  ;;  %v8368_v38 = vld [vmem:[#allocation75_spill] sm:$0xff]  ;;  %v8371_v6 = vld [vmem:[#allocation89_spill] sm:$0xff] }
 0x15a   :  { %v1374_v54 = vsel %vm8362_vm7, %v5686_v24, %v1369_v12  ;;  %v5819_v5 = vstv %s5731_s0  ;;  %v5822_v24 = vstv %s5749_s21  ;;  %vm8366_vm0 = vnez %v7953_v33 }
 0x15b   :  { %8364 = vst [vmem:[#allocation28_spill] sm:$0xff] %v5819_v5  ;;  %8365 = vst [vmem:[#allocation27_spill] sm:$0xff] %v5822_v24  ;;  %v1362_v12 = vadd.f32 %v1358_v8, %v1351_v0  ;;  %v1363_v3 = vadd.f32 %v1359_v30, %v1352_v53  ;;  %v1379_v14 = vmul.f32 %v5235_v50, %v1373_v27  ;;  %vm8369_vm9 = vnez %v8368_v38  ;;  %v1421_v20 = vpop.permute.xlu1 %1420  ;;  %v8383_v5 = vld [vmem:[#allocation25_spill] sm:$0xff]  ;;  %v8448_v38 = vld [vmem:[#allocation40_spill] sm:$0xff] }
 0x15c   :  { %v1380_v22 = vmul.f32 %v5235_v50, %v1374_v54  ;;  %vm8370_vm7 = vmand %vm8369_vm9, %vm3942_vm10  ;;  %vm8372_vm2 = vnez %v8371_v6  ;;  %v1341_v8 = vadd.f32 %v1339_v47, %v1316_v55  ;;  %v1342_v30 = vadd.f32 %v1340_v57, %v1317_v28  ;;  %v8376_v50 = vld [vmem:[#allocation26_spill] sm:$0xff]  ;;  %2387 = vrot.lane.b32.xlu1 %v3611_v39, %s3124_s7  ;;  %2385 = vrot.lane.b32.xlu0 %v3628_v43, %s3124_s7  ;;  %s8419_s7 = smov 112  }
 0x15d   :  { %v1749_v1 = vsel %vm8370_vm7, %v1747_v16, 0.0  ;;  %vm8373_vm3 = vmand %vm8372_vm2, %vm8198_vm11  ;;  %v1765_v0 = vrot.slane %v1761_v13, 1  ;;  %v1766_v16 = vrot.slane %v1762_v58, 1  ;;  %vm8374_vm7 = vcmp.lt.s32.totalorder %v3289_v21, 49  ;;  %v1419_v13 = vpop.permute.xlu0 %1418 }
 0x15e   :  { %v1750_v15 = vsel %vm8373_vm3, %v1748_v9, 0.0  ;;  %v1779_v53 = vsel %vm8374_vm7, %v5747_v48, %v5729_v11  ;;  %vm8375_vm3 = vmmov %vm8374_vm7  ;;  %v1759_v26 = vmul.f32 %v1758_v56, %v8376_v50  ;;  %v1760_v31 = vmul.f32 %v1757_v17, %v8376_v50 }
 0x15f   :  { %v1780_v9 = vsel %vm8375_vm3, %v5729_v11, %v5747_v48  ;;  %vm8377_vm14 = vcmp.lt.s32.totalorder %v3289_v21, 94  ;;  %vm8379_vm7 = vmand %vm5646_vm5, %vm8366_vm0  ;;  %v1383_v17 = vrot.slane %v1379_v14, 1  ;;  %v1384_v50 = vrot.slane %v1380_v22, 1  ;;  %v1822_v22 = vpop.permute.xlu1 %1821 }
 0x160   :  { %v1398_v47 = vsel %vm8377_vm14, %v1394_v52, %v1396_v29  ;;  %vm8378_vm4 = vmmov %vm8377_vm14  ;;  %v1364_v58 = vsel %vm8379_vm7, %v1362_v12, 0.0  ;;  %v1377_v48 = vmul.f32 %v5232_v37, %v1374_v54  ;;  %v1769_v28 = vadd.f32 %v1765_v0, %v1759_v26  ;;  %2409 = vrot.lane.b32.xlu1 %v3611_v39, %s8419_s7  ;;  %2407 = vrot.lane.b32.xlu0 %v3628_v43, %s8419_s7 }
 0x161   :  { %v1399_v57 = vsel %vm8378_vm4, %v1396_v29, %v1394_v52  ;;  %vm8380_vm3 = vmand %vm5668_vm6, %vm8290_vm8  ;;  %v1376_v52 = vmul.f32 %v5232_v37, %v1373_v27  ;;  %v8382_v29 = vld [vmem:[#allocation31_spill] sm:$0xff]  ;;  %v1770_v12 = vadd.f32 %v1766_v16, %v1760_v31  ;;  %v1751_v24 = vadd.f32 %v1749_v1, %v8383_v5  ;;  %v1820_v18 = vpop.permute.xlu0 %1819 }
 0x162   :  { %v1365_v11 = vsel %vm8380_vm3, %v1363_v3, 0.0  ;;  %v1783_v56 = vmul.f32 %v1780_v9, %v8382_v29  ;;  %v1784_v55 = vmul.f32 %v1779_v53, %v8382_v29  ;;  %v1404_v3 = vmul.f32 %v5254_v36, %v1398_v47  ;;  %vm8389_vm3 = vmand %vm8369_vm9, %vm8160_vm15 }
 0x163   :  { %v1405_v14 = vmul.f32 %v5254_v36, %v1399_v57  ;;  %v1752_v27 = vadd.f32 %v1750_v15, %v8383_v5  ;;  %v5888_v54 = vstv %s5816_s18  ;;  %v5891_v37 = vstv %s5824_s27  ;;  %vm8390_vm4 = vmand %vm8372_vm2, %vm8163_vm1  ;;  %v5919_v16 = vpop.permute.xlu1 %1445  ;;  %s8806_s27 = sld [smem:[#allocation127_spill]] }
 0x164   :  { %8384 = vst [vmem:[#allocation75_spill] sm:$0xff] %v5888_v54  ;;  %8385 = vst [vmem:[#allocation89_spill] sm:$0xff] %v5891_v37  ;;  %v1387_v29 = vadd.f32 %v1383_v17, %v1376_v52  ;;  %v1388_v59 = vadd.f32 %v1384_v50, %v1377_v48  ;;  %v1366_v31 = vadd.f32 %v1364_v58, %v1341_v8  ;;  %v1787_v1 = vrot.slane %v1783_v56, 1  ;;  %v8392_v58 = vld [vmem:[#allocation30_spill] sm:$0xff]  ;;  %v8393_v56 = vld [vmem:[#allocation33_spill] sm:$0xff] }
 0x165   :  { %v1367_v26 = vadd.f32 %v1365_v11, %v1342_v30  ;;  %v1788_v0 = vrot.slane %v1784_v55, 1  ;;  %vm8387_vm14 = vcmp.lt.s32.totalorder %v3289_v21, 48  ;;  %v1771_v8 = vsel %vm8389_vm3, %v1769_v28, 0.0  ;;  %v5925_v48 = vpop.permute.xlu0 %1443  ;;  %2431 = vrot.lane.b32.xlu1 %v3611_v39, %s8426_s6  ;;  %2429 = vrot.lane.b32.xlu0 %v3628_v43, %s8426_s6 }
 0x166   :  { %v1801_v5 = vsel %vm8387_vm14, %v1798_v60, %v1800_v40  ;;  %vm8388_vm7 = vmmov %vm8387_vm14  ;;  %v1772_v30 = vsel %vm8390_vm4, %v1770_v12, 0.0  ;;  %vm8391_vm14 = vnez %v8029_v62  ;;  %v1781_v11 = vmul.f32 %v1780_v9, %v8392_v58 }
 0x167   :  { %v1802_v15 = vsel %vm8388_vm7, %v1800_v40, %v1798_v60  ;;  %v1408_v40 = vrot.slane %v1404_v3, 1  ;;  %v1409_v60 = vrot.slane %v1405_v14, 1  ;;  %v1782_v17 = vmul.f32 %v1779_v53, %v8392_v58  ;;  %vm8397_vm7 = vmand %vm5646_vm5, %vm8300_vm12 }
 0x168   :  { %v1401_v50 = vmul.f32 %v5251_v42, %v1398_v47  ;;  %v1402_v52 = vmul.f32 %v5251_v42, %v1399_v57  ;;  %v1805_v55 = vmul.f32 %v1802_v15, %v8393_v56  ;;  %v1806_v28 = vmul.f32 %v1801_v5, %v8393_v56  ;;  %vm8398_vm1 = vmand %vm5668_vm6, %vm8391_vm14 }
 0x169   :  { %vm8394_vm4 = vcmp.lt.s32.totalorder %v3289_v21, 93  ;;  %v1389_v53 = vsel %vm8397_vm7, %v1387_v29, 0.0  ;;  %v1390_v9 = vsel %vm8398_vm1, %v1388_v59, 0.0  ;;  %v1791_v47 = vadd.f32 %v1787_v1, %v1781_v11  ;;  %v1844_v59 = vpop.permute.xlu1 %1843  ;;  %2453 = vrot.lane.b32.xlu1 %v3611_v39, %s8436_s3  ;;  %2451 = vrot.lane.b32.xlu0 %v3628_v43, %s8436_s3 }
 0x16a   :  { %v1423_v12 = vsel %vm8394_vm4, %v1419_v13, %v1421_v20  ;;  %vm8395_vm3 = vmmov %vm8394_vm4  ;;  %v1792_v57 = vadd.f32 %v1788_v0, %v1782_v17  ;;  %vm8399_vm4 = vnez %v8042_v41  ;;  %vm8400_vm7 = vcmp.lt.s32.totalorder %v3289_v21, 47 }
 0x16b   :  { %v1424_v3 = vsel %vm8395_vm3, %v1421_v20, %v1419_v13  ;;  %vm7790_vm3 = vmand %vm5646_vm5, %vm8399_vm4  ;;  %v1412_v20 = vadd.f32 %v1408_v40, %v1401_v50  ;;  %v1413_v13 = vadd.f32 %v1409_v60, %v1402_v52  ;;  %v1823_v14 = vsel %vm8400_vm7, %v1820_v18, %v1822_v22  ;;  %v1842_v60 = vpop.permute.xlu0 %1841  ;;  %v8408_v52 = vld [vmem:[#allocation32_spill] sm:$0xff] }
 0x16c   :  { %vm8401_vm15 = vmmov %vm8400_vm7  ;;  %v1773_v1 = vadd.f32 %v1771_v8, %v1751_v24  ;;  %v1774_v0 = vadd.f32 %v1772_v30, %v1752_v27  ;;  %vm8402_vm11 = vnez %v8047_v4  ;;  %v1429_v58 = vmul.f32 %v5549_v2, %v1423_v12  ;;  %v8407_v8 = vld [vmem:[#allocation35_spill] sm:$0xff] }
 0x16d   :  { %v1824_v29 = vsel %vm8401_vm15, %v1822_v22, %v1820_v18  ;;  %vm7789_vm10 = vmand %vm5668_vm6, %vm8402_vm11  ;;  %v1430_v40 = vmul.f32 %v5549_v2, %v1424_v3  ;;  %v1809_v11 = vrot.slane %v1805_v55, 1  ;;  %v1810_v17 = vrot.slane %v1806_v28, 1  ;;  %v5990_v28 = vpop.permute.xlu1 %1470  ;;  %2475 = vrot.lane.b32.xlu1 %v3611_v39, %s3128_s12  ;;  %2473 = vrot.lane.b32.xlu0 %v3628_v43, %s3128_s12  ;;  %s6289_s12 = sld [smem:[#allocation5 + $0x30]] }
 0x16e   :  { %v1391_v18 = vadd.f32 %v1389_v53, %v1366_v31  ;;  %v1392_v22 = vadd.f32 %v1390_v9, %v1367_v26  ;;  %vm8404_vm15 = vmand %vm8369_vm9, %vm8348_vm13  ;;  %vm8405_vm7 = vnez %v8016_v61  ;;  %v1827_v30 = vmul.f32 %v1824_v29, %v8407_v8 }
 0x16f   :  { %v1793_v24 = vsel %vm8404_vm15, %v1791_v47, 0.0  ;;  %vm8406_vm1 = vmand %vm8372_vm2, %vm8405_vm7  ;;  %v1828_v50 = vmul.f32 %v1823_v14, %v8407_v8  ;;  %v1414_v31 = vsel %vm7790_vm3, %v1412_v20, 0.0  ;;  %v1415_v26 = vsel %vm7789_vm10, %v1413_v13, 0.0  ;;  %v5996_v20 = vpop.permute.xlu0 %1468 }
 0x170   :  { %v1794_v27 = vsel %vm8406_vm1, %v1792_v57, 0.0  ;;  %v1803_v56 = vmul.f32 %v1802_v15, %v8408_v52  ;;  %v1804_v55 = vmul.f32 %v1801_v5, %v8408_v52  ;;  %v1433_v53 = vrot.slane %v1429_v58, 1  ;;  %vm8414_vm3 = vmand %vm8369_vm9, %vm8366_vm0 }
 0x171   :  { %v1434_v9 = vrot.slane %v1430_v40, 1  ;;  %vm8409_vm1 = vcmp.lt.s32.totalorder %v3289_v21, 46  ;;  %v1795_v8 = vadd.f32 %v1793_v24, %v1773_v1  ;;  %v1796_v42 = vadd.f32 %v1794_v27, %v1774_v0  ;;  %v8413_v24 = vld [vmem:[#allocation34_spill] sm:$0xff]  ;;  %2497 = vrot.lane.b32.xlu1 %v3611_v39, %s3129_s26  ;;  %2495 = vrot.lane.b32.xlu0 %v3628_v43, %s3129_s26  ;;  %s6295_s26 = sld [smem:[#allocation5 + $0x61]] }
 0x172   :  { %v1845_v47 = vsel %vm8409_vm1, %v1842_v60, %v1844_v59  ;;  %vm8410_vm15 = vmmov %vm8409_vm1  ;;  %v1813_v2 = vadd.f32 %v1809_v11, %v1803_v56  ;;  %v1814_v13 = vadd.f32 %v1810_v17, %v1804_v55  ;;  %v1426_v5 = vmul.f32 %v5546_v44, %v1423_v12  ;;  %v1866_v17 = vpop.permute.xlu1 %1865 }
 0x173   :  { %v1846_v57 = vsel %vm8410_vm15, %v1844_v59, %v1842_v60  ;;  %v1427_v15 = vmul.f32 %v5546_v44, %v1424_v3  ;;  %v1831_v58 = vrot.slane %v1827_v30, 1  ;;  %v1832_v40 = vrot.slane %v1828_v50, 1  ;;  %v8411_v59 = vld [vmem:[#allocation37_spill] sm:$0xff]  ;;  %v1864_v50 = vpop.permute.xlu0 %1863  ;;  %vm8415_vm1 = vmand %vm8372_vm2, %vm8290_vm8 }
 0x174   :  { %v1849_v60 = vmul.f32 %v1846_v57, %v8411_v59  ;;  %v1850_v1 = vmul.f32 %v1845_v47, %v8411_v59  ;;  %v6007_v0 = vadd.f32 %v1414_v31, %v1391_v18  ;;  %v6009_v11 = vadd.f32 %v1415_v26, %v1392_v22  ;;  %v8425_v59 = vld [vmem:[#allocation36_spill] sm:$0xff] }
 0x175   :  { %vm8412_vm15 = vnez %v8072_v25  ;;  %v1437_v12 = vadd.f32 %v1433_v53, %v1426_v5  ;;  %v1438_v3 = vadd.f32 %v1434_v9, %v1427_v15  ;;  %v1825_v27 = vmul.f32 %v1824_v29, %v8413_v24  ;;  %v8422_v53 = vld [vmem:[#allocation39_spill] sm:$0xff]  ;;  %2519 = vrot.lane.b32.xlu1 %v3611_v39, %s3130_s4  ;;  %2517 = vrot.lane.b32.xlu0 %v3628_v43, %s3130_s4 }
 0x176   :  { %v1826_v30 = vmul.f32 %v1823_v14, %v8413_v24  ;;  %v1815_v18 = vsel %vm8414_vm3, %v1813_v2, 0.0  ;;  %v1816_v22 = vsel %vm8415_vm1, %v1814_v13, 0.0  ;;  %vm8416_vm10 = vnez %v8076_v23  ;;  %v6053_v5 = vpop.permute.xlu1 %1495 }
 0x177   :  { %vm8417_vm13 = vcmp.lt.s32.totalorder %v3289_v21, 45  ;;  %v1835_v2 = vadd.f32 %v1831_v58, %v1825_v27  ;;  %vm103_vm1 = vcmp.lt.s32.totalorder %v5609_v35, 16  ;;  %vm8420_vm8 = vcmp.lt.s32.totalorder %v3289_v21, 83  ;;  %v8428_v27 = vld [vmem:[#allocation38_spill] sm:$0xff] }
 0x178   :  { %v1867_v14 = vsel %vm8417_vm13, %v1864_v50, %v1866_v17  ;;  %vm8418_vm11 = vmmov %vm8417_vm13  ;;  %v1836_v31 = vadd.f32 %v1832_v40, %v1826_v30  ;;  %v1448_v26 = vsel %vm8420_vm8, %v5925_v48, %v5919_v16  ;;  %v1853_v56 = vrot.slane %v1849_v60, 1  ;;  %v6065_v40 = vpop.permute.xlu0 %1493 }
 0x179   :  { %v1868_v29 = vsel %vm8418_vm11, %v1866_v17, %v1864_v50  ;;  %vm8421_vm13 = vmmov %vm8420_vm8  ;;  %v1854_v55 = vrot.slane %v1850_v1, 1  ;;  %v1872_v13 = vmul.f32 %v1867_v14, %v8422_v53  ;;  %v1817_v15 = vadd.f32 %v1815_v18, %v1795_v8  ;;  %v8427_v17 = vld [vmem:[#allocation121_spill] sm:$0xff]  ;;  %2541 = vrot.lane.b32.xlu1 %v3611_v39, %s3131_s28  ;;  %2539 = vrot.lane.b32.xlu0 %v3628_v43, %s3131_s28 }
 0x17a   :  { %v1449_v52 = vsel %vm8421_vm13, %v5919_v16, %v5925_v48  ;;  %v1871_v9 = vmul.f32 %v1868_v29, %v8422_v53  ;;  %v1818_v58 = vadd.f32 %v1816_v22, %v1796_v42  ;;  %vm8423_vm8 = vmand %vm5646_vm5, %vm8412_vm15  ;;  %v1847_v60 = vmul.f32 %v1846_v57, %v8425_v59  ;;  %v1888_v22 = vpop.permute.xlu1 %1887 }
 0x17b   :  { %v1439_v16 = vsel %vm8423_vm8, %v1437_v12, 0.0  ;;  %vm8424_vm13 = vmand %vm5668_vm6, %vm8416_vm10  ;;  %v1848_v1 = vmul.f32 %v1845_v47, %v8425_v59  ;;  %v1876_v42 = vrot.slane %v1872_v13, 1  ;;  %v1454_v24 = vmul.f32 %v8427_v17, %v1448_v26 }
 0x17c   :  { %v1440_v48 = vsel %vm8424_vm13, %v1438_v3, 0.0  ;;  %v1875_v8 = vrot.slane %v1871_v9, 1  ;;  %v1455_v12 = vmul.f32 %v8427_v17, %v1449_v52  ;;  %v1869_v30 = vmul.f32 %v1868_v29, %v8428_v27  ;;  %vm8429_vm8 = vmand %vm8369_vm9, %vm8300_vm12  ;;  %v8431_v29 = vld [vmem:[#allocation120_spill] sm:$0xff]  ;;  %v1886_v59 = vpop.permute.xlu0 %1885 }
 0x17d   :  { %v1870_v50 = vmul.f32 %v1867_v14, %v8428_v27  ;;  %v1837_v47 = vsel %vm8429_vm8, %v1835_v2, 0.0  ;;  %vm8430_vm13 = vmand %vm8372_vm2, %vm8391_vm14  ;;  %v1857_v3 = vadd.f32 %v1853_v56, %v1847_v60  ;;  %v1858_v18 = vadd.f32 %v1854_v55, %v1848_v1  ;;  %2563 = vrot.lane.b32.xlu1 %v3611_v39, %s3132_s16  ;;  %2561 = vrot.lane.b32.xlu0 %v3628_v43, %s3132_s16 }
 0x17e   :  { %v1838_v57 = vsel %vm8430_vm13, %v1836_v31, 0.0  ;;  %v1451_v14 = vmul.f32 %v8431_v29, %v1448_v26  ;;  %v1452_v53 = vmul.f32 %v8431_v29, %v1449_v52  ;;  %v1879_v9 = vadd.f32 %v1875_v8, %v1869_v30  ;;  %v8440_v8 = vld [vmem:[#allocation41_spill] sm:$0xff] }
 0x17f   :  { %v1880_v13 = vadd.f32 %v1876_v42, %v1870_v50  ;;  %vm8432_vm8 = vcmp.lt.s32.totalorder %v3289_v21, 82  ;;  %vm8434_vm7 = vcmp.lt.s32.totalorder %v3289_v21, 35  ;;  %v1839_v56 = vadd.f32 %v1837_v47, %v1817_v15  ;;  %v6118_v42 = vpop.permute.xlu1 %1520 }
 0x180   :  { %v1473_v2 = vsel %vm8432_vm8, %v5996_v20, %v5990_v28  ;;  %vm8433_vm13 = vmmov %vm8432_vm8  ;;  %v1889_v26 = vsel %vm8434_vm7, %v1886_v59, %v1888_v22  ;;  %v1840_v55 = vadd.f32 %v1838_v57, %v1818_v58  ;;  %v1458_v60 = vrot.slane %v1454_v24, 1  ;;  %v8441_v24 = vld [vmem:[#allocation122_spill] sm:$0xff]  ;;  %v6132_v47 = vpop.permute.xlu0 %1518 }
 0x181   :  { %v1474_v31 = vsel %vm8433_vm13, %v5990_v28, %v5996_v20  ;;  %vm8435_vm3 = vmmov %vm8434_vm7  ;;  %v1459_v1 = vrot.slane %v1455_v12, 1  ;;  %vm8438_vm7 = vnez %v8047_v4  ;;  %v1894_v58 = vmul.f32 %v1889_v26, %v8440_v8  ;;  %2585 = vrot.lane.b32.xlu1 %v3611_v39, %s3133_s11  ;;  %2583 = vrot.lane.b32.xlu0 %v3628_v43, %s3133_s11 }
 0x182   :  { %v1890_v52 = vsel %vm8435_vm3, %v1888_v22, %v1886_v59  ;;  %vm8437_vm8 = vmand %vm8369_vm9, %vm8399_vm4  ;;  %v1479_v12 = vmul.f32 %v8441_v24, %v1473_v2  ;;  %v1480_v27 = vmul.f32 %v8441_v24, %v1474_v31  ;;  %v8445_v57 = vmov 0  ;;  %v8604_v24 = vld [vmem:[#allocation54_spill] sm:$0xff] }
 0x183   :  { %v1859_v28 = vsel %vm8437_vm8, %v1857_v3, 0.0  ;;  %vm8439_vm3 = vmand %vm8372_vm2, %vm8438_vm7  ;;  %v1893_v15 = vmul.f32 %v1890_v52, %v8440_v8  ;;  %v1891_v3 = vmul.f32 %v1890_v52, %v8448_v38  ;;  %v1898_v6 = vrot.slane %v1894_v58, 1 }
 0x184   :  { %v1860_v20 = vsel %vm8439_vm3, %v1858_v18, 0.0  ;;  %vm8442_vm13 = vmand %vm8369_vm9, %vm8412_vm15  ;;  %vm8444_vm3 = vcmp.ge.s32.totalorder %v5609_v35, 0  ;;  %v1892_v18 = vmul.f32 %v1889_v26, %v8448_v38  ;;  %v8451_v35 = vmov 0 }
 0x185   :  { %v1881_v30 = vsel %vm8442_vm13, %v1879_v9, 0.0  ;;  %vm8443_vm8 = vmand %vm8372_vm2, %vm8416_vm10  ;;  %v1897_v22 = vrot.slane %v1893_v15, 1  ;;  %vm8449_vm2 = vcmp.lt.s32.totalorder %v5612_v10, 16  ;;  %v1861_v9 = vadd.f32 %v1859_v28, %v1839_v56  ;;  %2607 = vrot.lane.b32.xlu1 %v3611_v39, %s3134_s13  ;;  %2605 = vrot.lane.b32.xlu0 %v3628_v43, %s3134_s13 }
 0x186   :  { %v1882_v50 = vsel %vm8443_vm8, %v1880_v13, 0.0  ;;  %vm6138_vm11 = vmand %vm8444_vm3, %vm103_vm1  ;;  %vm8450_vm1 = vcmp.ge.s32.totalorder %v5612_v10, 0  ;;  %v1862_v13 = vadd.f32 %v1860_v20, %v1840_v55  ;;  %v1441_v59 = vadd.f32 %v1439_v16, %v6007_v0  ;;  %v1910_v10 = vpop.permute.xlu1 %1909  ;;  %v8464_v20 = vld [vmem:[#allocation19_spill] sm:$0xff] }
 0x187   :  { %v8446_v57 = vsel %vm6138_vm11, 4294967295, %v8445_v57  ;;  %vm6153_vm13 = vmand %vm8450_vm1, %vm8449_vm2  ;;  %v1442_v26 = vadd.f32 %v1440_v48, %v6009_v11  ;;  %v1462_v52 = vadd.f32 %v1458_v60, %v1451_v14  ;;  %v1463_v8 = vadd.f32 %v1459_v1, %v1452_v53  ;;  %v1908_v11 = vpop.permute.xlu0 %1907  ;;  %v8456_v48 = vld [vmem:[#allocation110_spill] sm:$0xff]  ;;  %v8459_v53 = vld [vmem:[#allocation113_spill] sm:$0xff] }
 0x188   :  { %8447 = vst [vmem:[#allocation26_spill] sm:$0xff] %v8446_v57  ;;  %v8452_v35 = vsel %vm6153_vm13, 4294967295, %v8451_v35  ;;  %v1901_v15 = vadd.f32 %v1897_v22, %v1891_v3  ;;  %v1902_v58 = vadd.f32 %v1898_v6, %v1892_v18  ;;  %vm8454_vm8 = vnez %v7982_v46  ;;  %v8467_v18 = vld [vmem:[#allocation43_spill] sm:$0xff] }
 0x189   :  { %8453 = vst [vmem:[#allocation31_spill] sm:$0xff] %v8452_v35  ;;  %v1483_v56 = vrot.slane %v1479_v12, 1  ;;  %v1484_v55 = vrot.slane %v1480_v27, 1  ;;  %v1883_v0 = vadd.f32 %v1881_v30, %v1861_v9  ;;  %v1884_v16 = vadd.f32 %v1882_v50, %v1862_v13  ;;  %2629 = vrot.lane.b32.xlu1 %v3611_v39, %s3135_s8  ;;  %2627 = vrot.lane.b32.xlu0 %v3628_v43, %s3135_s8  ;;  %v8602_v57 = vld [vmem:[#allocation79_spill] sm:$0xff] }
 0x18a   :  { %vm8455_vm1 = vnez %v7995_v7  ;;  %vm8457_vm6 = vnez %v8456_v48  ;;  %vm8460_vm3 = vnez %v8459_v53  ;;  %vm8462_vm15 = vcmp.lt.s32.totalorder %v3289_v21, 34 }
 0x18b   :  { %vm7800_vm9 = vmand %vm6153_vm13, %vm8455_vm1  ;;  %v1911_v1 = vsel %vm8462_vm15, %v1908_v11, %v1910_v10  ;;  %v1476_v12 = vmul.f32 %v8464_v20, %v1473_v2  ;;  %v1477_v27 = vmul.f32 %v8464_v20, %v1474_v31  ;;  %v1546_v31 = vpop.permute.xlu1 %1545  ;;  %v1544_v13 = vpop.permute.xlu0 %1543  ;;  %v2261_v44 = vmul.f32 %v3628_v43, %v8604_v24 }
 0x18c   :  { %vm8458_vm5 = vmand %vm8457_vm6, %vm8454_vm8  ;;  %v1916_v2 = vmul.f32 %v1911_v1, %v8467_v18  ;;  %v1465_v9 = vsel %vm7800_vm9, %v1463_v8, 0.0  ;;  %v8472_v8 = vld [vmem:[#allocation124_spill] sm:$0xff]  ;;  %vm8475_vm9 = vcmp.lt.s32.totalorder %v3289_v21, 80 }
 0x18d   :  { %v1903_v14 = vsel %vm8458_vm5, %v1901_v15, 0.0  ;;  %vm8461_vm10 = vmand %vm8460_vm3, %vm8455_vm1  ;;  %2651 = vrot.lane.b32.xlu1 %v3611_v39, %s3136_s10  ;;  %2649 = vrot.lane.b32.xlu0 %v3628_v43, %s3136_s10  ;;  %s3143_s10 = smov 0.0  }
 0x18e   :  { %v1904_v60 = vsel %vm8461_vm10, %v1902_v58, 0.0  ;;  %vm8463_vm2 = vmmov %vm8462_vm15  ;;  %v1905_v30 = vadd.f32 %v1903_v14, %v1883_v0  ;;  %vm8465_vm10 = vcmp.lt.s32.totalorder %v3289_v21, 81  ;;  %v1920_v0 = vrot.slane %v1916_v2, 1 }
 0x18f   :  { %v1912_v28 = vsel %vm8463_vm2, %v1910_v10, %v1908_v11  ;;  %v1906_v50 = vadd.f32 %v1904_v60, %v1884_v16  ;;  %v1498_v38 = vsel %vm8465_vm10, %v6065_v40, %v6053_v5  ;;  %vm8466_vm5 = vmmov %vm8465_vm10  ;;  %vm8469_vm2 = vnez %v7988_v32 }
 0x190   :  { %v1499_v3 = vsel %vm8466_vm5, %v6053_v5, %v6065_v40  ;;  %v1915_v22 = vmul.f32 %v1912_v28, %v8467_v18  ;;  %vm8468_vm15 = vmand %vm6138_vm11, %vm8454_vm8  ;;  %v1487_v5 = vadd.f32 %v1483_v56, %v1476_v12  ;;  %v1488_v40 = vadd.f32 %v1484_v55, %v1477_v27  ;;  %v1932_v12 = vpop.permute.xlu1 %1931 }
 0x191   :  { %v1464_v6 = vsel %vm8468_vm15, %v1462_v52, 0.0  ;;  %vm7802_vm10 = vmand %vm6138_vm11, %vm8469_vm2  ;;  %vm8470_vm5 = vnez %v8006_v49  ;;  %v8471_v52 = vld [vmem:[#allocation42_spill] sm:$0xff]  ;;  %v1504_v16 = vmul.f32 %v8472_v8, %v1498_v38  ;;  %v1505_v56 = vmul.f32 %v8472_v8, %v1499_v3  ;;  %2673 = vrot.lane.b32.xlu1 %v3611_v39, %s3137_s5  ;;  %2671 = vrot.lane.b32.xlu0 %v3628_v43, %s3137_s5 }
 0x192   :  { %vm7803_vm15 = vmand %vm6153_vm13, %vm8470_vm5  ;;  %v1913_v15 = vmul.f32 %v1912_v28, %v8471_v52  ;;  %v1914_v58 = vmul.f32 %v1911_v1, %v8471_v52  ;;  %v1919_v10 = vrot.slane %v1915_v22, 1  ;;  %v6229_v55 = vstv %s6147_s14  ;;  %v1930_v22 = vpop.permute.xlu0 %1929 }
 0x193   :  { %8473 = vst [vmem:[#allocation25_spill] sm:$0xff] %v6229_v55  ;;  %v6232_v11 = vstv %s6161_s1  ;;  %v1466_v14 = vadd.f32 %v1464_v6, %v1441_v59  ;;  %v1467_v60 = vadd.f32 %v1465_v9, %v1442_v26  ;;  %v1489_v27 = vsel %vm7802_vm10, %v1487_v5, 0.0  ;;  %vm8476_vm1 = vmmov %vm8475_vm9 }
 0x194   :  { %8474 = vst [vmem:[#allocation30_spill] sm:$0xff] %v6232_v11  ;;  %v1923_v28 = vadd.f32 %v1919_v10, %v1913_v15  ;;  %v1924_v1 = vadd.f32 %v1920_v0, %v1914_v58  ;;  %v1490_v18 = vsel %vm7803_vm15, %v1488_v40, 0.0  ;;  %v1523_v59 = vsel %vm8475_vm9, %v6132_v47, %v6118_v42  ;;  %vm8477_vm10 = vmand %vm8457_vm6, %vm8469_vm2  ;;  %v8483_v10 = vld [vmem:[#allocation46_spill] sm:$0xff] }
 0x195   :  { %v1524_v26 = vsel %vm8476_vm1, %v6118_v42, %v6132_v47  ;;  %vm8478_vm15 = vmand %vm8460_vm3, %vm8470_vm5  ;;  %vm8479_vm9 = vcmp.lt.s32.totalorder %v3289_v21, 33  ;;  %v1508_v42 = vrot.slane %v1504_v16, 1  ;;  %v1509_v47 = vrot.slane %v1505_v56, 1  ;;  %2695 = vrot.lane.b32.xlu1 %v3611_v39, %s3138_s2  ;;  %2693 = vrot.lane.b32.xlu0 %v3628_v43, %s3138_s2 }
 0x196   :  { %v1925_v2 = vsel %vm8477_vm10, %v1923_v28, 0.0  ;;  %v1926_v6 = vsel %vm8478_vm15, %v1924_v1, 0.0  ;;  %v1933_v9 = vsel %vm8479_vm9, %v1930_v22, %v1932_v12  ;;  %vm8480_vm8 = vmmov %vm8479_vm9  ;;  %vm8481_vm1 = vcmp.lt.s32.totalorder %v3289_v21, 79  ;;  %v6276_v1 = vpop.permute.xlu1 %1570 }
 0x197   :  { %v1934_v5 = vsel %vm8480_vm8, %v1932_v12, %v1930_v22  ;;  %v1927_v40 = vadd.f32 %v1925_v2, %v1905_v30  ;;  %v1928_v52 = vadd.f32 %v1926_v6, %v1906_v50  ;;  %v1548_v15 = vsel %vm8481_vm1, %v1544_v13, %v1546_v31  ;;  %vm8482_vm10 = vmmov %vm8481_vm1  ;;  %v8484_v12 = vld [vmem:[#allocation29_spill] sm:$0xff]  ;;  %v8485_v50 = vld [vmem:[#allocation27_spill] sm:$0xff]  ;;  %v6282_v2 = vpop.permute.xlu0 %1568 }
 0x198   :  { %v1549_v58 = vsel %vm8482_vm10, %v1546_v31, %v1544_v13  ;;  %v1937_v0 = vmul.f32 %v1934_v5, %v8483_v10  ;;  %v1938_v28 = vmul.f32 %v1933_v9, %v8483_v10  ;;  %v1501_v16 = vmul.f32 %v8484_v12, %v1498_v38  ;;  %v8486_v6 = vld [vmem:[#allocation45_spill] sm:$0xff] }
 0x199   :  { %v1502_v30 = vmul.f32 %v8484_v12, %v1499_v3  ;;  %v1529_v56 = vmul.f32 %v8485_v50, %v1523_v59  ;;  %v1530_v22 = vmul.f32 %v8485_v50, %v1524_v26  ;;  %v1935_v8 = vmul.f32 %v1934_v5, %v8486_v6  ;;  %2717 = vrot.lane.b32.xlu1 %v3611_v39, %s3139_s25 }
 0x19a   :  { %v1936_v31 = vmul.f32 %v1933_v9, %v8486_v6  ;;  %v1941_v13 = vrot.slane %v1937_v0, 1  ;;  %v1942_v20 = vrot.slane %v1938_v28, 1  ;;  %v1491_v38 = vadd.f32 %v1489_v27, %v1466_v14  ;;  %v1954_v14 = vpop.permute.xlu1 %1953  ;;  %2715 = vrot.lane.b32.xlu0 %v3628_v43, %s3139_s25 }
 0x19b   :  { %v1492_v3 = vadd.f32 %v1490_v18, %v1467_v60  ;;  %v1554_v10 = vmul.f32 %v5891_v37, %v1548_v15  ;;  %v1555_v12 = vmul.f32 %v5891_v37, %v1549_v58  ;;  %vm8487_vm15 = vnez %v8012_v45  ;;  %v8489_v60 = vld [vmem:[#allocation28_spill] sm:$0xff]  ;;  %v1952_v50 = vpop.permute.xlu0 %1951 }
 0x19c   :  { %v1512_v9 = vadd.f32 %v1508_v42, %v1501_v16  ;;  %v1513_v5 = vadd.f32 %v1509_v47, %v1502_v30  ;;  %v1945_v0 = vadd.f32 %v1941_v13, %v1935_v8  ;;  %v1946_v28 = vadd.f32 %v1942_v20, %v1936_v31  ;;  %vm8490_vm8 = vmand %vm8457_vm6, %vm8487_vm15 }
 0x19d   :  { %vm8488_vm1 = vnez %v8016_v61  ;;  %v1526_v27 = vmul.f32 %v8489_v60, %v1523_v59  ;;  %v1527_v18 = vmul.f32 %v8489_v60, %v1524_v26  ;;  %v1533_v6 = vrot.slane %v1529_v56, 1  ;;  %2739 = vrot.lane.b32.xlu1 %v3611_v39, %s3140_s24 }
 0x19e   :  { %v1534_v37 = vrot.slane %v1530_v22, 1  ;;  %v1947_v8 = vsel %vm8490_vm8, %v1945_v0, 0.0  ;;  %vm8491_vm9 = vmand %vm8460_vm3, %vm8488_vm1  ;;  %vm8492_vm10 = vcmp.lt.s32.totalorder %v3289_v21, 32  ;;  %v1558_v42 = vrot.slane %v1554_v10, 1  ;;  %v8496_v22 = vld [vmem:[#allocation48_spill] sm:$0xff]  ;;  %v8498_v0 = vld [vmem:[#allocation47_spill] sm:$0xff]  ;;  %2737 = vrot.lane.b32.xlu0 %v3628_v43, %s3140_s24 }
 0x19f   :  { %v1948_v20 = vsel %vm8491_vm9, %v1946_v28, 0.0  ;;  %v1955_v59 = vsel %vm8492_vm10, %v1952_v50, %v1954_v14  ;;  %vm8493_vm5 = vmmov %vm8492_vm10  ;;  %v1559_v47 = vrot.slane %v1555_v12, 1  ;;  %v1949_v16 = vadd.f32 %v1947_v8, %v1927_v40 }
 0x1a0   :  { %v1956_v26 = vsel %vm8493_vm5, %v1954_v14, %v1952_v50  ;;  %v1950_v30 = vadd.f32 %v1948_v20, %v1928_v52  ;;  %vm8494_vm8 = vmand %vm6138_vm11, %vm8487_vm15  ;;  %v1960_v40 = vmul.f32 %v1955_v59, %v8496_v22  ;;  %v6337_v52 = vpop.permute.xlu1 %1595  ;;  %v1537_v12 = vadd.f32 %v1533_v6, %v1526_v27 }
 0x1a1   :  { %v1514_v56 = vsel %vm8494_vm8, %v1512_v9, 0.0  ;;  %vm8495_vm5 = vmand %vm6153_vm13, %vm8488_vm1  ;;  %v1959_v31 = vmul.f32 %v1956_v26, %v8496_v22  ;;  %v1538_v13 = vadd.f32 %v1534_v37, %v1527_v18  ;;  %v1551_v10 = vmul.f32 %v5888_v54, %v1548_v15  ;;  %2759 = vrot.lane.b32.xlu1 %v3628_v43, %s3141_s23 }
 0x1a2   :  { %v1515_v50 = vsel %vm8495_vm5, %v1513_v5, 0.0  ;;  %vm7813_vm9 = vmand %vm6138_vm11, %vm8366_vm0  ;;  %v1552_v9 = vmul.f32 %v5888_v54, %v1549_v58  ;;  %v6345_v5 = vpop.permute.xlu0 %1593  ;;  %vm8497_vm10 = vnez %v7955_v63  ;;  %v1957_v28 = vmul.f32 %v1956_v26, %v8498_v0 }
 0x1a3   :  { %v1958_v14 = vmul.f32 %v1955_v59, %v8498_v0  ;;  %v1963_v8 = vrot.slane %v1959_v31, 1  ;;  %v1964_v20 = vrot.slane %v1960_v40, 1  ;;  %v1562_v37 = vadd.f32 %v1558_v42, %v1551_v10  ;;  %vm8501_vm5 = vmand %vm6153_vm13, %vm8497_vm10 }
 0x1a4   :  { %v1563_v15 = vadd.f32 %v1559_v47, %v1552_v9  ;;  %v6360_v58 = vstv %s6289_s12  ;;  %v6363_v27 = vstv %s6295_s26  ;;  %v1516_v18 = vadd.f32 %v1514_v56, %v1491_v38  ;;  %v1976_v22 = vpop.permute.xlu1 %1975 }
 0x1a5   :  { %8499 = vst [vmem:[#allocation33_spill] sm:$0xff] %v6360_v58  ;;  %8500 = vst [vmem:[#allocation35_spill] sm:$0xff] %v6363_v27  ;;  %v1517_v6 = vadd.f32 %v1515_v50, %v1492_v3  ;;  %v1967_v59 = vadd.f32 %v1963_v8, %v1957_v28  ;;  %v1968_v26 = vadd.f32 %v1964_v20, %v1958_v14  ;;  %v1539_v42 = vsel %vm7813_vm9, %v1537_v12, 0.0  ;;  %v8510_v28 = vld [vmem:[#allocation50_spill] sm:$0xff] }
 0x1a6   :  { %v1540_v38 = vsel %vm8501_vm5, %v1538_v13, 0.0  ;;  %vm8502_vm1 = vcmp.lt.s32.totalorder %v3289_v21, 78  ;;  %v1974_v56 = vpop.permute.xlu0 %1973  ;;  %vm8504_vm9 = vmand %vm8457_vm6, %vm8366_vm0  ;;  %2761 = vrot.lane.b32.xlu1 %v3611_v39, %s3141_s23 }
 0x1a7   :  { %v1573_v3 = vsel %vm8502_vm1, %v6282_v2, %v6276_v1  ;;  %vm8503_vm8 = vmmov %vm8502_vm1  ;;  %v1969_v50 = vsel %vm8504_vm9, %v1967_v59, 0.0  ;;  %vm8506_vm1 = vcmp.lt.s32.totalorder %v3289_v21, 31  ;;  %v1542_v59 = vadd.f32 %v1540_v38, %v1517_v6 }
 0x1a8   :  { %v1574_v47 = vsel %vm8503_vm8, %v6276_v1, %v6282_v2  ;;  %vm8505_vm5 = vmand %vm8460_vm3, %vm8497_vm10  ;;  %v1977_v40 = vsel %vm8506_vm1, %v1974_v56, %v1976_v22  ;;  %v1971_v13 = vadd.f32 %v1969_v50, %v1949_v16  ;;  %v1579_v9 = vmul.f32 %v6232_v11, %v1573_v3  ;;  %v1998_v20 = vpop.permute.xlu1 %1997 }
 0x1a9   :  { %v1970_v31 = vsel %vm8505_vm5, %v1968_v26, 0.0  ;;  %vm8507_vm15 = vmmov %vm8506_vm1  ;;  %v1580_v0 = vmul.f32 %v6232_v11, %v1574_v47  ;;  %v1982_v8 = vmul.f32 %v1977_v40, %v8510_v28  ;;  %v8511_v26 = vld [vmem:[#allocation49_spill] sm:$0xff]  ;;  %vm8512_vm5 = vcmp.lt.s32.totalorder %v3289_v21, 30 }
 0x1aa   :  { %v1978_v12 = vsel %vm8507_vm15, %v1976_v22, %v1974_v56  ;;  %vm8508_vm9 = vmand %vm6138_vm11, %vm8300_vm12  ;;  %v1972_v10 = vadd.f32 %v1970_v31, %v1950_v30  ;;  %vm7820_vm15 = vcmp.lt.s32.totalorder %v3289_v21, 77  ;;  %v1980_v16 = vmul.f32 %v1977_v40, %v8511_v26  ;;  %v1996_v30 = vpop.permute.xlu0 %1995 }
 0x1ab   :  { %v1564_v1 = vsel %vm8508_vm9, %v1562_v37, 0.0  ;;  %vm8509_vm8 = vmand %vm6153_vm13, %vm8391_vm14  ;;  %v1981_v14 = vmul.f32 %v1978_v12, %v8510_v28  ;;  %v1541_v37 = vadd.f32 %v1539_v42, %v1516_v18  ;;  %v1986_v56 = vrot.slane %v1982_v8, 1 }
 0x1ac   :  { %v1565_v2 = vsel %vm8509_vm8, %v1563_v15, 0.0  ;;  %v1979_v15 = vmul.f32 %v1978_v12, %v8511_v26  ;;  %v1999_v50 = vsel %vm8512_vm5, %v1996_v30, %v1998_v20  ;;  %vm8513_vm1 = vmmov %vm8512_vm5  ;;  %v1576_v6 = vmul.f32 %v6229_v55, %v1573_v3  ;;  %v2020_v8 = vpop.permute.xlu1 %2019 }
 0x1ad   :  { %v1985_v22 = vrot.slane %v1981_v14, 1  ;;  %v2000_v31 = vsel %vm8513_vm1, %v1998_v20, %v1996_v30  ;;  %v6430_v28 = vadd.f32 %v1564_v1, %v1541_v37  ;;  %v6432_v18 = vadd.f32 %v1565_v2, %v1542_v59  ;;  %v8514_v20 = vld [vmem:[#allocation51_spill] sm:$0xff]  ;;  %v8515_v1 = vld [vmem:[#allocation52_spill] sm:$0xff]  ;;  %vm8516_vm9 = vmand %vm8457_vm6, %vm8300_vm12 }
 0x1ae   :  { %v1577_v42 = vmul.f32 %v6229_v55, %v1574_v47  ;;  %v1583_v38 = vrot.slane %v1579_v9, 1  ;;  %v1584_v40 = vrot.slane %v1580_v0, 1  ;;  %v1990_v14 = vadd.f32 %v1986_v56, %v1980_v16  ;;  %v2018_v59 = vpop.permute.xlu0 %2017  ;;  %vm8517_vm8 = vmand %vm8460_vm3, %vm8391_vm14 }
 0x1af   :  { %v1989_v12 = vadd.f32 %v1985_v22, %v1979_v15  ;;  %v2001_v26 = vmul.f32 %v2000_v31, %v8514_v20  ;;  %v2002_v30 = vmul.f32 %v1999_v50, %v8514_v20  ;;  %v2003_v37 = vmul.f32 %v2000_v31, %v8515_v1 }
 0x1b0   :  { %v2004_v2 = vmul.f32 %v1999_v50, %v8515_v1  ;;  %v1992_v47 = vsel %vm8517_vm8, %v1990_v14, 0.0  ;;  %vm8518_vm5 = vcmp.lt.s32.totalorder %v3289_v21, 29  ;;  %v1587_v50 = vadd.f32 %v1583_v38, %v1576_v6  ;;  %v2042_v1 = vpop.permute.xlu1 %2041 }
 0x1b1   :  { %v1991_v3 = vsel %vm8516_vm9, %v1989_v12, 0.0  ;;  %v2021_v9 = vsel %vm8518_vm5, %v2018_v59, %v2020_v8  ;;  %vm8519_vm1 = vmmov %vm8518_vm5  ;;  %v1994_v16 = vadd.f32 %v1992_v47, %v1972_v10  ;;  %v2007_v22 = vrot.slane %v2003_v37, 1  ;;  %v8520_v12 = vld [vmem:[#allocation55_spill] sm:$0xff] }
 0x1b2   :  { %v2022_v0 = vsel %vm8519_vm1, %v2020_v8, %v2018_v59  ;;  %v1993_v15 = vadd.f32 %v1991_v3, %v1971_v13  ;;  %v2008_v56 = vrot.slane %v2004_v2, 1  ;;  %v1588_v31 = vadd.f32 %v1584_v40, %v1577_v42  ;;  %v8521_v8 = vld [vmem:[#allocation53_spill] sm:$0xff]  ;;  %v2040_v13 = vpop.permute.xlu0 %2039  ;;  %vm8524_vm5 = vmand %vm8457_vm6, %vm8399_vm4 }
 0x1b3   :  { %v2025_v14 = vmul.f32 %v2022_v0, %v8520_v12  ;;  %v2026_v20 = vmul.f32 %v2021_v9, %v8520_v12  ;;  %v2011_v55 = vadd.f32 %v2007_v22, %v2001_v26  ;;  %v2023_v59 = vmul.f32 %v2022_v0, %v8521_v8  ;;  %vm8525_vm1 = vmand %vm8460_vm3, %vm8438_vm7  ;;  %v8527_v0 = vld [vmem:[#allocation57_spill] sm:$0xff] }
 0x1b4   :  { %v2012_v54 = vadd.f32 %v2008_v56, %v2002_v30  ;;  %v2024_v60 = vmul.f32 %v2021_v9, %v8521_v8  ;;  %vm8522_vm9 = vcmp.lt.s32.totalorder %v3289_v21, 19  ;;  %v6474_v42 = vsel %vm7820_vm15, %v6345_v5, %v6337_v52  ;;  %v2064_v47 = vpop.permute.xlu1 %2063 }
 0x1b5   :  { %v2029_v10 = vrot.slane %v2025_v14, 1  ;;  %v2030_v37 = vrot.slane %v2026_v20, 1  ;;  %v2043_v2 = vsel %vm8522_vm9, %v2040_v13, %v2042_v1  ;;  %vm8523_vm8 = vmmov %vm8522_vm9  ;;  %v6480_v38 = vsel %vm7820_vm15, %v6337_v52, %v6345_v5 }
 0x1b6   :  { %v2044_v6 = vsel %vm8523_vm8, %v2042_v1, %v2040_v13  ;;  %v2013_v40 = vsel %vm8524_vm5, %v2011_v55, 0.0  ;;  %v2014_v26 = vsel %vm8525_vm1, %v2012_v54, 0.0  ;;  %v8526_v55 = vld [vmem:[#allocation56_spill] sm:$0xff]  ;;  %v2048_v56 = vmul.f32 %v2043_v2, %v8527_v0  ;;  %v2062_v12 = vpop.permute.xlu0 %2061 }
 0x1b7   :  { %v2015_v52 = vadd.f32 %v2013_v40, %v1993_v15  ;;  %v2016_v5 = vadd.f32 %v2014_v26, %v1994_v16  ;;  %v2033_v30 = vadd.f32 %v2029_v10, %v2023_v59  ;;  %v2034_v3 = vadd.f32 %v2030_v37, %v2024_v60  ;;  %v8536_v13 = vld [vmem:[#allocation60_spill] sm:$0xff]  ;;  %v8537_v26 = vld [vmem:[#allocation59_spill] sm:$0xff] }
 0x1b8   :  { %v2045_v54 = vmul.f32 %v2044_v6, %v8526_v55  ;;  %v2046_v9 = vmul.f32 %v2043_v2, %v8526_v55  ;;  %v2047_v22 = vmul.f32 %v2044_v6, %v8527_v0  ;;  %vm8528_vm5 = vnez %v8072_v25  ;;  %v2086_v2 = vpop.permute.xlu1 %2085 }
 0x1b9   :  { %vm8529_vm1 = vmand %vm8457_vm6, %vm8528_vm5  ;;  %vm8530_vm15 = vnez %v8076_v23  ;;  %vm8532_vm9 = vcmp.lt.s32.totalorder %v3289_v21, 18  ;;  %v2052_v8 = vrot.slane %v2048_v56, 1  ;;  %v1604_v55 = vmul.f32 %v6363_v27, %v6474_v42 }
 0x1ba   :  { %v2035_v60 = vsel %vm8529_vm1, %v2033_v30, 0.0  ;;  %vm8531_vm8 = vmand %vm8460_vm3, %vm8530_vm15  ;;  %v2065_v16 = vsel %vm8532_vm9, %v2062_v12, %v2064_v47  ;;  %v2051_v1 = vrot.slane %v2047_v22, 1  ;;  %vm8538_vm3 = vcmp.lt.s32.totalorder %v3289_v21, 17  ;;  %v8544_v22 = vld [vmem:[#allocation62_spill] sm:$0xff] }
 0x1bb   :  { %v2036_v15 = vsel %vm8531_vm8, %v2034_v3, 0.0  ;;  %vm8533_vm14 = vmmov %vm8532_vm9  ;;  %v2037_v48 = vadd.f32 %v2035_v60, %v2015_v52  ;;  %v2070_v37 = vmul.f32 %v2065_v16, %v8536_v13  ;;  %v2056_v40 = vadd.f32 %v2052_v8, %v2046_v9  ;;  %v8540_v9 = vld [vmem:[#allocation58_spill] sm:$0xff] }
 0x1bc   :  { %v2066_v14 = vsel %vm8533_vm14, %v2064_v47, %v2062_v12  ;;  %v2038_v20 = vadd.f32 %v2036_v15, %v2016_v5  ;;  %vm8534_vm6 = vmand %vm6138_vm11, %vm8399_vm4  ;;  %v2055_v6 = vadd.f32 %v2051_v1, %v2045_v54  ;;  %v2068_v5 = vmul.f32 %v2065_v16, %v8537_v26  ;;  %v8548_v1 = vld [vmem:[#allocation61_spill] sm:$0xff] }
 0x1bd   :  { %v6529_v53 = vsel %vm8534_vm6, %v1587_v50, 0.0  ;;  %vm8535_vm14 = vmand %vm6153_vm13, %vm8438_vm7  ;;  %v2069_v10 = vmul.f32 %v2066_v14, %v8536_v13  ;;  %v2067_v52 = vmul.f32 %v2066_v14, %v8537_v26  ;;  %v2084_v50 = vpop.permute.xlu0 %2083  ;;  %v2074_v3 = vrot.slane %v2070_v37, 1  ;;  %v2108_v14 = vpop.permute.xlu1 %2107 }
 0x1be   :  { %v6536_v59 = vsel %vm8535_vm14, %v1588_v31, 0.0  ;;  %v2087_v47 = vsel %vm8538_vm3, %v2084_v50, %v2086_v2  ;;  %vm8539_vm9 = vmmov %vm8538_vm3  ;;  %v1605_v54 = vmul.f32 %v6363_v27, %v6480_v38  ;;  %vm8541_vm8 = vnez %v8540_v9 }
 0x1bf   :  { %v2073_v30 = vrot.slane %v2069_v10, 1  ;;  %v2088_v31 = vsel %vm8539_vm9, %v2086_v2, %v2084_v50  ;;  %vm8542_vm1 = vnez %v7982_v46  ;;  %vm8545_vm14 = vnez %v8544_v22  ;;  %v8549_v10 = vld [vmem:[#allocation63_spill] sm:$0xff] }
 0x1c0   :  { %vm8543_vm6 = vmand %vm8541_vm8, %vm8542_vm1  ;;  %vm8546_vm3 = vnez %v7995_v7  ;;  %v2078_v16 = vadd.f32 %v2074_v3, %v2068_v5  ;;  %v2089_v8 = vmul.f32 %v2088_v31, %v8548_v1  ;;  %v2090_v13 = vmul.f32 %v2087_v47, %v8548_v1  ;;  %v8556_v1 = vld [vmem:[#allocation64_spill] sm:$0xff] }
 0x1c1   :  { %v2057_v0 = vsel %vm8543_vm6, %v2055_v6, 0.0  ;;  %vm8547_vm9 = vmand %vm8545_vm14, %vm8546_vm3  ;;  %v2077_v15 = vadd.f32 %v2073_v30, %v2067_v52  ;;  %v2091_v37 = vmul.f32 %v2088_v31, %v8549_v10  ;;  %v2092_v2 = vmul.f32 %v2087_v47, %v8549_v10  ;;  %v2106_v6 = vpop.permute.xlu0 %2105  ;;  %v8555_v31 = vld [vmem:[#allocation65_spill] sm:$0xff] }
 0x1c2   :  { %v2058_v56 = vsel %vm8547_vm9, %v2056_v40, 0.0  ;;  %v2059_v12 = vadd.f32 %v2057_v0, %v2037_v48  ;;  %vm8550_vm6 = vmand %vm8541_vm8, %vm8469_vm2  ;;  %vm8551_vm9 = vnez %v8006_v49  ;;  %vm8553_vm1 = vcmp.lt.s32.totalorder %v3289_v21, 16 }
 0x1c3   :  { %v2060_v60 = vadd.f32 %v2058_v56, %v2038_v20  ;;  %v2079_v40 = vsel %vm8550_vm6, %v2077_v15, 0.0  ;;  %vm8552_vm3 = vmand %vm8545_vm14, %vm8551_vm9  ;;  %v2109_v20 = vsel %vm8553_vm1, %v2106_v6, %v2108_v14  ;;  %v2095_v50 = vrot.slane %v2091_v37, 1  ;;  %v2130_v15 = vpop.permute.xlu1 %2129 }
 0x1c4   :  { %v2080_v48 = vsel %vm8552_vm3, %v2078_v16, 0.0  ;;  %vm8554_vm7 = vmmov %vm8553_vm1  ;;  %v2081_v52 = vadd.f32 %v2079_v40, %v2059_v12  ;;  %v2096_v30 = vrot.slane %v2092_v2, 1  ;;  %v1601_v3 = vmul.f32 %v6360_v58, %v6474_v42 }
 0x1c5   :  { %v2110_v26 = vsel %vm8554_vm7, %v2108_v14, %v2106_v6  ;;  %v2082_v5 = vadd.f32 %v2080_v48, %v2060_v60  ;;  %v1602_v47 = vmul.f32 %v6360_v58, %v6480_v38  ;;  %v2114_v56 = vmul.f32 %v2109_v20, %v8555_v31  ;;  %v2128_v60 = vpop.permute.xlu0 %2127 }
 0x1c6   :  { %v2113_v0 = vmul.f32 %v2110_v26, %v8555_v31  ;;  %v2099_v16 = vadd.f32 %v2095_v50, %v2089_v8  ;;  %v2100_v14 = vadd.f32 %v2096_v30, %v2090_v13  ;;  %v2111_v10 = vmul.f32 %v2110_v26, %v8556_v1  ;;  %v8563_v31 = vld [vmem:[#allocation66_spill] sm:$0xff] }
 0x1c7   :  { %v2112_v12 = vmul.f32 %v2109_v20, %v8556_v1  ;;  %v2118_v2 = vrot.slane %v2114_v56, 1  ;;  %vm8557_vm7 = vcmp.lt.s32.totalorder %v3289_v21, 15  ;;  %v1608_v6 = vrot.slane %v1604_v55, 1  ;;  %v2152_v30 = vpop.permute.xlu1 %2151 }
 0x1c8   :  { %v2117_v37 = vrot.slane %v2113_v0, 1  ;;  %v2131_v42 = vsel %vm8557_vm7, %v2128_v60, %v2130_v15  ;;  %vm8558_vm1 = vmmov %vm8557_vm7  ;;  %v1609_v40 = vrot.slane %v1605_v54, 1  ;;  %vm8559_vm3 = vnez %v8012_v45  ;;  %v8564_v0 = vld [vmem:[#allocation67_spill] sm:$0xff] }
 0x1c9   :  { %v2132_v38 = vsel %vm8558_vm1, %v2130_v15, %v2128_v60  ;;  %vm8560_vm6 = vmand %vm8541_vm8, %vm8559_vm3  ;;  %vm8561_vm9 = vnez %v8016_v61  ;;  %v2122_v50 = vadd.f32 %v2118_v2, %v2112_v12  ;;  %v2134_v54 = vmul.f32 %v2131_v42, %v8563_v31 }
 0x1ca   :  { %v2101_v8 = vsel %vm8560_vm6, %v2099_v16, 0.0  ;;  %vm8562_vm2 = vmand %vm8545_vm14, %vm8561_vm9  ;;  %v2121_v26 = vadd.f32 %v2117_v37, %v2111_v10  ;;  %v2133_v55 = vmul.f32 %v2132_v38, %v8563_v31  ;;  %v2135_v56 = vmul.f32 %v2132_v38, %v8564_v0  ;;  %v2150_v16 = vpop.permute.xlu0 %2149  ;;  %v8569_v38 = vld [vmem:[#allocation70_spill] sm:$0xff] }
 0x1cb   :  { %v2102_v13 = vsel %vm8562_vm2, %v2100_v14, 0.0  ;;  %v2103_v48 = vadd.f32 %v2101_v8, %v2081_v52  ;;  %v2136_v15 = vmul.f32 %v2131_v42, %v8564_v0  ;;  %vm8565_vm7 = vmand %vm8541_vm8, %vm8366_vm0  ;;  %vm8567_vm1 = vcmp.lt.s32.totalorder %v3289_v21, 14  ;;  %v8570_v0 = vld [vmem:[#allocation69_spill] sm:$0xff] }
 0x1cc   :  { %v2104_v20 = vadd.f32 %v2102_v13, %v2082_v5  ;;  %v2123_v14 = vsel %vm8565_vm7, %v2121_v26, 0.0  ;;  %vm8566_vm2 = vmand %vm8545_vm14, %vm8497_vm10  ;;  %v2153_v5 = vsel %vm8567_vm1, %v2150_v16, %v2152_v30  ;;  %v2139_v60 = vrot.slane %v2135_v56, 1  ;;  %v2174_v26 = vpop.permute.xlu1 %2173 }
 0x1cd   :  { %v2124_v52 = vsel %vm8566_vm2, %v2122_v50, 0.0  ;;  %vm8568_vm6 = vmmov %vm8567_vm1  ;;  %v2125_v10 = vadd.f32 %v2123_v14, %v2103_v48  ;;  %v2140_v37 = vrot.slane %v2136_v15, 1  ;;  %v1612_v2 = vadd.f32 %v1608_v6, %v1601_v3 }
 0x1ce   :  { %v2154_v1 = vsel %vm8568_vm6, %v2152_v30, %v2150_v16  ;;  %v2126_v12 = vadd.f32 %v2124_v52, %v2104_v20  ;;  %v1613_v42 = vadd.f32 %v1609_v40, %v1602_v47  ;;  %v2158_v13 = vmul.f32 %v2153_v5, %v8569_v38  ;;  %v2172_v20 = vpop.permute.xlu0 %2171  ;;  %vm8573_vm7 = vmand %vm8541_vm8, %vm8300_vm12 }
 0x1cf   :  { %v2157_v8 = vmul.f32 %v2154_v1, %v8569_v38  ;;  %v2143_v50 = vadd.f32 %v2139_v60, %v2133_v55  ;;  %v2144_v31 = vadd.f32 %v2140_v37, %v2134_v54  ;;  %v2155_v30 = vmul.f32 %v2154_v1, %v8570_v0  ;;  %v8582_v37 = vld [vmem:[#allocation71_spill] sm:$0xff] }
 0x1d0   :  { %v2156_v48 = vmul.f32 %v2153_v5, %v8570_v0  ;;  %v2162_v47 = vrot.slane %v2158_v13, 1  ;;  %vm8571_vm1 = vcmp.lt.s32.totalorder %v3289_v21, 13  ;;  %v1591_v55 = vadd.f32 %v6529_v53, %v6430_v28  ;;  %v2196_v28 = vpop.permute.xlu1 %2195 }
 0x1d1   :  { %v2161_v3 = vrot.slane %v2157_v8, 1  ;;  %v2175_v6 = vsel %vm8571_vm1, %v2172_v20, %v2174_v26  ;;  %vm8572_vm6 = vmmov %vm8571_vm1  ;;  %v1592_v54 = vadd.f32 %v6536_v59, %v6432_v18  ;;  %v2145_v56 = vsel %vm8573_vm7, %v2143_v50, 0.0  ;;  %v8578_v59 = vld [vmem:[#allocation72_spill] sm:$0xff] }
 0x1d2   :  { %v2176_v40 = vsel %vm8572_vm6, %v2174_v26, %v2172_v20  ;;  %vm8574_vm2 = vnez %v8029_v62  ;;  %v2147_v16 = vadd.f32 %v2145_v56, %v2125_v10  ;;  %v2166_v5 = vadd.f32 %v2162_v47, %v2156_v48  ;;  %vm8576_vm6 = vmand %vm6138_vm11, %vm8528_vm5  ;;  %v2194_v50 = vpop.permute.xlu0 %2193 }
 0x1d3   :  { %vm8575_vm1 = vmand %vm8545_vm14, %vm8574_vm2  ;;  %v2165_v52 = vadd.f32 %v2161_v3, %v2155_v30  ;;  %v1614_v18 = vsel %vm8576_vm6, %v1612_v2, 0.0  ;;  %v2179_v1 = vmul.f32 %v2176_v40, %v8578_v59  ;;  %v2180_v10 = vmul.f32 %v2175_v6, %v8578_v59 }
 0x1d4   :  { %v2146_v15 = vsel %vm8575_vm1, %v2144_v31, 0.0  ;;  %vm8577_vm7 = vmand %vm6153_vm13, %vm8530_vm15  ;;  %vm8580_vm6 = vnez %v8047_v4  ;;  %v2177_v2 = vmul.f32 %v2176_v40, %v8582_v37  ;;  %v2218_v31 = vpop.permute.xlu1 %2217  ;;  %v6680_v0 = vadd.f32 %v1614_v18, %v1591_v55 }
 0x1d5   :  { %v2148_v14 = vadd.f32 %v2146_v15, %v2126_v12  ;;  %v1615_v53 = vsel %vm8577_vm7, %v1613_v42, 0.0  ;;  %vm8579_vm1 = vmand %vm8541_vm8, %vm8399_vm4  ;;  %v2178_v42 = vmul.f32 %v2175_v6, %v8582_v37  ;;  %v2183_v13 = vrot.slane %v2179_v1, 1 }
 0x1d6   :  { %v2167_v12 = vsel %vm8579_vm1, %v2165_v52, 0.0  ;;  %vm8581_vm11 = vmand %vm8545_vm14, %vm8580_vm6  ;;  %v2184_v26 = vrot.slane %v2180_v10, 1  ;;  %8583 = vst [vmem:[#allocation32_spill] sm:$0xff] %v6680_v0  ;;  %v6682_v30 = vadd.f32 %v1615_v53, %v1592_v54  ;;  %v2216_v54 = vpop.permute.xlu0 %2215  ;;  %vm8587_vm1 = vcmask 1040384  }
 0x1d7   :  { %v2168_v60 = vsel %vm8581_vm11, %v2166_v5, 0.0  ;;  %v2169_v38 = vadd.f32 %v2167_v12, %v2147_v16  ;;  %v2187_v48 = vadd.f32 %v2183_v13, %v2177_v2  ;;  %vm8585_vm11 = vmand %vm8541_vm8, %vm8528_vm5  ;;  %v1618_v56 = vsel %vm8587_vm1, %v6680_v0, 0.0 }
 0x1d8   :  { %v2170_v8 = vadd.f32 %v2168_v60, %v2148_v14  ;;  %8584 = vst [vmem:[#allocation37_spill] sm:$0xff] %v6682_v30  ;;  %v2188_v20 = vadd.f32 %v2184_v26, %v2178_v42  ;;  %vm8586_vm7 = vmand %vm8545_vm14, %vm8530_vm15  ;;  %v2240_v55 = vpop.permute.xlu1 %2239  ;;  %v1630_v14 = vmul.f32 %v6680_v0, %v6680_v0  ;;  %v1631_v52 = vmul.f32 %v6682_v30, %v6682_v30 }
 0x1d9   :  { %v2189_v3 = vsel %vm8585_vm11, %v2187_v48, 0.0  ;;  %vm8588_vm13 = vmmov %vm8587_vm1 }
 0x1da   :  { %v2190_v47 = vsel %vm8586_vm7, %v2188_v20, 0.0  ;;  %v6694_v6 = vadd.f32 %v2189_v3, %v2169_v38  ;;  %v1619_v9 = vsel %vm8588_vm13, %v6682_v30, 0.0  ;;  %v2238_v22 = vpop.permute.xlu0 %2237  ;;  %vm8589_vm8 = vmmov %vm8587_vm1  ;;  %vm8592_vm13 = vcmp.lt.s32.totalorder %v3289_v21, 3 }
 0x1db   :  { %v6696_v40 = vadd.f32 %v2190_v47, %v2170_v8  ;;  %v1620_v15 = vadd.f32 %v1619_v9, %v1618_v56  ;;  %v1632_v53 = vsel %vm8589_vm8, %v1630_v14, 0.0  ;;  %vm8590_vm14 = vmmov %vm8587_vm1  ;;  %v2198_v56 = vsel %vm8592_vm13, %v2196_v28, %v2194_v50 }
 0x1dc   :  { %v6702_v16 = vpop.permute.xlu1 %2277  ;;  %v1633_v59 = vsel %vm8590_vm14, %v1631_v52, 0.0  ;;  %vm8593_vm11 = vmmov %vm8592_vm13  ;;  %vm8595_vm7 = vcmp.lt.s32.totalorder %v3289_v21, 2  ;;  %vm8598_vm8 = vcmp.lt.s32.totalorder %v3289_v21, 1  ;;  %vm8608_vm13 = vcmp.lt.s32.totalorder %v3289_v21, 127 }
 0x1dd   :  { %1621 = vadd.xlane.f32.xlu0 %v1620_v15  ;;  %v1634_v1 = vadd.f32 %v1633_v59, %v1632_v53  ;;  %v2197_v9 = vsel %vm8593_vm11, %v2194_v50, %v2196_v28  ;;  %v8594_v15 = vld [vmem:[#allocation74_spill] sm:$0xff]  ;;  %v2219_v52 = vsel %vm8595_vm7, %v2216_v54, %v2218_v31  ;;  %vm8596_vm1 = vmmov %vm8595_vm7  ;;  %v2241_v30 = vsel %vm8598_vm8, %v2238_v22, %v2240_v55  ;;  %v8601_v28 = vld [vmem:[#allocation77_spill] sm:$0xff] }
 0x1de   :  { %v2276_v18 = vpop.permute.xlu0 %2275  ;;  %v2201_v14 = vmul.f32 %v2198_v56, %v8594_v15  ;;  %v2220_v53 = vsel %vm8596_vm1, %v2218_v31, %v2216_v54  ;;  %v2202_v59 = vmul.f32 %v2197_v9, %v8594_v15  ;;  %vm8599_vm14 = vmmov %vm8598_vm8  ;;  %v2224_v27 = vmul.f32 %v2219_v52, %v8601_v28  ;;  %v8603_v15 = vld [vmem:[#allocation73_spill] sm:$0xff] }
 0x1df   :  { %1635 = vadd.xlane.f32.xlu1 %v1634_v1  ;;  %v2242_v0 = vsel %vm8599_vm14, %v2240_v55, %v2238_v22  ;;  %v2223_v50 = vmul.f32 %v2220_v53, %v8601_v28  ;;  %v2246_v54 = vmul.f32 %v2241_v30, %v8602_v57  ;;  %v2199_v29 = vmul.f32 %v2198_v56, %v8603_v15  ;;  %vm8614_vm8 = vmmov %vm8608_vm13 }
 0x1e0   :  { %v6708_v5 = vpop.permute.xlu1 %2299  ;;  %v2205_v11 = vrot.slane %v2201_v14, 1  ;;  %v2206_v35 = vrot.slane %v2202_v59, 1  ;;  %v2245_v31 = vmul.f32 %v2242_v0, %v8602_v57  ;;  %v2200_v17 = vmul.f32 %v2197_v9, %v8603_v15 }
 0x1e1   :  { %v2227_v55 = vrot.slane %v2223_v50, 1  ;;  %v2228_v22 = vrot.slane %v2224_v27, 1  ;;  %v2221_v28 = vmul.f32 %v2220_v53, %v8606_v19  ;;  %v2262_v14 = vmul.f32 %v3611_v39, %v8604_v24  ;;  %v8609_v53 = vld [vmem:[#allocation78_spill] sm:$0xff] }
 0x1e2   :  { %v6714_v12 = vpop.permute.xlu0 %2297  ;;  %v2209_v51 = vadd.f32 %v2205_v11, %v2199_v29  ;;  %v2210_v57 = vadd.f32 %v2206_v35, %v2200_v17  ;;  %v2222_v56 = vmul.f32 %v2219_v52, %v8606_v19  ;;  %v2265_v50 = vrot.slane %v2261_v44, 1  ;;  %v8615_v35 = vld [vmem:[#allocation85_spill] sm:$0xff] }
 0x1e3   :  { %v2279_v29 = vsel %vm8608_vm13, %v2276_v18, %v6702_v16  ;;  %v2231_v11 = vadd.f32 %v2227_v55, %v2221_v28  ;;  %v2243_v15 = vmul.f32 %v2242_v0, %v8609_v53  ;;  %v2244_v24 = vmul.f32 %v2241_v30, %v8609_v53 }
 0x1e4   :  { %v6712_v10 = vpop.permute.xlu1 %2321  ;;  %v2232_v27 = vadd.f32 %v2228_v22, %v2222_v56  ;;  %vm8612_vm7 = vnez %v7982_v46  ;;  %v2266_v44 = vrot.slane %v2262_v14, 1  ;;  %v2280_v17 = vsel %vm8614_vm8, %v6702_v16, %v2276_v18 }
 0x1e5   :  { %vm8616_vm14 = vnez %v8615_v35  ;;  %vm8617_vm13 = vnez %v7995_v7  ;;  %vm8621_vm8 = vnez %v7988_v32 }
 0x1e6   :  { %v6718_v37 = vpop.permute.xlu0 %2319  ;;  %vm8618_vm15 = vmand %vm8616_vm14, %vm8617_vm13 }
 0x1e7   :  { %v2212_v0 = vsel %vm8618_vm15, %v2210_v57, 0.0  ;;  %vm8623_vm15 = vnez %v8006_v49 }
 0x1e8   :  { %v6716_v60 = vpop.permute.xlu1 %2343  ;;  %vm8624_vm13 = vmand %vm8616_vm14, %vm8623_vm15  ;;  %v2214_v22 = vadd.f32 %v2212_v0, %v6696_v40  ;;  %v8627_v40 = vld [vmem:[#allocation84_spill] sm:$0xff] }
 0x1ea   :  { %v6724_v42 = vpop.permute.xlu0 %2341 }
 0x1ec   :  { %v6722_v2 = vpop.permute.xlu1 %2365 }
 0x1ee   :  { %v6730_v8 = vpop.permute.xlu0 %2363 }
 0x1f0   :  { %2783 = vrot.lane.b32.xlu1 %v3611_v39, %s3142_s30  ;;  %v6728_v38 = vpop.permute.xlu1 %2387 }
 0x1f2   :  { %v6734_v26 = vpop.permute.xlu0 %2385 }
 0x1f3   :  { %2781 = vrot.lane.b32.xlu0 %v3628_v43, %s3142_s30  ;;  %s8803_s30 = sld [smem:[#allocation125_spill]] }
 0x1f4   :  { %v6732_v13 = vpop.permute.xlu1 %2409 }
 0x1f6   :  { %v6738_v20 = vpop.permute.xlu0 %2407 }
 0x1f8   :  { %v6736_v48 = vpop.permute.xlu1 %2431 }
 0x1fa   :  { %v6742_v47 = vpop.permute.xlu0 %2429 }
 0x1fc   :  { %v6740_v3 = vpop.permute.xlu1 %2453 }
 0x1fd   :  { %8591 = vst [vmem:[#allocation34_spill] sm:$0xff] %v6740_v3  ;;  %v8607_v3 = vld [vmem:[#allocation68_spill] sm:$0xff] }
 0x1fe   :  { %v6760_v58 = vpop.permute.xlu0 %2451  ;;  %v2259_v9 = vmul.f32 %v3628_v43, %v8607_v3  ;;  %v2260_v43 = vmul.f32 %v3611_v39, %v8607_v3 }
 0x1ff   :  { %8600 = vst [vmem:[#allocation36_spill] sm:$0xff] %v6760_v58  ;;  %v2250_v58 = vrot.slane %v2246_v54, 1 }
 0x200   :  { %v6754_v1 = vpop.permute.xlu1 %2475  ;;  %v2269_v18 = vadd.f32 %v2265_v50, %v2259_v9  ;;  %v2270_v28 = vadd.f32 %v2266_v44, %v2260_v43 }
 0x201   :  { %8597 = vst [vmem:[#allocation39_spill] sm:$0xff] %v6754_v1  ;;  %v2249_v1 = vrot.slane %v2245_v31, 1  ;;  %v2254_v52 = vadd.f32 %v2250_v58, %v2244_v24  ;;  %v8619_v31 = vld [vmem:[#allocation81_spill] sm:$0xff]  ;;  %v2234_v58 = vsel %vm8624_vm13, %v2232_v27, 0.0  ;;  %vm8626_vm13 = vmand %vm8616_vm14, %vm8561_vm9  ;;  %v8628_v27 = vld [vmem:[#allocation80_spill] sm:$0xff] }
 0x202   :  { %v6775_v59 = vpop.permute.xlu0 %2473  ;;  %v2283_v54 = vmul.f32 %v2279_v29, %v8619_v31  ;;  %v2284_v3 = vmul.f32 %v2280_v17, %v8619_v31  ;;  %v2281_v53 = vmul.f32 %v2279_v29, %v8628_v27  ;;  %v8633_v31 = vld [vmem:[#allocation87_spill] sm:$0xff] }
 0x203   :  { %v2253_v30 = vadd.f32 %v2249_v1, %v2243_v15 }
 0x204   :  { %v6770_v36 = vpop.permute.xlu1 %2497  ;;  %v2287_v56 = vrot.slane %v2283_v54, 1 }
 0x205   :  { %8605 = vst [vmem:[#allocation38_spill] sm:$0xff] %v6770_v36  ;;  %v8610_v36 = vld [vmem:[#allocation82_spill] sm:$0xff] }
 0x206   :  { %vm8611_vm11 = vnez %v8610_v36 }
 0x207   :  { %vm8613_vm1 = vmand %vm8611_vm11, %vm8612_vm7 }
 0x208   :  { %v2211_v19 = vsel %vm8613_vm1, %v2209_v51, 0.0  ;;  %v6801_v55 = vpop.permute.xlu1 %2519  ;;  %vm8620_vm1 = vcmp.lt.s32.totalorder %v3289_v21, 126  ;;  %v6807_v51 = vpop.permute.xlu0 %2495  ;;  %vm8622_vm7 = vmand %vm8611_vm11, %vm8621_vm8 }
 0x209   :  { %v2301_v39 = vsel %vm8620_vm1, %v6714_v12, %v6708_v5  ;;  %v2233_v16 = vsel %vm8622_vm7, %v2231_v11, 0.0  ;;  %v2213_v1 = vadd.f32 %v2211_v19, %v6694_v6  ;;  %v2302_v14 = vsel %vm8620_vm1, %v6708_v5, %v6714_v12  ;;  %vm8625_vm7 = vmand %vm8611_vm11, %vm8559_vm3 }
 0x20a   :  { %v2255_v57 = vsel %vm8625_vm7, %v2253_v30, 0.0  ;;  %v2256_v6 = vsel %vm8626_vm13, %v2254_v52, 0.0  ;;  %v2305_v9 = vmul.f32 %v2301_v39, %v8627_v40  ;;  %v2236_v11 = vadd.f32 %v2234_v58, %v2214_v22  ;;  %v8637_v22 = vld [vmem:[#allocation83_spill] sm:$0xff] }
 0x20b   :  { %v2235_v50 = vadd.f32 %v2233_v16, %v2213_v1  ;;  %vm8629_vm1 = vcmp.lt.s32.totalorder %v3289_v21, 125  ;;  %v2288_v12 = vrot.slane %v2284_v3, 1  ;;  %v2306_v15 = vmul.f32 %v2302_v14, %v8627_v40 }
 0x20c   :  { %v2323_v5 = vsel %vm8629_vm1, %v6718_v37, %v6712_v10  ;;  %vm8630_vm7 = vmmov %vm8629_vm1  ;;  %vm8631_vm13 = vcmp.lt.s32.totalorder %v3289_v21, 115  ;;  %v6851_v43 = vpop.permute.xlu1 %2541  ;;  %v2258_v44 = vadd.f32 %v2256_v6, %v2236_v11  ;;  %v2282_v30 = vmul.f32 %v2280_v17, %v8628_v27  ;;  %v6859_v52 = vpop.permute.xlu0 %2517  ;;  %v8636_v17 = vld [vmem:[#allocation90_spill] sm:$0xff] }
 0x20d   :  { %v2324_v24 = vsel %vm8630_vm7, %v6712_v10, %v6718_v37  ;;  %v2345_v19 = vsel %vm8631_vm13, %v6724_v42, %v6716_v60  ;;  %v2257_v29 = vadd.f32 %v2255_v57, %v2235_v50  ;;  %vm8632_vm1 = vmand %vm8611_vm11, %vm8366_vm0  ;;  %v2291_v10 = vadd.f32 %v2287_v56, %v2281_v53 }
 0x20e   :  { %v2271_v0 = vsel %vm8632_vm1, %v2269_v18, 0.0  ;;  %v2309_v37 = vrot.slane %v2305_v9, 1  ;;  %v2327_v54 = vmul.f32 %v2323_v5, %v8633_v31  ;;  %vm8634_vm7 = vmmov %vm8631_vm13  ;;  %v2328_v18 = vmul.f32 %v2324_v24, %v8633_v31  ;;  %v8644_v31 = vld [vmem:[#allocation88_spill] sm:$0xff] }
 0x20f   :  { %v2346_v16 = vsel %vm8634_vm7, %v6716_v60, %v6724_v42  ;;  %vm8635_vm13 = vmand %vm8616_vm14, %vm8497_vm10  ;;  %v2349_v3 = vmul.f32 %v2345_v19, %v8636_v17  ;;  %v2292_v1 = vadd.f32 %v2288_v12, %v2282_v30  ;;  %v2303_v57 = vmul.f32 %v2301_v39, %v8637_v22  ;;  %v8641_v12 = vld [vmem:[#allocation94_spill] sm:$0xff] }
 0x210   :  { %v2272_v58 = vsel %vm8635_vm13, %v2270_v28, 0.0  ;;  %v2310_v6 = vrot.slane %v2306_v15, 1  ;;  %vm8638_vm1 = vcmp.lt.s32.totalorder %v3289_v21, 114  ;;  %v2273_v60 = vadd.f32 %v2271_v0, %v2257_v29  ;;  %vm8639_vm7 = vmand %vm8611_vm11, %vm8300_vm12  ;;  %v6885_v11 = vpop.permute.xlu1 %2563  ;;  %v6892_v29 = vpop.permute.xlu0 %2539  ;;  %v8643_v30 = vld [vmem:[#allocation86_spill] sm:$0xff] }
 0x211   :  { %v2367_v56 = vsel %vm8638_vm1, %v6730_v8, %v6722_v2  ;;  %v2304_v42 = vmul.f32 %v2302_v14, %v8637_v22  ;;  %v2350_v40 = vmul.f32 %v2346_v16, %v8636_v17  ;;  %v2274_v9 = vadd.f32 %v2272_v58, %v2258_v44  ;;  %vm8640_vm13 = vmmov %vm8638_vm1 }
 0x212   :  { %v2293_v28 = vsel %vm8639_vm7, %v2291_v10, 0.0  ;;  %v2313_v50 = vadd.f32 %v2309_v37, %v2303_v57  ;;  %v2331_v39 = vrot.slane %v2327_v54, 1  ;;  %v2332_v27 = vrot.slane %v2328_v18, 1  ;;  %vm8642_vm1 = vmand %vm8616_vm14, %vm8574_vm2 }
 0x213   :  { %v2353_v53 = vrot.slane %v2349_v3, 1  ;;  %v2368_v14 = vsel %vm8640_vm13, %v6722_v2, %v6730_v8  ;;  %v2371_v15 = vmul.f32 %v2367_v56, %v8641_v12  ;;  %v2294_v44 = vsel %vm8642_vm1, %v2292_v1, 0.0  ;;  %vm8647_vm1 = vmand %vm8611_vm11, %vm8399_vm4 }
 0x214   :  { %v2314_v0 = vadd.f32 %v2310_v6, %v2304_v42  ;;  %v2325_v10 = vmul.f32 %v2323_v5, %v8643_v30  ;;  %v2326_v37 = vmul.f32 %v2324_v24, %v8643_v30  ;;  %v2347_v54 = vmul.f32 %v2345_v19, %v8644_v31  ;;  %v8648_v6 = vld [vmem:[#allocation98_spill] sm:$0xff] }
 0x215   :  { %v2354_v58 = vrot.slane %v2350_v40, 1  ;;  %vm8645_vm7 = vcmp.lt.s32.totalorder %v3289_v21, 113  ;;  %v2315_v5 = vsel %vm8647_vm1, %v2313_v50, 0.0  ;;  %v2372_v19 = vmul.f32 %v2368_v14, %v8641_v12  ;;  %vm8652_vm1 = vmand %vm8611_vm11, %vm8528_vm5 }
 0x216   :  { %v2389_v2 = vsel %vm8645_vm7, %v6734_v26, %v6728_v38  ;;  %vm8646_vm13 = vmmov %vm8645_vm7  ;;  %v2335_v24 = vadd.f32 %v2331_v39, %v2325_v10  ;;  %v2336_v18 = vadd.f32 %v2332_v27, %v2326_v37  ;;  %v2348_v17 = vmul.f32 %v2346_v16, %v8644_v31  ;;  %v8650_v39 = vld [vmem:[#allocation93_spill] sm:$0xff]  ;;  %v8660_v37 = vld [vmem:[#allocation100_spill] sm:$0xff] }
 0x217   :  { %v2390_v8 = vsel %vm8646_vm13, %v6728_v38, %v6734_v26  ;;  %v2357_v3 = vadd.f32 %v2353_v53, %v2347_v54  ;;  %v2375_v1 = vrot.slane %v2371_v15, 1  ;;  %v2295_v22 = vadd.f32 %v2293_v28, %v2273_v60  ;;  %v6919_v26 = vpop.permute.xlu1 %2585  ;;  %vm8649_vm7 = vmand %vm8616_vm14, %vm8580_vm6  ;;  %v6931_v60 = vpop.permute.xlu0 %2561  ;;  %v8656_v15 = vld [vmem:[#allocation95_spill] sm:$0xff]  ;;  %v8662_v54 = vld [vmem:[#allocation96_spill] sm:$0xff] }
 0x218   :  { %v2296_v57 = vadd.f32 %v2294_v44, %v2274_v9  ;;  %v2393_v42 = vmul.f32 %v2389_v2, %v8648_v6  ;;  %v2394_v38 = vmul.f32 %v2390_v8, %v8648_v6  ;;  %v2316_v40 = vsel %vm8649_vm7, %v2314_v0, 0.0 }
 0x219   :  { %v2358_v50 = vadd.f32 %v2354_v58, %v2348_v17  ;;  %v2369_v27 = vmul.f32 %v2367_v56, %v8650_v39  ;;  %vm8651_vm13 = vcmp.lt.s32.totalorder %v3289_v21, 112  ;;  %v2317_v9 = vadd.f32 %v2315_v5, %v2295_v22 }
 0x21a   :  { %v2411_v16 = vsel %vm8651_vm13, %v6738_v20, %v6732_v13  ;;  %v2337_v28 = vsel %vm8652_vm1, %v2335_v24, 0.0  ;;  %v2376_v53 = vrot.slane %v2372_v19, 1  ;;  %vm8653_vm7 = vmmov %vm8651_vm13  ;;  %vm8654_vm6 = vnez %v8076_v23  ;;  %v8666_v24 = vld [vmem:[#allocation97_spill] sm:$0xff] }
 0x21b   :  { %v2412_v56 = vsel %vm8653_vm7, %v6732_v13, %v6738_v20  ;;  %vm8655_vm13 = vmand %vm8616_vm14, %vm8654_vm6  ;;  %vm8657_vm4 = vnez %v8656_v15  ;;  %vm8658_vm2 = vnez %v7982_v46  ;;  %v2370_v44 = vmul.f32 %v2368_v14, %v8650_v39  ;;  %v8709_v15 = vld [vmem:[#allocation115_spill] sm:$0xff] }
 0x21c   :  { %v2338_v12 = vsel %vm8655_vm13, %v2336_v18, 0.0  ;;  %vm8659_vm12 = vmand %vm8657_vm4, %vm8658_vm2  ;;  %v2379_v0 = vadd.f32 %v2375_v1, %v2369_v27  ;;  %v2397_v30 = vrot.slane %v2393_v42, 1  ;;  %v2398_v10 = vrot.slane %v2394_v38, 1  ;;  %v6973_v42 = vpop.permute.xlu0 %2583  ;;  %v8671_v27 = vld [vmem:[#allocation36_spill] sm:$0xff] }
 0x21d   :  { %v2359_v36 = vsel %vm8659_vm12, %v2357_v3, 0.0  ;;  %v2415_v31 = vmul.f32 %v2411_v16, %v8660_v37  ;;  %vm8661_vm11 = vcmp.lt.s32.totalorder %v3289_v21, 111  ;;  %v2318_v20 = vadd.f32 %v2316_v40, %v2296_v57  ;;  %v6970_v3 = vpop.permute.xlu1 %2607  ;;  %v8668_v57 = vld [vmem:[#allocation102_spill] sm:$0xff]  ;;  %vm8669_vm13 = vmand %vm8657_vm4, %vm8621_vm8 }
 0x21e   :  { %v2433_v13 = vsel %vm8661_vm11, %v6742_v47, %v6736_v48  ;;  %v2339_v35 = vadd.f32 %v2337_v28, %v2317_v9  ;;  %vm8663_vm14 = vnez %v8662_v54  ;;  %vm8664_vm1 = vnez %v7995_v7  ;;  %vm8667_vm12 = vmmov %vm8661_vm11 }
 0x21f   :  { %vm8665_vm7 = vmand %vm8663_vm14, %vm8664_vm1  ;;  %v2416_v14 = vmul.f32 %v2412_v56, %v8660_v37  ;;  %v2380_v5 = vadd.f32 %v2376_v53, %v2370_v44  ;;  %v2391_v19 = vmul.f32 %v2389_v2, %v8666_v24  ;;  %v2392_v18 = vmul.f32 %v2390_v8, %v8666_v24  ;;  %v8674_v53 = vld [vmem:[#allocation99_spill] sm:$0xff]  ;;  %v8682_v24 = vld [vmem:[#allocation101_spill] sm:$0xff] }
 0x220   :  { %v2360_v58 = vsel %vm8665_vm7, %v2358_v50, 0.0  ;;  %v2434_v17 = vsel %vm8667_vm12, %v6736_v48, %v6742_v47  ;;  %v2340_v1 = vadd.f32 %v2338_v12, %v2318_v20  ;;  %v2361_v22 = vadd.f32 %v2359_v36, %v2339_v35  ;;  %v8670_v47 = vld [vmem:[#allocation34_spill] sm:$0xff]  ;;  %vm8673_vm7 = vmand %vm8663_vm14, %vm8623_vm15  ;;  %v8681_v35 = vld [vmem:[#allocation104_spill] sm:$0xff] }
 0x221   :  { %v2437_v6 = vmul.f32 %v2433_v13, %v8668_v57  ;;  %v2381_v2 = vsel %vm8669_vm13, %v2379_v0, 0.0  ;;  %v2401_v8 = vadd.f32 %v2397_v30, %v2391_v19  ;;  %v2402_v38 = vadd.f32 %v2398_v10, %v2392_v18  ;;  %v8676_v10 = vld [vmem:[#allocation39_spill] sm:$0xff] }
 0x222   :  { %v2419_v40 = vrot.slane %v2415_v31, 1  ;;  %v2362_v50 = vadd.f32 %v2360_v58, %v2340_v1  ;;  %v2420_v39 = vrot.slane %v2416_v14, 1  ;;  %v2438_v48 = vmul.f32 %v2434_v17, %v8668_v57  ;;  %v7015_v14 = vpop.permute.xlu1 %2629  ;;  %v7019_v1 = vpop.permute.xlu0 %2605  ;;  %v8683_v57 = vld [vmem:[#allocation106_spill] sm:$0xff] }
 0x223   :  { %vm8672_vm11 = vcmp.lt.s32.totalorder %v3289_v21, 110  ;;  %v2382_v28 = vsel %vm8673_vm7, %v2380_v5, 0.0  ;;  %v2413_v12 = vmul.f32 %v2411_v16, %v8674_v53  ;;  %v2414_v36 = vmul.f32 %v2412_v56, %v8674_v53  ;;  %vm8679_vm7 = vmand %vm8657_vm4, %vm8559_vm3 }
 0x224   :  { %v2455_v9 = vsel %vm8672_vm11, %v8671_v27, %v8670_v47  ;;  %vm8675_vm12 = vmmov %vm8672_vm11  ;;  %v2383_v0 = vadd.f32 %v2381_v2, %v2361_v22  ;;  %v2441_v30 = vrot.slane %v2437_v6, 1  ;;  %vm8677_vm13 = vcmp.lt.s32.totalorder %v3289_v21, 109 }
 0x225   :  { %v2456_v44 = vsel %vm8675_vm12, %v8670_v47, %v8671_v27  ;;  %v2477_v37 = vsel %vm8677_vm13, %v6775_v59, %v8676_v10  ;;  %vm8678_vm11 = vmmov %vm8677_vm13  ;;  %v2403_v16 = vsel %vm8679_vm7, %v2401_v8, 0.0  ;;  %v2423_v20 = vadd.f32 %v2419_v40, %v2413_v12  ;;  %v8689_v12 = vld [vmem:[#allocation103_spill] sm:$0xff] }
 0x226   :  { %v2478_v31 = vsel %vm8678_vm11, %v8676_v10, %v6775_v59  ;;  %vm8680_vm12 = vmand %vm8663_vm14, %vm8561_vm9  ;;  %v2459_v58 = vmul.f32 %v2455_v9, %v8681_v35  ;;  %v2424_v5 = vadd.f32 %v2420_v39, %v2414_v36  ;;  %v2435_v59 = vmul.f32 %v2433_v13, %v8682_v24 }
 0x227   :  { %v2404_v56 = vsel %vm8680_vm12, %v2402_v38, 0.0  ;;  %v2442_v19 = vrot.slane %v2438_v48, 1  ;;  %v2460_v18 = vmul.f32 %v2456_v44, %v8681_v35  ;;  %v2384_v22 = vadd.f32 %v2382_v28, %v2362_v50  ;;  %vm8684_vm13 = vmand %vm8657_vm4, %vm8366_vm0  ;;  %v8685_v48 = vld [vmem:[#allocation38_spill] sm:$0xff] }
 0x228   :  { %v2481_v6 = vmul.f32 %v2477_v37, %v8683_v57  ;;  %v2482_v2 = vmul.f32 %v2478_v31, %v8683_v57  ;;  %v2405_v8 = vadd.f32 %v2403_v16, %v2383_v0  ;;  %v2436_v38 = vmul.f32 %v2434_v17, %v8682_v24  ;;  %vm8687_vm7 = vmand %vm8663_vm14, %vm8497_vm10  ;;  %v7047_v16 = vpop.permute.xlu1 %2651  ;;  %v8698_v57 = vld [vmem:[#allocation112_spill] sm:$0xff] }
 0x229   :  { %v2445_v40 = vadd.f32 %v2441_v30, %v2435_v59  ;;  %v2406_v47 = vadd.f32 %v2404_v56, %v2384_v22  ;;  %v2425_v13 = vsel %vm8684_vm13, %v2423_v20, 0.0  ;;  %v2463_v39 = vrot.slane %v2459_v58, 1 }
 0x22a   :  { %vm8686_vm11 = vcmp.lt.s32.totalorder %v3289_v21, 99  ;;  %v2426_v17 = vsel %vm8687_vm7, %v2424_v5, 0.0  ;;  %v2446_v27 = vadd.f32 %v2442_v19, %v2436_v38  ;;  %v2464_v28 = vrot.slane %v2460_v18, 1  ;;  %v7057_v5 = vpop.permute.xlu0 %2627 }
 0x22b   :  { %v2499_v50 = vsel %vm8686_vm11, %v6807_v51, %v8685_v48  ;;  %vm8688_vm12 = vmmov %vm8686_vm11  ;;  %v2457_v36 = vmul.f32 %v2455_v9, %v8689_v12  ;;  %v2485_v0 = vrot.slane %v2481_v6, 1  ;;  %v2486_v30 = vrot.slane %v2482_v2, 1  ;;  %v8694_v9 = vld [vmem:[#allocation108_spill] sm:$0xff] }
 0x22c   :  { %v2500_v53 = vsel %vm8688_vm12, %v8685_v48, %v6807_v51  ;;  %vm8690_vm13 = vcmp.lt.s32.totalorder %v3289_v21, 98  ;;  %vm8691_vm11 = vnez %v8025_v34  ;;  %v2458_v20 = vmul.f32 %v2456_v44, %v8689_v12  ;;  %v8693_v51 = vld [vmem:[#allocation105_spill] sm:$0xff] }
 0x22d   :  { %v2521_v10 = vsel %vm8690_vm13, %v6859_v52, %v6801_v55  ;;  %vm8692_vm7 = vmand %vm8657_vm4, %vm8691_vm11  ;;  %v2479_v35 = vmul.f32 %v2477_v37, %v8693_v51  ;;  %v2503_v58 = vmul.f32 %v2499_v50, %v8694_v9  ;;  %v2467_v24 = vadd.f32 %v2463_v39, %v2457_v36 }
 0x22e   :  { %v2447_v56 = vsel %vm8692_vm7, %v2445_v40, 0.0  ;;  %v2480_v59 = vmul.f32 %v2478_v31, %v8693_v51  ;;  %v2504_v19 = vmul.f32 %v2500_v53, %v8694_v9  ;;  %vm8695_vm12 = vmmov %vm8690_vm13  ;;  %v2427_v22 = vadd.f32 %v2425_v13, %v2405_v8 }
 0x22f   :  { %v2522_v18 = vsel %vm8695_vm12, %v6801_v55, %v6859_v52  ;;  %vm8696_vm13 = vnez %v8029_v62  ;;  %v2468_v37 = vadd.f32 %v2464_v28, %v2458_v20  ;;  %v2525_v6 = vmul.f32 %v2521_v10, %v8698_v57  ;;  %v8707_v20 = vld [vmem:[#allocation111_spill] sm:$0xff] }
 0x230   :  { %vm8697_vm7 = vmand %vm8663_vm14, %vm8696_vm13  ;;  %v2428_v2 = vadd.f32 %v2426_v17, %v2406_v47  ;;  %v2489_v38 = vadd.f32 %v2485_v0, %v2479_v35  ;;  %v2490_v31 = vadd.f32 %v2486_v30, %v2480_v59  ;;  %v2449_v40 = vadd.f32 %v2447_v56, %v2427_v22  ;;  %v7081_v47 = vpop.permute.xlu1 %2673  ;;  %v8704_v17 = vld [vmem:[#allocation107_spill] sm:$0xff]  ;;  %v7090_v0 = vpop.permute.xlu0 %2649 }
 0x231   :  { %v2448_v44 = vsel %vm8697_vm7, %v2446_v27, 0.0  ;;  %v2507_v39 = vrot.slane %v2503_v58, 1  ;;  %v2526_v48 = vmul.f32 %v2522_v18, %v8698_v57  ;;  %vm8699_vm12 = vnez %v8042_v41 }
 0x232   :  { %v2450_v12 = vadd.f32 %v2448_v44, %v2428_v2  ;;  %vm8700_vm11 = vmand %vm8657_vm4, %vm8699_vm12  ;;  %v2508_v52 = vrot.slane %v2504_v19, 1  ;;  %vm8701_vm7 = vcmp.lt.s32.totalorder %v3289_v21, 97  ;;  %vm8702_vm13 = vnez %v8047_v4  ;;  %v8713_v2 = vld [vmem:[#allocation17_spill] sm:$0xff] }
 0x233   :  { %v2469_v55 = vsel %vm8700_vm11, %v2467_v24, 0.0  ;;  %v2543_v8 = vsel %vm8701_vm7, %v6892_v29, %v6851_v43  ;;  %vm8703_vm10 = vmand %vm8663_vm14, %vm8702_vm13  ;;  %v2501_v27 = vmul.f32 %v2499_v50, %v8704_v17  ;;  %v2502_v28 = vmul.f32 %v2500_v53, %v8704_v17 }
 0x234   :  { %v2470_v13 = vsel %vm8703_vm10, %v2468_v37, 0.0  ;;  %v2529_v36 = vrot.slane %v2525_v6, 1  ;;  %vm8705_vm11 = vmand %vm8657_vm4, %vm8528_vm5  ;;  %v2523_v51 = vmul.f32 %v2521_v10, %v8707_v20  ;;  %vm8708_vm10 = vcmp.lt.s32.totalorder %v3289_v21, 97  ;;  %v7119_v6 = vpop.permute.xlu1 %2695 }
 0x235   :  { %v2491_v30 = vsel %vm8705_vm11, %v2489_v38, 0.0  ;;  %vm8706_vm7 = vmand %vm8663_vm14, %vm8654_vm6  ;;  %v2544_v50 = vsel %vm8708_vm10, %v6851_v43, %v6892_v29  ;;  %v2511_v53 = vadd.f32 %v2507_v39, %v2501_v27  ;;  %v2530_v35 = vrot.slane %v2526_v48, 1  ;;  %v8712_v29 = vld [vmem:[#allocation116_spill] sm:$0xff]  ;;  %v7130_v39 = vpop.permute.xlu0 %2671  ;;  %v8720_v48 = vld [vmem:[#allocation114_spill] sm:$0xff] }
 0x236   :  { %v2492_v56 = vsel %vm8706_vm7, %v2490_v31, 0.0  ;;  %v2547_v9 = vmul.f32 %v2543_v8, %v8709_v15  ;;  %vm8710_vm4 = vcmp.lt.s32.totalorder %v3289_v21, 96  ;;  %v2471_v58 = vadd.f32 %v2469_v55, %v2449_v40 }
 0x237   :  { %v2565_v54 = vsel %vm8710_vm4, %v6931_v60, %v6885_v11  ;;  %v2472_v24 = vadd.f32 %v2470_v13, %v2450_v12  ;;  %v2512_v59 = vadd.f32 %v2508_v52, %v2502_v28  ;;  %v2524_v19 = vmul.f32 %v2522_v18, %v8707_v20  ;;  %vm8711_vm14 = vmmov %vm8710_vm4 }
 0x238   :  { %v2533_v10 = vadd.f32 %v2529_v36, %v2523_v51  ;;  %v2548_v22 = vmul.f32 %v2544_v50, %v8709_v15  ;;  %v2493_v44 = vadd.f32 %v2491_v30, %v2471_v58  ;;  %v2566_v43 = vsel %vm8711_vm14, %v6885_v11, %v6931_v60  ;;  %v8717_v11 = vld [vmem:[#allocation123_spill] sm:$0xff]  ;;  %v8724_v30 = vld [vmem:[#allocation117_spill] sm:$0xff] }
 0x239   :  { %v2494_v37 = vadd.f32 %v2492_v56, %v2472_v24  ;;  %v2569_v57 = vmul.f32 %v2565_v54, %v8712_v29  ;;  %vm8714_vm11 = vnez %v8713_v2  ;;  %v2534_v38 = vadd.f32 %v2530_v35, %v2524_v19  ;;  %v8728_v15 = vld [vmem:[#allocation91_spill] sm:$0xff] }
 0x23a   :  { %vm8715_vm7 = vmand %vm8714_vm11, %vm8658_vm2  ;;  %v2551_v31 = vrot.slane %v2547_v9, 1  ;;  %vm8716_vm10 = vcmp.lt.s32.totalorder %v3289_v21, 95  ;;  %vm8718_vm4 = vnez %v8717_v11  ;;  %v2545_v12 = vmul.f32 %v2543_v8, %v8720_v48  ;;  %v8729_v58 = vld [vmem:[#allocation119_spill] sm:$0xff] }
 0x23b   :  { %v2513_v18 = vsel %vm8715_vm7, %v2511_v53, 0.0  ;;  %v2587_v40 = vsel %vm8716_vm10, %v6973_v42, %v6919_v26  ;;  %vm8719_vm14 = vmand %vm8718_vm4, %vm8664_vm1  ;;  %v2546_v55 = vmul.f32 %v2544_v50, %v8720_v48  ;;  %v2552_v17 = vrot.slane %v2548_v22, 1  ;;  %v2694_v22 = vpop.permute.xlu0 %2693 }
 0x23c   :  { %v2514_v60 = vsel %vm8719_vm14, %v2512_v59, 0.0  ;;  %vm8721_vm7 = vmmov %vm8716_vm10  ;;  %v2570_v27 = vmul.f32 %v2566_v43, %v8712_v29  ;;  %vm8723_vm14 = vcmp.lt.s32.totalorder %v3289_v21, 94  ;;  %v2515_v28 = vadd.f32 %v2513_v18, %v2493_v44 }
 0x23d   :  { %v2588_v52 = vsel %vm8721_vm7, %v6919_v26, %v6973_v42  ;;  %vm8722_vm10 = vmand %vm8714_vm11, %vm8621_vm8  ;;  %v2609_v8 = vsel %vm8723_vm14, %v7019_v1, %v6970_v3  ;;  %v2573_v36 = vrot.slane %v2569_v57, 1  ;;  %v2591_v56 = vmul.f32 %v2587_v40, %v8724_v30  ;;  %v8731_v57 = vld [vmem:[#allocation109_spill] sm:$0xff] }
 0x23e   :  { %v2535_v13 = vsel %vm8722_vm10, %v2533_v10, 0.0  ;;  %vm8725_vm7 = vmmov %vm8723_vm14  ;;  %v2555_v20 = vadd.f32 %v2551_v31, %v2545_v12  ;;  %v2592_v51 = vmul.f32 %v2588_v52, %v8724_v30  ;;  %vm8727_vm14 = vcmp.lt.s32.totalorder %v3289_v21, 93  ;;  %v8733_v31 = vld [vmem:[#allocation92_spill] sm:$0xff] }
 0x23f   :  { %v2610_v26 = vsel %vm8725_vm7, %v6970_v3, %v7019_v1  ;;  %vm8726_vm10 = vmand %vm8718_vm4, %vm8623_vm15  ;;  %v2631_v50 = vsel %vm8727_vm14, %v7057_v5, %v7015_v14  ;;  %v2516_v53 = vadd.f32 %v2514_v60, %v2494_v37  ;;  %v2537_v35 = vadd.f32 %v2535_v13, %v2515_v28  ;;  %v7170_v1 = vpop.permute.xlu1 %2717 }
 0x240   :  { %v2536_v42 = vsel %vm8726_vm10, %v2534_v38, 0.0  ;;  %v2567_v9 = vmul.f32 %v2565_v54, %v8728_v15  ;;  %v2613_v3 = vmul.f32 %v2609_v8, %v8729_v58  ;;  %v2556_v24 = vadd.f32 %v2552_v17, %v2546_v55  ;;  %vm8730_vm7 = vmmov %vm8727_vm14 }
 0x241   :  { %v2574_v59 = vrot.slane %v2570_v27, 1  ;;  %v2614_v19 = vmul.f32 %v2610_v26, %v8729_v58  ;;  %v2632_v10 = vsel %vm8730_vm7, %v7015_v14, %v7057_v5  ;;  %v2538_v44 = vadd.f32 %v2536_v42, %v2516_v53  ;;  %vm8732_vm10 = vmand %vm8714_vm11, %vm8559_vm3  ;;  %v8740_v58 = vld [vmem:[#allocation44_spill] sm:$0xff] }
 0x242   :  { %v2577_v29 = vadd.f32 %v2573_v36, %v2567_v9  ;;  %v2595_v37 = vrot.slane %v2591_v56, 1  ;;  %v2635_v18 = vmul.f32 %v2631_v50, %v8731_v57  ;;  %v2557_v54 = vsel %vm8732_vm10, %v2555_v20, 0.0  ;;  %vm8736_vm10 = vmand %vm8718_vm4, %vm8561_vm9  ;;  %v8738_v36 = vld [vmem:[#allocation118_spill] sm:$0xff]  ;;  %v8739_v20 = vld [vmem:[#allocation121_spill] sm:$0xff] }
 0x243   :  { %v2568_v38 = vmul.f32 %v2566_v43, %v8728_v15  ;;  %v2589_v60 = vmul.f32 %v2587_v40, %v8733_v31  ;;  %v2596_v48 = vrot.slane %v2592_v51, 1  ;;  %v2617_v12 = vrot.slane %v2613_v3, 1 }
 0x244   :  { %v2636_v14 = vmul.f32 %v2632_v10, %v8731_v57  ;;  %vm8734_vm14 = vcmp.lt.s32.totalorder %v3289_v21, 83  ;;  %v2558_v43 = vsel %vm8736_vm10, %v2556_v24, 0.0  ;;  %v2590_v13 = vmul.f32 %v2588_v52, %v8733_v31  ;;  %v2716_v52 = vpop.permute.xlu0 %2715 }
 0x245   :  { %v2653_v5 = vsel %vm8734_vm14, %v7090_v0, %v7047_v16  ;;  %vm8735_vm7 = vmmov %vm8734_vm14  ;;  %v2578_v40 = vadd.f32 %v2574_v59, %v2568_v38  ;;  %v2618_v17 = vrot.slane %v2614_v19, 1  ;;  %v2599_v28 = vadd.f32 %v2595_v37, %v2589_v60  ;;  %v8749_v60 = vld [vmem:[#allocation122_spill] sm:$0xff] }
 0x246   :  { %v2654_v55 = vsel %vm8735_vm7, %v7047_v16, %v7090_v0  ;;  %vm8737_vm14 = vmand %vm8714_vm11, %vm8366_vm0  ;;  %v2611_v30 = vmul.f32 %v2609_v8, %v8738_v36  ;;  %v2639_v16 = vrot.slane %v2635_v18, 1  ;;  %v2740_v0 = vpop.permute.xlu1 %2739  ;;  %v2600_v56 = vadd.f32 %v2596_v48, %v2590_v13 }
 0x247   :  { %v2579_v27 = vsel %vm8737_vm14, %v2577_v29, 0.0  ;;  %v2612_v42 = vmul.f32 %v2610_v26, %v8738_v36  ;;  %v2657_v51 = vmul.f32 %v2653_v5, %v8739_v20  ;;  %v2658_v53 = vmul.f32 %v2654_v55, %v8739_v20 }
 0x248   :  { %v2559_v15 = vadd.f32 %v2557_v54, %v2537_v35  ;;  %v2621_v9 = vadd.f32 %v2617_v12, %v2611_v30  ;;  %v2633_v3 = vmul.f32 %v2631_v50, %v8740_v58  ;;  %v2640_v24 = vrot.slane %v2636_v14, 1  ;;  %v2738_v13 = vpop.permute.xlu0 %2737 }
 0x249   :  { %v2560_v59 = vadd.f32 %v2558_v43, %v2538_v44  ;;  %vm8741_vm7 = vnez %v7955_v63  ;;  %v2622_v19 = vadd.f32 %v2618_v17, %v2612_v42  ;;  %vm8743_vm14 = vcmp.lt.s32.totalorder %v3289_v21, 82 }
 0x24a   :  { %vm8742_vm10 = vmand %vm8718_vm4, %vm8741_vm7  ;;  %v2675_v26 = vsel %vm8743_vm14, %v7130_v39, %v7081_v47  ;;  %v2581_v29 = vadd.f32 %v2579_v27, %v2559_v15  ;;  %vm8744_vm0 = vnez %v8025_v34  ;;  %v2634_v35 = vmul.f32 %v2632_v10, %v8740_v58  ;;  %v2760_v12 = vpop.permute.xlu1 %2759  ;;  %v8758_v58 = vld [vmem:[#allocation124_spill] sm:$0xff] }
 0x24b   :  { %v2580_v8 = vsel %vm8742_vm10, %v2578_v40, 0.0  ;;  %vm8745_vm9 = vmand %vm8714_vm11, %vm8744_vm0  ;;  %v2643_v44 = vadd.f32 %v2639_v16, %v2633_v3  ;;  %vm8746_vm10 = vnez %v8029_v62  ;;  %v2661_v57 = vrot.slane %v2657_v51, 1  ;;  %v8751_v40 = vld [vmem:[#allocation120_spill] sm:$0xff] }
 0x24c   :  { %v2601_v50 = vsel %vm8745_vm9, %v2599_v28, 0.0  ;;  %vm8747_vm7 = vmand %vm8718_vm4, %vm8746_vm10  ;;  %v2662_v18 = vrot.slane %v2658_v53, 1  ;;  %v2676_v54 = vsel %vm8743_vm14, %v7081_v47, %v7130_v39  ;;  %v2582_v38 = vadd.f32 %v2580_v8, %v2560_v59  ;;  %v8757_v53 = vld [vmem:[#allocation19_spill] sm:$0xff] }
 0x24d   :  { %v2602_v37 = vsel %vm8747_vm7, %v2600_v56, 0.0  ;;  %vm8748_vm9 = vmand %vm8714_vm11, %vm8699_vm12  ;;  %v2644_v31 = vadd.f32 %v2640_v24, %v2634_v35  ;;  %v2679_v48 = vmul.f32 %v2675_v26, %v8749_v60  ;;  %v2603_v14 = vadd.f32 %v2601_v50, %v2581_v29  ;;  %v8760_v29 = vld [vmem:[#allocation26_spill] sm:$0xff]  ;;  %v8763_v50 = vld [vmem:[#allocation31_spill] sm:$0xff] }
 0x24e   :  { %v2623_v10 = vsel %vm8748_vm9, %v2621_v9, 0.0  ;;  %vm8750_vm7 = vmand %vm8718_vm4, %vm8702_vm13  ;;  %v2655_v47 = vmul.f32 %v2653_v5, %v8751_v40  ;;  %v2656_v39 = vmul.f32 %v2654_v55, %v8751_v40  ;;  %v2604_v17 = vadd.f32 %v2602_v37, %v2582_v38  ;;  %v2762_v59 = vpop.permute.xlu1 %2761 }
 0x24f   :  { %v2624_v43 = vsel %vm8750_vm7, %v2622_v19, 0.0  ;;  %vm8752_vm14 = vmand %vm8714_vm11, %vm8528_vm5  ;;  %v2680_v28 = vmul.f32 %v2676_v54, %v8749_v60  ;;  %vm8753_vm9 = vcmp.lt.s32.totalorder %v3289_v21, 81  ;;  %v2625_v30 = vadd.f32 %v2623_v10, %v2603_v14  ;;  %v8771_v14 = vld [vmem:[#allocation29_spill] sm:$0xff] }
 0x250   :  { %v2645_v27 = vsel %vm8752_vm14, %v2643_v44, 0.0  ;;  %v2697_v36 = vsel %vm8753_vm9, %v2694_v22, %v7119_v6  ;;  %v2665_v16 = vadd.f32 %v2661_v57, %v2655_v47  ;;  %v2666_v56 = vadd.f32 %v2662_v18, %v2656_v39  ;;  %vm8754_vm7 = vmmov %vm8753_vm9  ;;  %v8766_v44 = vld [vmem:[#allocation27_spill] sm:$0xff]  ;;  %v8772_v47 = vld [vmem:[#allocation89_spill] sm:$0xff] }
 0x251   :  { %v2698_v5 = vsel %vm8754_vm7, %v7119_v6, %v2694_v22  ;;  %v2626_v55 = vadd.f32 %v2624_v43, %v2604_v17  ;;  %vm8755_vm11 = vmand %vm8718_vm4, %vm8654_vm6  ;;  %v2683_v42 = vrot.slane %v2679_v48, 1  ;;  %vm8756_vm14 = vcmp.lt.s32.totalorder %v3289_v21, 80  ;;  %v8773_v17 = vld [vmem:[#allocation30_spill] sm:$0xff] }
 0x252   :  { %v2646_v2 = vsel %vm8755_vm11, %v2644_v31, 0.0  ;;  %v2719_v20 = vsel %vm8756_vm14, %v2716_v52, %v7170_v1  ;;  %v2647_v51 = vadd.f32 %v2645_v27, %v2625_v30  ;;  %v2677_v15 = vmul.f32 %v2675_v26, %v8757_v53  ;;  %vm8759_vm4 = vmmov %vm8756_vm14 }
 0x253   :  { %v2678_v9 = vmul.f32 %v2676_v54, %v8757_v53  ;;  %v2701_v3 = vmul.f32 %v2697_v36, %v8758_v58  ;;  %v2684_v22 = vrot.slane %v2680_v28, 1  ;;  %v2702_v11 = vmul.f32 %v2698_v5, %v8758_v58 }
 0x254   :  { %v2720_v24 = vsel %vm8759_vm4, %v7170_v1, %v2716_v52  ;;  %v2648_v19 = vadd.f32 %v2646_v2, %v2626_v55  ;;  %vm8761_vm9 = vnez %v8760_v29  ;;  %vm8764_vm11 = vnez %v8763_v50 }
 0x255   :  { %vm8762_vm7 = vmand %vm8761_vm9, %vm8658_vm2  ;;  %v2723_v37 = vmul.f32 %v2719_v20, %v8766_v44  ;;  %v2687_v57 = vadd.f32 %v2683_v42, %v2677_v15  ;;  %vm8767_vm4 = vcmp.lt.s32.totalorder %v3289_v21, 79  ;;  %v2705_v54 = vrot.slane %v2701_v3, 1 }
 0x256   :  { %v2667_v26 = vsel %vm8762_vm7, %v2665_v16, 0.0  ;;  %vm8765_vm14 = vmand %vm8764_vm11, %vm8664_vm1  ;;  %v2741_v1 = vsel %vm8767_vm4, %v2738_v13, %v2740_v0  ;;  %v2724_v46 = vmul.f32 %v2720_v24, %v8766_v44  ;;  %vm8769_vm2 = vcmp.lt.s32.totalorder %v3289_v21, 78 }
 0x257   :  { %v2668_v35 = vsel %vm8765_vm14, %v2666_v56, 0.0  ;;  %vm8768_vm6 = vmmov %vm8767_vm4  ;;  %v2763_v38 = vsel %vm8769_vm2, %v2760_v12, %v2762_v59  ;;  %v2669_v10 = vadd.f32 %v2667_v26, %v2647_v51  ;;  %v2688_v31 = vadd.f32 %v2684_v22, %v2678_v9  ;;  %v8781_v26 = vld [vmem:[#allocation25_spill] sm:$0xff] }
 0x258   :  { %v2742_v52 = vsel %vm8768_vm6, %v2740_v0, %v2738_v13  ;;  %vm8770_vm7 = vmmov %vm8769_vm2  ;;  %v2706_v60 = vrot.slane %v2702_v11, 1  ;;  %v2699_v43 = vmul.f32 %v2697_v36, %v8771_v14  ;;  %v2727_v40 = vrot.slane %v2723_v37, 1  ;;  %v8775_v36 = vld [vmem:[#allocation28_spill] sm:$0xff]  ;;  %v8778_v11 = vld [vmem:[#allocation75_spill] sm:$0xff] }
 0x259   :  { %v2764_v7 = vsel %vm8770_vm7, %v2762_v59, %v2760_v12  ;;  %v2745_v39 = vmul.f32 %v2741_v1, %v8772_v47  ;;  %v2746_v0 = vmul.f32 %v2742_v52, %v8772_v47  ;;  %v2700_v13 = vmul.f32 %v2698_v5, %v8771_v14  ;;  %vm8774_vm6 = vmand %vm8761_vm9, %vm8621_vm8 }
 0x25a   :  { %v2767_v27 = vmul.f32 %v2763_v38, %v8773_v17  ;;  %v2768_v28 = vmul.f32 %v2764_v7, %v8773_v17  ;;  %v2689_v12 = vsel %vm8774_vm6, %v2687_v57, 0.0  ;;  %v2709_v16 = vadd.f32 %v2705_v54, %v2699_v43  ;;  %vm8776_vm1 = vmand %vm8764_vm11, %vm8623_vm15 }
 0x25b   :  { %v2721_v56 = vmul.f32 %v2719_v20, %v8775_v36  ;;  %v2728_v55 = vrot.slane %v2724_v46, 1  ;;  %v2670_v2 = vadd.f32 %v2668_v35, %v2648_v19  ;;  %v2690_v5 = vsel %vm8776_vm1, %v2688_v31, 0.0  ;;  %vm8777_vm8 = vmand %vm8761_vm9, %vm8559_vm3 }
 0x25c   :  { %v2710_v42 = vadd.f32 %v2706_v60, %v2700_v13  ;;  %v2722_v53 = vmul.f32 %v2720_v24, %v8775_v36  ;;  %v2749_v9 = vrot.slane %v2745_v39, 1  ;;  %v2750_v32 = vrot.slane %v2746_v0, 1  ;;  %v8793_v13 = vld [vmem:[#allocation33_spill] sm:$0xff] }
 0x25d   :  { %v2731_v15 = vadd.f32 %v2727_v40, %v2721_v56  ;;  %v2691_v58 = vadd.f32 %v2689_v12, %v2669_v10  ;;  %v2771_v3 = vrot.slane %v2767_v27, 1  ;;  %v2711_v20 = vsel %vm8777_vm8, %v2709_v16, 0.0  ;;  %vm8788_vm8 = vmand %vm8761_vm9, %vm8744_vm0  ;;  %v8790_v40 = vld [vmem:[#allocation35_spill] sm:$0xff] }
 0x25e   :  { %v2732_v49 = vadd.f32 %v2728_v55, %v2722_v53  ;;  %v2743_v59 = vmul.f32 %v2741_v1, %v8778_v11  ;;  %vm8779_vm15 = vnez %v8016_v61  ;;  %v2765_v35 = vmul.f32 %v2763_v38, %v8781_v26  ;;  %vm8792_vm0 = vmand %vm8764_vm11, %vm8702_vm13 }
 0x25f   :  { %vm8780_vm14 = vmand %vm8764_vm11, %vm8779_vm15  ;;  %v2766_v44 = vmul.f32 %v2764_v7, %v8781_v26  ;;  %v2692_v45 = vadd.f32 %v2690_v5, %v2670_v2  ;;  %vm8782_vm3 = vnez %v7953_v33  ;;  %v2713_v54 = vadd.f32 %v2711_v20, %v2691_v58  ;;  %v8801_v20 = vld [vmem:[#allocation32_spill] sm:$0xff] }
 0x260   :  { %v2712_v24 = vsel %vm8780_vm14, %v2710_v42, 0.0  ;;  %vm8783_vm4 = vmand %vm8761_vm9, %vm8782_vm3  ;;  %v2753_v1 = vadd.f32 %v2749_v9, %v2743_v59  ;;  %v2775_v61 = vadd.f32 %v2771_v3, %v2765_v35  ;;  %vm8784_vm2 = vnez %v7955_v63 }
 0x261   :  { %v2733_v57 = vsel %vm8783_vm4, %v2731_v15, 0.0  ;;  %v2714_v31 = vadd.f32 %v2712_v24, %v2692_v45  ;;  %vm8785_vm7 = vmand %vm8764_vm11, %vm8784_vm2  ;;  %vm8786_vm6 = vcmp.lt.s32.totalorder %v3289_v21, 77  ;;  %vm8797_vm3 = vcmask 1040384  }
 0x262   :  { %v2734_v38 = vsel %vm8785_vm7, %v2732_v49, 0.0  ;;  %v2735_v60 = vadd.f32 %v2733_v57, %v2713_v54  ;;  %vm8787_vm1 = vmmov %vm8786_vm6  ;;  %v2755_v43 = vsel %vm8788_vm8, %v2753_v1, 0.0  ;;  %v1662_v35 = vstv %s8804_s19 }
 0x263   :  { %vm8789_vm15 = vmand %vm8764_vm11, %vm8746_vm10  ;;  %v2736_v0 = vadd.f32 %v2734_v38, %v2714_v31 }
 0x264   :  { %vm8791_vm14 = vmand %vm8761_vm9, %vm8699_vm12  ;;  %v2757_v12 = vadd.f32 %v2755_v43, %v2735_v60  ;;  %vm8795_vm12 = vnez %v8076_v23 }
 0x265   :  { %v2777_v21 = vsel %vm8791_vm14, %v2775_v61, 0.0  ;;  %vm8794_vm13 = vmand %vm8761_vm9, %vm8528_vm5 }
 0x266   :  { %v1622_v6 = vpop.xlane.xlu0 %1621  ;;  %v2779_v55 = vadd.f32 %v2777_v21, %v2757_v12  ;;  %vm8796_vm10 = vmand %vm8764_vm11, %vm8795_vm12 }
 0x267   :  { %v1623_v8 = vrot.slane %v1622_v6, 4  ;;  %vm8798_vm4 = vmmov %vm8797_vm3 }
 0x268   :  { %v1636_v19 = vpop.xlane.xlu1 %1635  ;;  %vm8799_vm5 = vmmov %vm8797_vm3 }
 0x269   :  { %v1624_v18 = vadd.f32 %v1623_v8, %v1622_v6  ;;  %v2772_v6 = vrot.slane %v2768_v28, 1  ;;  %v2744_v8 = vmul.f32 %v2742_v52, %v8778_v11  ;;  %v1637_v37 = vrot.slane %v1636_v19, 4  ;;  %vm8800_vm9 = vmmov %vm8797_vm3  ;;  %v8802_v11 = vld [vmem:[#allocation37_spill] sm:$0xff] }
 0x26b   :  { %v1625_v48 = vrot.slane %v1624_v18, 2  ;;  %v2754_v52 = vadd.f32 %v2750_v32, %v2744_v8  ;;  %v2776_v46 = vadd.f32 %v2772_v6, %v2766_v44  ;;  %v1638_v10 = vadd.f32 %v1637_v37, %v1636_v19 }
 0x26c   :  { %v2784_v7 = vpop.permute.xlu1 %2783  ;;  %v1659_v19 = vstv %s8803_s30 }
 0x26d   :  { %v1626_v30 = vadd.f32 %v1625_v48, %v1624_v18  ;;  %v2782_v18 = vpop.permute.xlu0 %2781  ;;  %v1639_v48 = vrot.slane %v1638_v10, 2  ;;  %v2756_v63 = vsel %vm8789_vm15, %v2754_v52, 0.0  ;;  %v2778_v34 = vsel %vm8792_vm0, %v2776_v46, 0.0 }
 0x26e   :  { %v2785_v33 = vsel %vm8786_vm6, %v2782_v18, %v2784_v7  ;;  %v2786_v14 = vsel %vm8787_vm1, %v2784_v7, %v2782_v18  ;;  %v2758_v16 = vadd.f32 %v2756_v63, %v2736_v0 }
 0x26f   :  { %v1627_v51 = vrot.slane %v1626_v30, 1  ;;  %v2789_v47 = vmul.f32 %v2785_v33, %v8790_v40  ;;  %v2790_v39 = vmul.f32 %v2786_v14, %v8790_v40  ;;  %v1640_v62 = vadd.f32 %v1639_v48, %v1638_v10 }
 0x270   :  { %v2787_v17 = vmul.f32 %v2785_v33, %v8793_v13  ;;  %v2788_v27 = vmul.f32 %v2786_v14, %v8793_v13  ;;  %v2780_v2 = vadd.f32 %v2778_v34, %v2758_v16 }
 0x271   :  { %v1628_v22 = vadd.f32 %v1627_v51, %v1626_v30  ;;  %v2793_v28 = vrot.slane %v2789_v47, 1  ;;  %v2794_v30 = vrot.slane %v2790_v39, 1  ;;  %v1641_v36 = vrot.slane %v1640_v62, 1 }
 0x273   :  { %2998 = vpush %v1628_v22  ;;  %v2797_v56 = vadd.f32 %v2793_v28, %v2787_v17  ;;  %v2798_v41 = vadd.f32 %v2794_v30, %v2788_v27  ;;  %v1642_v5 = vadd.f32 %v1641_v36, %v1640_v62  ;;  %v8805_v62 = vld [vmem:[#allocation8_spill] sm:$0xff] }
 0x274   :  { %v1677_v27 = vld [vmem:[%s8806_s27] sm:$0xff] }
 0x275   :  { %v2799_v4 = vsel %vm8794_vm13, %v2797_v56, 0.0  ;;  %v2800_v42 = vsel %vm8796_vm10, %v2798_v41, 0.0  ;;  %3000 = vpush %v1642_v5 }
 0x276   :  { %v7374_v51 = vadd.f32 %v2799_v4, %v2779_v55  ;;  %v7376_v53 = vadd.f32 %v2800_v42, %v2780_v2 }
 0x278   :  { %v2803_v15 = vsel %vm8797_vm3, %v7374_v51, 0.0  ;;  %v2804_v29 = vsel %vm8798_vm4, %v7376_v53, 0.0  ;;  %v2815_v25 = vmul.f32 %v7374_v51, %v7374_v51  ;;  %v2816_v50 = vmul.f32 %v7376_v53, %v7376_v53 }
 0x279   :  { %v2805_v23 = vadd.f32 %v2804_v29, %v2803_v15 }
 0x27a   :  { %v2817_v9 = vsel %vm8799_vm5, %v2815_v25, 0.0  ;;  %v2818_v32 = vsel %vm8800_vm9, %v2816_v50, 0.0 }
 0x27b   :  { %2806 = vadd.xlane.f32.xlu0 %v2805_v23  ;;  %v2819_v58 = vadd.f32 %v2818_v32, %v2817_v9 }
 0x27d   :  { %2820 = vadd.xlane.f32.xlu1 %v2819_v58 }
 0x2a4   :  { %s2999_s4 = spop %2998 }
 0x2a5   :  { %s1644_s28 = smul.f32 0.00390625, %s2999_s4 }
 0x2a6   :  { %s3001_s11 = spop %3000 }
 0x2a7   :  { %s1646_s16 = smul.f32 %s1644_s28, %s1644_s28  ;;  %v1649_v22 = vstv %s1644_s28 }
 0x2a8   :  { %s1645_s13 = smul.f32 0.00390625, %s3001_s11  ;;  %v1650_v49 = vsub.f32 %v8801_v20, %v1649_v22  ;;  %v1651_v59 = vsub.f32 %v8802_v11, %v1649_v22  ;;  %v2992_v22 = vld [vmem:[%s8806_s27 + $0x8] sm:$0xff] }
 0x2aa   :  { %s1647_s8 = ssub.f32 %s1645_s13, %s1646_s16 }
 0x2ac   :  { %s1648_s5 = smax.f32 %s3143_s10, %s1647_s8 }
 0x2ad   :  { %s1652_s2 = sadd.f32 1e-05, %s1648_s5 }
 0x2af   :  { %v1653_v3 = vstv %s1652_s2 }
 0x2b0   :  { %3060 = vrsqrt.f32 %v1653_v3 }
 0x2bd   :  { %v3061_v6 = vpop.eup %3060 }
 0x2be   :  { %3002 = vpush %v3061_v6 }
 0x2ef   :  { %s3003_s25 = spop %3002 }
 0x2f0   :  { %v1656_v8 = vstv %s3003_s25 }
 0x2f1   :  { %v1657_v24 = vmul.f32 %v1656_v8, %v1650_v49  ;;  %v1658_v26 = vmul.f32 %v1656_v8, %v1651_v59 }
 0x2f3   :  { %v1660_v44 = vmul.f32 %v1659_v19, %v1657_v24  ;;  %v1661_v37 = vmul.f32 %v1659_v19, %v1658_v26 }
 0x2f5   :  { %v1663_v45 = vadd.f32 %v1662_v35, %v1660_v44  ;;  %v1664_v57 = vadd.f32 %v1662_v35, %v1661_v37 }
 0x2f7   :  { %v2984_v1 = vmul.f32 -1.442695, %v1663_v45  ;;  %v2985_v52 = vmul.f32 -1.442695, %v1664_v57 }
 0x2f9   :  { %3062 = vpow2.f32 %v2984_v1 }
 0x2fa   :  { %3064 = vpow2.f32 %v2985_v52 }
 0x304   :  { %v2807_v18 = vpop.xlane.xlu0 %2806 }
 0x305   :  { %v2808_v54 = vrot.slane %v2807_v18, 4 }
 0x306   :  { %v3063_v61 = vpop.eup %3062  ;;  %v2821_v46 = vpop.xlane.xlu1 %2820 }
 0x307   :  { %v3065_v10 = vpop.eup %3064  ;;  %v1671_v31 = vadd.f32 1.0, %v3063_v61  ;;  %v2809_v38 = vadd.f32 %v2808_v54, %v2807_v18  ;;  %v2822_v7 = vrot.slane %v2821_v46, 4 }
 0x308   :  { %v1672_v60 = vadd.f32 1.0, %v3065_v10 }
 0x309   :  { %3066 = vrcp.f32 %v1671_v31  ;;  %v2810_v48 = vrot.slane %v2809_v38, 2  ;;  %v2823_v33 = vadd.f32 %v2822_v7, %v2821_v46 }
 0x30a   :  { %3068 = vrcp.f32 %v1672_v60 }
 0x30b   :  { %v2811_v14 = vadd.f32 %v2810_v48, %v2809_v38  ;;  %v2824_v43 = vrot.slane %v2823_v33, 2 }
 0x30d   :  { %v2825_v63 = vadd.f32 %v2824_v43, %v2823_v33  ;;  %v2812_v40 = vrot.slane %v2811_v14, 1 }
 0x30f   :  { %v2813_v47 = vadd.f32 %v2812_v40, %v2811_v14  ;;  %v2826_v39 = vrot.slane %v2825_v63, 1 }
 0x311   :  { %3004 = vpush %v2813_v47  ;;  %v2827_v0 = vadd.f32 %v2826_v39, %v2825_v63 }
 0x313   :  { %3006 = vpush %v2827_v0 }
 0x316   :  { %v3067_v21 = vpop.eup %3066 }
 0x317   :  { %v3069_v34 = vpop.eup %3068  ;;  %v1681_v13 = vrot.slane %v3067_v21, %v8805_v62 }
 0x318   :  { %v1685_v17 = vrot.slane %v3069_v34, %v8805_v62 }
 0x31a   :  { %v1688_v28 = vcombine.low %v1681_v13, %v1685_v17 }
 0x31c   :  { %v1690_v30 = vmul.f32 %v1688_v28, %v1677_v27 }
 0x31e   :  { %1691 = vst [vmem:[%s8807_s20] sm:$0xff] %v1690_v30 }
 0x342   :  { %s3005_s17 = spop %3004 }
 0x343   :  { %s2829_s15 = smul.f32 0.00390625, %s3005_s17 }
 0x344   :  { %s3007_s7 = spop %3006 }
 0x345   :  { %s2831_s6 = smul.f32 %s2829_s15, %s2829_s15  ;;  %v2834_v36 = vstv %s2829_s15 }
 0x346   :  { %s2830_s3 = smul.f32 0.00390625, %s3007_s7  ;;  %v2835_v56 = vsub.f32 %v7374_v51, %v2834_v36  ;;  %v2836_v41 = vsub.f32 %v7376_v53, %v2834_v36 }
 0x348   :  { %s2832_s14 = ssub.f32 %s2830_s3, %s2831_s6 }
 0x34a   :  { %s2833_s1 = smax.f32 %s3143_s10, %s2832_s14 }
 0x34b   :  { %s2837_s12 = sadd.f32 1e-05, %s2833_s1 }
 0x34d   :  { %v2838_v12 = vstv %s2837_s12 }
 0x34e   :  { %3070 = vrsqrt.f32 %v2838_v12 }
 0x35b   :  { %v3071_v16 = vpop.eup %3070 }
 0x35c   :  { %3008 = vpush %v3071_v16 }
 0x38d   :  { %s3009_s26 = spop %3008 }
 0x38e   :  { %v2841_v55 = vstv %s3009_s26 }
 0x38f   :  { %v2842_v2 = vmul.f32 %v2841_v55, %v2835_v56  ;;  %v2843_v5 = vmul.f32 %v2841_v55, %v2836_v41 }
 0x391   :  { %v2844_v4 = vmul.f32 %v2842_v2, %v1659_v19  ;;  %v2845_v42 = vmul.f32 %v2843_v5, %v1659_v19 }
 0x393   :  { %v2846_v15 = vadd.f32 %v2844_v4, %v1662_v35  ;;  %v2847_v29 = vadd.f32 %v2845_v42, %v1662_v35 }
 0x395   :  { %v2990_v25 = vmul.f32 -1.442695, %v2846_v15  ;;  %v2991_v50 = vmul.f32 -1.442695, %v2847_v29 }
 0x397   :  { %3072 = vpow2.f32 %v2990_v25 }
 0x398   :  { %3074 = vpow2.f32 %v2991_v50 }
 0x3a4   :  { %v3073_v23 = vpop.eup %3072 }
 0x3a5   :  { %v3075_v9 = vpop.eup %3074  ;;  %v2854_v32 = vadd.f32 1.0, %v3073_v23 }
 0x3a6   :  { %v2855_v58 = vadd.f32 1.0, %v3075_v9 }
 0x3a7   :  { %3076 = vrcp.f32 %v2854_v32 }
 0x3a8   :  { %3078 = vrcp.f32 %v2855_v58 }
 0x3b4   :  { %v3077_v51 = vpop.eup %3076 }
 0x3b5   :  { %v3079_v53 = vpop.eup %3078  ;;  %v2864_v3 = vrot.slane %v3077_v51, %v8805_v62 }
 0x3b6   :  { %v2868_v6 = vrot.slane %v3079_v53, %v8805_v62 }
 0x3b8   :  { %v2871_v20 = vcombine.low %v2864_v3, %v2868_v6 }
 0x3ba   :  { %v2873_v49 = vmul.f32 %v2992_v22, %v2871_v20 }
 0x3bc   :  { %2993 = vst [vmem:[%s8807_s20 + $0x8] sm:$0xff] %v2873_v49 }
 0x3bd   :  { %2880 = vsyncpa [#allocation6], 1 }

</bundles_post_ra>
